<compile_context>
chip_gen: v7x
topology: tpu7x:2x2x1
jax: 0.10.0
libtpu: 0.0.40
codegen_flags: <defaults>
</compile_context>

<pallas_src>
import functools

import jax
import jax.numpy as jnp
from jax.experimental import pallas as pl
from jax.experimental.pallas import tpu as pltpu


def _convlstm_kernel(x_ref, w_ref, bn_ref, out_ref, comb_ref, patch_ref, c_ref,
                     *, B, H, W, CX, F, KP, WL, eps):
    CTOT = F + CX                      # comb channel order: [hx (F) | x (CX)]
    N = B * H * W
    t = pl.program_id(0)

    @pl.when(t == 0)
    def _init():
        comb_ref[...] = jnp.zeros_like(comb_ref)    # zero border + hx = 0
        patch_ref[...] = jnp.zeros_like(patch_ref)  # stripe tails stay 0 forever
        c_ref[...] = jnp.zeros_like(c_ref)

    # x_t into the interior of the padded comb buffer (channels [F:F+CX]).
    # Interior starts at sublane-tile-aligned column WL, so this is a clean
    # (lane-masked only) store with no sublane shifts.
    comb_ref[:, 1:H + 1, WL:WL + W, F:F + CX] = x_ref[0]

    # im2col staging: each tap lands in its own 128-lane-aligned stripe, so the
    # store is a single-tile masked vst (no lane rotates).  The (B,H,W,CTOT)
    # -> (N, CTOT) reshape is layout-preserving (W is a multiple of 8, CTOT is
    # the untouched minor dim).
    for idx in range(9):
        dy, dx = idx // 3, idx % 3
        w0 = WL - 1 + dx
        tap = comb_ref[:, dy:dy + H, w0:w0 + W, :].reshape(N, CTOT)
        patch_ref[:, idx * KP:idx * KP + CTOT] = tap.astype(jnp.bfloat16)

    # fused 3x3 conv: (N, 9*KP) @ (9*KP, 4F), bf16 operands, f32 accumulate.
    # The zero-padded K rows add exact zeros, so numerics are unchanged.
    acc = jnp.dot(patch_ref[...], w_ref[...], preferred_element_type=jnp.float32)

    # BatchNorm2d (training mode): single-pass biased stats folded to scale/shift
    inv_n = jnp.float32(1.0 / N)
    mean = jnp.sum(acc, axis=0, keepdims=True) * inv_n
    var = jnp.maximum(jnp.sum(acc * acc, axis=0, keepdims=True) * inv_n
                      - mean * mean, 0.0)
    scale = bn_ref[0:1, :] * jax.lax.rsqrt(var + eps)
    shift = bn_ref[1:2, :] - mean * scale
    gates = acc * scale + shift

    # gate split [in, forget, cell, out]; one full-width sigmoid, then slice
    sig = jax.nn.sigmoid(gates)
    ingate = sig[:, 0 * F:1 * F]
    forgetgate = sig[:, 1 * F:2 * F]
    outgate = sig[:, 3 * F:4 * F]
    cellgate = gates[:, 2 * F:3 * F]   # NOTE: no tanh — matches reference module

    cy = forgetgate * c_ref[...] + ingate * cellgate
    hy = outgate * jnp.tanh(cy)

    c_ref[...] = cy
    # hy becomes hx for step t+1: write it straight into the (aligned) interior
    comb_ref[:, 1:H + 1, WL:WL + W, 0:F] = hy.reshape(B, H, W, F)
    out_ref[0] = hy


def conv_lstm_block(x_bschw, weight_pt, gamma, beta, *, num_features, eps=1e-5):
    """x_bschw: (B, S, C, H, W) float32 (PyTorch layout). Returns (B, S, F, H, W)."""
    B, S, C, H, W = x_bschw.shape
    F = num_features
    CTOT = F + C
    COUT = 4 * F
    N = B * H * W
    KP = ((CTOT + 127) // 128) * 128     # lane-tile-aligned per-tap stripe width
    WL = 8                               # interior W offset (sublane-tile aligned)
    WP = WL + W + 8                      # padded W extent of the comb buffer

    # time-major, channels-last input
    x = jnp.transpose(x_bschw, (1, 0, 3, 4, 2)).astype(jnp.float32)      # (S,B,H,W,C)

    # (COUT, CIN=[x|hx], 3, 3) -> (3,3,CIN,COUT) -> per-tap channel order [hx|x]
    # -> (9, CTOT, COUT) -> zero-pad K of every tap to KP -> (9*KP, COUT) bf16
    # so each tap's weight block starts on its own lane-aligned stripe and the
    # fused conv runs at native MXU rate.
    w = jnp.transpose(weight_pt, (2, 3, 1, 0)).astype(jnp.float32)       # (3,3,CIN,COUT)
    w = jnp.concatenate([w[:, :, C:, :], w[:, :, :C, :]], axis=2)        # [hx | x]
    w = w.reshape(9, CTOT, COUT)
    w = jnp.pad(w, ((0, 0), (0, KP - CTOT), (0, 0)))                     # zero K rows
    w = w.reshape(9 * KP, COUT).astype(jnp.bfloat16)

    bn = jnp.stack([gamma, beta], axis=0).astype(jnp.float32)            # (2, 4F)

    kernel = functools.partial(_convlstm_kernel, B=B, H=H, W=W, CX=C, F=F,
                               KP=KP, WL=WL, eps=eps)

    out = pl.pallas_call(
        kernel,
        out_shape=jax.ShapeDtypeStruct((S, N, F), jnp.float32),
        grid_spec=pltpu.PrefetchScalarGridSpec(
            num_scalar_prefetch=0,
            grid=(S,),
            in_specs=[
                pl.BlockSpec((1, B, H, W, C), lambda t: (t, 0, 0, 0, 0)),
                pl.BlockSpec((9 * KP, COUT), lambda t: (0, 0)),
                pl.BlockSpec((2, COUT), lambda t: (0, 0)),
            ],
            out_specs=pl.BlockSpec((1, N, F), lambda t: (t, 0, 0)),
            scratch_shapes=[
                pltpu.VMEM((B, H + 2, WP, CTOT), jnp.float32),  # padded [hx|x]
                pltpu.VMEM((N, 9 * KP), jnp.bfloat16),          # im2col stripes
                pltpu.VMEM((N, F), jnp.float32),                # cell state
            ],
        ),
        compiler_params=pltpu.CompilerParams(
            dimension_semantics=("arbitrary",),        # strict sequential recurrence
            vmem_limit_bytes=32 * 1024 * 1024),
    )(x, w, bn)

    # (S, B*H*W, F) -> PyTorch output layout (B, S, F, H, W)
    out = out.reshape(S, B, H, W, F)
    return jnp.transpose(out, (1, 0, 4, 2, 3))


def conv_lstm_block_ref(x_bschw, weight_pt, gamma, beta, *, num_features, eps=1e-5):
    """Pure-JAX f32 reference mirroring the PyTorch forward (training-mode BN)."""
    B, S, C, H, W = x_bschw.shape
    F = num_features
    hx = jnp.zeros((B, F, H, W), jnp.float32)
    cx = jnp.zeros((B, F, H, W), jnp.float32)
    outs = []
    for t in range(S):
        comb = jnp.concatenate([x_bschw[:, t], hx], axis=1)
        gates = jax.lax.conv_general_dilated(
            comb, weight_pt, window_strides=(1, 1), padding=((1, 1), (1, 1)),
            dimension_numbers=("NCHW", "OIHW", "NCHW"),
            precision=jax.lax.Precision.HIGHEST)
        mean = jnp.mean(gates, axis=(0, 2, 3), keepdims=True)
        var = jnp.mean((gates - mean) ** 2, axis=(0, 2, 3), keepdims=True)
        gates = ((gates - mean) / jnp.sqrt(var + eps)
                 * gamma[None, :, None, None] + beta[None, :, None, None])
        i, f, g, o = jnp.split(gates, 4, axis=1)
        cx = jax.nn.sigmoid(f) * cx + jax.nn.sigmoid(i) * g
        hx = jax.nn.sigmoid(o) * jnp.tanh(cx)
        outs.append(hx)
    return jnp.stack(outs, axis=1)   # (B, S, F, H, W)


if __name__ == "__main__":
    key = jax.random.PRNGKey(0)
    B, S, C, H, W = 2, 8, 4, 16, 16
    F = 32  # num_features
    k1, k2, k3, k4 = jax.random.split(key, 4)

    x = jax.random.normal(k1, (B, S, C, H, W), jnp.float32)
    fan_in = (C + F) * 3 * 3
    weight = jax.random.normal(k2, (4 * F, C + F, 3, 3), jnp.float32) / jnp.sqrt(fan_in)
    gamma = 1.0 + 0.1 * jax.random.normal(k3, (4 * F,), jnp.float32)
    beta = 0.1 * jax.random.normal(k4, (4 * F,), jnp.float32)

    out = conv_lstm_block(x, weight, gamma, beta, num_features=F)
    out = jax.block_until_ready(out)

    ref = conv_lstm_block_ref(x, weight, gamma, beta, num_features=F)
    assert out.shape == (B, S, F, H, W), out.shape
    diff = jnp.abs(out - ref)
    max_err = float(jnp.max(diff))
    mean_err = float(jnp.mean(diff))
    # tolerance covers bf16 MXU operands accumulated over 8 recurrent steps
    assert max_err < 1e-1, f"max abs err {max_err}"
    assert mean_err < 2e-2, f"mean abs err {mean_err}"
    print("KERNEL_OK")
</pallas_src>

<mosaic_0001>
module attributes {stable_mosaic.version = 11 : i64} {
  func.func @_convlstm_kernel(%arg0: i32, %arg1: memref<1x2x16x16x4xf32, #tpu.memory_space<vmem>>, %arg2: memref<1152x128xbf16, #tpu.memory_space<vmem>>, %arg3: memref<2x128xf32, #tpu.memory_space<vmem>>, %arg4: memref<1x512x32xf32, #tpu.memory_space<vmem>>, %arg5: memref<2x18x32x36xf32, #tpu.memory_space<vmem>>, %arg6: memref<512x1152xbf16, #tpu.memory_space<vmem>>, %arg7: memref<512x32xf32, #tpu.memory_space<vmem>>) attributes {dimension_semantics = [#tpu.dimension_semantics<arbitrary>], iteration_bounds = array<i64: 8>, scalar_prefetch = 0 : i64, scratch_operands = 3 : i64, tpu.core_type = #tpu.core_type<tc>, window_params = [{transform_indices = @transform_0, window_bounds = array<i64: 1, 2, 16, 16, 4>}, {pipeline_mode = #tpu.pipeline_mode<synchronous>, transform_indices = @transform_1, window_bounds = array<i64: 1152, 128>}, {pipeline_mode = #tpu.pipeline_mode<synchronous>, transform_indices = @transform_2, window_bounds = array<i64: 2, 128>}, {transform_indices = @transform_3, window_bounds = array<i64: 1, 512, 32>}]} {
    %c0_i32 = arith.constant 0 : i32
    %0 = arith.cmpi eq, %arg0, %c0_i32 : i32
    %1 = arith.extui %0 : i1 to i32
    %c0_i32_0 = arith.constant 0 : i32
    %2 = arith.cmpi ne, %1, %c0_i32_0 : i32
    scf.if %2 {
      %cst_75 = arith.constant 0.000000e+00 : f32
      %91 = vector.broadcast %cst_75 : f32 to vector<2x18x32x36xf32>
      %c0_76 = arith.constant 0 : index
      %c0_77 = arith.constant 0 : index
      %c0_78 = arith.constant 0 : index
      %c0_79 = arith.constant 0 : index
      %92 = vector.load %arg5[%c0_76, %c0_77, %c0_78, %c0_79] : memref<2x18x32x36xf32, #tpu.memory_space<vmem>>, vector<2x18x32x36xf32>
      tpu.vector_store %arg5[%c0_76, %c0_77, %c0_78, %c0_79], %91 {strides = array<i32>} : memref<2x18x32x36xf32, #tpu.memory_space<vmem>>, vector<2x18x32x36xf32>,
      %cst_80 = arith.constant 0.000000e+00 : bf16
      %93 = vector.broadcast %cst_80 : bf16 to vector<512x1152xbf16>
      %c0_81 = arith.constant 0 : index
      %c0_82 = arith.constant 0 : index
      %94 = vector.load %arg6[%c0_81, %c0_82] : memref<512x1152xbf16, #tpu.memory_space<vmem>>, vector<512x1152xbf16>
      tpu.vector_store %arg6[%c0_81, %c0_82], %93 {strides = array<i32>} : memref<512x1152xbf16, #tpu.memory_space<vmem>>, vector<512x1152xbf16>,
      %cst_83 = arith.constant 0.000000e+00 : f32
      %95 = vector.broadcast %cst_83 : f32 to vector<512x32xf32>
      %c0_84 = arith.constant 0 : index
      %c0_85 = arith.constant 0 : index
      %96 = vector.load %arg7[%c0_84, %c0_85] : memref<512x32xf32, #tpu.memory_space<vmem>>, vector<512x32xf32>
      tpu.vector_store %arg7[%c0_84, %c0_85], %95 {strides = array<i32>} : memref<512x32xf32, #tpu.memory_space<vmem>>, vector<512x32xf32>,
    } else {
    }
    %c0 = arith.constant 0 : index
    %c0_1 = arith.constant 0 : index
    %c0_2 = arith.constant 0 : index
    %c0_3 = arith.constant 0 : index
    %c0_4 = arith.constant 0 : index
    %3 = vector.load %arg1[%c0, %c0_1, %c0_2, %c0_3, %c0_4] : memref<1x2x16x16x4xf32, #tpu.memory_space<vmem>>, vector<1x2x16x16x4xf32>
    %4 = vector.shape_cast %3 : vector<1x2x16x16x4xf32> to vector<2x16x16x4xf32>
    %c0_5 = arith.constant 0 : index
    %c1 = arith.constant 1 : index
    %c8 = arith.constant 8 : index
    %c32 = arith.constant 32 : index
    %5 = vector.load %arg5[%c0_5, %c1, %c8, %c32] : memref<2x18x32x36xf32, #tpu.memory_space<vmem>>, vector<2x16x16x4xf32>
    tpu.vector_store %arg5[%c0_5, %c1, %c8, %c32], %4 {strides = array<i32>} : memref<2x18x32x36xf32, #tpu.memory_space<vmem>>, vector<2x16x16x4xf32>,
    %c0_6 = arith.constant 0 : index
    %c0_7 = arith.constant 0 : index
    %c7 = arith.constant 7 : index
    %c0_8 = arith.constant 0 : index
    %6 = vector.load %arg5[%c0_6, %c0_7, %c7, %c0_8] : memref<2x18x32x36xf32, #tpu.memory_space<vmem>>, vector<2x16x16x36xf32>
    %7 = vector.shape_cast %6 : vector<2x16x16x36xf32> to vector<512x36xf32>
    %8 = arith.truncf %7 : vector<512x36xf32> to vector<512x36xbf16>
    %c0_9 = arith.constant 0 : index
    %c0_10 = arith.constant 0 : index
    %9 = vector.load %arg6[%c0_9, %c0_10] : memref<512x1152xbf16, #tpu.memory_space<vmem>>, vector<512x36xbf16>
    tpu.vector_store %arg6[%c0_9, %c0_10], %8 {strides = array<i32>} : memref<512x1152xbf16, #tpu.memory_space<vmem>>, vector<512x36xbf16>,
    %c0_11 = arith.constant 0 : index
    %c0_12 = arith.constant 0 : index
    %c8_13 = arith.constant 8 : index
    %c0_14 = arith.constant 0 : index
    %10 = vector.load %arg5[%c0_11, %c0_12, %c8_13, %c0_14] : memref<2x18x32x36xf32, #tpu.memory_space<vmem>>, vector<2x16x16x36xf32>
    %11 = vector.shape_cast %10 : vector<2x16x16x36xf32> to vector<512x36xf32>
    %12 = arith.truncf %11 : vector<512x36xf32> to vector<512x36xbf16>
    %c0_15 = arith.constant 0 : index
    %c128 = arith.constant 128 : index
    %13 = vector.load %arg6[%c0_15, %c128] : memref<512x1152xbf16, #tpu.memory_space<vmem>>, vector<512x36xbf16>
    tpu.vector_store %arg6[%c0_15, %c128], %12 {strides = array<i32>} : memref<512x1152xbf16, #tpu.memory_space<vmem>>, vector<512x36xbf16>,
    %c0_16 = arith.constant 0 : index
    %c0_17 = arith.constant 0 : index
    %c9 = arith.constant 9 : index
    %c0_18 = arith.constant 0 : index
    %14 = vector.load %arg5[%c0_16, %c0_17, %c9, %c0_18] : memref<2x18x32x36xf32, #tpu.memory_space<vmem>>, vector<2x16x16x36xf32>
    %15 = vector.shape_cast %14 : vector<2x16x16x36xf32> to vector<512x36xf32>
    %16 = arith.truncf %15 : vector<512x36xf32> to vector<512x36xbf16>
    %c0_19 = arith.constant 0 : index
    %c256 = arith.constant 256 : index
    %17 = vector.load %arg6[%c0_19, %c256] : memref<512x1152xbf16, #tpu.memory_space<vmem>>, vector<512x36xbf16>
    tpu.vector_store %arg6[%c0_19, %c256], %16 {strides = array<i32>} : memref<512x1152xbf16, #tpu.memory_space<vmem>>, vector<512x36xbf16>,
    %c0_20 = arith.constant 0 : index
    %c1_21 = arith.constant 1 : index
    %c7_22 = arith.constant 7 : index
    %c0_23 = arith.constant 0 : index
    %18 = vector.load %arg5[%c0_20, %c1_21, %c7_22, %c0_23] : memref<2x18x32x36xf32, #tpu.memory_space<vmem>>, vector<2x16x16x36xf32>
    %19 = vector.shape_cast %18 : vector<2x16x16x36xf32> to vector<512x36xf32>
    %20 = arith.truncf %19 : vector<512x36xf32> to vector<512x36xbf16>
    %c0_24 = arith.constant 0 : index
    %c384 = arith.constant 384 : index
    %21 = vector.load %arg6[%c0_24, %c384] : memref<512x1152xbf16, #tpu.memory_space<vmem>>, vector<512x36xbf16>
    tpu.vector_store %arg6[%c0_24, %c384], %20 {strides = array<i32>} : memref<512x1152xbf16, #tpu.memory_space<vmem>>, vector<512x36xbf16>,
    %c0_25 = arith.constant 0 : index
    %c1_26 = arith.constant 1 : index
    %c8_27 = arith.constant 8 : index
    %c0_28 = arith.constant 0 : index
    %22 = vector.load %arg5[%c0_25, %c1_26, %c8_27, %c0_28] : memref<2x18x32x36xf32, #tpu.memory_space<vmem>>, vector<2x16x16x36xf32>
    %23 = vector.shape_cast %22 : vector<2x16x16x36xf32> to vector<512x36xf32>
    %24 = arith.truncf %23 : vector<512x36xf32> to vector<512x36xbf16>
    %c0_29 = arith.constant 0 : index
    %c512 = arith.constant 512 : index
    %25 = vector.load %arg6[%c0_29, %c512] : memref<512x1152xbf16, #tpu.memory_space<vmem>>, vector<512x36xbf16>
    tpu.vector_store %arg6[%c0_29, %c512], %24 {strides = array<i32>} : memref<512x1152xbf16, #tpu.memory_space<vmem>>, vector<512x36xbf16>,
    %c0_30 = arith.constant 0 : index
    %c1_31 = arith.constant 1 : index
    %c9_32 = arith.constant 9 : index
    %c0_33 = arith.constant 0 : index
    %26 = vector.load %arg5[%c0_30, %c1_31, %c9_32, %c0_33] : memref<2x18x32x36xf32, #tpu.memory_space<vmem>>, vector<2x16x16x36xf32>
    %27 = vector.shape_cast %26 : vector<2x16x16x36xf32> to vector<512x36xf32>
    %28 = arith.truncf %27 : vector<512x36xf32> to vector<512x36xbf16>
    %c0_34 = arith.constant 0 : index
    %c640 = arith.constant 640 : index
    %29 = vector.load %arg6[%c0_34, %c640] : memref<512x1152xbf16, #tpu.memory_space<vmem>>, vector<512x36xbf16>
    tpu.vector_store %arg6[%c0_34, %c640], %28 {strides = array<i32>} : memref<512x1152xbf16, #tpu.memory_space<vmem>>, vector<512x36xbf16>,
    %c0_35 = arith.constant 0 : index
    %c2 = arith.constant 2 : index
    %c7_36 = arith.constant 7 : index
    %c0_37 = arith.constant 0 : index
    %30 = vector.load %arg5[%c0_35, %c2, %c7_36, %c0_37] : memref<2x18x32x36xf32, #tpu.memory_space<vmem>>, vector<2x16x16x36xf32>
    %31 = vector.shape_cast %30 : vector<2x16x16x36xf32> to vector<512x36xf32>
    %32 = arith.truncf %31 : vector<512x36xf32> to vector<512x36xbf16>
    %c0_38 = arith.constant 0 : index
    %c768 = arith.constant 768 : index
    %33 = vector.load %arg6[%c0_38, %c768] : memref<512x1152xbf16, #tpu.memory_space<vmem>>, vector<512x36xbf16>
    tpu.vector_store %arg6[%c0_38, %c768], %32 {strides = array<i32>} : memref<512x1152xbf16, #tpu.memory_space<vmem>>, vector<512x36xbf16>,
    %c0_39 = arith.constant 0 : index
    %c2_40 = arith.constant 2 : index
    %c8_41 = arith.constant 8 : index
    %c0_42 = arith.constant 0 : index
    %34 = vector.load %arg5[%c0_39, %c2_40, %c8_41, %c0_42] : memref<2x18x32x36xf32, #tpu.memory_space<vmem>>, vector<2x16x16x36xf32>
    %35 = vector.shape_cast %34 : vector<2x16x16x36xf32> to vector<512x36xf32>
    %36 = arith.truncf %35 : vector<512x36xf32> to vector<512x36xbf16>
    %c0_43 = arith.constant 0 : index
    %c896 = arith.constant 896 : index
    %37 = vector.load %arg6[%c0_43, %c896] : memref<512x1152xbf16, #tpu.memory_space<vmem>>, vector<512x36xbf16>
    tpu.vector_store %arg6[%c0_43, %c896], %36 {strides = array<i32>} : memref<512x1152xbf16, #tpu.memory_space<vmem>>, vector<512x36xbf16>,
    %c0_44 = arith.constant 0 : index
    %c2_45 = arith.constant 2 : index
    %c9_46 = arith.constant 9 : index
    %c0_47 = arith.constant 0 : index
    %38 = vector.load %arg5[%c0_44, %c2_45, %c9_46, %c0_47] : memref<2x18x32x36xf32, #tpu.memory_space<vmem>>, vector<2x16x16x36xf32>
    %39 = vector.shape_cast %38 : vector<2x16x16x36xf32> to vector<512x36xf32>
    %40 = arith.truncf %39 : vector<512x36xf32> to vector<512x36xbf16>
    %c0_48 = arith.constant 0 : index
    %c1024 = arith.constant 1024 : index
    %41 = vector.load %arg6[%c0_48, %c1024] : memref<512x1152xbf16, #tpu.memory_space<vmem>>, vector<512x36xbf16>
    tpu.vector_store %arg6[%c0_48, %c1024], %40 {strides = array<i32>} : memref<512x1152xbf16, #tpu.memory_space<vmem>>, vector<512x36xbf16>,
    %c0_49 = arith.constant 0 : index
    %c0_50 = arith.constant 0 : index
    %42 = vector.load %arg6[%c0_49, %c0_50] : memref<512x1152xbf16, #tpu.memory_space<vmem>>, vector<512x1152xbf16>
    %c0_51 = arith.constant 0 : index
    %c0_52 = arith.constant 0 : index
    %43 = vector.load %arg2[%c0_51, %c0_52] : memref<1152x128xbf16, #tpu.memory_space<vmem>>, vector<1152x128xbf16>
    %cst = arith.constant dense<0.000000e+00> : vector<512x128xf32>
    %44 = tpu.matmul %42, %43, %cst {dimension_numbers = #tpu.dot_dimension_numbers<[1], [0], [0], [1], [0, 0, 1, 1], [], []>} : vector<512x1152xbf16>, vector<1152x128xbf16>, vector<512x128xf32> -> vector<512x128xf32>
    %cst_53 = arith.constant dense<0.000000e+00> : vector<128xf32>
    %45 = vector.multi_reduction <add>, %44, %cst_53 [0] : vector<512x128xf32> to vector<128xf32>
    %46 = vector.shape_cast %45 : vector<128xf32> to vector<1x128xf32>
    %cst_54 = arith.constant 0.001953125 : f32
    %47 = vector.broadcast %cst_54 : f32 to vector<1x128xf32>
    %48 = arith.mulf %46, %47 : vector<1x128xf32>
    %49 = arith.mulf %44, %44 : vector<512x128xf32>
    %cst_55 = arith.constant dense<0.000000e+00> : vector<128xf32>
    %50 = vector.multi_reduction <add>, %49, %cst_55 [0] : vector<512x128xf32> to vector<128xf32>
    %51 = vector.shape_cast %50 : vector<128xf32> to vector<1x128xf32>
    %cst_56 = arith.constant 0.001953125 : f32
    %52 = vector.broadcast %cst_56 : f32 to vector<1x128xf32>
    %53 = arith.mulf %51, %52 : vector<1x128xf32>
    %54 = arith.mulf %48, %48 : vector<1x128xf32>
    %55 = arith.subf %53, %54 : vector<1x128xf32>
    %cst_57 = arith.constant 0.000000e+00 : f32
    %56 = vector.broadcast %cst_57 : f32 to vector<1x128xf32>
    %57 = arith.maximumf %55, %56 : vector<1x128xf32>
    %c0_58 = arith.constant 0 : index
    %c0_59 = arith.constant 0 : index
    %58 = vector.load %arg3[%c0_58, %c0_59] : memref<2x128xf32, #tpu.memory_space<vmem>>, vector<1x128xf32>
    %cst_60 = arith.constant 9.99999974E-6 : f32
    %59 = vector.broadcast %cst_60 : f32 to vector<1x128xf32>
    %60 = arith.addf %57, %59 : vector<1x128xf32>
    %61 = math.rsqrt %60 : vector<1x128xf32>
    %62 = arith.mulf %58, %61 : vector<1x128xf32>
    %c1_61 = arith.constant 1 : index
    %c0_62 = arith.constant 0 : index
    %63 = vector.load %arg3[%c1_61, %c0_62] : memref<2x128xf32, #tpu.memory_space<vmem>>, vector<1x128xf32>
    %64 = arith.mulf %48, %62 : vector<1x128xf32>
    %65 = arith.subf %63, %64 : vector<1x128xf32>
    %66 = vector.broadcast %62 : vector<1x128xf32> to vector<512x128xf32>
    %67 = arith.mulf %44, %66 : vector<512x128xf32>
    %68 = vector.broadcast %65 : vector<1x128xf32> to vector<512x128xf32>
    %69 = arith.addf %67, %68 : vector<512x128xf32>
    %70 = arith.negf %69 : vector<512x128xf32>
    %71 = math.exp %70 : vector<512x128xf32>
    %cst_63 = arith.constant 1.000000e+00 : f32
    %72 = vector.broadcast %cst_63 : f32 to vector<512x128xf32>
    %73 = arith.addf %72, %71 : vector<512x128xf32>
    %74 = arith.divf %72, %73 : vector<512x128xf32>
    %75 = vector.extract_strided_slice %74 {offsets = [0, 0], sizes = [512, 32], strides = [1, 1]} : vector<512x128xf32> to vector<512x32xf32>
    %76 = vector.extract_strided_slice %74 {offsets = [0, 32], sizes = [512, 32], strides = [1, 1]} : vector<512x128xf32> to vector<512x32xf32>
    %77 = vector.extract_strided_slice %74 {offsets = [0, 96], sizes = [512, 32], strides = [1, 1]} : vector<512x128xf32> to vector<512x32xf32>
    %78 = vector.extract_strided_slice %69 {offsets = [0, 64], sizes = [512, 32], strides = [1, 1]} : vector<512x128xf32> to vector<512x32xf32>
    %c0_64 = arith.constant 0 : index
    %c0_65 = arith.constant 0 : index
    %79 = vector.load %arg7[%c0_64, %c0_65] : memref<512x32xf32, #tpu.memory_space<vmem>>, vector<512x32xf32>
    %80 = arith.mulf %76, %79 : vector<512x32xf32>
    %81 = arith.mulf %75, %78 : vector<512x32xf32>
    %82 = arith.addf %80, %81 : vector<512x32xf32>
    %83 = math.tanh %82 : vector<512x32xf32>
    %84 = arith.mulf %77, %83 : vector<512x32xf32>
    %c0_66 = arith.constant 0 : index
    %c0_67 = arith.constant 0 : index
    %85 = vector.load %arg7[%c0_66, %c0_67] : memref<512x32xf32, #tpu.memory_space<vmem>>, vector<512x32xf32>
    tpu.vector_store %arg7[%c0_66, %c0_67], %82 {strides = array<i32>} : memref<512x32xf32, #tpu.memory_space<vmem>>, vector<512x32xf32>,
    %86 = vector.shape_cast %84 : vector<512x32xf32> to vector<2x16x16x32xf32>
    %c0_68 = arith.constant 0 : index
    %c1_69 = arith.constant 1 : index
    %c8_70 = arith.constant 8 : index
    %c0_71 = arith.constant 0 : index
    %87 = vector.load %arg5[%c0_68, %c1_69, %c8_70, %c0_71] : memref<2x18x32x36xf32, #tpu.memory_space<vmem>>, vector<2x16x16x32xf32>
    tpu.vector_store %arg5[%c0_68, %c1_69, %c8_70, %c0_71], %86 {strides = array<i32>} : memref<2x18x32x36xf32, #tpu.memory_space<vmem>>, vector<2x16x16x32xf32>,
    %c0_72 = arith.constant 0 : index
    %c0_73 = arith.constant 0 : index
    %c0_74 = arith.constant 0 : index
    %88 = vector.load %arg4[%c0_72, %c0_73, %c0_74] : memref<1x512x32xf32, #tpu.memory_space<vmem>>, vector<1x512x32xf32>
    %89 = vector.shape_cast %88 : vector<1x512x32xf32> to vector<512x32xf32>
    %90 = vector.shape_cast %84 : vector<512x32xf32> to vector<1x512x32xf32>
    tpu.vector_store %arg4[%c0_72, %c0_73, %c0_74], %90 {strides = array<i32>} : memref<1x512x32xf32, #tpu.memory_space<vmem>>, vector<1x512x32xf32>,
    return
  }
  func.func @transform_0(%arg0: i32) -> (i32, i32, i32, i32, i32) {
    %c0_i32 = arith.constant 0 : i32
    %c0_i32_0 = arith.constant 0 : i32
    %c0_i32_1 = arith.constant 0 : i32
    %c0_i32_2 = arith.constant 0 : i32
    %c0_i32_3 = arith.constant 0 : i32
    return %arg0, %c0_i32, %c0_i32_0, %c0_i32_1, %c0_i32_2 : i32, i32, i32, i32, i32
  }
  func.func @transform_1(%arg0: i32) -> (i32, i32) {
    %c0_i32 = arith.constant 0 : i32
    %c0_i32_0 = arith.constant 0 : i32
    %c0_i32_1 = arith.constant 0 : i32
    return %c0_i32, %c0_i32_0 : i32, i32
  }
  func.func @transform_2(%arg0: i32) -> (i32, i32) {
    %c0_i32 = arith.constant 0 : i32
    %c0_i32_0 = arith.constant 0 : i32
    %c0_i32_1 = arith.constant 0 : i32
    return %c0_i32, %c0_i32_0 : i32, i32
  }
  func.func @transform_3(%arg0: i32) -> (i32, i32, i32) {
    %c0_i32 = arith.constant 0 : i32
    %c0_i32_0 = arith.constant 0 : i32
    %c0_i32_1 = arith.constant 0 : i32
    return %arg0, %c0_i32, %c0_i32_0 : i32, i32, i32
  }
}

</mosaic_0001>

<bundles_post_ra>
// kernel: tpu_custom_call.1
= control target key start
LH: loop header
LB: loop body
LE: loop exit
PB: predicated region body
PF: predicated region fallthrough
CT: control target
= control target key end

     0   :  { %s8553_s12 = smov 0   ;;  %s12892_s0 = inlined_call_operand.vmem [shape: f32[8,2,16,16,4], index: 0, kind: input, shape index: {}]   ;;  %s12893_s1 = inlined_call_operand.vmem [shape: bf16[1152,128], index: 1, kind: input, shape index: {}]   ;;  %s12894_s2 = inlined_call_operand.vmem [shape: f32[2,128], index: 2, kind: input, shape index: {}]   ;;  %s12895_s3 = inlined_call_operand.vmem [shape: f32[8,512,32], index: 3, kind: output, shape index: {}]  }
   0x1 LB: > { %s7425_s13 = sadd.s32 4294967295, %s8525_s12   ;;  %p7429_p0 = scmp.ge.s32.totalorder %s8525_s12, 1  ;;  %s8525_s12 = sphi %s8553_s12, %s13_s12  }
   0x2   : > { %p137_p1 = scmp.lt.s32.totalorder %s8525_s12, 9 }
   0x4   : > { %p138_p2 = pnand %p7429_p0, %p137_p1 }
   0x6   : > { %141 = sbr.rel (%p138_p2) target bundleno = 2023 (0x7e7), region = 32 }
   0xd   : > { %p161_p3 = scmp.lt.s32.totalorder %s7425_s13, 7  ;;  %p7434_p4 = scmp.ne.s32.totalorder %s7425_s13, 0 }
   0xe   : > { %vm176_vm0 = vcmask (!%p7434_p4), 293888   ;;  %vm609_vm1 = vcmask (!%p7434_p4), 261120   ;;  %v8527_v0 = vmov (!%p7434_p4), 0.0   ;;  %v8528_v1 = vmov (!%p7434_p4), 0  }
   0xf   : > { %s162_s14 = scalar_select %p161_p3, %s7425_s13, 7 }
  0x10   : > { %175 = sbr.rel (%p7434_p4) target bundleno = 264 (0x108), region = 36  ;;  %177 = vst.msk [vmem:[#allocation2] sm:$0xff] (!%p7434_p4), %vm176_vm0, %v8527_v0  ;;  %178 = vst.msk [vmem:[#allocation2 + $0x8] sm:$0xff] (!%p7434_p4), %vm176_vm0, %v8527_v0 }
  0x11   : > { %s7573_s15 = sshll.u32 %s162_s14, 9  ;;  %179 = vst.msk [vmem:[#allocation2 + $0x10] sm:$0xff] (!%p7434_p4), %vm176_vm0, %v8527_v0  ;;  %180 = vst.msk [vmem:[#allocation2 + $0x18] sm:$0xff] (!%p7434_p4), %vm176_vm0, %v8527_v0 }
  0x12   : > { %s8564_s18 = scalar_lea.vmem %s12892_s0, %s7573_s15  ;;  %s8569_s21 = scalar_lea.vmem %s12895_s3, %s7573_s15  ;;  %181 = vst.msk [vmem:[#allocation2 + $0x20] sm:$0xff] (!%p7434_p4), %vm176_vm0, %v8527_v0  ;;  %182 = vst.msk [vmem:[#allocation2 + $0x28] sm:$0xff] (!%p7434_p4), %vm176_vm0, %v8527_v0 }
  0x13   : > { %183 = vst.msk [vmem:[#allocation2 + $0x30] sm:$0xff] (!%p7434_p4), %vm176_vm0, %v8527_v0  ;;  %184 = vst.msk [vmem:[#allocation2 + $0x38] sm:$0xff] (!%p7434_p4), %vm176_vm0, %v8527_v0 }
  0x14   : > { %185 = vst.msk [vmem:[#allocation2 + $0x40] sm:$0xff] (!%p7434_p4), %vm176_vm0, %v8527_v0  ;;  %186 = vst.msk [vmem:[#allocation2 + $0x48] sm:$0xff] (!%p7434_p4), %vm176_vm0, %v8527_v0 }
  0x15   : > { %187 = vst.msk [vmem:[#allocation2 + $0x50] sm:$0xff] (!%p7434_p4), %vm176_vm0, %v8527_v0  ;;  %188 = vst.msk [vmem:[#allocation2 + $0x58] sm:$0xff] (!%p7434_p4), %vm176_vm0, %v8527_v0 }
  0x16   : > { %189 = vst.msk [vmem:[#allocation2 + $0x60] sm:$0xff] (!%p7434_p4), %vm176_vm0, %v8527_v0  ;;  %190 = vst.msk [vmem:[#allocation2 + $0x68] sm:$0xff] (!%p7434_p4), %vm176_vm0, %v8527_v0 }
  0x17   : > { %191 = vst.msk [vmem:[#allocation2 + $0x70] sm:$0xff] %vm176_vm0, %v8527_v0  ;;  %192 = vst.msk [vmem:[#allocation2 + $0x78] sm:$0xff] %vm176_vm0, %v8527_v0 }
  0x18   : > { %193 = vst.msk [vmem:[#allocation2 + $0x80] sm:$0xff] %vm176_vm0, %v8527_v0  ;;  %194 = vst.msk [vmem:[#allocation2 + $0x88] sm:$0xff] %vm176_vm0, %v8527_v0 }
  0x19   : > { %195 = vst.msk [vmem:[#allocation2 + $0x90] sm:$0xff] %vm176_vm0, %v8527_v0  ;;  %196 = vst.msk [vmem:[#allocation2 + $0x98] sm:$0xff] %vm176_vm0, %v8527_v0 }
  0x1a   : > { %197 = vst.msk [vmem:[#allocation2 + $0xa0] sm:$0xff] %vm176_vm0, %v8527_v0  ;;  %198 = vst.msk [vmem:[#allocation2 + $0xa8] sm:$0xff] %vm176_vm0, %v8527_v0 }
  0x1b   : > { %199 = vst.msk [vmem:[#allocation2 + $0xb0] sm:$0xff] %vm176_vm0, %v8527_v0  ;;  %200 = vst.msk [vmem:[#allocation2 + $0xb8] sm:$0xff] %vm176_vm0, %v8527_v0 }
  0x1c   : > { %201 = vst.msk [vmem:[#allocation2 + $0xc0] sm:$0xff] %vm176_vm0, %v8527_v0  ;;  %202 = vst.msk [vmem:[#allocation2 + $0xc8] sm:$0xff] %vm176_vm0, %v8527_v0 }
  0x1d   : > { %203 = vst.msk [vmem:[#allocation2 + $0xd0] sm:$0xff] %vm176_vm0, %v8527_v0  ;;  %204 = vst.msk [vmem:[#allocation2 + $0xd8] sm:$0xff] %vm176_vm0, %v8527_v0 }
  0x1e   : > { %205 = vst.msk [vmem:[#allocation2 + $0xe0] sm:$0xff] %vm176_vm0, %v8527_v0  ;;  %206 = vst.msk [vmem:[#allocation2 + $0xe8] sm:$0xff] %vm176_vm0, %v8527_v0 }
  0x1f   : > { %207 = vst.msk [vmem:[#allocation2 + $0xf0] sm:$0xff] %vm176_vm0, %v8527_v0  ;;  %208 = vst.msk [vmem:[#allocation2 + $0xf8] sm:$0xff] %vm176_vm0, %v8527_v0 }
  0x20   : > { %209 = vst.msk [vmem:[#allocation2 + $0x100] sm:$0xff] %vm176_vm0, %v8527_v0  ;;  %210 = vst.msk [vmem:[#allocation2 + $0x108] sm:$0xff] %vm176_vm0, %v8527_v0 }
  0x21   : > { %211 = vst.msk [vmem:[#allocation2 + $0x110] sm:$0xff] %vm176_vm0, %v8527_v0  ;;  %212 = vst.msk [vmem:[#allocation2 + $0x118] sm:$0xff] %vm176_vm0, %v8527_v0 }
  0x22   : > { %213 = vst.msk [vmem:[#allocation2 + $0x120] sm:$0xff] %vm176_vm0, %v8527_v0  ;;  %214 = vst.msk [vmem:[#allocation2 + $0x128] sm:$0xff] %vm176_vm0, %v8527_v0 }
  0x23   : > { %215 = vst.msk [vmem:[#allocation2 + $0x130] sm:$0xff] %vm176_vm0, %v8527_v0  ;;  %216 = vst.msk [vmem:[#allocation2 + $0x138] sm:$0xff] %vm176_vm0, %v8527_v0 }
  0x24   : > { %217 = vst.msk [vmem:[#allocation2 + $0x140] sm:$0xff] %vm176_vm0, %v8527_v0  ;;  %218 = vst.msk [vmem:[#allocation2 + $0x148] sm:$0xff] %vm176_vm0, %v8527_v0 }
  0x25   : > { %219 = vst.msk [vmem:[#allocation2 + $0x150] sm:$0xff] %vm176_vm0, %v8527_v0  ;;  %220 = vst.msk [vmem:[#allocation2 + $0x158] sm:$0xff] %vm176_vm0, %v8527_v0 }
  0x26   : > { %221 = vst.msk [vmem:[#allocation2 + $0x160] sm:$0xff] %vm176_vm0, %v8527_v0  ;;  %222 = vst.msk [vmem:[#allocation2 + $0x168] sm:$0xff] %vm176_vm0, %v8527_v0 }
  0x27   : > { %223 = vst.msk [vmem:[#allocation2 + $0x170] sm:$0xff] %vm176_vm0, %v8527_v0  ;;  %224 = vst.msk [vmem:[#allocation2 + $0x178] sm:$0xff] %vm176_vm0, %v8527_v0 }
  0x28   : > { %225 = vst.msk [vmem:[#allocation2 + $0x180] sm:$0xff] %vm176_vm0, %v8527_v0  ;;  %226 = vst.msk [vmem:[#allocation2 + $0x188] sm:$0xff] %vm176_vm0, %v8527_v0 }
  0x29   : > { %227 = vst.msk [vmem:[#allocation2 + $0x190] sm:$0xff] %vm176_vm0, %v8527_v0  ;;  %228 = vst.msk [vmem:[#allocation2 + $0x198] sm:$0xff] %vm176_vm0, %v8527_v0 }
  0x2a   : > { %229 = vst.msk [vmem:[#allocation2 + $0x1a0] sm:$0xff] %vm176_vm0, %v8527_v0  ;;  %230 = vst.msk [vmem:[#allocation2 + $0x1a8] sm:$0xff] %vm176_vm0, %v8527_v0 }
  0x2b   : > { %231 = vst.msk [vmem:[#allocation2 + $0x1b0] sm:$0xff] %vm176_vm0, %v8527_v0  ;;  %232 = vst.msk [vmem:[#allocation2 + $0x1b8] sm:$0xff] %vm176_vm0, %v8527_v0 }
  0x2c   : > { %233 = vst.msk [vmem:[#allocation2 + $0x1c0] sm:$0xff] %vm176_vm0, %v8527_v0  ;;  %234 = vst.msk [vmem:[#allocation2 + $0x1c8] sm:$0xff] %vm176_vm0, %v8527_v0 }
  0x2d   : > { %235 = vst.msk [vmem:[#allocation2 + $0x1d0] sm:$0xff] %vm176_vm0, %v8527_v0  ;;  %236 = vst.msk [vmem:[#allocation2 + $0x1d8] sm:$0xff] %vm176_vm0, %v8527_v0 }
  0x2e   : > { %237 = vst.msk [vmem:[#allocation2 + $0x1e0] sm:$0xff] %vm176_vm0, %v8527_v0  ;;  %238 = vst.msk [vmem:[#allocation2 + $0x1e8] sm:$0xff] %vm176_vm0, %v8527_v0 }
  0x2f   : > { %239 = vst.msk [vmem:[#allocation2 + $0x1f0] sm:$0xff] %vm176_vm0, %v8527_v0  ;;  %240 = vst.msk [vmem:[#allocation2 + $0x1f8] sm:$0xff] %vm176_vm0, %v8527_v0 }
  0x30   : > { %241 = vst.msk [vmem:[#allocation2 + $0x200] sm:$0xff] %vm176_vm0, %v8527_v0  ;;  %242 = vst.msk [vmem:[#allocation2 + $0x208] sm:$0xff] %vm176_vm0, %v8527_v0 }
  0x31   : > { %243 = vst.msk [vmem:[#allocation2 + $0x210] sm:$0xff] %vm176_vm0, %v8527_v0  ;;  %244 = vst.msk [vmem:[#allocation2 + $0x218] sm:$0xff] %vm176_vm0, %v8527_v0 }
  0x32   : > { %245 = vst.msk [vmem:[#allocation2 + $0x220] sm:$0xff] %vm176_vm0, %v8527_v0  ;;  %246 = vst.msk [vmem:[#allocation2 + $0x228] sm:$0xff] %vm176_vm0, %v8527_v0 }
  0x33   : > { %247 = vst.msk [vmem:[#allocation2 + $0x230] sm:$0xff] %vm176_vm0, %v8527_v0  ;;  %248 = vst.msk [vmem:[#allocation2 + $0x238] sm:$0xff] %vm176_vm0, %v8527_v0 }
  0x34   : > { %249 = vst.msk [vmem:[#allocation2 + $0x240] sm:$0xff] %vm176_vm0, %v8527_v0  ;;  %250 = vst.msk [vmem:[#allocation2 + $0x248] sm:$0xff] %vm176_vm0, %v8527_v0 }
  0x35   : > { %251 = vst.msk [vmem:[#allocation2 + $0x250] sm:$0xff] %vm176_vm0, %v8527_v0  ;;  %252 = vst.msk [vmem:[#allocation2 + $0x258] sm:$0xff] %vm176_vm0, %v8527_v0 }
  0x36   : > { %253 = vst.msk [vmem:[#allocation2 + $0x260] sm:$0xff] %vm176_vm0, %v8527_v0  ;;  %254 = vst.msk [vmem:[#allocation2 + $0x268] sm:$0xff] %vm176_vm0, %v8527_v0 }
  0x37   : > { %255 = vst.msk [vmem:[#allocation2 + $0x270] sm:$0xff] %vm176_vm0, %v8527_v0  ;;  %256 = vst.msk [vmem:[#allocation2 + $0x278] sm:$0xff] %vm176_vm0, %v8527_v0 }
  0x38   : > { %257 = vst.msk [vmem:[#allocation2 + $0x280] sm:$0xff] %vm176_vm0, %v8527_v0  ;;  %258 = vst.msk [vmem:[#allocation2 + $0x288] sm:$0xff] %vm176_vm0, %v8527_v0 }
  0x39   : > { %259 = vst.msk [vmem:[#allocation2 + $0x290] sm:$0xff] %vm176_vm0, %v8527_v0  ;;  %260 = vst.msk [vmem:[#allocation2 + $0x298] sm:$0xff] %vm176_vm0, %v8527_v0 }
  0x3a   : > { %261 = vst.msk [vmem:[#allocation2 + $0x2a0] sm:$0xff] %vm176_vm0, %v8527_v0  ;;  %262 = vst.msk [vmem:[#allocation2 + $0x2a8] sm:$0xff] %vm176_vm0, %v8527_v0 }
  0x3b   : > { %263 = vst.msk [vmem:[#allocation2 + $0x2b0] sm:$0xff] %vm176_vm0, %v8527_v0  ;;  %264 = vst.msk [vmem:[#allocation2 + $0x2b8] sm:$0xff] %vm176_vm0, %v8527_v0 }
  0x3c   : > { %265 = vst.msk [vmem:[#allocation2 + $0x2c0] sm:$0xff] %vm176_vm0, %v8527_v0  ;;  %266 = vst.msk [vmem:[#allocation2 + $0x2c8] sm:$0xff] %vm176_vm0, %v8527_v0 }
  0x3d   : > { %267 = vst.msk [vmem:[#allocation2 + $0x2d0] sm:$0xff] %vm176_vm0, %v8527_v0  ;;  %268 = vst.msk [vmem:[#allocation2 + $0x2d8] sm:$0xff] %vm176_vm0, %v8527_v0 }
  0x3e   : > { %269 = vst.msk [vmem:[#allocation2 + $0x2e0] sm:$0xff] %vm176_vm0, %v8527_v0  ;;  %270 = vst.msk [vmem:[#allocation2 + $0x2e8] sm:$0xff] %vm176_vm0, %v8527_v0 }
  0x3f   : > { %271 = vst.msk [vmem:[#allocation2 + $0x2f0] sm:$0xff] %vm176_vm0, %v8527_v0  ;;  %272 = vst.msk [vmem:[#allocation2 + $0x2f8] sm:$0xff] %vm176_vm0, %v8527_v0 }
  0x40   : > { %273 = vst.msk [vmem:[#allocation2 + $0x300] sm:$0xff] %vm176_vm0, %v8527_v0  ;;  %274 = vst.msk [vmem:[#allocation2 + $0x308] sm:$0xff] %vm176_vm0, %v8527_v0 }
  0x41   : > { %275 = vst.msk [vmem:[#allocation2 + $0x310] sm:$0xff] %vm176_vm0, %v8527_v0  ;;  %276 = vst.msk [vmem:[#allocation2 + $0x318] sm:$0xff] %vm176_vm0, %v8527_v0 }
  0x42   : > { %277 = vst.msk [vmem:[#allocation2 + $0x320] sm:$0xff] %vm176_vm0, %v8527_v0  ;;  %278 = vst.msk [vmem:[#allocation2 + $0x328] sm:$0xff] %vm176_vm0, %v8527_v0 }
  0x43   : > { %279 = vst.msk [vmem:[#allocation2 + $0x330] sm:$0xff] %vm176_vm0, %v8527_v0  ;;  %280 = vst.msk [vmem:[#allocation2 + $0x338] sm:$0xff] %vm176_vm0, %v8527_v0 }
  0x44   : > { %281 = vst.msk [vmem:[#allocation2 + $0x340] sm:$0xff] %vm176_vm0, %v8527_v0  ;;  %282 = vst.msk [vmem:[#allocation2 + $0x348] sm:$0xff] %vm176_vm0, %v8527_v0 }
  0x45   : > { %283 = vst.msk [vmem:[#allocation2 + $0x350] sm:$0xff] %vm176_vm0, %v8527_v0  ;;  %284 = vst.msk [vmem:[#allocation2 + $0x358] sm:$0xff] %vm176_vm0, %v8527_v0 }
  0x46   : > { %285 = vst.msk [vmem:[#allocation2 + $0x360] sm:$0xff] %vm176_vm0, %v8527_v0  ;;  %286 = vst.msk [vmem:[#allocation2 + $0x368] sm:$0xff] %vm176_vm0, %v8527_v0 }
  0x47   : > { %287 = vst.msk [vmem:[#allocation2 + $0x370] sm:$0xff] %vm176_vm0, %v8527_v0  ;;  %288 = vst.msk [vmem:[#allocation2 + $0x378] sm:$0xff] %vm176_vm0, %v8527_v0 }
  0x48   : > { %289 = vst.msk [vmem:[#allocation2 + $0x380] sm:$0xff] %vm176_vm0, %v8527_v0  ;;  %290 = vst.msk [vmem:[#allocation2 + $0x388] sm:$0xff] %vm176_vm0, %v8527_v0 }
  0x49   : > { %291 = vst.msk [vmem:[#allocation2 + $0x390] sm:$0xff] %vm176_vm0, %v8527_v0  ;;  %292 = vst.msk [vmem:[#allocation2 + $0x398] sm:$0xff] %vm176_vm0, %v8527_v0 }
  0x4a   : > { %293 = vst.msk [vmem:[#allocation2 + $0x3a0] sm:$0xff] %vm176_vm0, %v8527_v0  ;;  %294 = vst.msk [vmem:[#allocation2 + $0x3a8] sm:$0xff] %vm176_vm0, %v8527_v0 }
  0x4b   : > { %295 = vst.msk [vmem:[#allocation2 + $0x3b0] sm:$0xff] %vm176_vm0, %v8527_v0  ;;  %296 = vst.msk [vmem:[#allocation2 + $0x3b8] sm:$0xff] %vm176_vm0, %v8527_v0 }
  0x4c   : > { %297 = vst.msk [vmem:[#allocation2 + $0x3c0] sm:$0xff] %vm176_vm0, %v8527_v0  ;;  %298 = vst.msk [vmem:[#allocation2 + $0x3c8] sm:$0xff] %vm176_vm0, %v8527_v0 }
  0x4d   : > { %299 = vst.msk [vmem:[#allocation2 + $0x3d0] sm:$0xff] %vm176_vm0, %v8527_v0  ;;  %300 = vst.msk [vmem:[#allocation2 + $0x3d8] sm:$0xff] %vm176_vm0, %v8527_v0 }
  0x4e   : > { %301 = vst.msk [vmem:[#allocation2 + $0x3e0] sm:$0xff] %vm176_vm0, %v8527_v0  ;;  %302 = vst.msk [vmem:[#allocation2 + $0x3e8] sm:$0xff] %vm176_vm0, %v8527_v0 }
  0x4f   : > { %303 = vst.msk [vmem:[#allocation2 + $0x3f0] sm:$0xff] %vm176_vm0, %v8527_v0  ;;  %304 = vst.msk [vmem:[#allocation2 + $0x3f8] sm:$0xff] %vm176_vm0, %v8527_v0 }
  0x50   : > { %305 = vst.msk [vmem:[#allocation2 + $0x400] sm:$0xff] %vm176_vm0, %v8527_v0  ;;  %306 = vst.msk [vmem:[#allocation2 + $0x408] sm:$0xff] %vm176_vm0, %v8527_v0 }
  0x51   : > { %307 = vst.msk [vmem:[#allocation2 + $0x410] sm:$0xff] %vm176_vm0, %v8527_v0  ;;  %308 = vst.msk [vmem:[#allocation2 + $0x418] sm:$0xff] %vm176_vm0, %v8527_v0 }
  0x52   : > { %309 = vst.msk [vmem:[#allocation2 + $0x420] sm:$0xff] %vm176_vm0, %v8527_v0  ;;  %310 = vst.msk [vmem:[#allocation2 + $0x428] sm:$0xff] %vm176_vm0, %v8527_v0 }
  0x53   : > { %311 = vst.msk [vmem:[#allocation2 + $0x430] sm:$0xff] %vm176_vm0, %v8527_v0  ;;  %312 = vst.msk [vmem:[#allocation2 + $0x438] sm:$0xff] %vm176_vm0, %v8527_v0 }
  0x54   : > { %313 = vst.msk [vmem:[#allocation2 + $0x440] sm:$0xff] %vm176_vm0, %v8527_v0  ;;  %314 = vst.msk [vmem:[#allocation2 + $0x448] sm:$0xff] %vm176_vm0, %v8527_v0 }
  0x55   : > { %315 = vst.msk [vmem:[#allocation2 + $0x450] sm:$0xff] %vm176_vm0, %v8527_v0  ;;  %316 = vst.msk [vmem:[#allocation2 + $0x458] sm:$0xff] %vm176_vm0, %v8527_v0 }
  0x56   : > { %317 = vst.msk [vmem:[#allocation2 + $0x460] sm:$0xff] %vm176_vm0, %v8527_v0  ;;  %318 = vst.msk [vmem:[#allocation2 + $0x468] sm:$0xff] %vm176_vm0, %v8527_v0 }
  0x57   : > { %319 = vst.msk [vmem:[#allocation2 + $0x470] sm:$0xff] %vm176_vm0, %v8527_v0  ;;  %320 = vst.msk [vmem:[#allocation2 + $0x478] sm:$0xff] %vm176_vm0, %v8527_v0 }
  0x58   : > { %321 = vst [vmem:[#allocation3] sm:$0xff] %v8528_v1  ;;  %322 = vst [vmem:[#allocation3 + $0x8] sm:$0xff] %v8528_v1 }
  0x59   : > { %323 = vst [vmem:[#allocation3 + $0x10] sm:$0xff] %v8528_v1  ;;  %324 = vst [vmem:[#allocation3 + $0x18] sm:$0xff] %v8528_v1 }
  0x5a   : > { %325 = vst [vmem:[#allocation3 + $0x20] sm:$0xff] %v8528_v1  ;;  %326 = vst [vmem:[#allocation3 + $0x28] sm:$0xff] %v8528_v1 }
  0x5b   : > { %327 = vst [vmem:[#allocation3 + $0x30] sm:$0xff] %v8528_v1  ;;  %328 = vst [vmem:[#allocation3 + $0x38] sm:$0xff] %v8528_v1 }
  0x5c   : > { %329 = vst [vmem:[#allocation3 + $0x40] sm:$0xff] %v8528_v1  ;;  %330 = vst [vmem:[#allocation3 + $0x48] sm:$0xff] %v8528_v1 }
  0x5d   : > { %331 = vst [vmem:[#allocation3 + $0x50] sm:$0xff] %v8528_v1  ;;  %332 = vst [vmem:[#allocation3 + $0x58] sm:$0xff] %v8528_v1 }
  0x5e   : > { %333 = vst [vmem:[#allocation3 + $0x60] sm:$0xff] %v8528_v1  ;;  %334 = vst [vmem:[#allocation3 + $0x68] sm:$0xff] %v8528_v1 }
  0x5f   : > { %335 = vst [vmem:[#allocation3 + $0x70] sm:$0xff] %v8528_v1  ;;  %336 = vst [vmem:[#allocation3 + $0x78] sm:$0xff] %v8528_v1 }
  0x60   : > { %337 = vst [vmem:[#allocation3 + $0x80] sm:$0xff] %v8528_v1  ;;  %338 = vst [vmem:[#allocation3 + $0x88] sm:$0xff] %v8528_v1 }
  0x61   : > { %339 = vst [vmem:[#allocation3 + $0x90] sm:$0xff] %v8528_v1  ;;  %340 = vst [vmem:[#allocation3 + $0x98] sm:$0xff] %v8528_v1 }
  0x62   : > { %341 = vst [vmem:[#allocation3 + $0xa0] sm:$0xff] %v8528_v1  ;;  %342 = vst [vmem:[#allocation3 + $0xa8] sm:$0xff] %v8528_v1 }
  0x63   : > { %343 = vst [vmem:[#allocation3 + $0xb0] sm:$0xff] %v8528_v1  ;;  %344 = vst [vmem:[#allocation3 + $0xb8] sm:$0xff] %v8528_v1 }
  0x64   : > { %345 = vst [vmem:[#allocation3 + $0xc0] sm:$0xff] %v8528_v1  ;;  %346 = vst [vmem:[#allocation3 + $0xc8] sm:$0xff] %v8528_v1 }
  0x65   : > { %347 = vst [vmem:[#allocation3 + $0xd0] sm:$0xff] %v8528_v1  ;;  %348 = vst [vmem:[#allocation3 + $0xd8] sm:$0xff] %v8528_v1 }
  0x66   : > { %349 = vst [vmem:[#allocation3 + $0xe0] sm:$0xff] %v8528_v1  ;;  %350 = vst [vmem:[#allocation3 + $0xe8] sm:$0xff] %v8528_v1 }
  0x67   : > { %351 = vst [vmem:[#allocation3 + $0xf0] sm:$0xff] %v8528_v1  ;;  %352 = vst [vmem:[#allocation3 + $0xf8] sm:$0xff] %v8528_v1 }
  0x68   : > { %353 = vst [vmem:[#allocation3 + $0x100] sm:$0xff] %v8528_v1  ;;  %354 = vst [vmem:[#allocation3 + $0x108] sm:$0xff] %v8528_v1 }
  0x69   : > { %355 = vst [vmem:[#allocation3 + $0x110] sm:$0xff] %v8528_v1  ;;  %356 = vst [vmem:[#allocation3 + $0x118] sm:$0xff] %v8528_v1 }
  0x6a   : > { %357 = vst [vmem:[#allocation3 + $0x120] sm:$0xff] %v8528_v1  ;;  %358 = vst [vmem:[#allocation3 + $0x128] sm:$0xff] %v8528_v1 }
  0x6b   : > { %359 = vst [vmem:[#allocation3 + $0x130] sm:$0xff] %v8528_v1  ;;  %360 = vst [vmem:[#allocation3 + $0x138] sm:$0xff] %v8528_v1 }
  0x6c   : > { %361 = vst [vmem:[#allocation3 + $0x140] sm:$0xff] %v8528_v1  ;;  %362 = vst [vmem:[#allocation3 + $0x148] sm:$0xff] %v8528_v1 }
  0x6d   : > { %363 = vst [vmem:[#allocation3 + $0x150] sm:$0xff] %v8528_v1  ;;  %364 = vst [vmem:[#allocation3 + $0x158] sm:$0xff] %v8528_v1 }
  0x6e   : > { %365 = vst [vmem:[#allocation3 + $0x160] sm:$0xff] %v8528_v1  ;;  %366 = vst [vmem:[#allocation3 + $0x168] sm:$0xff] %v8528_v1 }
  0x6f   : > { %367 = vst [vmem:[#allocation3 + $0x170] sm:$0xff] %v8528_v1  ;;  %368 = vst [vmem:[#allocation3 + $0x178] sm:$0xff] %v8528_v1 }
  0x70   : > { %369 = vst [vmem:[#allocation3 + $0x180] sm:$0xff] %v8528_v1  ;;  %370 = vst [vmem:[#allocation3 + $0x188] sm:$0xff] %v8528_v1 }
  0x71   : > { %371 = vst [vmem:[#allocation3 + $0x190] sm:$0xff] %v8528_v1  ;;  %372 = vst [vmem:[#allocation3 + $0x198] sm:$0xff] %v8528_v1 }
  0x72   : > { %373 = vst [vmem:[#allocation3 + $0x1a0] sm:$0xff] %v8528_v1  ;;  %374 = vst [vmem:[#allocation3 + $0x1a8] sm:$0xff] %v8528_v1 }
  0x73   : > { %375 = vst [vmem:[#allocation3 + $0x1b0] sm:$0xff] %v8528_v1  ;;  %376 = vst [vmem:[#allocation3 + $0x1b8] sm:$0xff] %v8528_v1 }
  0x74   : > { %377 = vst [vmem:[#allocation3 + $0x1c0] sm:$0xff] %v8528_v1  ;;  %378 = vst [vmem:[#allocation3 + $0x1c8] sm:$0xff] %v8528_v1 }
  0x75   : > { %379 = vst [vmem:[#allocation3 + $0x1d0] sm:$0xff] %v8528_v1  ;;  %380 = vst [vmem:[#allocation3 + $0x1d8] sm:$0xff] %v8528_v1 }
  0x76   : > { %381 = vst [vmem:[#allocation3 + $0x1e0] sm:$0xff] %v8528_v1  ;;  %382 = vst [vmem:[#allocation3 + $0x1e8] sm:$0xff] %v8528_v1 }
  0x77   : > { %383 = vst [vmem:[#allocation3 + $0x1f0] sm:$0xff] %v8528_v1  ;;  %384 = vst [vmem:[#allocation3 + $0x1f8] sm:$0xff] %v8528_v1 }
  0x78   : > { %385 = vst [vmem:[#allocation3 + $0x200] sm:$0xff] %v8528_v1  ;;  %386 = vst [vmem:[#allocation3 + $0x208] sm:$0xff] %v8528_v1 }
  0x79   : > { %387 = vst [vmem:[#allocation3 + $0x210] sm:$0xff] %v8528_v1  ;;  %388 = vst [vmem:[#allocation3 + $0x218] sm:$0xff] %v8528_v1 }
  0x7a   : > { %389 = vst [vmem:[#allocation3 + $0x220] sm:$0xff] %v8528_v1  ;;  %390 = vst [vmem:[#allocation3 + $0x228] sm:$0xff] %v8528_v1 }
  0x7b   : > { %391 = vst [vmem:[#allocation3 + $0x230] sm:$0xff] %v8528_v1  ;;  %392 = vst [vmem:[#allocation3 + $0x238] sm:$0xff] %v8528_v1 }
  0x7c   : > { %393 = vst [vmem:[#allocation3 + $0x240] sm:$0xff] %v8528_v1  ;;  %394 = vst [vmem:[#allocation3 + $0x248] sm:$0xff] %v8528_v1 }
  0x7d   : > { %395 = vst [vmem:[#allocation3 + $0x250] sm:$0xff] %v8528_v1  ;;  %396 = vst [vmem:[#allocation3 + $0x258] sm:$0xff] %v8528_v1 }
  0x7e   : > { %397 = vst [vmem:[#allocation3 + $0x260] sm:$0xff] %v8528_v1  ;;  %398 = vst [vmem:[#allocation3 + $0x268] sm:$0xff] %v8528_v1 }
  0x7f   : > { %399 = vst [vmem:[#allocation3 + $0x270] sm:$0xff] %v8528_v1  ;;  %400 = vst [vmem:[#allocation3 + $0x278] sm:$0xff] %v8528_v1 }
  0x80   : > { %401 = vst [vmem:[#allocation3 + $0x280] sm:$0xff] %v8528_v1  ;;  %402 = vst [vmem:[#allocation3 + $0x288] sm:$0xff] %v8528_v1 }
  0x81   : > { %403 = vst [vmem:[#allocation3 + $0x290] sm:$0xff] %v8528_v1  ;;  %404 = vst [vmem:[#allocation3 + $0x298] sm:$0xff] %v8528_v1 }
  0x82   : > { %405 = vst [vmem:[#allocation3 + $0x2a0] sm:$0xff] %v8528_v1  ;;  %406 = vst [vmem:[#allocation3 + $0x2a8] sm:$0xff] %v8528_v1 }
  0x83   : > { %407 = vst [vmem:[#allocation3 + $0x2b0] sm:$0xff] %v8528_v1  ;;  %408 = vst [vmem:[#allocation3 + $0x2b8] sm:$0xff] %v8528_v1 }
  0x84   : > { %409 = vst [vmem:[#allocation3 + $0x2c0] sm:$0xff] %v8528_v1  ;;  %410 = vst [vmem:[#allocation3 + $0x2c8] sm:$0xff] %v8528_v1 }
  0x85   : > { %411 = vst [vmem:[#allocation3 + $0x2d0] sm:$0xff] %v8528_v1  ;;  %412 = vst [vmem:[#allocation3 + $0x2d8] sm:$0xff] %v8528_v1 }
  0x86   : > { %413 = vst [vmem:[#allocation3 + $0x2e0] sm:$0xff] %v8528_v1  ;;  %414 = vst [vmem:[#allocation3 + $0x2e8] sm:$0xff] %v8528_v1 }
  0x87   : > { %415 = vst [vmem:[#allocation3 + $0x2f0] sm:$0xff] %v8528_v1  ;;  %416 = vst [vmem:[#allocation3 + $0x2f8] sm:$0xff] %v8528_v1 }
  0x88   : > { %417 = vst [vmem:[#allocation3 + $0x300] sm:$0xff] %v8528_v1  ;;  %418 = vst [vmem:[#allocation3 + $0x308] sm:$0xff] %v8528_v1 }
  0x89   : > { %419 = vst [vmem:[#allocation3 + $0x310] sm:$0xff] %v8528_v1  ;;  %420 = vst [vmem:[#allocation3 + $0x318] sm:$0xff] %v8528_v1 }
  0x8a   : > { %421 = vst [vmem:[#allocation3 + $0x320] sm:$0xff] %v8528_v1  ;;  %422 = vst [vmem:[#allocation3 + $0x328] sm:$0xff] %v8528_v1 }
  0x8b   : > { %423 = vst [vmem:[#allocation3 + $0x330] sm:$0xff] %v8528_v1  ;;  %424 = vst [vmem:[#allocation3 + $0x338] sm:$0xff] %v8528_v1 }
  0x8c   : > { %425 = vst [vmem:[#allocation3 + $0x340] sm:$0xff] %v8528_v1  ;;  %426 = vst [vmem:[#allocation3 + $0x348] sm:$0xff] %v8528_v1 }
  0x8d   : > { %427 = vst [vmem:[#allocation3 + $0x350] sm:$0xff] %v8528_v1  ;;  %428 = vst [vmem:[#allocation3 + $0x358] sm:$0xff] %v8528_v1 }
  0x8e   : > { %429 = vst [vmem:[#allocation3 + $0x360] sm:$0xff] %v8528_v1  ;;  %430 = vst [vmem:[#allocation3 + $0x368] sm:$0xff] %v8528_v1 }
  0x8f   : > { %431 = vst [vmem:[#allocation3 + $0x370] sm:$0xff] %v8528_v1  ;;  %432 = vst [vmem:[#allocation3 + $0x378] sm:$0xff] %v8528_v1 }
  0x90   : > { %433 = vst [vmem:[#allocation3 + $0x380] sm:$0xff] %v8528_v1  ;;  %434 = vst [vmem:[#allocation3 + $0x388] sm:$0xff] %v8528_v1 }
  0x91   : > { %435 = vst [vmem:[#allocation3 + $0x390] sm:$0xff] %v8528_v1  ;;  %436 = vst [vmem:[#allocation3 + $0x398] sm:$0xff] %v8528_v1 }
  0x92   : > { %437 = vst [vmem:[#allocation3 + $0x3a0] sm:$0xff] %v8528_v1  ;;  %438 = vst [vmem:[#allocation3 + $0x3a8] sm:$0xff] %v8528_v1 }
  0x93   : > { %439 = vst [vmem:[#allocation3 + $0x3b0] sm:$0xff] %v8528_v1  ;;  %440 = vst [vmem:[#allocation3 + $0x3b8] sm:$0xff] %v8528_v1 }
  0x94   : > { %441 = vst [vmem:[#allocation3 + $0x3c0] sm:$0xff] %v8528_v1  ;;  %442 = vst [vmem:[#allocation3 + $0x3c8] sm:$0xff] %v8528_v1 }
  0x95   : > { %443 = vst [vmem:[#allocation3 + $0x3d0] sm:$0xff] %v8528_v1  ;;  %444 = vst [vmem:[#allocation3 + $0x3d8] sm:$0xff] %v8528_v1 }
  0x96   : > { %445 = vst [vmem:[#allocation3 + $0x3e0] sm:$0xff] %v8528_v1  ;;  %446 = vst [vmem:[#allocation3 + $0x3e8] sm:$0xff] %v8528_v1 }
  0x97   : > { %447 = vst [vmem:[#allocation3 + $0x3f0] sm:$0xff] %v8528_v1  ;;  %448 = vst [vmem:[#allocation3 + $0x3f8] sm:$0xff] %v8528_v1 }
  0x98   : > { %449 = vst [vmem:[#allocation3 + $0x400] sm:$0xff] %v8528_v1  ;;  %450 = vst [vmem:[#allocation3 + $0x408] sm:$0xff] %v8528_v1 }
  0x99   : > { %451 = vst [vmem:[#allocation3 + $0x410] sm:$0xff] %v8528_v1  ;;  %452 = vst [vmem:[#allocation3 + $0x418] sm:$0xff] %v8528_v1 }
  0x9a   : > { %453 = vst [vmem:[#allocation3 + $0x420] sm:$0xff] %v8528_v1  ;;  %454 = vst [vmem:[#allocation3 + $0x428] sm:$0xff] %v8528_v1 }
  0x9b   : > { %455 = vst [vmem:[#allocation3 + $0x430] sm:$0xff] %v8528_v1  ;;  %456 = vst [vmem:[#allocation3 + $0x438] sm:$0xff] %v8528_v1 }
  0x9c   : > { %457 = vst [vmem:[#allocation3 + $0x440] sm:$0xff] %v8528_v1  ;;  %458 = vst [vmem:[#allocation3 + $0x448] sm:$0xff] %v8528_v1 }
  0x9d   : > { %459 = vst [vmem:[#allocation3 + $0x450] sm:$0xff] %v8528_v1  ;;  %460 = vst [vmem:[#allocation3 + $0x458] sm:$0xff] %v8528_v1 }
  0x9e   : > { %461 = vst [vmem:[#allocation3 + $0x460] sm:$0xff] %v8528_v1  ;;  %462 = vst [vmem:[#allocation3 + $0x468] sm:$0xff] %v8528_v1 }
  0x9f   : > { %463 = vst [vmem:[#allocation3 + $0x470] sm:$0xff] %v8528_v1  ;;  %464 = vst [vmem:[#allocation3 + $0x478] sm:$0xff] %v8528_v1 }
  0xa0   : > { %465 = vst [vmem:[#allocation3 + $0x480] sm:$0xff] %v8528_v1  ;;  %466 = vst [vmem:[#allocation3 + $0x488] sm:$0xff] %v8528_v1 }
  0xa1   : > { %467 = vst [vmem:[#allocation3 + $0x490] sm:$0xff] %v8528_v1  ;;  %468 = vst [vmem:[#allocation3 + $0x498] sm:$0xff] %v8528_v1 }
  0xa2   : > { %469 = vst [vmem:[#allocation3 + $0x4a0] sm:$0xff] %v8528_v1  ;;  %470 = vst [vmem:[#allocation3 + $0x4a8] sm:$0xff] %v8528_v1 }
  0xa3   : > { %471 = vst [vmem:[#allocation3 + $0x4b0] sm:$0xff] %v8528_v1  ;;  %472 = vst [vmem:[#allocation3 + $0x4b8] sm:$0xff] %v8528_v1 }
  0xa4   : > { %473 = vst [vmem:[#allocation3 + $0x4c0] sm:$0xff] %v8528_v1  ;;  %474 = vst [vmem:[#allocation3 + $0x4c8] sm:$0xff] %v8528_v1 }
  0xa5   : > { %475 = vst [vmem:[#allocation3 + $0x4d0] sm:$0xff] %v8528_v1  ;;  %476 = vst [vmem:[#allocation3 + $0x4d8] sm:$0xff] %v8528_v1 }
  0xa6   : > { %477 = vst [vmem:[#allocation3 + $0x4e0] sm:$0xff] %v8528_v1  ;;  %478 = vst [vmem:[#allocation3 + $0x4e8] sm:$0xff] %v8528_v1 }
  0xa7   : > { %479 = vst [vmem:[#allocation3 + $0x4f0] sm:$0xff] %v8528_v1  ;;  %480 = vst [vmem:[#allocation3 + $0x4f8] sm:$0xff] %v8528_v1 }
  0xa8   : > { %481 = vst [vmem:[#allocation3 + $0x500] sm:$0xff] %v8528_v1  ;;  %482 = vst [vmem:[#allocation3 + $0x508] sm:$0xff] %v8528_v1 }
  0xa9   : > { %483 = vst [vmem:[#allocation3 + $0x510] sm:$0xff] %v8528_v1  ;;  %484 = vst [vmem:[#allocation3 + $0x518] sm:$0xff] %v8528_v1 }
  0xaa   : > { %485 = vst [vmem:[#allocation3 + $0x520] sm:$0xff] %v8528_v1  ;;  %486 = vst [vmem:[#allocation3 + $0x528] sm:$0xff] %v8528_v1 }
  0xab   : > { %487 = vst [vmem:[#allocation3 + $0x530] sm:$0xff] %v8528_v1  ;;  %488 = vst [vmem:[#allocation3 + $0x538] sm:$0xff] %v8528_v1 }
  0xac   : > { %489 = vst [vmem:[#allocation3 + $0x540] sm:$0xff] %v8528_v1  ;;  %490 = vst [vmem:[#allocation3 + $0x548] sm:$0xff] %v8528_v1 }
  0xad   : > { %491 = vst [vmem:[#allocation3 + $0x550] sm:$0xff] %v8528_v1  ;;  %492 = vst [vmem:[#allocation3 + $0x558] sm:$0xff] %v8528_v1 }
  0xae   : > { %493 = vst [vmem:[#allocation3 + $0x560] sm:$0xff] %v8528_v1  ;;  %494 = vst [vmem:[#allocation3 + $0x568] sm:$0xff] %v8528_v1 }
  0xaf   : > { %495 = vst [vmem:[#allocation3 + $0x570] sm:$0xff] %v8528_v1  ;;  %496 = vst [vmem:[#allocation3 + $0x578] sm:$0xff] %v8528_v1 }
  0xb0   : > { %497 = vst [vmem:[#allocation3 + $0x580] sm:$0xff] %v8528_v1  ;;  %498 = vst [vmem:[#allocation3 + $0x588] sm:$0xff] %v8528_v1 }
  0xb1   : > { %499 = vst [vmem:[#allocation3 + $0x590] sm:$0xff] %v8528_v1  ;;  %500 = vst [vmem:[#allocation3 + $0x598] sm:$0xff] %v8528_v1 }
  0xb2   : > { %501 = vst [vmem:[#allocation3 + $0x5a0] sm:$0xff] %v8528_v1  ;;  %502 = vst [vmem:[#allocation3 + $0x5a8] sm:$0xff] %v8528_v1 }
  0xb3   : > { %503 = vst [vmem:[#allocation3 + $0x5b0] sm:$0xff] %v8528_v1  ;;  %504 = vst [vmem:[#allocation3 + $0x5b8] sm:$0xff] %v8528_v1 }
  0xb4   : > { %505 = vst [vmem:[#allocation3 + $0x5c0] sm:$0xff] %v8528_v1  ;;  %506 = vst [vmem:[#allocation3 + $0x5c8] sm:$0xff] %v8528_v1 }
  0xb5   : > { %507 = vst [vmem:[#allocation3 + $0x5d0] sm:$0xff] %v8528_v1  ;;  %508 = vst [vmem:[#allocation3 + $0x5d8] sm:$0xff] %v8528_v1 }
  0xb6   : > { %509 = vst [vmem:[#allocation3 + $0x5e0] sm:$0xff] %v8528_v1  ;;  %510 = vst [vmem:[#allocation3 + $0x5e8] sm:$0xff] %v8528_v1 }
  0xb7   : > { %511 = vst [vmem:[#allocation3 + $0x5f0] sm:$0xff] %v8528_v1  ;;  %512 = vst [vmem:[#allocation3 + $0x5f8] sm:$0xff] %v8528_v1 }
  0xb8   : > { %513 = vst [vmem:[#allocation3 + $0x600] sm:$0xff] %v8528_v1  ;;  %514 = vst [vmem:[#allocation3 + $0x608] sm:$0xff] %v8528_v1 }
  0xb9   : > { %515 = vst [vmem:[#allocation3 + $0x610] sm:$0xff] %v8528_v1  ;;  %516 = vst [vmem:[#allocation3 + $0x618] sm:$0xff] %v8528_v1 }
  0xba   : > { %517 = vst [vmem:[#allocation3 + $0x620] sm:$0xff] %v8528_v1  ;;  %518 = vst [vmem:[#allocation3 + $0x628] sm:$0xff] %v8528_v1 }
  0xbb   : > { %519 = vst [vmem:[#allocation3 + $0x630] sm:$0xff] %v8528_v1  ;;  %520 = vst [vmem:[#allocation3 + $0x638] sm:$0xff] %v8528_v1 }
  0xbc   : > { %521 = vst [vmem:[#allocation3 + $0x640] sm:$0xff] %v8528_v1  ;;  %522 = vst [vmem:[#allocation3 + $0x648] sm:$0xff] %v8528_v1 }
  0xbd   : > { %523 = vst [vmem:[#allocation3 + $0x650] sm:$0xff] %v8528_v1  ;;  %524 = vst [vmem:[#allocation3 + $0x658] sm:$0xff] %v8528_v1 }
  0xbe   : > { %525 = vst [vmem:[#allocation3 + $0x660] sm:$0xff] %v8528_v1  ;;  %526 = vst [vmem:[#allocation3 + $0x668] sm:$0xff] %v8528_v1 }
  0xbf   : > { %527 = vst [vmem:[#allocation3 + $0x670] sm:$0xff] %v8528_v1  ;;  %528 = vst [vmem:[#allocation3 + $0x678] sm:$0xff] %v8528_v1 }
  0xc0   : > { %529 = vst [vmem:[#allocation3 + $0x680] sm:$0xff] %v8528_v1  ;;  %530 = vst [vmem:[#allocation3 + $0x688] sm:$0xff] %v8528_v1 }
  0xc1   : > { %531 = vst [vmem:[#allocation3 + $0x690] sm:$0xff] %v8528_v1  ;;  %532 = vst [vmem:[#allocation3 + $0x698] sm:$0xff] %v8528_v1 }
  0xc2   : > { %533 = vst [vmem:[#allocation3 + $0x6a0] sm:$0xff] %v8528_v1  ;;  %534 = vst [vmem:[#allocation3 + $0x6a8] sm:$0xff] %v8528_v1 }
  0xc3   : > { %535 = vst [vmem:[#allocation3 + $0x6b0] sm:$0xff] %v8528_v1  ;;  %536 = vst [vmem:[#allocation3 + $0x6b8] sm:$0xff] %v8528_v1 }
  0xc4   : > { %537 = vst [vmem:[#allocation3 + $0x6c0] sm:$0xff] %v8528_v1  ;;  %538 = vst [vmem:[#allocation3 + $0x6c8] sm:$0xff] %v8528_v1 }
  0xc5   : > { %539 = vst [vmem:[#allocation3 + $0x6d0] sm:$0xff] %v8528_v1  ;;  %540 = vst [vmem:[#allocation3 + $0x6d8] sm:$0xff] %v8528_v1 }
  0xc6   : > { %541 = vst [vmem:[#allocation3 + $0x6e0] sm:$0xff] %v8528_v1  ;;  %542 = vst [vmem:[#allocation3 + $0x6e8] sm:$0xff] %v8528_v1 }
  0xc7   : > { %543 = vst [vmem:[#allocation3 + $0x6f0] sm:$0xff] %v8528_v1  ;;  %544 = vst [vmem:[#allocation3 + $0x6f8] sm:$0xff] %v8528_v1 }
  0xc8   : > { %545 = vst [vmem:[#allocation3 + $0x700] sm:$0xff] %v8528_v1  ;;  %546 = vst [vmem:[#allocation3 + $0x708] sm:$0xff] %v8528_v1 }
  0xc9   : > { %547 = vst [vmem:[#allocation3 + $0x710] sm:$0xff] %v8528_v1  ;;  %548 = vst [vmem:[#allocation3 + $0x718] sm:$0xff] %v8528_v1 }
  0xca   : > { %549 = vst [vmem:[#allocation3 + $0x720] sm:$0xff] %v8528_v1  ;;  %550 = vst [vmem:[#allocation3 + $0x728] sm:$0xff] %v8528_v1 }
  0xcb   : > { %551 = vst [vmem:[#allocation3 + $0x730] sm:$0xff] %v8528_v1  ;;  %552 = vst [vmem:[#allocation3 + $0x738] sm:$0xff] %v8528_v1 }
  0xcc   : > { %553 = vst [vmem:[#allocation3 + $0x740] sm:$0xff] %v8528_v1  ;;  %554 = vst [vmem:[#allocation3 + $0x748] sm:$0xff] %v8528_v1 }
  0xcd   : > { %555 = vst [vmem:[#allocation3 + $0x750] sm:$0xff] %v8528_v1  ;;  %556 = vst [vmem:[#allocation3 + $0x758] sm:$0xff] %v8528_v1 }
  0xce   : > { %557 = vst [vmem:[#allocation3 + $0x760] sm:$0xff] %v8528_v1  ;;  %558 = vst [vmem:[#allocation3 + $0x768] sm:$0xff] %v8528_v1 }
  0xcf   : > { %559 = vst [vmem:[#allocation3 + $0x770] sm:$0xff] %v8528_v1  ;;  %560 = vst [vmem:[#allocation3 + $0x778] sm:$0xff] %v8528_v1 }
  0xd0   : > { %561 = vst [vmem:[#allocation3 + $0x780] sm:$0xff] %v8528_v1  ;;  %562 = vst [vmem:[#allocation3 + $0x788] sm:$0xff] %v8528_v1 }
  0xd1   : > { %563 = vst [vmem:[#allocation3 + $0x790] sm:$0xff] %v8528_v1  ;;  %564 = vst [vmem:[#allocation3 + $0x798] sm:$0xff] %v8528_v1 }
  0xd2   : > { %565 = vst [vmem:[#allocation3 + $0x7a0] sm:$0xff] %v8528_v1  ;;  %566 = vst [vmem:[#allocation3 + $0x7a8] sm:$0xff] %v8528_v1 }
  0xd3   : > { %567 = vst [vmem:[#allocation3 + $0x7b0] sm:$0xff] %v8528_v1  ;;  %568 = vst [vmem:[#allocation3 + $0x7b8] sm:$0xff] %v8528_v1 }
  0xd4   : > { %569 = vst [vmem:[#allocation3 + $0x7c0] sm:$0xff] %v8528_v1  ;;  %570 = vst [vmem:[#allocation3 + $0x7c8] sm:$0xff] %v8528_v1 }
  0xd5   : > { %571 = vst [vmem:[#allocation3 + $0x7d0] sm:$0xff] %v8528_v1  ;;  %572 = vst [vmem:[#allocation3 + $0x7d8] sm:$0xff] %v8528_v1 }
  0xd6   : > { %573 = vst [vmem:[#allocation3 + $0x7e0] sm:$0xff] %v8528_v1  ;;  %574 = vst [vmem:[#allocation3 + $0x7e8] sm:$0xff] %v8528_v1 }
  0xd7   : > { %575 = vst [vmem:[#allocation3 + $0x7f0] sm:$0xff] %v8528_v1  ;;  %576 = vst [vmem:[#allocation3 + $0x7f8] sm:$0xff] %v8528_v1 }
  0xd8   : > { %577 = vst [vmem:[#allocation3 + $0x800] sm:$0xff] %v8528_v1  ;;  %578 = vst [vmem:[#allocation3 + $0x808] sm:$0xff] %v8528_v1 }
  0xd9   : > { %579 = vst [vmem:[#allocation3 + $0x810] sm:$0xff] %v8528_v1  ;;  %580 = vst [vmem:[#allocation3 + $0x818] sm:$0xff] %v8528_v1 }
  0xda   : > { %581 = vst [vmem:[#allocation3 + $0x820] sm:$0xff] %v8528_v1  ;;  %582 = vst [vmem:[#allocation3 + $0x828] sm:$0xff] %v8528_v1 }
  0xdb   : > { %583 = vst [vmem:[#allocation3 + $0x830] sm:$0xff] %v8528_v1  ;;  %584 = vst [vmem:[#allocation3 + $0x838] sm:$0xff] %v8528_v1 }
  0xdc   : > { %585 = vst [vmem:[#allocation3 + $0x840] sm:$0xff] %v8528_v1  ;;  %586 = vst [vmem:[#allocation3 + $0x848] sm:$0xff] %v8528_v1 }
  0xdd   : > { %587 = vst [vmem:[#allocation3 + $0x850] sm:$0xff] %v8528_v1  ;;  %588 = vst [vmem:[#allocation3 + $0x858] sm:$0xff] %v8528_v1 }
  0xde   : > { %589 = vst [vmem:[#allocation3 + $0x860] sm:$0xff] %v8528_v1  ;;  %590 = vst [vmem:[#allocation3 + $0x868] sm:$0xff] %v8528_v1 }
  0xdf   : > { %591 = vst [vmem:[#allocation3 + $0x870] sm:$0xff] %v8528_v1  ;;  %592 = vst [vmem:[#allocation3 + $0x878] sm:$0xff] %v8528_v1 }
  0xe0   : > { %593 = vst [vmem:[#allocation3 + $0x880] sm:$0xff] %v8528_v1  ;;  %594 = vst [vmem:[#allocation3 + $0x888] sm:$0xff] %v8528_v1 }
  0xe1   : > { %595 = vst [vmem:[#allocation3 + $0x890] sm:$0xff] %v8528_v1  ;;  %596 = vst [vmem:[#allocation3 + $0x898] sm:$0xff] %v8528_v1 }
  0xe2   : > { %597 = vst [vmem:[#allocation3 + $0x8a0] sm:$0xff] %v8528_v1  ;;  %598 = vst [vmem:[#allocation3 + $0x8a8] sm:$0xff] %v8528_v1 }
  0xe3   : > { %599 = vst [vmem:[#allocation3 + $0x8b0] sm:$0xff] %v8528_v1  ;;  %600 = vst [vmem:[#allocation3 + $0x8b8] sm:$0xff] %v8528_v1 }
  0xe4   : > { %601 = vst [vmem:[#allocation3 + $0x8c0] sm:$0xff] %v8528_v1  ;;  %602 = vst [vmem:[#allocation3 + $0x8c8] sm:$0xff] %v8528_v1 }
  0xe5   : > { %603 = vst [vmem:[#allocation3 + $0x8d0] sm:$0xff] %v8528_v1  ;;  %604 = vst [vmem:[#allocation3 + $0x8d8] sm:$0xff] %v8528_v1 }
  0xe6   : > { %605 = vst [vmem:[#allocation3 + $0x8e0] sm:$0xff] %v8528_v1  ;;  %606 = vst [vmem:[#allocation3 + $0x8e8] sm:$0xff] %v8528_v1 }
  0xe7   : > { %607 = vst [vmem:[#allocation3 + $0x8f0] sm:$0xff] %v8528_v1  ;;  %608 = vst [vmem:[#allocation3 + $0x8f8] sm:$0xff] %v8528_v1 }
  0xe8   : > { %610 = vst.msk [vmem:[#allocation4] sm:$0xff] %vm609_vm1, %v8527_v0  ;;  %611 = vst.msk [vmem:[#allocation4 + $0x8] sm:$0xff] %vm609_vm1, %v8527_v0 }
  0xe9   : > { %612 = vst.msk [vmem:[#allocation4 + $0x10] sm:$0xff] %vm609_vm1, %v8527_v0  ;;  %613 = vst.msk [vmem:[#allocation4 + $0x18] sm:$0xff] %vm609_vm1, %v8527_v0 }
  0xea   : > { %614 = vst.msk [vmem:[#allocation4 + $0x20] sm:$0xff] %vm609_vm1, %v8527_v0  ;;  %615 = vst.msk [vmem:[#allocation4 + $0x28] sm:$0xff] %vm609_vm1, %v8527_v0 }
  0xeb   : > { %616 = vst.msk [vmem:[#allocation4 + $0x30] sm:$0xff] %vm609_vm1, %v8527_v0  ;;  %617 = vst.msk [vmem:[#allocation4 + $0x38] sm:$0xff] %vm609_vm1, %v8527_v0 }
  0xec   : > { %618 = vst.msk [vmem:[#allocation4 + $0x40] sm:$0xff] %vm609_vm1, %v8527_v0  ;;  %619 = vst.msk [vmem:[#allocation4 + $0x48] sm:$0xff] %vm609_vm1, %v8527_v0 }
  0xed   : > { %620 = vst.msk [vmem:[#allocation4 + $0x50] sm:$0xff] %vm609_vm1, %v8527_v0  ;;  %621 = vst.msk [vmem:[#allocation4 + $0x58] sm:$0xff] %vm609_vm1, %v8527_v0 }
  0xee   : > { %622 = vst.msk [vmem:[#allocation4 + $0x60] sm:$0xff] %vm609_vm1, %v8527_v0  ;;  %623 = vst.msk [vmem:[#allocation4 + $0x68] sm:$0xff] %vm609_vm1, %v8527_v0 }
  0xef   : > { %624 = vst.msk [vmem:[#allocation4 + $0x70] sm:$0xff] %vm609_vm1, %v8527_v0  ;;  %625 = vst.msk [vmem:[#allocation4 + $0x78] sm:$0xff] %vm609_vm1, %v8527_v0 }
  0xf0   : > { %626 = vst.msk [vmem:[#allocation4 + $0x80] sm:$0xff] %vm609_vm1, %v8527_v0  ;;  %627 = vst.msk [vmem:[#allocation4 + $0x88] sm:$0xff] %vm609_vm1, %v8527_v0 }
  0xf1   : > { %628 = vst.msk [vmem:[#allocation4 + $0x90] sm:$0xff] %vm609_vm1, %v8527_v0  ;;  %629 = vst.msk [vmem:[#allocation4 + $0x98] sm:$0xff] %vm609_vm1, %v8527_v0 }
  0xf2   : > { %630 = vst.msk [vmem:[#allocation4 + $0xa0] sm:$0xff] %vm609_vm1, %v8527_v0  ;;  %631 = vst.msk [vmem:[#allocation4 + $0xa8] sm:$0xff] %vm609_vm1, %v8527_v0 }
  0xf3   : > { %632 = vst.msk [vmem:[#allocation4 + $0xb0] sm:$0xff] %vm609_vm1, %v8527_v0  ;;  %633 = vst.msk [vmem:[#allocation4 + $0xb8] sm:$0xff] %vm609_vm1, %v8527_v0 }
  0xf4   : > { %634 = vst.msk [vmem:[#allocation4 + $0xc0] sm:$0xff] %vm609_vm1, %v8527_v0  ;;  %635 = vst.msk [vmem:[#allocation4 + $0xc8] sm:$0xff] %vm609_vm1, %v8527_v0 }
  0xf5   : > { %636 = vst.msk [vmem:[#allocation4 + $0xd0] sm:$0xff] %vm609_vm1, %v8527_v0  ;;  %637 = vst.msk [vmem:[#allocation4 + $0xd8] sm:$0xff] %vm609_vm1, %v8527_v0 }
  0xf6   : > { %638 = vst.msk [vmem:[#allocation4 + $0xe0] sm:$0xff] %vm609_vm1, %v8527_v0  ;;  %639 = vst.msk [vmem:[#allocation4 + $0xe8] sm:$0xff] %vm609_vm1, %v8527_v0 }
  0xf7   : > { %640 = vst.msk [vmem:[#allocation4 + $0xf0] sm:$0xff] %vm609_vm1, %v8527_v0  ;;  %641 = vst.msk [vmem:[#allocation4 + $0xf8] sm:$0xff] %vm609_vm1, %v8527_v0 }
  0xf8   : > { %642 = vst.msk [vmem:[#allocation4 + $0x100] sm:$0xff] %vm609_vm1, %v8527_v0  ;;  %643 = vst.msk [vmem:[#allocation4 + $0x108] sm:$0xff] %vm609_vm1, %v8527_v0 }
  0xf9   : > { %644 = vst.msk [vmem:[#allocation4 + $0x110] sm:$0xff] %vm609_vm1, %v8527_v0  ;;  %645 = vst.msk [vmem:[#allocation4 + $0x118] sm:$0xff] %vm609_vm1, %v8527_v0 }
  0xfa   : > { %646 = vst.msk [vmem:[#allocation4 + $0x120] sm:$0xff] %vm609_vm1, %v8527_v0  ;;  %647 = vst.msk [vmem:[#allocation4 + $0x128] sm:$0xff] %vm609_vm1, %v8527_v0 }
  0xfb   : > { %648 = vst.msk [vmem:[#allocation4 + $0x130] sm:$0xff] %vm609_vm1, %v8527_v0  ;;  %649 = vst.msk [vmem:[#allocation4 + $0x138] sm:$0xff] %vm609_vm1, %v8527_v0 }
  0xfc   : > { %650 = vst.msk [vmem:[#allocation4 + $0x140] sm:$0xff] %vm609_vm1, %v8527_v0  ;;  %651 = vst.msk [vmem:[#allocation4 + $0x148] sm:$0xff] %vm609_vm1, %v8527_v0 }
  0xfd   : > { %652 = vst.msk [vmem:[#allocation4 + $0x150] sm:$0xff] %vm609_vm1, %v8527_v0  ;;  %653 = vst.msk [vmem:[#allocation4 + $0x158] sm:$0xff] %vm609_vm1, %v8527_v0 }
  0xfe   : > { %654 = vst.msk [vmem:[#allocation4 + $0x160] sm:$0xff] %vm609_vm1, %v8527_v0  ;;  %655 = vst.msk [vmem:[#allocation4 + $0x168] sm:$0xff] %vm609_vm1, %v8527_v0 }
  0xff   : > { %656 = vst.msk [vmem:[#allocation4 + $0x170] sm:$0xff] %vm609_vm1, %v8527_v0  ;;  %657 = vst.msk [vmem:[#allocation4 + $0x178] sm:$0xff] %vm609_vm1, %v8527_v0 }
 0x100   : > { %658 = vst.msk [vmem:[#allocation4 + $0x180] sm:$0xff] %vm609_vm1, %v8527_v0  ;;  %659 = vst.msk [vmem:[#allocation4 + $0x188] sm:$0xff] %vm609_vm1, %v8527_v0 }
 0x101   : > { %660 = vst.msk [vmem:[#allocation4 + $0x190] sm:$0xff] %vm609_vm1, %v8527_v0  ;;  %661 = vst.msk [vmem:[#allocation4 + $0x198] sm:$0xff] %vm609_vm1, %v8527_v0 }
 0x102   : > { %662 = vst.msk [vmem:[#allocation4 + $0x1a0] sm:$0xff] %vm609_vm1, %v8527_v0  ;;  %663 = vst.msk [vmem:[#allocation4 + $0x1a8] sm:$0xff] %vm609_vm1, %v8527_v0 }
 0x103   : > { %664 = vst.msk [vmem:[#allocation4 + $0x1b0] sm:$0xff] %vm609_vm1, %v8527_v0  ;;  %665 = vst.msk [vmem:[#allocation4 + $0x1b8] sm:$0xff] %vm609_vm1, %v8527_v0 }
 0x104   : > { %666 = vst.msk [vmem:[#allocation4 + $0x1c0] sm:$0xff] %vm609_vm1, %v8527_v0  ;;  %667 = vst.msk [vmem:[#allocation4 + $0x1c8] sm:$0xff] %vm609_vm1, %v8527_v0 }
 0x105   : > { %668 = vst.msk [vmem:[#allocation4 + $0x1d0] sm:$0xff] %vm609_vm1, %v8527_v0  ;;  %669 = vst.msk [vmem:[#allocation4 + $0x1d8] sm:$0xff] %vm609_vm1, %v8527_v0 }
 0x106   : > { %670 = vst.msk [vmem:[#allocation4 + $0x1e0] sm:$0xff] %vm609_vm1, %v8527_v0  ;;  %671 = vst.msk [vmem:[#allocation4 + $0x1e8] sm:$0xff] %vm609_vm1, %v8527_v0 }
 0x107   : > { %672 = vst.msk [vmem:[#allocation4 + $0x1f0] sm:$0xff] %vm609_vm1, %v8527_v0  ;;  %673 = vst.msk [vmem:[#allocation4 + $0x1f8] sm:$0xff] %vm609_vm1, %v8527_v0 }
 0x108 PF: > { %v674_v2 = vld [vmem:[%s8564_s18] sm:$0xff]  ;;  %v676_v3 = vld [vmem:[%s8564_s18 + $0x10] sm:$0xff]  ;;  %s8529_s22 = smov 32   ;;  %v675_v4 = vld [vmem:[%s8564_s18 + $0x8] sm:$0xff]  ;;  %v8530_v6 = vmov 0   ;;  %vm1156_vm2 = vcmask 293888  }
 0x109   : > { %802 = vrot.lane.b32.xlu0 %v674_v2, %s8529_s22  ;;  %806 = vrot.lane.b32.xlu1 %v676_v3, %s8529_s22  ;;  %v677_v5 = vld [vmem:[%s8564_s18 + $0x18] sm:$0xff]  ;;  %v1189_v7 = vld [vmem:[#allocation2 + $0x8] sm:$0xff]  ;;  %v678_v9 = vld [vmem:[%s8564_s18 + $0x20] sm:$0xff]  ;;  %vm995_vm3 = vcmask 294144   ;;  %s8531_s30 = smov 64   ;;  %s8532_s4 = smov 96  }
 0x10a   : > { %3078 = vmatprep.subr.bf16.mxu1 %v8530_v6  ;;  %3367 = vmatprep.subr.bf16.mxu0 %v8530_v6  ;;  %v679_v8 = vld [vmem:[%s8564_s18 + $0x28] sm:$0xff]  ;;  %v1190_v10 = vld [vmem:[#allocation2 + $0x10] sm:$0xff]  ;;  %v8061_v11 = vld [vmem:[%s12893_s1] sm:$0xff]   ;;  %vm6921_vm4 = vcmask 261120  }
 0x10b   : > { %v1253_v12 = vpack.c.bf16 %v1190_v10, %v1189_v7  ;;  %v681_v13 = vld [vmem:[%s8564_s18 + $0x38] sm:$0xff]  ;;  %3079 = vmatpush1.bf16.msra.mxu1 %v8061_v11  ;;  %v8062_v14 = vld [vmem:[%s12893_s1 + $0x8] sm:$0xff]   ;;  %v9300_v15 = vld [vmem:[%s12893_s1 + $0x80] sm:$0xff]  }
 0x10c   : > { %v680_v16 = vld [vmem:[%s8564_s18 + $0x30] sm:$0xff]  ;;  %3080 = vmatprep.subr.bf16.mxu1 %v8530_v6  ;;  %3368 = vmatpush1.bf16.msra.mxu0 %v9300_v15  ;;  %v1060_v18 = vld [vmem:[#allocation2 + $0x7] sm:$0xff]  ;;  %v8066_v25 = vld [vmem:[%s12893_s1 + $0x18] sm:$0xff]  }
 0x10d   : > { %804 = vrot.lane.b32.xlu0 %v675_v4, %s8529_s22  ;;  %808 = vrot.lane.b32.xlu1 %v677_v5, %s8529_s22  ;;  %1285 = vst.msk [vmem:[#allocation3 + $0x8] sm:$0xff] %vm1156_vm2, %v1253_v12  ;;  %v8064_v17 = vld [vmem:[%s12893_s1 + $0x10] sm:$0xff]   ;;  %v9312_v19 = vld [vmem:[%s12893_s1 + $0x88] sm:$0xff]  }
 0x10e   : > { %3369 = vmatprep.subr.bf16.mxu0 %v8530_v6  ;;  %v683_v20 = vld [vmem:[%s8564_s18 + $0x48] sm:$0xff]  ;;  %v682_v22 = vld [vmem:[%s8564_s18 + $0x40] sm:$0xff]  ;;  %v9323_v24 = vld [vmem:[%s12893_s1 + $0x90] sm:$0xff]  }
 0x10f   : > { %3081 = vmatpush1.bf16.msra.mxu1 %v8062_v14  ;;  %v1061_v21 = vld [vmem:[#allocation2 + $0xf] sm:$0xff]  ;;  %v685_v26 = vld [vmem:[%s8564_s18 + $0x58] sm:$0xff]  ;;  %v8068_v30 = vld [vmem:[%s12893_s1 + $0x20] sm:$0xff]  }
 0x110   : > { %3082 = vmatprep.subr.bf16.mxu1 %v8530_v6  ;;  %v1124_v23 = vpack.c.bf16 %v1061_v21, %v1060_v18  ;;  %3370 = vmatpush1.bf16.msra.mxu0 %v9312_v19  ;;  %v684_v28 = vld [vmem:[%s8564_s18 + $0x50] sm:$0xff]  ;;  %v9339_v29 = vld [vmem:[%s12893_s1 + $0x98] sm:$0xff]   ;;  %v687_v31 = vld [vmem:[%s8564_s18 + $0x68] sm:$0xff] }
 0x111   : > { %812 = vrot.lane.b32.xlu1 %v679_v8, %s8529_s22  ;;  %810 = vrot.lane.b32.xlu0 %v678_v9, %s8529_s22  ;;  %v686_v32 = vld [vmem:[%s8564_s18 + $0x60] sm:$0xff]  ;;  %v8070_v34 = vld [vmem:[%s12893_s1 + $0x28] sm:$0xff]   ;;  %v1318_v41 = vld [vmem:[#allocation2 + $0x11] sm:$0xff] }
 0x112   : > { %3371 = vmatprep.subr.bf16.mxu0 %v8530_v6  ;;  %1157 = vst.msk [vmem:[#allocation3] sm:$0xff] %vm1156_vm2, %v1124_v23  ;;  %v9354_v33 = vld [vmem:[%s12893_s1 + $0xa0] sm:$0xff]   ;;  %v689_v35 = vld [vmem:[%s8564_s18 + $0x78] sm:$0xff]  ;;  %v688_v36 = vld [vmem:[%s8564_s18 + $0x70] sm:$0xff] }
 0x113   : > { %3083 = vmatpush1.bf16.msra.mxu1 %v8064_v17  ;;  %v1317_v37 = vld [vmem:[#allocation2 + $0x9] sm:$0xff]  ;;  %v690_v42 = vld [vmem:[%s8564_s18 + $0x80] sm:$0xff]  ;;  %v693_v45 = vld [vmem:[%s8564_s18 + $0x98] sm:$0xff] }
 0x114   : > { %v2215_v27 = vld [vmem:[#allocation3 + $0x8] sm:$0xff]  ;;  %3084 = vmatprep.subr.bf16.mxu1 %v8530_v6  ;;  %3372 = vmatpush1.bf16.msra.mxu0 %v9323_v24  ;;  %v8072_v40 = vld [vmem:[%s12893_s1 + $0x30] sm:$0xff]   ;;  %v1381_v43 = vpack.c.bf16 %v1318_v41, %v1317_v37  ;;  %v8074_v46 = vld [vmem:[%s12893_s1 + $0x38] sm:$0xff]  }
 0x115   : > { %816 = vrot.lane.b32.xlu1 %v681_v13, %s8529_s22  ;;  %814 = vrot.lane.b32.xlu0 %v680_v16, %s8529_s22  ;;  %v9369_v38 = vld [vmem:[%s12893_s1 + $0xa8] sm:$0xff]   ;;  %v9384_v44 = vld [vmem:[%s12893_s1 + $0xb0] sm:$0xff]  }
 0x116   : > { %3110 = vmatprep.mubr.bf16.mxu1 %v2215_v27  ;;  %3373 = vmatprep.subr.bf16.mxu0 %v8530_v6  ;;  %v691_v39 = vld [vmem:[%s8564_s18 + $0x88] sm:$0xff]  ;;  %1413 = vst.msk [vmem:[#allocation3 + $0x10] sm:$0xff] %vm1156_vm2, %v1381_v43  ;;  %v692_v47 = vld [vmem:[%s8564_s18 + $0x90] sm:$0xff]  ;;  %v9400_v48 = vld [vmem:[%s12893_s1 + $0xb8] sm:$0xff]  }
 0x117   : > { %3085 = vmatpush1.bf16.msra.mxu1 %v8066_v25  ;;  %v695_v49 = vld [vmem:[%s8564_s18 + $0xa8] sm:$0xff]  ;;  %v8076_v50 = vld [vmem:[%s12893_s1 + $0x40] sm:$0xff]   ;;  %v697_v54 = vld [vmem:[%s8564_s18 + $0xb8] sm:$0xff] }
 0x118   : > { %3086 = vmatprep.subr.bf16.mxu1 %v8530_v6  ;;  %3374 = vmatpush1.bf16.msra.mxu0 %v9339_v29  ;;  %v694_v51 = vld [vmem:[%s8564_s18 + $0xa0] sm:$0xff]  ;;  %v8078_v53 = vld [vmem:[%s12893_s1 + $0x48] sm:$0xff]   ;;  %v696_v55 = vld [vmem:[%s8564_s18 + $0xb0] sm:$0xff] }
 0x119   : > { %820 = vrot.lane.b32.xlu1 %v683_v20, %s8529_s22  ;;  %818 = vrot.lane.b32.xlu0 %v682_v22, %s8529_s22  ;;  %v9415_v52 = vld [vmem:[%s12893_s1 + $0xc0] sm:$0xff]   ;;  %v9430_v56 = vld [vmem:[%s12893_s1 + $0xc8] sm:$0xff]  }
 0x11a   : > { %3375 = vmatprep.subr.bf16.mxu0 %v8530_v6  ;;  %v8080_v57 = vld [vmem:[%s12893_s1 + $0x50] sm:$0xff]   ;;  %v699_v58 = vld [vmem:[%s8564_s18 + $0xc8] sm:$0xff]  ;;  %v698_v59 = vld [vmem:[%s8564_s18 + $0xc0] sm:$0xff] }
 0x11b   : > { %3087 = vmatpush1.bf16.msra.mxu1 %v8068_v30  ;;  %v9445_v60 = vld [vmem:[%s12893_s1 + $0xd0] sm:$0xff]   ;;  %v8082_v61 = vld [vmem:[%s12893_s1 + $0x58] sm:$0xff]   ;;  %v8084_v1 = vld [vmem:[%s12893_s1 + $0x60] sm:$0xff]  }
 0x11c   : > { %3088 = vmatprep.subr.bf16.mxu1 %v8530_v6  ;;  %3376 = vmatpush1.bf16.msra.mxu0 %v9354_v33  ;;  %v701_v62 = vld [vmem:[%s8564_s18 + $0xd8] sm:$0xff]  ;;  %v700_v63 = vld [vmem:[%s8564_s18 + $0xd0] sm:$0xff]  ;;  %v703_v2 = vld [vmem:[%s8564_s18 + $0xe8] sm:$0xff] }
 0x11d   : > { %824 = vrot.lane.b32.xlu1 %v685_v26, %s8529_s22  ;;  %822 = vrot.lane.b32.xlu0 %v684_v28, %s8529_s22  ;;  %v9460_v0 = vld [vmem:[%s12893_s1 + $0xd8] sm:$0xff]   ;;  %v702_v3 = vld [vmem:[%s8564_s18 + $0xe0] sm:$0xff] }
 0x11e   : > { %3377 = vmatprep.subr.bf16.mxu0 %v8530_v6  ;;  %v9475_v4 = vld [vmem:[%s12893_s1 + $0xe0] sm:$0xff]   ;;  %v8086_v5 = vld [vmem:[%s12893_s1 + $0x68] sm:$0xff]   ;;  %v8088_v10 = vld [vmem:[%s12893_s1 + $0x70] sm:$0xff]  }
 0x11f   : > { %3089 = vmatpush1.bf16.msra.mxu1 %v8070_v34  ;;  %v707_v7 = vld [vmem:[%s8564_s18 + $0x108] sm:$0xff]  ;;  %v706_v9 = vld [vmem:[%s8564_s18 + $0x100] sm:$0xff]  ;;  %v709_v11 = vld [vmem:[%s8564_s18 + $0x118] sm:$0xff] }
 0x120   : > { %3090 = vmatprep.subr.bf16.mxu1 %v8530_v6  ;;  %3378 = vmatpush1.bf16.msra.mxu0 %v9369_v38  ;;  %v9489_v8 = vld [vmem:[%s12893_s1 + $0xe8] sm:$0xff]   ;;  %v9504_v12 = vld [vmem:[%s12893_s1 + $0xf0] sm:$0xff]   ;;  %v8090_v14 = vld [vmem:[%s12893_s1 + $0x78] sm:$0xff]  }
 0x121   : > { %828 = vrot.lane.b32.xlu1 %v687_v31, %s8529_s22  ;;  %826 = vrot.lane.b32.xlu0 %v686_v32, %s8529_s22  ;;  %v708_v13 = vld [vmem:[%s8564_s18 + $0x110] sm:$0xff]  ;;  %v9515_v16 = vld [vmem:[%s12893_s1 + $0xf8] sm:$0xff]   ;;  %v2214_v20 = vld [vmem:[#allocation3] sm:$0xff] }
 0x122   : > { %3379 = vmatprep.subr.bf16.mxu0 %v8530_v6  ;;  %v711_v17 = vld [vmem:[%s8564_s18 + $0x128] sm:$0xff]  ;;  %v710_v18 = vld [vmem:[%s8564_s18 + $0x120] sm:$0xff]  ;;  %v713_v21 = vld [vmem:[%s8564_s18 + $0x138] sm:$0xff] }
 0x123   : > { %3091 = vmatpush1.bf16.msra.mxu1 %v8072_v40  ;;  %v712_v22 = vld [vmem:[%s8564_s18 + $0x130] sm:$0xff]  ;;  %v715_v23 = vld [vmem:[%s8564_s18 + $0x148] sm:$0xff]  ;;  %v714_v25 = vld [vmem:[%s8564_s18 + $0x140] sm:$0xff] }
 0x124   : > { %3092 = vmatprep.subr.bf16.mxu1 %v8530_v6  ;;  %3380 = vmatpush1.bf16.msra.mxu0 %v9384_v44  ;;  %v717_v26 = vld [vmem:[%s8564_s18 + $0x158] sm:$0xff]  ;;  %v719_v27 = vld [vmem:[%s8564_s18 + $0x168] sm:$0xff]  ;;  %v718_v28 = vld [vmem:[%s8564_s18 + $0x160] sm:$0xff] }
 0x125   : > { %832 = vrot.lane.b32.xlu1 %v689_v35, %s8529_s22  ;;  %830 = vrot.lane.b32.xlu0 %v688_v36, %s8529_s22  ;;  %v720_v30 = vld [vmem:[%s8564_s18 + $0x170] sm:$0xff]  ;;  %v723_v31 = vld [vmem:[%s8564_s18 + $0x188] sm:$0xff] }
 0x126   : > { %3381 = vmatprep.subr.bf16.mxu0 %v8530_v6  ;;  %v722_v32 = vld [vmem:[%s8564_s18 + $0x180] sm:$0xff]  ;;  %v724_v34 = vld [vmem:[%s8564_s18 + $0x190] sm:$0xff]  ;;  %v727_v35 = vld [vmem:[%s8564_s18 + $0x1a8] sm:$0xff] }
 0x127   : > { %3093 = vmatpush1.bf16.msra.mxu1 %v8074_v46  ;;  %v726_v36 = vld [vmem:[%s8564_s18 + $0x1a0] sm:$0xff]  ;;  %v729_v37 = vld [vmem:[%s8564_s18 + $0x1b8] sm:$0xff] }
 0x128   : > { %3094 = vmatprep.subr.bf16.mxu1 %v8530_v6  ;;  %3382 = vmatpush1.bf16.msra.mxu0 %v9400_v48  ;;  %v730_v40 = vld [vmem:[%s8564_s18 + $0x1c0] sm:$0xff]  ;;  %v733_v41 = vld [vmem:[%s8564_s18 + $0x1d8] sm:$0xff] }
 0x129   : > { %836 = vrot.lane.b32.xlu1 %v691_v39, %s8529_s22  ;;  %834 = vrot.lane.b32.xlu0 %v690_v42, %s8529_s22  ;;  %v731_v39 = vld [vmem:[%s8564_s18 + $0x1c8] sm:$0xff] }
 0x12a   : > { %3383 = vmatprep.subr.bf16.mxu0 %v8530_v6 }
 0x12b   : > { %3095 = vmatpush1.bf16.msra.mxu1 %v8076_v50 }
 0x12c   : > { %3096 = vmatprep.subr.bf16.mxu1 %v8530_v6  ;;  %3384 = vmatpush1.bf16.msra.mxu0 %v9415_v52 }
 0x12d   : > { %840 = vrot.lane.b32.xlu1 %v693_v45, %s8529_s22  ;;  %838 = vrot.lane.b32.xlu0 %v692_v47, %s8529_s22  ;;  %v735_v45 = vld [vmem:[%s8564_s18 + $0x1e8] sm:$0xff] }
 0x12e   : > { %3385 = vmatprep.subr.bf16.mxu0 %v8530_v6 }
 0x12f   : > { %3097 = vmatpush1.bf16.msra.mxu1 %v8078_v53  ;;  %v1222_v53 = vld [vmem:[#allocation2 + $0x250] sm:$0xff] }
 0x130   : > { %3098 = vmatprep.subr.bf16.mxu1 %v8530_v6  ;;  %3386 = vmatpush1.bf16.msra.mxu0 %v9430_v56 }
 0x131   : > { %844 = vrot.lane.b32.xlu1 %v695_v49, %s8529_s22  ;;  %842 = vrot.lane.b32.xlu0 %v694_v51, %s8529_s22  ;;  %v1221_v51 = vld [vmem:[#allocation2 + $0x248] sm:$0xff] }
 0x132   : > { %3387 = vmatprep.subr.bf16.mxu0 %v8530_v6 }
 0x133   : > { %3099 = vmatpush1.bf16.msra.mxu1 %v8080_v57 }
 0x134   : > { %3100 = vmatprep.subr.bf16.mxu1 %v8530_v6  ;;  %3388 = vmatpush1.bf16.msra.mxu0 %v9445_v60 }
 0x135   : > { %848 = vrot.lane.b32.xlu1 %v697_v54, %s8529_s22  ;;  %846 = vrot.lane.b32.xlu0 %v696_v55, %s8529_s22  ;;  %v1092_v54 = vld [vmem:[#allocation2 + $0x247] sm:$0xff]  ;;  %v1093_v55 = vld [vmem:[#allocation2 + $0x24f] sm:$0xff] }
 0x136   : > { %3389 = vmatprep.subr.bf16.mxu0 %v8530_v6 }
 0x137   : > { %3101 = vmatpush1.bf16.msra.mxu1 %v8082_v61 }
 0x138   : > { %3102 = vmatprep.subr.bf16.mxu1 %v8530_v6  ;;  %3390 = vmatpush1.bf16.msra.mxu0 %v9460_v0 }
 0x139   : > { %852 = vrot.lane.b32.xlu1 %v699_v58, %s8529_s22  ;;  %850 = vrot.lane.b32.xlu0 %v698_v59, %s8529_s22  ;;  %v1269_v59 = vpack.c.bf16 %v1222_v53, %v1221_v51 }
 0x13a   : > { %3391 = vmatprep.subr.bf16.mxu0 %v8530_v6 }
 0x13b   : > { %3103 = vmatpush1.bf16.msra.mxu1 %v8084_v1  ;;  %1301 = vst.msk [vmem:[#allocation3 + $0x488] sm:$0xff] %vm1156_vm2, %v1269_v59 }
 0x13c   : > { %3104 = vmatprep.subr.bf16.mxu1 %v8530_v6  ;;  %3392 = vmatpush1.bf16.msra.mxu0 %v9475_v4 }
 0x13d   : > { %856 = vrot.lane.b32.xlu1 %v701_v62, %s8529_s22  ;;  %854 = vrot.lane.b32.xlu0 %v700_v63, %s8529_s22 }
 0x13e   : > { %3393 = vmatprep.subr.bf16.mxu0 %v8530_v6 }
 0x13f   : > { %3105 = vmatpush1.bf16.msra.mxu1 %v8086_v5 }
 0x140   : > { %3106 = vmatprep.subr.bf16.mxu1 %v8530_v6  ;;  %3394 = vmatpush1.bf16.msra.mxu0 %v9489_v8 }
 0x141   : > { %860 = vrot.lane.b32.xlu1 %v703_v2, %s8529_s22  ;;  %858 = vrot.lane.b32.xlu0 %v702_v3, %s8529_s22 }
 0x142   : > { %3395 = vmatprep.subr.bf16.mxu0 %v8530_v6 }
 0x143   : > { %3107 = vmatpush1.bf16.msra.mxu1 %v8088_v10 }
 0x144   : > { %3108 = vmatprep.subr.bf16.mxu1 %v8530_v6  ;;  %3396 = vmatpush1.bf16.msra.mxu0 %v9504_v12 }
 0x145   : > { %868 = vrot.lane.b32.xlu1 %v707_v7, %s8529_s22  ;;  %866 = vrot.lane.b32.xlu0 %v706_v9, %s8529_s22 }
 0x146   : > { %3397 = vmatprep.subr.bf16.mxu0 %v8530_v6 }
 0x147   : > { %3109 = vmatpush1.bf16.msra.mxu1 %v8090_v14 }
 0x148   : > { %7695 = vmatprep.subr.bf16.mxu1 %v8530_v6  ;;  %3398 = vmatpush1.bf16.msra.mxu0 %v9515_v16 }
 0x149   : > { %872 = vrot.lane.b32.xlu1 %v709_v11, %s8529_s22  ;;  %870 = vrot.lane.b32.xlu0 %v708_v13, %s8529_s22 }
 0x14a   : > { %3111 = vmatmul.mubr.bf16.vlgmr.msra.gmra.mrb[0].mxu1 %v2214_v20  ;;  %3656 = vmatprep.subr.bf16.mxu0 %v8530_v6 }
 0x14b   : > { %7711 = vmatpush1.bf16.msra.mxu1 %v9300_v15  ;;  %v716_v15 = vld [vmem:[%s8564_s18 + $0x150] sm:$0xff] }
 0x14c   : > { %7696 = vmatprep.subr.bf16.mxu1 %v8530_v6 }
 0x14d   : > { %876 = vrot.lane.b32.xlu1 %v711_v17, %s8529_s22  ;;  %874 = vrot.lane.b32.xlu0 %v710_v18, %s8529_s22 }
 0x14f   : > { %7712 = vmatpush1.bf16.msra.mxu1 %v9312_v19  ;;  %v705_v19 = vld [vmem:[%s8564_s18 + $0xf8] sm:$0xff] }
 0x150   : > { %7697 = vmatprep.subr.bf16.mxu1 %v8530_v6 }
 0x151   : > { %880 = vrot.lane.b32.xlu1 %v713_v21, %s8529_s22  ;;  %878 = vrot.lane.b32.xlu0 %v712_v22, %s8529_s22 }
 0x153   : > { %7713 = vmatpush1.bf16.msra.mxu1 %v9323_v24  ;;  %v704_v24 = vld [vmem:[%s8564_s18 + $0xf0] sm:$0xff] }
 0x154   : > { %7698 = vmatprep.subr.bf16.mxu1 %v8530_v6 }
 0x155   : > { %884 = vrot.lane.b32.xlu1 %v715_v23, %s8529_s22  ;;  %882 = vrot.lane.b32.xlu0 %v714_v25, %s8529_s22 }
 0x157   : > { %7714 = vmatpush1.bf16.msra.mxu1 %v9339_v29  ;;  %v721_v29 = vld [vmem:[%s8564_s18 + $0x178] sm:$0xff] }
 0x158   : > { %7699 = vmatprep.subr.bf16.mxu1 %v8530_v6 }
 0x159   : > { %888 = vrot.lane.b32.xlu1 %v717_v26, %s8529_s22  ;;  %886 = vrot.lane.b32.xlu0 %v716_v15, %s8529_s22 }
 0x15b   : > { %7715 = vmatpush1.bf16.msra.mxu1 %v9354_v33  ;;  %v725_v33 = vld [vmem:[%s8564_s18 + $0x198] sm:$0xff] }
 0x15c   : > { %7700 = vmatprep.subr.bf16.mxu1 %v8530_v6 }
 0x15d   : > { %892 = vrot.lane.b32.xlu1 %v719_v27, %s8529_s22  ;;  %890 = vrot.lane.b32.xlu0 %v718_v28, %s8529_s22  ;;  %v2216_v28 = vld [vmem:[#allocation3 + $0x10] sm:$0xff] }
 0x15f   : > { %7716 = vmatpush1.bf16.msra.mxu1 %v9369_v38  ;;  %v728_v38 = vld [vmem:[%s8564_s18 + $0x1b0] sm:$0xff] }
 0x160   : > { %7701 = vmatprep.subr.bf16.mxu1 %v8530_v6 }
 0x161   : > { %864 = vrot.lane.b32.xlu1 %v705_v19, %s8529_s22  ;;  %862 = vrot.lane.b32.xlu0 %v704_v24, %s8529_s22  ;;  %v8093_v19 = vld [vmem:[%s12893_s1 + $0x100] sm:$0xff]  }
 0x163   : > { %7717 = vmatpush1.bf16.msra.mxu1 %v9384_v44  ;;  %v732_v44 = vld [vmem:[%s8564_s18 + $0x1d0] sm:$0xff] }
 0x164   : > { %7702 = vmatprep.subr.bf16.mxu1 %v8530_v6 }
 0x165   : > { %896 = vrot.lane.b32.xlu1 %v721_v29, %s8529_s22  ;;  %894 = vrot.lane.b32.xlu0 %v720_v30, %s8529_s22 }
 0x167   : > { %7718 = vmatpush1.bf16.msra.mxu1 %v9400_v48  ;;  %v734_v48 = vld [vmem:[%s8564_s18 + $0x1e0] sm:$0xff] }
 0x168   : > { %7703 = vmatprep.subr.bf16.mxu1 %v8530_v6 }
 0x169   : > { %900 = vrot.lane.b32.xlu1 %v723_v31, %s8529_s22  ;;  %898 = vrot.lane.b32.xlu0 %v722_v32, %s8529_s22 }
 0x16b   : > { %7719 = vmatpush1.bf16.msra.mxu1 %v9415_v52 }
 0x16c   : > { %7704 = vmatprep.subr.bf16.mxu1 %v8530_v6 }
 0x16d   : > { %904 = vrot.lane.b32.xlu1 %v725_v33, %s8529_s22  ;;  %902 = vrot.lane.b32.xlu0 %v724_v34, %s8529_s22 }
 0x16f   : > { %7720 = vmatpush1.bf16.msra.mxu1 %v9430_v56 }
 0x170   : > { %7705 = vmatprep.subr.bf16.mxu1 %v8530_v6 }
 0x171   : > { %908 = vrot.lane.b32.xlu1 %v727_v35, %s8529_s22  ;;  %906 = vrot.lane.b32.xlu0 %v726_v36, %s8529_s22 }
 0x173   : > { %7721 = vmatpush1.bf16.msra.mxu1 %v9445_v60  ;;  %v1140_v60 = vpack.c.bf16 %v1093_v55, %v1092_v54  ;;  %v8095_v54 = vld [vmem:[%s12893_s1 + $0x110] sm:$0xff]  }
 0x174   : > { %7706 = vmatprep.subr.bf16.mxu1 %v8530_v6 }
 0x175   : > { %912 = vrot.lane.b32.xlu1 %v729_v37, %s8529_s22  ;;  %910 = vrot.lane.b32.xlu0 %v728_v38, %s8529_s22  ;;  %1173 = vst.msk [vmem:[#allocation3 + $0x480] sm:$0xff] %vm1156_vm2, %v1140_v60 }
 0x177   : > { %7722 = vmatpush1.bf16.msra.mxu1 %v9460_v0 }
 0x178   : > { %7707 = vmatprep.subr.bf16.mxu1 %v8530_v6 }
 0x179   : > { %916 = vrot.lane.b32.xlu1 %v731_v39, %s8529_s22  ;;  %914 = vrot.lane.b32.xlu0 %v730_v40, %s8529_s22 }
 0x17b   : > { %v803_v42 = vpop.permute.xlu0 %802  ;;  %v807_v43 = vpop.permute.xlu1 %806  ;;  %7723 = vmatpush1.bf16.msra.mxu1 %v9475_v4 }
 0x17c   : > { %996 = vst.msk [vmem:[#allocation2 + $0x28] sm:$0xff] %vm995_vm3, %v803_v42  ;;  %998 = vst.msk [vmem:[#allocation2 + $0x48] sm:$0xff] %vm995_vm3, %v807_v43  ;;  %7708 = vmatprep.subr.bf16.mxu1 %v8530_v6  ;;  %v8094_v43 = vld [vmem:[%s12893_s1 + $0x108] sm:$0xff]  }
 0x17d   : > { %920 = vrot.lane.b32.xlu1 %v733_v41, %s8529_s22  ;;  %918 = vrot.lane.b32.xlu0 %v732_v44, %s8529_s22 }
 0x17f   : > { %v805_v46 = vpop.permute.xlu0 %804  ;;  %v809_v47 = vpop.permute.xlu1 %808  ;;  %7724 = vmatpush1.bf16.msra.mxu1 %v9489_v8 }
 0x180   : > { %997 = vst.msk [vmem:[#allocation2 + $0x30] sm:$0xff] %vm995_vm3, %v805_v46  ;;  %999 = vst.msk [vmem:[#allocation2 + $0x50] sm:$0xff] %vm995_vm3, %v809_v47  ;;  %7709 = vmatprep.subr.bf16.mxu1 %v8530_v6 }
 0x181   : > { %924 = vrot.lane.b32.xlu1 %v735_v45, %s8529_s22  ;;  %922 = vrot.lane.b32.xlu0 %v734_v48, %s8529_s22 }
 0x183   : > { %v813_v49 = vpop.permute.xlu1 %812  ;;  %v811_v50 = vpop.permute.xlu0 %810  ;;  %v1062_v52 = vld [vmem:[#allocation2 + $0x27] sm:$0xff]  ;;  %7725 = vmatpush1.bf16.msra.mxu1 %v9504_v12 }
 0x184   : > { %1001 = vst.msk [vmem:[#allocation2 + $0x70] sm:$0xff] %vm995_vm3, %v813_v49  ;;  %1000 = vst.msk [vmem:[#allocation2 + $0x68] sm:$0xff] %vm995_vm3, %v811_v50  ;;  %v1191_v56 = vld [vmem:[#allocation2 + $0x28] sm:$0xff]  ;;  %7710 = vmatprep.subr.bf16.mxu1 %v8530_v6 }
 0x185   : > { %v1064_v57 = vld [vmem:[#allocation2 + $0x47] sm:$0xff] }
 0x186   : > { %v1193_v58 = vld [vmem:[#allocation2 + $0x48] sm:$0xff] }
 0x187   : > { %v1063_v61 = vld [vmem:[#allocation2 + $0x2f] sm:$0xff]  ;;  %v817_v0 = vpop.permute.xlu1 %816  ;;  %v815_v1 = vpop.permute.xlu0 %814  ;;  %7726 = vmatpush1.bf16.msra.mxu1 %v9515_v16 }
 0x188   : > { %v1192_v62 = vld [vmem:[#allocation2 + $0x30] sm:$0xff]  ;;  %v1509_v7 = vpack.c.bf16 %v1063_v61, %v1062_v52  ;;  %1003 = vst.msk [vmem:[#allocation2 + $0x90] sm:$0xff] %vm995_vm3, %v817_v0  ;;  %1002 = vst.msk [vmem:[#allocation2 + $0x88] sm:$0xff] %vm995_vm3, %v815_v1 }
 0x189   : > { %v1319_v63 = vld [vmem:[#allocation2 + $0x29] sm:$0xff]  ;;  %v1254_v2 = vpack.c.bf16 %v1192_v62, %v1191_v56  ;;  %v1320_v3 = vld [vmem:[#allocation2 + $0x31] sm:$0xff] }
 0x18a   : > { %v1065_v4 = vld [vmem:[#allocation2 + $0x4f] sm:$0xff]  ;;  %v1382_v8 = vpack.c.bf16 %v1320_v3, %v1319_v63  ;;  %1541 = vst.msk [vmem:[#allocation3 + $0x18] sm:$0xff] %vm1156_vm2, %v1509_v7  ;;  %1158 = vst.msk [vmem:[#allocation3 + $0x48] sm:$0xff] %vm1156_vm2, %v1509_v7  ;;  %v8096_v7 = vld [vmem:[%s12893_s1 + $0x118] sm:$0xff]  }
 0x18b   : > { %v1194_v5 = vld [vmem:[#allocation2 + $0x50] sm:$0xff]  ;;  %v1894_v13 = vpack.c.bf16 %v1065_v4, %v1064_v57  ;;  %1669 = vst.msk [vmem:[#allocation3 + $0x20] sm:$0xff] %vm1156_vm2, %v1254_v2  ;;  %1286 = vst.msk [vmem:[#allocation3 + $0x50] sm:$0xff] %vm1156_vm2, %v1254_v2  ;;  %v1066_v18 = vld [vmem:[#allocation2 + $0x67] sm:$0xff]  ;;  %v821_v20 = vpop.permute.xlu1 %820  ;;  %v819_v21 = vpop.permute.xlu0 %818 }
 0x18c   : > { %v1255_v9 = vpack.c.bf16 %v1194_v5, %v1193_v58  ;;  %v1321_v10 = vld [vmem:[#allocation2 + $0x49] sm:$0xff]  ;;  %v1322_v11 = vld [vmem:[#allocation2 + $0x51] sm:$0xff]  ;;  %1414 = vst.msk [vmem:[#allocation3 + $0x58] sm:$0xff] %vm1156_vm2, %v1382_v8  ;;  %1797 = vst.msk [vmem:[#allocation3 + $0x28] sm:$0xff] %vm1156_vm2, %v1382_v8 }
 0x18d   : > { %v1383_v14 = vpack.c.bf16 %v1322_v11, %v1321_v10  ;;  %1926 = vst.msk [vmem:[#allocation3 + $0x30] sm:$0xff] %vm1156_vm2, %v1894_v13  ;;  %v1196_v12 = vld [vmem:[#allocation2 + $0x70] sm:$0xff]  ;;  %1542 = vst.msk [vmem:[#allocation3 + $0x60] sm:$0xff] %vm1156_vm2, %v1894_v13  ;;  %v1195_v23 = vld [vmem:[#allocation2 + $0x68] sm:$0xff] }
 0x18e   : > { %1287 = vst.msk [vmem:[#allocation3 + $0x98] sm:$0xff] %vm1156_vm2, %v1255_v9  ;;  %1670 = vst.msk [vmem:[#allocation3 + $0x68] sm:$0xff] %vm1156_vm2, %v1255_v9  ;;  %v1324_v17 = vld [vmem:[#allocation2 + $0x71] sm:$0xff]  ;;  %v1323_v25 = vld [vmem:[#allocation2 + $0x69] sm:$0xff]  ;;  %v1256_v15 = vpack.c.bf16 %v1196_v12, %v1195_v23 }
 0x18f   : > { %2054 = vst.msk [vmem:[#allocation3 + $0x38] sm:$0xff] %vm1156_vm2, %v1255_v9  ;;  %1159 = vst.msk [vmem:[#allocation3 + $0x90] sm:$0xff] %vm1156_vm2, %v1894_v13  ;;  %v1067_v22 = vld [vmem:[#allocation2 + $0x6f] sm:$0xff]  ;;  %v2151_v27 = vpack.c.bf16 %v1324_v17, %v1323_v25  ;;  %v1068_v29 = vld [vmem:[#allocation2 + $0x87] sm:$0xff]  ;;  %v825_v30 = vpop.permute.xlu1 %824  ;;  %v823_v31 = vpop.permute.xlu0 %822 }
 0x190   : > { %1415 = vst.msk [vmem:[#allocation3 + $0xa0] sm:$0xff] %vm1156_vm2, %v1383_v14  ;;  %1798 = vst.msk [vmem:[#allocation3 + $0x70] sm:$0xff] %vm1156_vm2, %v1383_v14  ;;  %v1127_v26 = vpack.c.bf16 %v1067_v22, %v1066_v18  ;;  %v1198_v16 = vld [vmem:[#allocation2 + $0x90] sm:$0xff]  ;;  %v1197_v33 = vld [vmem:[#allocation2 + $0x88] sm:$0xff] }
 0x191   : > { %2182 = vst.msk [vmem:[#allocation3 + $0x40] sm:$0xff] %vm1156_vm2, %v1383_v14  ;;  %1288 = vst.msk [vmem:[#allocation3 + $0xe0] sm:$0xff] %vm1156_vm2, %v1256_v15  ;;  %v1326_v24 = vld [vmem:[#allocation2 + $0x91] sm:$0xff]  ;;  %v1325_v34 = vld [vmem:[#allocation2 + $0x89] sm:$0xff]  ;;  %v1257_v39 = vpack.c.bf16 %v1198_v16, %v1197_v33 }
 0x192   : > { %1005 = vst.msk [vmem:[#allocation2 + $0xb0] sm:$0xff] %vm995_vm3, %v821_v20  ;;  %1004 = vst.msk [vmem:[#allocation2 + $0xa8] sm:$0xff] %vm995_vm3, %v819_v21  ;;  %v1069_v32 = vld [vmem:[#allocation2 + $0x8f] sm:$0xff]  ;;  %v2217_v36 = vld [vmem:[#allocation3 + $0x18] sm:$0xff]  ;;  %v1385_v40 = vpack.c.bf16 %v1326_v24, %v1325_v34 }
 0x193   : > { %1160 = vst.msk [vmem:[#allocation3 + $0xd8] sm:$0xff] %vm1156_vm2, %v1127_v26  ;;  %1543 = vst.msk [vmem:[#allocation3 + $0xa8] sm:$0xff] %vm1156_vm2, %v1127_v26  ;;  %v2224_v35 = vld [vmem:[#allocation3 + $0x50] sm:$0xff]  ;;  %v2223_v37 = vld [vmem:[#allocation3 + $0x48] sm:$0xff]  ;;  %v1128_v38 = vpack.c.bf16 %v1069_v32, %v1068_v29  ;;  %3399 = vmatprep.mubr.bf16.mxu0 %v2217_v36  ;;  %v829_v46 = vpop.permute.xlu1 %828  ;;  %v827_v47 = vpop.permute.xlu0 %826 }
 0x194   : > { %1671 = vst.msk [vmem:[#allocation3 + $0xb0] sm:$0xff] %vm1156_vm2, %v1256_v15  ;;  %1927 = vst.msk [vmem:[#allocation3 + $0x78] sm:$0xff] %vm1156_vm2, %v1127_v26  ;;  %3118 = vmatprep.mubr.bf16.mxu1 %v2224_v35  ;;  %v2226_v42 = vld [vmem:[#allocation3 + $0x60] sm:$0xff]  ;;  %3400 = vmatmul.mubr.bf16.vlgmr.msra.gmra.mrb[0].mxu0 %v2216_v28  ;;  %v2225_v5 = vld [vmem:[#allocation3 + $0x58] sm:$0xff] }
 0x195   : > { %2055 = vst.msk [vmem:[#allocation3 + $0x80] sm:$0xff] %vm1156_vm2, %v1256_v15  ;;  %2183 = vst.msk [vmem:[#allocation3 + $0x88] sm:$0xff] %vm1156_vm2, %v2151_v27  ;;  %v2233_v41 = vld [vmem:[#allocation3 + $0x98] sm:$0xff]  ;;  %3119 = vmatmul.mubr.bf16.gmra.mrb[4].mxu1 %v2223_v37  ;;  %3657 = vmatpush1.bf16.msra.mxu0 %v8093_v19  ;;  %v8097_v25 = vld [vmem:[%s12893_s1 + $0x120] sm:$0xff]  }
 0x196   : > { %1416 = vst.msk [vmem:[#allocation3 + $0xe8] sm:$0xff] %vm1156_vm2, %v2151_v27  ;;  %1799 = vst.msk [vmem:[#allocation3 + $0xb8] sm:$0xff] %vm1156_vm2, %v2151_v27  ;;  %3126 = vmatprep.mubr.bf16.mxu1 %v2233_v41  ;;  %3407 = vmatprep.mubr.bf16.mxu0 %v2226_v42  ;;  %v2232_v4 = vld [vmem:[#allocation3 + $0x90] sm:$0xff]  ;;  %v8098_v35 = vld [vmem:[%s12893_s1 + $0x128] sm:$0xff]  }
 0x197   : > { %1007 = vst.msk [vmem:[#allocation2 + $0xd0] sm:$0xff] %vm995_vm3, %v825_v30  ;;  %1006 = vst.msk [vmem:[#allocation2 + $0xc8] sm:$0xff] %vm995_vm3, %v823_v31  ;;  %3658 = vmatprep.subr.bf16.mxu0 %v8530_v6  ;;  %v833_v59 = vpop.permute.xlu1 %832  ;;  %v831_v60 = vpop.permute.xlu0 %830  ;;  %v2234_v34 = vld [vmem:[#allocation3 + $0xa0] sm:$0xff] }
 0x198   : > { %1161 = vst.msk [vmem:[#allocation3 + $0x120] sm:$0xff] %vm1156_vm2, %v1128_v38  ;;  %1289 = vst.msk [vmem:[#allocation3 + $0x128] sm:$0xff] %vm1156_vm2, %v1257_v39  ;;  %v2242_v0 = vld [vmem:[#allocation3 + $0xe0] sm:$0xff] }
 0x199   : > { %1544 = vst.msk [vmem:[#allocation3 + $0xf0] sm:$0xff] %vm1156_vm2, %v1128_v38  ;;  %1672 = vst.msk [vmem:[#allocation3 + $0xf8] sm:$0xff] %vm1156_vm2, %v1257_v39  ;;  %v1200_v44 = vld [vmem:[#allocation2 + $0xb0] sm:$0xff]  ;;  %v1070_v48 = vld [vmem:[#allocation2 + $0xa7] sm:$0xff]  ;;  %3659 = vmatpush1.bf16.msra.mxu0 %v8094_v43 }
 0x19a   : > { %1928 = vst.msk [vmem:[#allocation3 + $0xc0] sm:$0xff] %vm1156_vm2, %v1128_v38  ;;  %2056 = vst.msk [vmem:[#allocation3 + $0xc8] sm:$0xff] %vm1156_vm2, %v1257_v39  ;;  %v1328_v45 = vld [vmem:[#allocation2 + $0xb1] sm:$0xff]  ;;  %v1199_v50 = vld [vmem:[#allocation2 + $0xa8] sm:$0xff]  ;;  %3660 = vmatprep.subr.bf16.mxu0 %v8530_v6 }
 0x19b   : > { %1417 = vst.msk [vmem:[#allocation3 + $0x130] sm:$0xff] %vm1156_vm2, %v1385_v40  ;;  %1800 = vst.msk [vmem:[#allocation3 + $0x100] sm:$0xff] %vm1156_vm2, %v1385_v40  ;;  %v1071_v49 = vld [vmem:[#allocation2 + $0xaf] sm:$0xff]  ;;  %v1258_v52 = vpack.c.bf16 %v1200_v44, %v1199_v50  ;;  %v837_v13 = vpop.permute.xlu1 %836  ;;  %v835_v14 = vpop.permute.xlu0 %834  ;;  %v2241_v23 = vld [vmem:[#allocation3 + $0xd8] sm:$0xff] }
 0x19c   : > { %1009 = vst.msk [vmem:[#allocation2 + $0xf0] sm:$0xff] %vm995_vm3, %v829_v46  ;;  %1008 = vst.msk [vmem:[#allocation2 + $0xe8] sm:$0xff] %vm995_vm3, %v827_v47  ;;  %v1129_v51 = vpack.c.bf16 %v1071_v49, %v1070_v48  ;;  %v1327_v53 = vld [vmem:[#allocation2 + $0xa9] sm:$0xff]  ;;  %3408 = vmatmul.mubr.bf16.gmra.mrb[4].mxu0 %v2225_v5 }
 0x19d   : > { %v1386_v55 = vpack.c.bf16 %v1328_v45, %v1327_v53  ;;  %2184 = vst.msk [vmem:[#allocation3 + $0xd0] sm:$0xff] %vm1156_vm2, %v1385_v40  ;;  %1290 = vst.msk [vmem:[#allocation3 + $0x170] sm:$0xff] %vm1156_vm2, %v1258_v52  ;;  %v2235_v8 = vld [vmem:[#allocation3 + $0xa8] sm:$0xff]  ;;  %3127 = vmatmul.mubr.bf16.gmra.mrb[8].mxu1 %v2232_v4  ;;  %3661 = vmatpush1.bf16.msra.mxu0 %v8095_v54  ;;  %v8099_v49 = vld [vmem:[%s12893_s1 + $0x130] sm:$0xff]  }
 0x19e   : > { %1162 = vst.msk [vmem:[#allocation3 + $0x168] sm:$0xff] %vm1156_vm2, %v1129_v51  ;;  %1545 = vst.msk [vmem:[#allocation3 + $0x138] sm:$0xff] %vm1156_vm2, %v1129_v51  ;;  %v1202_v56 = vld [vmem:[#allocation2 + $0xd0] sm:$0xff]  ;;  %v1072_v58 = vld [vmem:[#allocation2 + $0xc7] sm:$0xff]  ;;  %3134 = vmatprep.mubr.bf16.mxu1 %v2242_v0  ;;  %3662 = vmatprep.subr.bf16.mxu0 %v8530_v6 }
 0x19f   : > { %1673 = vst.msk [vmem:[#allocation3 + $0x140] sm:$0xff] %vm1156_vm2, %v1258_v52  ;;  %1929 = vst.msk [vmem:[#allocation3 + $0x108] sm:$0xff] %vm1156_vm2, %v1129_v51  ;;  %v1330_v57 = vld [vmem:[#allocation2 + $0xd1] sm:$0xff]  ;;  %v1201_v62 = vld [vmem:[#allocation2 + $0xc8] sm:$0xff]  ;;  %3415 = vmatprep.mubr.bf16.mxu0 %v2235_v8  ;;  %v841_v28 = vpop.permute.xlu1 %840  ;;  %v839_v19 = vpop.permute.xlu0 %838 }
 0x1a0   : > { %2057 = vst.msk [vmem:[#allocation3 + $0x110] sm:$0xff] %vm1156_vm2, %v1258_v52  ;;  %v1073_v61 = vld [vmem:[#allocation2 + $0xcf] sm:$0xff]  ;;  %1418 = vst.msk [vmem:[#allocation3 + $0x178] sm:$0xff] %vm1156_vm2, %v1386_v55  ;;  %v1259_v2 = vpack.c.bf16 %v1202_v56, %v1201_v62  ;;  %v2250_v48 = vld [vmem:[#allocation3 + $0x120] sm:$0xff] }
 0x1a1   : > { %v1329_v63 = vld [vmem:[#allocation2 + $0xc9] sm:$0xff]  ;;  %1011 = vst.msk [vmem:[#allocation2 + $0x110] sm:$0xff] %vm995_vm3, %v833_v59  ;;  %1010 = vst.msk [vmem:[#allocation2 + $0x108] sm:$0xff] %vm995_vm3, %v831_v60  ;;  %v1130_v1 = vpack.c.bf16 %v1073_v61, %v1072_v58  ;;  %3663 = vmatpush1.bf16.msra.mxu0 %v8096_v7 }
 0x1a2   : > { %1801 = vst.msk [vmem:[#allocation3 + $0x148] sm:$0xff] %vm1156_vm2, %v1386_v55  ;;  %v9681_v3 = vpack.c.bf16 %v1330_v57, %v1329_v63  ;;  %1291 = vst.msk [vmem:[#allocation3 + $0x1b8] sm:$0xff] %vm1156_vm2, %v1259_v2  ;;  %3664 = vmatprep.subr.bf16.mxu0 %v8530_v6  ;;  %v2251_v30 = vld [vmem:[#allocation3 + $0x128] sm:$0xff]  ;;  %v2244_v36 = vld [vmem:[#allocation3 + $0xf0] sm:$0xff] }
 0x1a3   : > { %1163 = vst.msk [vmem:[#allocation3 + $0x1b0] sm:$0xff] %vm1156_vm2, %v1130_v1  ;;  %1546 = vst.msk [vmem:[#allocation3 + $0x180] sm:$0xff] %vm1156_vm2, %v1130_v1  ;;  %v1204_v9 = vld [vmem:[#allocation2 + $0xf0] sm:$0xff]  ;;  %v1074_v11 = vld [vmem:[#allocation2 + $0xe7] sm:$0xff]  ;;  %v845_v40 = vpop.permute.xlu1 %844  ;;  %v843_v41 = vpop.permute.xlu0 %842 }
 0x1a4   : > { %1674 = vst.msk [vmem:[#allocation3 + $0x188] sm:$0xff] %vm1156_vm2, %v1259_v2  ;;  %1930 = vst.msk [vmem:[#allocation3 + $0x150] sm:$0xff] %vm1156_vm2, %v1130_v1  ;;  %v1332_v10 = vld [vmem:[#allocation2 + $0xf1] sm:$0xff]  ;;  %v1203_v17 = vld [vmem:[#allocation2 + $0xe8] sm:$0xff]  ;;  %3416 = vmatmul.mubr.bf16.gmra.mrb[8].mxu0 %v2234_v34 }
 0x1a5   : > { %2058 = vst.msk [vmem:[#allocation3 + $0x158] sm:$0xff] %vm1156_vm2, %v1259_v2  ;;  %1419 = vst.msk [vmem:[#allocation3 + $0x1c0] sm:$0xff] %vm1156_vm2, %v9681_v3  ;;  %v1075_v12 = vld [vmem:[#allocation2 + $0xef] sm:$0xff]  ;;  %v1260_v21 = vpack.c.bf16 %v1204_v9, %v1203_v17  ;;  %3135 = vmatmul.mubr.bf16.gmra.mrb[12].mxu1 %v2241_v23  ;;  %3665 = vmatpush1.bf16.msra.mxu0 %v8097_v25  ;;  %v8100_v63 = vld [vmem:[%s12893_s1 + $0x138] sm:$0xff]  }
 0x1a6   : > { %1802 = vst.msk [vmem:[#allocation3 + $0x190] sm:$0xff] %vm1156_vm2, %v9681_v3  ;;  %v1331_v18 = vld [vmem:[#allocation2 + $0xe9] sm:$0xff]  ;;  %v1131_v20 = vpack.c.bf16 %v1075_v12, %v1074_v11  ;;  %2185 = vst.msk [vmem:[#allocation3 + $0x118] sm:$0xff] %vm1156_vm2, %v1386_v55  ;;  %3142 = vmatprep.mubr.bf16.mxu1 %v2251_v30  ;;  %3666 = vmatprep.subr.bf16.mxu0 %v8530_v6  ;;  %v2253_v0 = vld [vmem:[#allocation3 + $0x138] sm:$0xff] }
 0x1a7   : > { %1013 = vst.msk [vmem:[#allocation2 + $0x130] sm:$0xff] %vm995_vm3, %v837_v13  ;;  %1012 = vst.msk [vmem:[#allocation2 + $0x128] sm:$0xff] %vm995_vm3, %v835_v14  ;;  %v9699_v22 = vpack.c.bf16 %v1332_v10, %v1331_v18  ;;  %3423 = vmatprep.mubr.bf16.mxu0 %v2244_v36  ;;  %v849_v53 = vpop.permute.xlu1 %848  ;;  %v847_v54 = vpop.permute.xlu0 %846  ;;  %v2260_v58 = vld [vmem:[#allocation3 + $0x170] sm:$0xff]  ;;  %v2243_v62 = vld [vmem:[#allocation3 + $0xe8] sm:$0xff] }
 0x1a8   : > { %1164 = vst.msk [vmem:[#allocation3 + $0x1f8] sm:$0xff] %vm1156_vm2, %v1131_v20  ;;  %1292 = vst.msk [vmem:[#allocation3 + $0x200] sm:$0xff] %vm1156_vm2, %v1260_v21  ;;  %v1206_v26 = vld [vmem:[#allocation2 + $0x110] sm:$0xff]  ;;  %v1076_v27 = vld [vmem:[#allocation2 + $0x107] sm:$0xff] }
 0x1a9   : > { %1547 = vst.msk [vmem:[#allocation3 + $0x1c8] sm:$0xff] %vm1156_vm2, %v1131_v20  ;;  %1675 = vst.msk [vmem:[#allocation3 + $0x1d0] sm:$0xff] %vm1156_vm2, %v1260_v21  ;;  %v1334_v15 = vld [vmem:[#allocation2 + $0x111] sm:$0xff]  ;;  %v1205_v24 = vld [vmem:[#allocation2 + $0x108] sm:$0xff]  ;;  %3667 = vmatpush1.bf16.msra.mxu0 %v8098_v35 }
 0x1aa   : > { %1931 = vst.msk [vmem:[#allocation3 + $0x198] sm:$0xff] %vm1156_vm2, %v1131_v20  ;;  %2059 = vst.msk [vmem:[#allocation3 + $0x1a0] sm:$0xff] %vm1156_vm2, %v1260_v21  ;;  %v1077_v16 = vld [vmem:[#allocation2 + $0x10f] sm:$0xff]  ;;  %v1261_v32 = vpack.c.bf16 %v1206_v26, %v1205_v24  ;;  %3668 = vmatprep.subr.bf16.mxu0 %v8530_v6  ;;  %v8101_v12 = vld [vmem:[%s12893_s1 + $0x140] sm:$0xff]  }
 0x1ab   : > { %1420 = vst.msk [vmem:[#allocation3 + $0x208] sm:$0xff] %vm1156_vm2, %v9699_v22  ;;  %1803 = vst.msk [vmem:[#allocation3 + $0x1d8] sm:$0xff] %vm1156_vm2, %v9699_v22  ;;  %v1333_v29 = vld [vmem:[#allocation2 + $0x109] sm:$0xff]  ;;  %v1132_v31 = vpack.c.bf16 %v1077_v16, %v1076_v27  ;;  %v853_v4 = vpop.permute.xlu1 %852  ;;  %v851_v5 = vpop.permute.xlu0 %850 }
 0x1ac   : > { %1015 = vst.msk [vmem:[#allocation2 + $0x150] sm:$0xff] %vm995_vm3, %v841_v28  ;;  %1014 = vst.msk [vmem:[#allocation2 + $0x148] sm:$0xff] %vm995_vm3, %v839_v19  ;;  %v9718_v33 = vpack.c.bf16 %v1334_v15, %v1333_v29  ;;  %3424 = vmatmul.mubr.bf16.gmra.mrb[12].mxu0 %v2243_v62  ;;  %v2259_v14 = vld [vmem:[#allocation3 + $0x168] sm:$0xff]  ;;  %v2269_v15 = vld [vmem:[#allocation3 + $0x1b8] sm:$0xff] }
 0x1ad   : > { %1165 = vst.msk [vmem:[#allocation3 + $0x240] sm:$0xff] %vm1156_vm2, %v1132_v31  ;;  %1293 = vst.msk [vmem:[#allocation3 + $0x248] sm:$0xff] %vm1156_vm2, %v1261_v32  ;;  %3143 = vmatmul.mubr.bf16.gmra.mrb[16].mxu1 %v2250_v48  ;;  %3669 = vmatpush1.bf16.msra.mxu0 %v8099_v49  ;;  %v2252_v16 = vld [vmem:[#allocation3 + $0x130] sm:$0xff]  ;;  %v8102_v24 = vld [vmem:[%s12893_s1 + $0x148] sm:$0xff]  }
 0x1ae   : > { %1421 = vst.msk [vmem:[#allocation3 + $0x250] sm:$0xff] %vm1156_vm2, %v9718_v33  ;;  %1548 = vst.msk [vmem:[#allocation3 + $0x210] sm:$0xff] %vm1156_vm2, %v1132_v31  ;;  %v1208_v37 = vld [vmem:[#allocation2 + $0x130] sm:$0xff]  ;;  %v1078_v39 = vld [vmem:[#allocation2 + $0x127] sm:$0xff]  ;;  %3150 = vmatprep.mubr.bf16.mxu1 %v2260_v58  ;;  %3670 = vmatprep.subr.bf16.mxu0 %v8530_v6 }
 0x1af   : > { %1676 = vst.msk [vmem:[#allocation3 + $0x218] sm:$0xff] %vm1156_vm2, %v1261_v32  ;;  %1932 = vst.msk [vmem:[#allocation3 + $0x1e0] sm:$0xff] %vm1156_vm2, %v1132_v31  ;;  %v1336_v38 = vld [vmem:[#allocation2 + $0x131] sm:$0xff]  ;;  %v1207_v43 = vld [vmem:[#allocation2 + $0x128] sm:$0xff]  ;;  %3431 = vmatprep.mubr.bf16.mxu0 %v2253_v0  ;;  %v857_v21 = vpop.permute.xlu1 %856  ;;  %v855_v23 = vpop.permute.xlu0 %854 }
 0x1b0   : > { %2060 = vst.msk [vmem:[#allocation3 + $0x1e8] sm:$0xff] %vm1156_vm2, %v1261_v32  ;;  %1804 = vst.msk [vmem:[#allocation3 + $0x220] sm:$0xff] %vm1156_vm2, %v9718_v33  ;;  %v1079_v42 = vld [vmem:[#allocation2 + $0x12f] sm:$0xff]  ;;  %v1262_v46 = vpack.c.bf16 %v1208_v37, %v1207_v43  ;;  %v2262_v29 = vld [vmem:[#allocation3 + $0x180] sm:$0xff] }
 0x1b1   : > { %v1335_v44 = vld [vmem:[#allocation2 + $0x129] sm:$0xff]  ;;  %1017 = vst.msk [vmem:[#allocation2 + $0x170] sm:$0xff] %vm995_vm3, %v845_v40  ;;  %1016 = vst.msk [vmem:[#allocation2 + $0x168] sm:$0xff] %vm995_vm3, %v843_v41  ;;  %v1133_v45 = vpack.c.bf16 %v1079_v42, %v1078_v39  ;;  %3671 = vmatpush1.bf16.msra.mxu0 %v8100_v63 }
 0x1b2   : > { %v1773_v47 = vpack.c.bf16 %v1336_v38, %v1335_v44  ;;  %2186 = vst.msk [vmem:[#allocation3 + $0x160] sm:$0xff] %vm1156_vm2, %v9681_v3  ;;  %1294 = vst.msk [vmem:[#allocation3 + $0x290] sm:$0xff] %vm1156_vm2, %v1262_v46  ;;  %3672 = vmatprep.subr.bf16.mxu0 %v8530_v6  ;;  %v2268_v42 = vld [vmem:[#allocation3 + $0x1b0] sm:$0xff] }
 0x1b3   : > { %1166 = vst.msk [vmem:[#allocation3 + $0x288] sm:$0xff] %vm1156_vm2, %v1133_v45  ;;  %1549 = vst.msk [vmem:[#allocation3 + $0x258] sm:$0xff] %vm1156_vm2, %v1133_v45  ;;  %v1210_v50 = vld [vmem:[#allocation2 + $0x150] sm:$0xff]  ;;  %v1080_v52 = vld [vmem:[#allocation2 + $0x147] sm:$0xff]  ;;  %v861_v34 = vpop.permute.xlu1 %860  ;;  %v859_v35 = vpop.permute.xlu0 %858 }
 0x1b4   : > { %1677 = vst.msk [vmem:[#allocation3 + $0x260] sm:$0xff] %vm1156_vm2, %v1262_v46  ;;  %1933 = vst.msk [vmem:[#allocation3 + $0x228] sm:$0xff] %vm1156_vm2, %v1133_v45  ;;  %v1338_v51 = vld [vmem:[#allocation2 + $0x151] sm:$0xff]  ;;  %v1209_v56 = vld [vmem:[#allocation2 + $0x148] sm:$0xff]  ;;  %3432 = vmatmul.mubr.bf16.gmra.mrb[16].mxu0 %v2252_v16 }
 0x1b5   : > { %2061 = vst.msk [vmem:[#allocation3 + $0x230] sm:$0xff] %vm1156_vm2, %v1262_v46  ;;  %1805 = vst.msk [vmem:[#allocation3 + $0x268] sm:$0xff] %vm1156_vm2, %v1773_v47  ;;  %v1081_v55 = vld [vmem:[#allocation2 + $0x14f] sm:$0xff]  ;;  %v1263_v60 = vpack.c.bf16 %v1210_v50, %v1209_v56  ;;  %3151 = vmatmul.mubr.bf16.gmra.mrb[20].mxu1 %v2259_v14  ;;  %3673 = vmatpush1.bf16.msra.mxu0 %v8101_v12  ;;  %v8104_v56 = vld [vmem:[%s12893_s1 + $0x158] sm:$0xff]  }
 0x1b6   : > { %v1337_v57 = vld [vmem:[#allocation2 + $0x149] sm:$0xff]  ;;  %1019 = vst.msk [vmem:[#allocation2 + $0x190] sm:$0xff] %vm995_vm3, %v849_v53  ;;  %1018 = vst.msk [vmem:[#allocation2 + $0x188] sm:$0xff] %vm995_vm3, %v847_v54  ;;  %v1134_v59 = vpack.c.bf16 %v1081_v55, %v1080_v52  ;;  %3158 = vmatprep.mubr.bf16.mxu1 %v2269_v15  ;;  %3674 = vmatprep.subr.bf16.mxu0 %v8530_v6  ;;  %v2261_v55 = vld [vmem:[#allocation3 + $0x178] sm:$0xff] }
 0x1b7   : > { %1422 = vst.msk [vmem:[#allocation3 + $0x298] sm:$0xff] %vm1156_vm2, %v1773_v47  ;;  %2189 = vst.msk [vmem:[#allocation3 + $0x238] sm:$0xff] %vm1156_vm2, %v1773_v47  ;;  %v1774_v61 = vpack.c.bf16 %v1338_v51, %v1337_v57  ;;  %3439 = vmatprep.mubr.bf16.mxu0 %v2262_v29  ;;  %v8103_v43 = vld [vmem:[%s12893_s1 + $0x150] sm:$0xff]   ;;  %v869_v47 = vpop.permute.xlu1 %868  ;;  %v867_v50 = vpop.permute.xlu0 %866  ;;  %v2278_v51 = vld [vmem:[#allocation3 + $0x200] sm:$0xff] }
 0x1b8   : > { %1167 = vst.msk [vmem:[#allocation3 + $0x2d0] sm:$0xff] %vm1156_vm2, %v1134_v59  ;;  %1295 = vst.msk [vmem:[#allocation3 + $0x2d8] sm:$0xff] %vm1156_vm2, %v1263_v60  ;;  %v1212_v1 = vld [vmem:[#allocation2 + $0x170] sm:$0xff]  ;;  %v1082_v3 = vld [vmem:[#allocation2 + $0x167] sm:$0xff] }
 0x1b9   : > { %1550 = vst.msk [vmem:[#allocation3 + $0x2a0] sm:$0xff] %vm1156_vm2, %v1134_v59  ;;  %1678 = vst.msk [vmem:[#allocation3 + $0x2a8] sm:$0xff] %vm1156_vm2, %v1263_v60  ;;  %v1340_v2 = vld [vmem:[#allocation2 + $0x171] sm:$0xff]  ;;  %v1211_v8 = vld [vmem:[#allocation2 + $0x168] sm:$0xff]  ;;  %3675 = vmatpush1.bf16.msra.mxu0 %v8102_v24 }
 0x1ba   : > { %1934 = vst.msk [vmem:[#allocation3 + $0x270] sm:$0xff] %vm1156_vm2, %v1134_v59  ;;  %2062 = vst.msk [vmem:[#allocation3 + $0x278] sm:$0xff] %vm1156_vm2, %v1263_v60  ;;  %v1083_v7 = vld [vmem:[#allocation2 + $0x16f] sm:$0xff]  ;;  %v1264_v11 = vpack.c.bf16 %v1212_v1, %v1211_v8  ;;  %3676 = vmatprep.subr.bf16.mxu0 %v8530_v6 }
 0x1bb   : > { %1806 = vst.msk [vmem:[#allocation3 + $0x2b0] sm:$0xff] %vm1156_vm2, %v1774_v61  ;;  %1423 = vst.msk [vmem:[#allocation3 + $0x2e0] sm:$0xff] %vm1156_vm2, %v1774_v61  ;;  %v1339_v9 = vld [vmem:[#allocation2 + $0x169] sm:$0xff]  ;;  %v1135_v10 = vpack.c.bf16 %v1083_v7, %v1082_v3  ;;  %v871_v1 = vpop.permute.xlu0 %870  ;;  %v2277_v7 = vld [vmem:[#allocation3 + $0x1f8] sm:$0xff] }
 0x1bc   : > { %2190 = vst.msk [vmem:[#allocation3 + $0x280] sm:$0xff] %vm1156_vm2, %v1774_v61  ;;  %v1775_v13 = vpack.c.bf16 %v1340_v2, %v1339_v9  ;;  %2187 = vst.msk [vmem:[#allocation3 + $0x1a8] sm:$0xff] %vm1156_vm2, %v9699_v22  ;;  %v2271_v57 = vld [vmem:[#allocation3 + $0x1c8] sm:$0xff]  ;;  %3440 = vmatmul.mubr.bf16.gmra.mrb[20].mxu0 %v2261_v55  ;;  %v873_v61 = vpop.permute.xlu1 %872 }
 0x1bd   : > { %1021 = vst.msk [vmem:[#allocation2 + $0x1b0] sm:$0xff] %vm995_vm3, %v853_v4  ;;  %1020 = vst.msk [vmem:[#allocation2 + $0x1a8] sm:$0xff] %vm995_vm3, %v851_v5  ;;  %v1214_v17 = vld [vmem:[#allocation2 + $0x190] sm:$0xff]  ;;  %v1084_v20 = vld [vmem:[#allocation2 + $0x187] sm:$0xff]  ;;  %3159 = vmatmul.mubr.bf16.gmra.mrb[24].mxu1 %v2268_v42  ;;  %3677 = vmatpush1.bf16.msra.mxu0 %v8103_v43 }
 0x1be   : > { %1168 = vst.msk [vmem:[#allocation3 + $0x318] sm:$0xff] %vm1156_vm2, %v1135_v10  ;;  %1296 = vst.msk [vmem:[#allocation3 + $0x320] sm:$0xff] %vm1156_vm2, %v1264_v11  ;;  %v1342_v18 = vld [vmem:[#allocation2 + $0x191] sm:$0xff]  ;;  %v1213_v25 = vld [vmem:[#allocation2 + $0x188] sm:$0xff]  ;;  %3166 = vmatprep.mubr.bf16.mxu1 %v2278_v51  ;;  %3678 = vmatprep.subr.bf16.mxu0 %v8530_v6 }
 0x1bf   : > { %1551 = vst.msk [vmem:[#allocation3 + $0x2e8] sm:$0xff] %vm1156_vm2, %v1135_v10  ;;  %1679 = vst.msk [vmem:[#allocation3 + $0x2f0] sm:$0xff] %vm1156_vm2, %v1264_v11  ;;  %v1085_v22 = vld [vmem:[#allocation2 + $0x18f] sm:$0xff]  ;;  %v1265_v28 = vpack.c.bf16 %v1214_v17, %v1213_v25  ;;  %3447 = vmatprep.mubr.bf16.mxu0 %v2271_v57  ;;  %v8105_v5 = vld [vmem:[%s12893_s1 + $0x160] sm:$0xff]   ;;  %v875_v12 = vpop.permute.xlu0 %874 }
 0x1c0   : > { %1935 = vst.msk [vmem:[#allocation3 + $0x2b8] sm:$0xff] %vm1156_vm2, %v1135_v10  ;;  %2063 = vst.msk [vmem:[#allocation3 + $0x2c0] sm:$0xff] %vm1156_vm2, %v1264_v11  ;;  %v1341_v26 = vld [vmem:[#allocation2 + $0x189] sm:$0xff]  ;;  %v1136_v27 = vpack.c.bf16 %v1085_v22, %v1084_v20  ;;  %v877_v10 = vpop.permute.xlu1 %876 }
 0x1c1   : > { %1807 = vst.msk [vmem:[#allocation3 + $0x2f8] sm:$0xff] %vm1156_vm2, %v1775_v13  ;;  %1424 = vst.msk [vmem:[#allocation3 + $0x328] sm:$0xff] %vm1156_vm2, %v1775_v13  ;;  %v1776_v19 = vpack.c.bf16 %v1342_v18, %v1341_v26  ;;  %3679 = vmatpush1.bf16.msra.mxu0 %v8104_v56  ;;  %v2287_v17 = vld [vmem:[#allocation3 + $0x248] sm:$0xff]  ;;  %v2280_v22 = vld [vmem:[#allocation3 + $0x210] sm:$0xff] }
 0x1c2   : > { %1023 = vst.msk [vmem:[#allocation2 + $0x1d0] sm:$0xff] %vm995_vm3, %v857_v21  ;;  %1022 = vst.msk [vmem:[#allocation2 + $0x1c8] sm:$0xff] %vm995_vm3, %v855_v23  ;;  %3680 = vmatprep.subr.bf16.mxu0 %v8530_v6  ;;  %v2270_v23 = vld [vmem:[#allocation3 + $0x1c0] sm:$0xff]  ;;  %v8106_v26 = vld [vmem:[%s12893_s1 + $0x168] sm:$0xff]  }
 0x1c3   : > { %2191 = vst.msk [vmem:[#allocation3 + $0x2c8] sm:$0xff] %vm1156_vm2, %v1775_v13  ;;  %1169 = vst.msk [vmem:[#allocation3 + $0x360] sm:$0xff] %vm1156_vm2, %v1136_v27  ;;  %v879_v29 = vpop.permute.xlu0 %878 }
 0x1c4   : > { %1297 = vst.msk [vmem:[#allocation3 + $0x368] sm:$0xff] %vm1156_vm2, %v1265_v28  ;;  %1552 = vst.msk [vmem:[#allocation3 + $0x330] sm:$0xff] %vm1156_vm2, %v1136_v27  ;;  %v1216_v30 = vld [vmem:[#allocation2 + $0x1b0] sm:$0xff]  ;;  %v1086_v32 = vld [vmem:[#allocation2 + $0x1a7] sm:$0xff]  ;;  %3448 = vmatmul.mubr.bf16.gmra.mrb[24].mxu0 %v2270_v23 }
 0x1c5   : > { %1680 = vst.msk [vmem:[#allocation3 + $0x338] sm:$0xff] %vm1156_vm2, %v1265_v28  ;;  %1936 = vst.msk [vmem:[#allocation3 + $0x300] sm:$0xff] %vm1156_vm2, %v1136_v27  ;;  %v1344_v31 = vld [vmem:[#allocation2 + $0x1b1] sm:$0xff]  ;;  %v1215_v37 = vld [vmem:[#allocation2 + $0x1a8] sm:$0xff]  ;;  %3167 = vmatmul.mubr.bf16.gmra.mrb[28].mxu1 %v2277_v7  ;;  %3681 = vmatpush1.bf16.msra.mxu0 %v8105_v5 }
 0x1c6   : > { %2064 = vst.msk [vmem:[#allocation3 + $0x308] sm:$0xff] %vm1156_vm2, %v1265_v28  ;;  %1808 = vst.msk [vmem:[#allocation3 + $0x340] sm:$0xff] %vm1156_vm2, %v1776_v19  ;;  %v1087_v36 = vld [vmem:[#allocation2 + $0x1af] sm:$0xff]  ;;  %v1266_v40 = vpack.c.bf16 %v1216_v30, %v1215_v37  ;;  %v881_v28 = vpop.permute.xlu1 %880  ;;  %3174 = vmatprep.mubr.bf16.mxu1 %v2287_v17  ;;  %3682 = vmatprep.subr.bf16.mxu0 %v8530_v6  ;;  %v2286_v37 = vld [vmem:[#allocation3 + $0x240] sm:$0xff] }
 0x1c7   : > { %1425 = vst.msk [vmem:[#allocation3 + $0x370] sm:$0xff] %vm1156_vm2, %v1776_v19  ;;  %2192 = vst.msk [vmem:[#allocation3 + $0x310] sm:$0xff] %vm1156_vm2, %v1776_v19  ;;  %v1343_v38 = vld [vmem:[#allocation2 + $0x1a9] sm:$0xff]  ;;  %v1137_v39 = vpack.c.bf16 %v1087_v36, %v1086_v32  ;;  %3455 = vmatprep.mubr.bf16.mxu0 %v2280_v22 }
 0x1c8   : > { %1025 = vst.msk [vmem:[#allocation2 + $0x1f0] sm:$0xff] %vm995_vm3, %v861_v34  ;;  %1024 = vst.msk [vmem:[#allocation2 + $0x1e8] sm:$0xff] %vm995_vm3, %v859_v35  ;;  %v1777_v41 = vpack.c.bf16 %v1344_v31, %v1343_v38  ;;  %v737_v34 = vld [vmem:[%s8564_s18 + $0x1f8] sm:$0xff]  ;;  %v8107_v35 = vld [vmem:[%s12893_s1 + $0x170] sm:$0xff]  }
 0x1c9   : > { %2188 = vst.msk [vmem:[#allocation3 + $0x1f0] sm:$0xff] %vm1156_vm2, %v9718_v33  ;;  %1170 = vst.msk [vmem:[#allocation3 + $0x3a8] sm:$0xff] %vm1156_vm2, %v1137_v39  ;;  %v1218_v44 = vld [vmem:[#allocation2 + $0x1d0] sm:$0xff]  ;;  %v1088_v46 = vld [vmem:[#allocation2 + $0x1c7] sm:$0xff]  ;;  %928 = vrot.lane.b32.xlu1 %v737_v34, %s8529_s22  ;;  %3683 = vmatpush1.bf16.msra.mxu0 %v8106_v26 }
 0x1ca   : > { %1298 = vst.msk [vmem:[#allocation3 + $0x3b0] sm:$0xff] %vm1156_vm2, %v1266_v40  ;;  %1553 = vst.msk [vmem:[#allocation3 + $0x378] sm:$0xff] %vm1156_vm2, %v1137_v39  ;;  %v1346_v45 = vld [vmem:[#allocation2 + $0x1d1] sm:$0xff]  ;;  %v1217_v48 = vld [vmem:[#allocation2 + $0x1c8] sm:$0xff]  ;;  %3684 = vmatprep.subr.bf16.mxu0 %v8530_v6 }
 0x1cb   : > { %1681 = vst.msk [vmem:[#allocation3 + $0x380] sm:$0xff] %vm1156_vm2, %v1266_v40  ;;  %1937 = vst.msk [vmem:[#allocation3 + $0x348] sm:$0xff] %vm1156_vm2, %v1137_v39  ;;  %v1089_v33 = vld [vmem:[#allocation2 + $0x1cf] sm:$0xff]  ;;  %v1267_v53 = vpack.c.bf16 %v1218_v44, %v1217_v48  ;;  %v883_v44 = vpop.permute.xlu0 %882 }
 0x1cc   : > { %2065 = vst.msk [vmem:[#allocation3 + $0x350] sm:$0xff] %vm1156_vm2, %v1266_v40  ;;  %1809 = vst.msk [vmem:[#allocation3 + $0x388] sm:$0xff] %vm1156_vm2, %v1777_v41  ;;  %v1345_v49 = vld [vmem:[#allocation2 + $0x1c9] sm:$0xff]  ;;  %v1138_v52 = vpack.c.bf16 %v1089_v33, %v1088_v46  ;;  %v885_v40 = vpop.permute.xlu1 %884 }
 0x1cd   : > { %1029 = vst.msk [vmem:[#allocation2 + $0x270] sm:$0xff] %vm995_vm3, %v869_v47  ;;  %1028 = vst.msk [vmem:[#allocation2 + $0x268] sm:$0xff] %vm995_vm3, %v867_v50  ;;  %v1778_v54 = vpack.c.bf16 %v1346_v45, %v1345_v49  ;;  %v736_v33 = vld [vmem:[%s8564_s18 + $0x1f0] sm:$0xff]  ;;  %v2279_v48 = vld [vmem:[#allocation3 + $0x208] sm:$0xff]  ;;  %3175 = vmatmul.mubr.bf16.gmra.mrb[32].mxu1 %v2286_v37  ;;  %3685 = vmatpush1.bf16.msra.mxu0 %v8107_v35 }
 0x1ce   : > { %1426 = vst.msk [vmem:[#allocation3 + $0x3b8] sm:$0xff] %vm1156_vm2, %v1777_v41  ;;  %2193 = vst.msk [vmem:[#allocation3 + $0x358] sm:$0xff] %vm1156_vm2, %v1777_v41  ;;  %v8108_v49 = vld [vmem:[%s12893_s1 + $0x178] sm:$0xff]   ;;  %v2296_v50 = vld [vmem:[#allocation3 + $0x290] sm:$0xff]  ;;  %926 = vrot.lane.b32.xlu0 %v736_v33, %s8529_s22  ;;  %3456 = vmatmul.mubr.bf16.gmra.mrb[28].mxu0 %v2279_v48 }
 0x1cf   : > { %1171 = vst.msk [vmem:[#allocation3 + $0x3f0] sm:$0xff] %vm1156_vm2, %v1138_v52  ;;  %1299 = vst.msk [vmem:[#allocation3 + $0x3f8] sm:$0xff] %vm1156_vm2, %v1267_v53  ;;  %v1220_v58 = vld [vmem:[#allocation2 + $0x1f0] sm:$0xff]  ;;  %v1090_v60 = vld [vmem:[#allocation2 + $0x1e7] sm:$0xff]  ;;  %3686 = vmatprep.subr.bf16.mxu0 %v8530_v6  ;;  %3182 = vmatprep.mubr.bf16.mxu1 %v2296_v50 }
 0x1d0   : > { %1554 = vst.msk [vmem:[#allocation3 + $0x3c0] sm:$0xff] %vm1156_vm2, %v1138_v52  ;;  %1682 = vst.msk [vmem:[#allocation3 + $0x3c8] sm:$0xff] %vm1156_vm2, %v1267_v53  ;;  %v1348_v59 = vld [vmem:[#allocation2 + $0x1f1] sm:$0xff]  ;;  %v1219_v63 = vld [vmem:[#allocation2 + $0x1e8] sm:$0xff]  ;;  %v889_v55 = vpop.permute.xlu1 %888 }
 0x1d1   : > { %1938 = vst.msk [vmem:[#allocation3 + $0x390] sm:$0xff] %vm1156_vm2, %v1138_v52  ;;  %2066 = vst.msk [vmem:[#allocation3 + $0x398] sm:$0xff] %vm1156_vm2, %v1267_v53  ;;  %v1091_v62 = vld [vmem:[#allocation2 + $0x1ef] sm:$0xff]  ;;  %v1268_v3 = vpack.c.bf16 %v1220_v58, %v1219_v63  ;;  %v8109_v63 = vld [vmem:[%s12893_s1 + $0x180] sm:$0xff]   ;;  %3687 = vmatpush1.bf16.msra.mxu0 %v8108_v49 }
 0x1d2   : > { %1810 = vst.msk [vmem:[#allocation3 + $0x3d0] sm:$0xff] %vm1156_vm2, %v1778_v54  ;;  %1427 = vst.msk [vmem:[#allocation3 + $0x400] sm:$0xff] %vm1156_vm2, %v1778_v54  ;;  %v1347_v0 = vld [vmem:[#allocation2 + $0x1e9] sm:$0xff]  ;;  %v1139_v2 = vpack.c.bf16 %v1091_v62, %v1090_v60  ;;  %3945 = vmatprep.subr.bf16.mxu0 %v8530_v6 }
 0x1d3   : > { %2194 = vst.msk [vmem:[#allocation3 + $0x3a0] sm:$0xff] %vm1156_vm2, %v1778_v54  ;;  %v1779_v4 = vpack.c.bf16 %v1348_v59, %v1347_v0  ;;  %1300 = vst.msk [vmem:[#allocation3 + $0x440] sm:$0xff] %vm1156_vm2, %v1268_v3  ;;  %v2219_v52 = vld [vmem:[#allocation3 + $0x28] sm:$0xff]  ;;  %v887_v59 = vpop.permute.xlu0 %886 }
 0x1d4   : > { %1031 = vst.msk [vmem:[#allocation2 + $0x290] sm:$0xff] %vm995_vm3, %v873_v61  ;;  %1030 = vst.msk [vmem:[#allocation2 + $0x288] sm:$0xff] %vm995_vm3, %v871_v1  ;;  %v1224_v8 = vld [vmem:[#allocation2 + $0x270] sm:$0xff]  ;;  %v1094_v11 = vld [vmem:[#allocation2 + $0x267] sm:$0xff]  ;;  %3688 = vmatprep.mubr.bf16.mxu0 %v2219_v52 }
 0x1d5   : > { %1172 = vst.msk [vmem:[#allocation3 + $0x438] sm:$0xff] %vm1156_vm2, %v1139_v2  ;;  %1555 = vst.msk [vmem:[#allocation3 + $0x408] sm:$0xff] %vm1156_vm2, %v1139_v2  ;;  %v1352_v9 = vld [vmem:[#allocation2 + $0x271] sm:$0xff]  ;;  %v1223_v14 = vld [vmem:[#allocation2 + $0x268] sm:$0xff] }
 0x1d6   : > { %1683 = vst.msk [vmem:[#allocation3 + $0x410] sm:$0xff] %vm1156_vm2, %v1268_v3  ;;  %1939 = vst.msk [vmem:[#allocation3 + $0x3d8] sm:$0xff] %vm1156_vm2, %v1139_v2  ;;  %v1095_v13 = vld [vmem:[#allocation2 + $0x26f] sm:$0xff]  ;;  %v1270_v20 = vpack.c.bf16 %v1224_v8, %v1223_v14  ;;  %v2218_v14 = vld [vmem:[#allocation3 + $0x20] sm:$0xff] }
 0x1d7   : > { %2067 = vst.msk [vmem:[#allocation3 + $0x3e0] sm:$0xff] %vm1156_vm2, %v1268_v3  ;;  %1811 = vst.msk [vmem:[#allocation3 + $0x418] sm:$0xff] %vm1156_vm2, %v1779_v4  ;;  %v1141_v18 = vpack.c.bf16 %v1095_v13, %v1094_v11  ;;  %v1351_v21 = vld [vmem:[#allocation2 + $0x269] sm:$0xff]  ;;  %3689 = vmatmul.mubr.bf16.vlgmr.msra.gmra.mrb[0].mxu0 %v2218_v14 }
 0x1d8   : > { %1033 = vst.msk [vmem:[#allocation2 + $0x2b0] sm:$0xff] %vm995_vm3, %v877_v10  ;;  %1032 = vst.msk [vmem:[#allocation2 + $0x2a8] sm:$0xff] %vm995_vm3, %v875_v12  ;;  %v1781_v25 = vpack.c.bf16 %v1352_v9, %v1351_v21  ;;  %v2295_v1 = vld [vmem:[#allocation3 + $0x288] sm:$0xff]  ;;  %v891_v9 = vpop.permute.xlu0 %890  ;;  %v2305_v12 = vld [vmem:[#allocation3 + $0x2d8] sm:$0xff]  ;;  %3946 = vmatpush1.bf16.msra.mxu0 %v8109_v63 }
 0x1d9   : > { %1428 = vst.msk [vmem:[#allocation3 + $0x448] sm:$0xff] %vm1156_vm2, %v1779_v4  ;;  %2195 = vst.msk [vmem:[#allocation3 + $0x3e8] sm:$0xff] %vm1156_vm2, %v1779_v4  ;;  %v893_v4 = vpop.permute.xlu1 %892  ;;  %v8110_v17 = vld [vmem:[%s12893_s1 + $0x188] sm:$0xff]   ;;  %3183 = vmatmul.mubr.bf16.gmra.mrb[36].mxu1 %v2295_v1  ;;  %3947 = vmatprep.subr.bf16.mxu0 %v8530_v6 }
 0x1da   : > { %1174 = vst.msk [vmem:[#allocation3 + $0x4c8] sm:$0xff] %vm1156_vm2, %v1141_v18  ;;  %1302 = vst.msk [vmem:[#allocation3 + $0x4d0] sm:$0xff] %vm1156_vm2, %v1270_v20  ;;  %3190 = vmatprep.mubr.bf16.mxu1 %v2305_v12 }
 0x1db   : > { %1557 = vst.msk [vmem:[#allocation3 + $0x498] sm:$0xff] %vm1156_vm2, %v1141_v18  ;;  %1685 = vst.msk [vmem:[#allocation3 + $0x4a0] sm:$0xff] %vm1156_vm2, %v1270_v20  ;;  %v1226_v15 = vld [vmem:[#allocation2 + $0x290] sm:$0xff]  ;;  %v1096_v19 = vld [vmem:[#allocation2 + $0x287] sm:$0xff] }
 0x1dc   : > { %v1354_v27 = vld [vmem:[#allocation2 + $0x291] sm:$0xff]  ;;  %v1225_v24 = vld [vmem:[#allocation2 + $0x288] sm:$0xff]  ;;  %1035 = vst.msk [vmem:[#allocation2 + $0x2d0] sm:$0xff] %vm995_vm3, %v881_v28  ;;  %1034 = vst.msk [vmem:[#allocation2 + $0x2c8] sm:$0xff] %vm995_vm3, %v879_v29  ;;  %3948 = vmatpush1.bf16.msra.mxu0 %v8110_v17 }
 0x1dd   : > { %v1097_v16 = vld [vmem:[#allocation2 + $0x28f] sm:$0xff]  ;;  %1813 = vst.msk [vmem:[#allocation3 + $0x4a8] sm:$0xff] %vm1156_vm2, %v1781_v25  ;;  %1430 = vst.msk [vmem:[#allocation3 + $0x4d8] sm:$0xff] %vm1156_vm2, %v1781_v25  ;;  %v1271_v31 = vpack.c.bf16 %v1226_v15, %v1225_v24  ;;  %v865_v22 = vpop.permute.xlu1 %864  ;;  %3949 = vmatprep.subr.bf16.mxu0 %v8530_v6 }
 0x1de   : > { %v1142_v30 = vpack.c.bf16 %v1097_v16, %v1096_v19  ;;  %v1353_v32 = vld [vmem:[#allocation2 + $0x289] sm:$0xff]  ;;  %1037 = vst.msk [vmem:[#allocation2 + $0x2f0] sm:$0xff] %vm995_vm3, %v885_v40  ;;  %1036 = vst.msk [vmem:[#allocation2 + $0x2e8] sm:$0xff] %vm995_vm3, %v883_v44 }
 0x1df   : > { %v9864_v36 = vpack.c.bf16 %v1354_v27, %v1353_v32  ;;  %1303 = vst.msk [vmem:[#allocation3 + $0x518] sm:$0xff] %vm1156_vm2, %v1271_v31  ;;  %1686 = vst.msk [vmem:[#allocation3 + $0x4e8] sm:$0xff] %vm1156_vm2, %v1271_v31  ;;  %v1228_v38 = vld [vmem:[#allocation2 + $0x2b0] sm:$0xff]  ;;  %v1098_v41 = vld [vmem:[#allocation2 + $0x2a7] sm:$0xff]  ;;  %v863_v27 = vpop.permute.xlu0 %862 }
 0x1e0   : > { %1175 = vst.msk [vmem:[#allocation3 + $0x510] sm:$0xff] %vm1156_vm2, %v1142_v30  ;;  %1558 = vst.msk [vmem:[#allocation3 + $0x4e0] sm:$0xff] %vm1156_vm2, %v1142_v30  ;;  %v1356_v39 = vld [vmem:[#allocation2 + $0x2b1] sm:$0xff]  ;;  %v1227_v43 = vld [vmem:[#allocation2 + $0x2a8] sm:$0xff] }
 0x1e1   : > { %1942 = vst.msk [vmem:[#allocation3 + $0x4b0] sm:$0xff] %vm1156_vm2, %v1142_v30  ;;  %2070 = vst.msk [vmem:[#allocation3 + $0x4b8] sm:$0xff] %vm1156_vm2, %v1271_v31  ;;  %v1099_v42 = vld [vmem:[#allocation2 + $0x2af] sm:$0xff]  ;;  %v1272_v46 = vpack.c.bf16 %v1228_v38, %v1227_v43  ;;  %v897_v32 = vpop.permute.xlu1 %896 }
 0x1e2   : > { %1814 = vst.msk [vmem:[#allocation3 + $0x4f0] sm:$0xff] %vm1156_vm2, %v9864_v36  ;;  %1431 = vst.msk [vmem:[#allocation3 + $0x520] sm:$0xff] %vm1156_vm2, %v9864_v36  ;;  %v1143_v45 = vpack.c.bf16 %v1099_v42, %v1098_v41  ;;  %v1355_v47 = vld [vmem:[#allocation2 + $0x2a9] sm:$0xff] }
 0x1e3   : > { %v9884_v51 = vpack.c.bf16 %v1356_v39, %v1355_v47  ;;  %1304 = vst.msk [vmem:[#allocation3 + $0x560] sm:$0xff] %vm1156_vm2, %v1272_v46  ;;  %1687 = vst.msk [vmem:[#allocation3 + $0x530] sm:$0xff] %vm1156_vm2, %v1272_v46  ;;  %v1230_v53 = vld [vmem:[#allocation2 + $0x2d0] sm:$0xff]  ;;  %v1100_v56 = vld [vmem:[#allocation2 + $0x2c7] sm:$0xff]  ;;  %v895_v38 = vpop.permute.xlu0 %894 }
 0x1e4   : > { %1176 = vst.msk [vmem:[#allocation3 + $0x558] sm:$0xff] %vm1156_vm2, %v1143_v45  ;;  %1559 = vst.msk [vmem:[#allocation3 + $0x528] sm:$0xff] %vm1156_vm2, %v1143_v45  ;;  %v1358_v54 = vld [vmem:[#allocation2 + $0x2d1] sm:$0xff]  ;;  %v1229_v58 = vld [vmem:[#allocation2 + $0x2c8] sm:$0xff] }
 0x1e5   : > { %1943 = vst.msk [vmem:[#allocation3 + $0x4f8] sm:$0xff] %vm1156_vm2, %v1143_v45  ;;  %2071 = vst.msk [vmem:[#allocation3 + $0x500] sm:$0xff] %vm1156_vm2, %v1272_v46  ;;  %v1101_v57 = vld [vmem:[#allocation2 + $0x2cf] sm:$0xff]  ;;  %v1273_v61 = vpack.c.bf16 %v1230_v53, %v1229_v58  ;;  %v1102_v5 = vld [vmem:[#allocation2 + $0x2e7] sm:$0xff]  ;;  %v901_v48 = vpop.permute.xlu1 %900 }
 0x1e6   : > { %1039 = vst.msk [vmem:[#allocation2 + $0x310] sm:$0xff] %vm995_vm3, %v889_v55  ;;  %v1144_v60 = vpack.c.bf16 %v1101_v57, %v1100_v56  ;;  %v1357_v62 = vld [vmem:[#allocation2 + $0x2c9] sm:$0xff]  ;;  %1038 = vst.msk [vmem:[#allocation2 + $0x308] sm:$0xff] %vm995_vm3, %v887_v59  ;;  %v1360_v3 = vld [vmem:[#allocation2 + $0x2f1] sm:$0xff] }
 0x1e7   : > { %1815 = vst.msk [vmem:[#allocation3 + $0x538] sm:$0xff] %vm1156_vm2, %v9884_v51  ;;  %1432 = vst.msk [vmem:[#allocation3 + $0x568] sm:$0xff] %vm1156_vm2, %v9884_v51  ;;  %v9902_v0 = vpack.c.bf16 %v1358_v54, %v1357_v62  ;;  %v1232_v2 = vld [vmem:[#allocation2 + $0x2f0] sm:$0xff]  ;;  %v1231_v8 = vld [vmem:[#allocation2 + $0x2e8] sm:$0xff]  ;;  %v899_v53 = vpop.permute.xlu0 %898 }
 0x1e8   : > { %1177 = vst.msk [vmem:[#allocation3 + $0x5a0] sm:$0xff] %vm1156_vm2, %v1144_v60  ;;  %1305 = vst.msk [vmem:[#allocation3 + $0x5a8] sm:$0xff] %vm1156_vm2, %v1273_v61  ;;  %v1103_v7 = vld [vmem:[#allocation2 + $0x2ef] sm:$0xff]  ;;  %v1274_v11 = vpack.c.bf16 %v1232_v2, %v1231_v8  ;;  %v2314_v39 = vld [vmem:[#allocation3 + $0x320] sm:$0xff] }
 0x1e9   : > { %1560 = vst.msk [vmem:[#allocation3 + $0x570] sm:$0xff] %vm1156_vm2, %v1144_v60  ;;  %1688 = vst.msk [vmem:[#allocation3 + $0x578] sm:$0xff] %vm1156_vm2, %v1273_v61  ;;  %v1145_v10 = vpack.c.bf16 %v1103_v7, %v1102_v5  ;;  %v1359_v13 = vld [vmem:[#allocation2 + $0x2e9] sm:$0xff]  ;;  %v2237_v46 = vld [vmem:[#allocation3 + $0xb8] sm:$0xff]  ;;  %v905_v62 = vpop.permute.xlu1 %904 }
 0x1ea   : > { %1944 = vst.msk [vmem:[#allocation3 + $0x540] sm:$0xff] %vm1156_vm2, %v1144_v60  ;;  %2072 = vst.msk [vmem:[#allocation3 + $0x548] sm:$0xff] %vm1156_vm2, %v1273_v61  ;;  %v9920_v18 = vpack.c.bf16 %v1360_v3, %v1359_v13  ;;  %v2228_v20 = vld [vmem:[#allocation3 + $0x70] sm:$0xff]  ;;  %v2227_v44 = vld [vmem:[#allocation3 + $0x68] sm:$0xff] }
 0x1eb   : > { %1041 = vst.msk [vmem:[#allocation2 + $0x330] sm:$0xff] %vm995_vm3, %v893_v4  ;;  %1040 = vst.msk [vmem:[#allocation2 + $0x328] sm:$0xff] %vm995_vm3, %v891_v9  ;;  %3696 = vmatprep.mubr.bf16.mxu0 %v2228_v20  ;;  %v2304_v29 = vld [vmem:[#allocation3 + $0x2d0] sm:$0xff]  ;;  %v8112_v54 = vld [vmem:[%s12893_s1 + $0x198] sm:$0xff]   ;;  %v903_v3 = vpop.permute.xlu0 %902 }
 0x1ec   : > { %1816 = vst.msk [vmem:[#allocation3 + $0x580] sm:$0xff] %vm1156_vm2, %v9902_v0  ;;  %1433 = vst.msk [vmem:[#allocation3 + $0x5b0] sm:$0xff] %vm1156_vm2, %v9902_v0  ;;  %v8111_v40 = vld [vmem:[%s12893_s1 + $0x190] sm:$0xff]   ;;  %3191 = vmatmul.mubr.bf16.gmra.mrb[40].mxu1 %v2304_v29  ;;  %3697 = vmatmul.mubr.bf16.gmra.mrb[4].mxu0 %v2227_v44  ;;  %v2313_v59 = vld [vmem:[#allocation3 + $0x318] sm:$0xff] }
 0x1ed   : > { %1178 = vst.msk [vmem:[#allocation3 + $0x5e8] sm:$0xff] %vm1156_vm2, %v1145_v10  ;;  %1306 = vst.msk [vmem:[#allocation3 + $0x5f0] sm:$0xff] %vm1156_vm2, %v1274_v11  ;;  %v1234_v21 = vld [vmem:[#allocation2 + $0x310] sm:$0xff]  ;;  %v1104_v25 = vld [vmem:[#allocation2 + $0x307] sm:$0xff]  ;;  %3704 = vmatprep.mubr.bf16.mxu0 %v2237_v46  ;;  %3198 = vmatprep.mubr.bf16.mxu1 %v2314_v39  ;;  %v909_v17 = vpop.permute.xlu1 %908 }
 0x1ee   : > { %1561 = vst.msk [vmem:[#allocation3 + $0x5b8] sm:$0xff] %vm1156_vm2, %v1145_v10  ;;  %1689 = vst.msk [vmem:[#allocation3 + $0x5c0] sm:$0xff] %vm1156_vm2, %v1274_v11  ;;  %v1362_v23 = vld [vmem:[#allocation2 + $0x311] sm:$0xff]  ;;  %v1233_v15 = vld [vmem:[#allocation2 + $0x308] sm:$0xff]  ;;  %3950 = vmatpush1.bf16.msra.mxu0 %v8111_v40 }
 0x1ef   : > { %1945 = vst.msk [vmem:[#allocation3 + $0x588] sm:$0xff] %vm1156_vm2, %v1145_v10  ;;  %2073 = vst.msk [vmem:[#allocation3 + $0x590] sm:$0xff] %vm1156_vm2, %v1274_v11  ;;  %v1105_v26 = vld [vmem:[#allocation2 + $0x30f] sm:$0xff]  ;;  %v1275_v19 = vpack.c.bf16 %v1234_v21, %v1233_v15  ;;  %3951 = vmatprep.subr.bf16.mxu0 %v8530_v6  ;;  %v8113_v5 = vld [vmem:[%s12893_s1 + $0x1a0] sm:$0xff]  }
 0x1f0   : > { %1027 = vst.msk [vmem:[#allocation2 + $0x210] sm:$0xff] %vm995_vm3, %v865_v22  ;;  %v1146_v28 = vpack.c.bf16 %v1105_v26, %v1104_v25  ;;  %v1361_v16 = vld [vmem:[#allocation2 + $0x309] sm:$0xff]  ;;  %1026 = vst.msk [vmem:[#allocation2 + $0x208] sm:$0xff] %vm995_vm3, %v863_v27  ;;  %v2246_v13 = vld [vmem:[#allocation3 + $0x100] sm:$0xff]  ;;  %v907_v22 = vpop.permute.xlu0 %906 }
 0x1f1   : > { %1817 = vst.msk [vmem:[#allocation3 + $0x5c8] sm:$0xff] %vm1156_vm2, %v9920_v18  ;;  %1434 = vst.msk [vmem:[#allocation3 + $0x5f8] sm:$0xff] %vm1156_vm2, %v9920_v18  ;;  %v9935_v24 = vpack.c.bf16 %v1362_v23, %v1361_v16  ;;  %v2323_v4 = vld [vmem:[#allocation3 + $0x368] sm:$0xff]  ;;  %v2236_v10 = vld [vmem:[#allocation3 + $0xb0] sm:$0xff] }
 0x1f2   : > { %1179 = vst.msk [vmem:[#allocation3 + $0x630] sm:$0xff] %vm1156_vm2, %v1146_v28  ;;  %1307 = vst.msk [vmem:[#allocation3 + $0x638] sm:$0xff] %vm1156_vm2, %v1275_v19  ;;  %v1236_v30 = vld [vmem:[#allocation2 + $0x330] sm:$0xff]  ;;  %v1106_v34 = vld [vmem:[#allocation2 + $0x327] sm:$0xff]  ;;  %3952 = vmatpush1.bf16.msra.mxu0 %v8112_v54 }
 0x1f3   : > { %1562 = vst.msk [vmem:[#allocation3 + $0x600] sm:$0xff] %vm1156_vm2, %v1146_v28  ;;  %1690 = vst.msk [vmem:[#allocation3 + $0x608] sm:$0xff] %vm1156_vm2, %v1275_v19  ;;  %v1364_v31 = vld [vmem:[#allocation2 + $0x331] sm:$0xff]  ;;  %v1235_v37 = vld [vmem:[#allocation2 + $0x328] sm:$0xff]  ;;  %3953 = vmatprep.subr.bf16.mxu0 %v8530_v6 }
 0x1f4   : > { %1946 = vst.msk [vmem:[#allocation3 + $0x5d0] sm:$0xff] %vm1156_vm2, %v1146_v28  ;;  %2074 = vst.msk [vmem:[#allocation3 + $0x5d8] sm:$0xff] %vm1156_vm2, %v1275_v19  ;;  %v1107_v35 = vld [vmem:[#allocation2 + $0x32f] sm:$0xff]  ;;  %v1276_v42 = vpack.c.bf16 %v1236_v30, %v1235_v37  ;;  %3199 = vmatmul.mubr.bf16.gmra.mrb[44].mxu1 %v2313_v59  ;;  %3705 = vmatmul.mubr.bf16.gmra.mrb[8].mxu0 %v2236_v10  ;;  %v2322_v19 = vld [vmem:[#allocation3 + $0x360] sm:$0xff]  ;;  %v913_v30 = vpop.permute.xlu1 %912 }
 0x1f5   : > { %1043 = vst.msk [vmem:[#allocation2 + $0x350] sm:$0xff] %vm995_vm3, %v897_v32  ;;  %v1147_v41 = vpack.c.bf16 %v1107_v35, %v1106_v34  ;;  %v1363_v43 = vld [vmem:[#allocation2 + $0x329] sm:$0xff]  ;;  %1042 = vst.msk [vmem:[#allocation2 + $0x348] sm:$0xff] %vm995_vm3, %v895_v38  ;;  %3712 = vmatprep.mubr.bf16.mxu0 %v2246_v13  ;;  %3206 = vmatprep.mubr.bf16.mxu1 %v2323_v4  ;;  %v911_v35 = vpop.permute.xlu0 %910  ;;  %v2341_v4 = vld [vmem:[#allocation3 + $0x3f8] sm:$0xff] }
 0x1f6   : > { %1818 = vst.msk [vmem:[#allocation3 + $0x610] sm:$0xff] %vm1156_vm2, %v9935_v24  ;;  %1435 = vst.msk [vmem:[#allocation3 + $0x640] sm:$0xff] %vm1156_vm2, %v9935_v24  ;;  %v9953_v45 = vpack.c.bf16 %v1364_v31, %v1363_v43  ;;  %3954 = vmatpush1.bf16.msra.mxu0 %v8113_v5  ;;  %v8114_v25 = vld [vmem:[%s12893_s1 + $0x1a8] sm:$0xff]   ;;  %v2332_v37 = vld [vmem:[#allocation3 + $0x3b0] sm:$0xff] }
 0x1f7   : > { %1180 = vst.msk [vmem:[#allocation3 + $0x678] sm:$0xff] %vm1156_vm2, %v1147_v41  ;;  %1308 = vst.msk [vmem:[#allocation3 + $0x680] sm:$0xff] %vm1156_vm2, %v1276_v42  ;;  %v1604_v47 = vld [vmem:[#allocation2 + $0x210] sm:$0xff]  ;;  %v1475_v49 = vld [vmem:[#allocation2 + $0x207] sm:$0xff]  ;;  %3955 = vmatprep.subr.bf16.mxu0 %v8530_v6 }
 0x1f8   : > { %1563 = vst.msk [vmem:[#allocation3 + $0x648] sm:$0xff] %vm1156_vm2, %v1147_v41  ;;  %1691 = vst.msk [vmem:[#allocation3 + $0x650] sm:$0xff] %vm1156_vm2, %v1276_v42  ;;  %v1732_v33 = vld [vmem:[#allocation2 + $0x211] sm:$0xff]  ;;  %v1603_v52 = vld [vmem:[#allocation2 + $0x208] sm:$0xff] }
 0x1f9   : > { %1947 = vst.msk [vmem:[#allocation3 + $0x618] sm:$0xff] %vm1156_vm2, %v1147_v41  ;;  %2075 = vst.msk [vmem:[#allocation3 + $0x620] sm:$0xff] %vm1156_vm2, %v1276_v42  ;;  %v1476_v50 = vld [vmem:[#allocation2 + $0x20f] sm:$0xff]  ;;  %v1652_v56 = vpack.c.bf16 %v1604_v47, %v1603_v52  ;;  %v2245_v42 = vld [vmem:[#allocation3 + $0xf8] sm:$0xff]  ;;  %v915_v52 = vpop.permute.xlu0 %914 }
 0x1fa   : > { %1045 = vst.msk [vmem:[#allocation2 + $0x370] sm:$0xff] %vm995_vm3, %v901_v48  ;;  %v1524_v55 = vpack.c.bf16 %v1476_v50, %v1475_v49  ;;  %v1731_v57 = vld [vmem:[#allocation2 + $0x209] sm:$0xff]  ;;  %1044 = vst.msk [vmem:[#allocation2 + $0x368] sm:$0xff] %vm995_vm3, %v899_v53  ;;  %3956 = vmatpush1.bf16.msra.mxu0 %v8114_v25  ;;  %v8116_v53 = vld [vmem:[%s12893_s1 + $0x1b8] sm:$0xff]  }
 0x1fb   : > { %1819 = vst.msk [vmem:[#allocation3 + $0x658] sm:$0xff] %vm1156_vm2, %v9953_v45  ;;  %1436 = vst.msk [vmem:[#allocation3 + $0x688] sm:$0xff] %vm1156_vm2, %v9953_v45  ;;  %v9971_v58 = vpack.c.bf16 %v1732_v33, %v1731_v57  ;;  %v8115_v38 = vld [vmem:[%s12893_s1 + $0x1b0] sm:$0xff]   ;;  %3957 = vmatprep.subr.bf16.mxu0 %v8530_v6  ;;  %v2255_v44 = vld [vmem:[#allocation3 + $0x148] sm:$0xff]  ;;  %v917_v33 = vpop.permute.xlu1 %916 }
 0x1fc   : > { %1556 = vst.msk [vmem:[#allocation3 + $0x450] sm:$0xff] %vm1156_vm2, %v1524_v55  ;;  %1684 = vst.msk [vmem:[#allocation3 + $0x458] sm:$0xff] %vm1156_vm2, %v1652_v56  ;;  %v1238_v60 = vld [vmem:[#allocation2 + $0x350] sm:$0xff]  ;;  %v1108_v63 = vld [vmem:[#allocation2 + $0x347] sm:$0xff]  ;;  %3207 = vmatmul.mubr.bf16.gmra.mrb[48].mxu1 %v2322_v19  ;;  %3713 = vmatmul.mubr.bf16.gmra.mrb[12].mxu0 %v2245_v42 }
 0x1fd   : > { %1940 = vst.msk [vmem:[#allocation3 + $0x420] sm:$0xff] %vm1156_vm2, %v1524_v55  ;;  %2068 = vst.msk [vmem:[#allocation3 + $0x428] sm:$0xff] %vm1156_vm2, %v1652_v56  ;;  %v1366_v61 = vld [vmem:[#allocation2 + $0x351] sm:$0xff]  ;;  %v1237_v2 = vld [vmem:[#allocation2 + $0x348] sm:$0xff]  ;;  %3720 = vmatprep.mubr.bf16.mxu0 %v2255_v44  ;;  %3214 = vmatprep.mubr.bf16.mxu1 %v2332_v37 }
 0x1fe   : > { %v1109_v1 = vld [vmem:[#allocation2 + $0x34f] sm:$0xff]  ;;  %1047 = vst.msk [vmem:[#allocation2 + $0x390] sm:$0xff] %vm995_vm3, %v905_v62  ;;  %v1277_v8 = vpack.c.bf16 %v1238_v60, %v1237_v2  ;;  %1046 = vst.msk [vmem:[#allocation2 + $0x388] sm:$0xff] %vm995_vm3, %v903_v3  ;;  %3958 = vmatpush1.bf16.msra.mxu0 %v8115_v38  ;;  %v919_v3 = vpop.permute.xlu0 %918  ;;  %v8117_v5 = vld [vmem:[%s12893_s1 + $0x1c0] sm:$0xff]  }
 0x1ff   : > { %1812 = vst.msk [vmem:[#allocation3 + $0x460] sm:$0xff] %vm1156_vm2, %v9971_v58  ;;  %v1148_v7 = vpack.c.bf16 %v1109_v1, %v1108_v63  ;;  %v1365_v9 = vld [vmem:[#allocation2 + $0x349] sm:$0xff]  ;;  %3959 = vmatprep.subr.bf16.mxu0 %v8530_v6  ;;  %v921_v62 = vpop.permute.xlu1 %920  ;;  %v2254_v10 = vld [vmem:[#allocation3 + $0x140] sm:$0xff]  ;;  %2198 = vst.msk [vmem:[#allocation3 + $0x4c0] sm:$0xff] %vm1156_vm2, %v9864_v36 }
 0x200   : > { %v9985_v11 = vpack.c.bf16 %v1366_v61, %v1365_v9  ;;  %1309 = vst.msk [vmem:[#allocation3 + $0x6c8] sm:$0xff] %vm1156_vm2, %v1277_v8  ;;  %1692 = vst.msk [vmem:[#allocation3 + $0x698] sm:$0xff] %vm1156_vm2, %v1277_v8  ;;  %v2331_v59 = vld [vmem:[#allocation3 + $0x3a8] sm:$0xff]  ;;  %v2376_v36 = vld [vmem:[#allocation3 + $0x510] sm:$0xff] }
 0x201   : > { %1181 = vst.msk [vmem:[#allocation3 + $0x6c0] sm:$0xff] %vm1156_vm2, %v1148_v7  ;;  %1564 = vst.msk [vmem:[#allocation3 + $0x690] sm:$0xff] %vm1156_vm2, %v1148_v7  ;;  %v1240_v14 = vld [vmem:[#allocation2 + $0x370] sm:$0xff]  ;;  %v1110_v20 = vld [vmem:[#allocation2 + $0x367] sm:$0xff] }
 0x202   : > { %1948 = vst.msk [vmem:[#allocation3 + $0x660] sm:$0xff] %vm1156_vm2, %v1148_v7  ;;  %2076 = vst.msk [vmem:[#allocation3 + $0x668] sm:$0xff] %vm1156_vm2, %v1277_v8  ;;  %v1368_v12 = vld [vmem:[#allocation2 + $0x371] sm:$0xff]  ;;  %v1239_v23 = vld [vmem:[#allocation2 + $0x368] sm:$0xff]  ;;  %3960 = vmatpush1.bf16.msra.mxu0 %v8116_v53  ;;  %v923_v25 = vpop.permute.xlu0 %922 }
 0x203   : > { %v1111_v21 = vld [vmem:[#allocation2 + $0x36f] sm:$0xff]  ;;  %1049 = vst.msk [vmem:[#allocation2 + $0x3b0] sm:$0xff] %vm995_vm3, %v909_v17  ;;  %v1278_v15 = vpack.c.bf16 %v1240_v14, %v1239_v23  ;;  %1048 = vst.msk [vmem:[#allocation2 + $0x3a8] sm:$0xff] %vm995_vm3, %v907_v22  ;;  %3961 = vmatprep.subr.bf16.mxu0 %v8530_v6 }
 0x204   : > { %1820 = vst.msk [vmem:[#allocation3 + $0x6a0] sm:$0xff] %vm1156_vm2, %v9985_v11  ;;  %1437 = vst.msk [vmem:[#allocation3 + $0x6d0] sm:$0xff] %vm1156_vm2, %v9985_v11  ;;  %v1149_v26 = vpack.c.bf16 %v1111_v21, %v1110_v20  ;;  %v1367_v27 = vld [vmem:[#allocation2 + $0x369] sm:$0xff]  ;;  %3215 = vmatmul.mubr.bf16.gmra.mrb[52].mxu1 %v2331_v59  ;;  %3721 = vmatmul.mubr.bf16.gmra.mrb[16].mxu0 %v2254_v10  ;;  %v925_v20 = vpop.permute.xlu1 %924  ;;  %v8120_v59 = vld [vmem:[%s12893_s1 + $0x1d8] sm:$0xff]  }
 0x205   : > { %v10003_v28 = vpack.c.bf16 %v1368_v12, %v1367_v27  ;;  %1310 = vst.msk [vmem:[#allocation3 + $0x710] sm:$0xff] %vm1156_vm2, %v1278_v15  ;;  %1693 = vst.msk [vmem:[#allocation3 + $0x6e0] sm:$0xff] %vm1156_vm2, %v1278_v15  ;;  %v1242_v16 = vld [vmem:[#allocation2 + $0x390] sm:$0xff]  ;;  %v1112_v31 = vld [vmem:[#allocation2 + $0x387] sm:$0xff]  ;;  %3222 = vmatprep.mubr.bf16.mxu1 %v2341_v4 }
 0x206   : > { %1182 = vst.msk [vmem:[#allocation3 + $0x708] sm:$0xff] %vm1156_vm2, %v1149_v26  ;;  %1565 = vst.msk [vmem:[#allocation3 + $0x6d8] sm:$0xff] %vm1156_vm2, %v1149_v26  ;;  %v1370_v29 = vld [vmem:[#allocation2 + $0x391] sm:$0xff]  ;;  %v1241_v34 = vld [vmem:[#allocation2 + $0x388] sm:$0xff]  ;;  %3962 = vmatpush1.bf16.msra.mxu0 %v8117_v5 }
 0x207   : > { %1949 = vst.msk [vmem:[#allocation3 + $0x6a8] sm:$0xff] %vm1156_vm2, %v1149_v26  ;;  %2077 = vst.msk [vmem:[#allocation3 + $0x6b0] sm:$0xff] %vm1156_vm2, %v1278_v15  ;;  %v1113_v32 = vld [vmem:[#allocation2 + $0x38f] sm:$0xff]  ;;  %v1279_v40 = vpack.c.bf16 %v1242_v16, %v1241_v34  ;;  %3963 = vmatprep.subr.bf16.mxu0 %v8530_v6  ;;  %v2377_v4 = vld [vmem:[#allocation3 + $0x518] sm:$0xff] }
 0x208   : > { %1051 = vst.msk [vmem:[#allocation2 + $0x3d0] sm:$0xff] %vm995_vm3, %v913_v30  ;;  %v1150_v39 = vpack.c.bf16 %v1113_v32, %v1112_v31  ;;  %v1369_v41 = vld [vmem:[#allocation2 + $0x389] sm:$0xff]  ;;  %1050 = vst.msk [vmem:[#allocation2 + $0x3c8] sm:$0xff] %vm995_vm3, %v911_v35  ;;  %v2350_v35 = vld [vmem:[#allocation3 + $0x440] sm:$0xff] }
 0x209   : > { %1821 = vst.msk [vmem:[#allocation3 + $0x6e8] sm:$0xff] %vm1156_vm2, %v10003_v28  ;;  %1438 = vst.msk [vmem:[#allocation3 + $0x718] sm:$0xff] %vm1156_vm2, %v10003_v28  ;;  %v1790_v43 = vpack.c.bf16 %v1370_v29, %v1369_v41  ;;  %v2264_v14 = vld [vmem:[#allocation3 + $0x190] sm:$0xff]  ;;  %v8118_v19 = vld [vmem:[%s12893_s1 + $0x1c8] sm:$0xff]  }
 0x20a   : > { %1183 = vst.msk [vmem:[#allocation3 + $0x750] sm:$0xff] %vm1156_vm2, %v1150_v39  ;;  %1311 = vst.msk [vmem:[#allocation3 + $0x758] sm:$0xff] %vm1156_vm2, %v1279_v40  ;;  %v1244_v46 = vld [vmem:[#allocation2 + $0x3b0] sm:$0xff]  ;;  %v1114_v48 = vld [vmem:[#allocation2 + $0x3a7] sm:$0xff]  ;;  %3728 = vmatprep.mubr.bf16.mxu0 %v2264_v14  ;;  %3964 = vmatpush1.bf16.msra.mxu0 %v8118_v19 }
 0x20b   : > { %1566 = vst.msk [vmem:[#allocation3 + $0x720] sm:$0xff] %vm1156_vm2, %v1150_v39  ;;  %1694 = vst.msk [vmem:[#allocation3 + $0x728] sm:$0xff] %vm1156_vm2, %v1279_v40  ;;  %v1372_v47 = vld [vmem:[#allocation2 + $0x3b1] sm:$0xff]  ;;  %v1243_v50 = vld [vmem:[#allocation2 + $0x3a8] sm:$0xff]  ;;  %3965 = vmatprep.subr.bf16.mxu0 %v8530_v6 }
 0x20c   : > { %1950 = vst.msk [vmem:[#allocation3 + $0x6f0] sm:$0xff] %vm1156_vm2, %v1150_v39  ;;  %2078 = vst.msk [vmem:[#allocation3 + $0x6f8] sm:$0xff] %vm1156_vm2, %v1279_v40  ;;  %v1115_v49 = vld [vmem:[#allocation2 + $0x3af] sm:$0xff]  ;;  %v1280_v55 = vpack.c.bf16 %v1244_v46, %v1243_v50  ;;  %v2290_v5 = vld [vmem:[#allocation3 + $0x260] sm:$0xff] }
 0x20d   : > { %1053 = vst.msk [vmem:[#allocation2 + $0x3f0] sm:$0xff] %vm995_vm3, %v917_v33  ;;  %v1151_v54 = vpack.c.bf16 %v1115_v49, %v1114_v48  ;;  %v1371_v56 = vld [vmem:[#allocation2 + $0x3a9] sm:$0xff]  ;;  %1052 = vst.msk [vmem:[#allocation2 + $0x3e8] sm:$0xff] %vm995_vm3, %v915_v52  ;;  %v2349_v52 = vld [vmem:[#allocation3 + $0x438] sm:$0xff] }
 0x20e   : > { %1822 = vst.msk [vmem:[#allocation3 + $0x730] sm:$0xff] %vm1156_vm2, %v1790_v43  ;;  %1439 = vst.msk [vmem:[#allocation3 + $0x760] sm:$0xff] %vm1156_vm2, %v1790_v43  ;;  %v1791_v57 = vpack.c.bf16 %v1372_v47, %v1371_v56  ;;  %v2340_v29 = vld [vmem:[#allocation3 + $0x3f0] sm:$0xff]  ;;  %v2263_v40 = vld [vmem:[#allocation3 + $0x188] sm:$0xff] }
 0x20f   : > { %2206 = vst.msk [vmem:[#allocation3 + $0x700] sm:$0xff] %vm1156_vm2, %v1790_v43  ;;  %1184 = vst.msk [vmem:[#allocation3 + $0x798] sm:$0xff] %vm1156_vm2, %v1151_v54  ;;  %v1246_v60 = vld [vmem:[#allocation2 + $0x3d0] sm:$0xff]  ;;  %v1116_v63 = vld [vmem:[#allocation2 + $0x3c7] sm:$0xff]  ;;  %3223 = vmatmul.mubr.bf16.gmra.mrb[56].mxu1 %v2340_v29  ;;  %3729 = vmatmul.mubr.bf16.gmra.mrb[20].mxu0 %v2263_v40 }
 0x210   : > { %1312 = vst.msk [vmem:[#allocation3 + $0x7a0] sm:$0xff] %vm1156_vm2, %v1280_v55  ;;  %1567 = vst.msk [vmem:[#allocation3 + $0x768] sm:$0xff] %vm1156_vm2, %v1151_v54  ;;  %v1374_v61 = vld [vmem:[#allocation2 + $0x3d1] sm:$0xff]  ;;  %v1245_v2 = vld [vmem:[#allocation2 + $0x3c8] sm:$0xff]  ;;  %3230 = vmatprep.mubr.bf16.mxu1 %v2350_v35 }
 0x211   : > { %1695 = vst.msk [vmem:[#allocation3 + $0x770] sm:$0xff] %vm1156_vm2, %v1280_v55  ;;  %1951 = vst.msk [vmem:[#allocation3 + $0x738] sm:$0xff] %vm1156_vm2, %v1151_v54  ;;  %v1117_v1 = vld [vmem:[#allocation2 + $0x3cf] sm:$0xff]  ;;  %v1281_v8 = vpack.c.bf16 %v1246_v60, %v1245_v2  ;;  %v2273_v43 = vld [vmem:[#allocation3 + $0x1d8] sm:$0xff] }
 0x212   : > { %2079 = vst.msk [vmem:[#allocation3 + $0x740] sm:$0xff] %vm1156_vm2, %v1280_v55  ;;  %1823 = vst.msk [vmem:[#allocation3 + $0x778] sm:$0xff] %vm1156_vm2, %v1791_v57  ;;  %v1152_v7 = vpack.c.bf16 %v1117_v1, %v1116_v63  ;;  %v1373_v9 = vld [vmem:[#allocation2 + $0x3c9] sm:$0xff]  ;;  %3736 = vmatprep.mubr.bf16.mxu0 %v2273_v43  ;;  %v2281_v63 = vld [vmem:[#allocation3 + $0x218] sm:$0xff] }
 0x213   : > { %1055 = vst.msk [vmem:[#allocation2 + $0x410] sm:$0xff] %vm995_vm3, %v921_v62  ;;  %1054 = vst.msk [vmem:[#allocation2 + $0x408] sm:$0xff] %vm995_vm3, %v919_v3  ;;  %v1792_v13 = vpack.c.bf16 %v1374_v61, %v1373_v9  ;;  %v8119_v39 = vld [vmem:[%s12893_s1 + $0x1d0] sm:$0xff]   ;;  %v2359_v53 = vld [vmem:[#allocation3 + $0x488] sm:$0xff] }
 0x214   : > { %1440 = vst.msk [vmem:[#allocation3 + $0x7a8] sm:$0xff] %vm1156_vm2, %v1791_v57  ;;  %2207 = vst.msk [vmem:[#allocation3 + $0x748] sm:$0xff] %vm1156_vm2, %v1791_v57  ;;  %v1248_v12 = vld [vmem:[#allocation2 + $0x3f0] sm:$0xff]  ;;  %v1118_v21 = vld [vmem:[#allocation2 + $0x3e7] sm:$0xff]  ;;  %3966 = vmatpush1.bf16.msra.mxu0 %v8119_v39 }
 0x215   : > { %1185 = vst.msk [vmem:[#allocation3 + $0x7e0] sm:$0xff] %vm1156_vm2, %v1152_v7  ;;  %1313 = vst.msk [vmem:[#allocation3 + $0x7e8] sm:$0xff] %vm1156_vm2, %v1281_v8  ;;  %v1376_v17 = vld [vmem:[#allocation2 + $0x3f1] sm:$0xff]  ;;  %v1247_v22 = vld [vmem:[#allocation2 + $0x3e8] sm:$0xff]  ;;  %3967 = vmatprep.subr.bf16.mxu0 %v8530_v6 }
 0x216   : > { %1568 = vst.msk [vmem:[#allocation3 + $0x7b0] sm:$0xff] %vm1156_vm2, %v1152_v7  ;;  %1696 = vst.msk [vmem:[#allocation3 + $0x7b8] sm:$0xff] %vm1156_vm2, %v1281_v8  ;;  %v1119_v23 = vld [vmem:[#allocation2 + $0x3ef] sm:$0xff]  ;;  %v1282_v15 = vpack.c.bf16 %v1248_v12, %v1247_v22  ;;  %v2282_v57 = vld [vmem:[#allocation3 + $0x220] sm:$0xff] }
 0x217   : > { %1952 = vst.msk [vmem:[#allocation3 + $0x780] sm:$0xff] %vm1156_vm2, %v1152_v7  ;;  %2080 = vst.msk [vmem:[#allocation3 + $0x788] sm:$0xff] %vm1156_vm2, %v1281_v8  ;;  %v1153_v26 = vpack.c.bf16 %v1119_v23, %v1118_v21  ;;  %v1375_v27 = vld [vmem:[#allocation2 + $0x3e9] sm:$0xff]  ;;  %3231 = vmatmul.mubr.bf16.gmra.mrb[60].mxu1 %v2349_v52  ;;  %v2358_v61 = vld [vmem:[#allocation3 + $0x480] sm:$0xff] }
 0x218   : > { %1057 = vst.msk [vmem:[#allocation2 + $0x430] sm:$0xff] %vm995_vm3, %v925_v20  ;;  %1056 = vst.msk [vmem:[#allocation2 + $0x428] sm:$0xff] %vm995_vm3, %v923_v25  ;;  %v1793_v16 = vpack.c.bf16 %v1376_v17, %v1375_v27  ;;  %v2272_v54 = vld [vmem:[#allocation3 + $0x1d0] sm:$0xff]  ;;  %3238 = vmatprep.mubr.bf16.mxu1 %v2359_v53  ;;  %3968 = vmatpush1.bf16.msra.mxu0 %v8120_v59  ;;  %v2291_v1 = vld [vmem:[#allocation3 + $0x268] sm:$0xff] }
 0x219   : > { %1824 = vst.msk [vmem:[#allocation3 + $0x7c0] sm:$0xff] %vm1156_vm2, %v1792_v13  ;;  %1441 = vst.msk [vmem:[#allocation3 + $0x7f0] sm:$0xff] %vm1156_vm2, %v1792_v13  ;;  %3737 = vmatmul.mubr.bf16.gmra.mrb[24].mxu0 %v2272_v54  ;;  %3969 = vmatprep.subr.bf16.mxu0 %v8530_v6  ;;  %v2368_v62 = vld [vmem:[#allocation3 + $0x4d0] sm:$0xff]  ;;  %v10107_v2 = vld [vmem:[%s12893_s1 + $0x200] sm:$0xff]  }
 0x21a   : > { %2208 = vst.msk [vmem:[#allocation3 + $0x790] sm:$0xff] %vm1156_vm2, %v1792_v13  ;;  %1186 = vst.msk [vmem:[#allocation3 + $0x828] sm:$0xff] %vm1156_vm2, %v1153_v26  ;;  %v1250_v30 = vld [vmem:[#allocation2 + $0x410] sm:$0xff]  ;;  %v1120_v31 = vld [vmem:[#allocation2 + $0x407] sm:$0xff]  ;;  %3744 = vmatprep.mubr.bf16.mxu0 %v2282_v57  ;;  %7615 = vmatprep.subr.bf16.mxu1 %v10107_v2 }
 0x21b   : > { %1314 = vst.msk [vmem:[#allocation3 + $0x830] sm:$0xff] %vm1156_vm2, %v1282_v15  ;;  %1569 = vst.msk [vmem:[#allocation3 + $0x7f8] sm:$0xff] %vm1156_vm2, %v1153_v26  ;;  %v1121_v32 = vld [vmem:[#allocation2 + $0x40f] sm:$0xff]  ;;  %v8122_v8 = vld [vmem:[%s12893_s1 + $0x1e0] sm:$0xff]  }
 0x21c   : > { %1697 = vst.msk [vmem:[#allocation3 + $0x800] sm:$0xff] %vm1156_vm2, %v1282_v15  ;;  %1953 = vst.msk [vmem:[#allocation3 + $0x7c8] sm:$0xff] %vm1156_vm2, %v1153_v26  ;;  %v1249_v34 = vld [vmem:[#allocation2 + $0x408] sm:$0xff]  ;;  %v1154_v37 = vpack.c.bf16 %v1121_v32, %v1120_v31  ;;  %v1378_v41 = vld [vmem:[#allocation2 + $0x411] sm:$0xff]  ;;  %3970 = vmatpush1.bf16.msra.mxu0 %v8122_v8 }
 0x21d   : > { %2081 = vst.msk [vmem:[#allocation3 + $0x7d0] sm:$0xff] %vm1156_vm2, %v1282_v15  ;;  %1825 = vst.msk [vmem:[#allocation3 + $0x808] sm:$0xff] %vm1156_vm2, %v1793_v16  ;;  %v1283_v38 = vpack.c.bf16 %v1250_v30, %v1249_v34  ;;  %v1377_v42 = vld [vmem:[#allocation2 + $0x409] sm:$0xff]  ;;  %3971 = vmatprep.subr.bf16.mxu0 %v8530_v6  ;;  %v2386_v9 = vld [vmem:[#allocation3 + $0x560] sm:$0xff] }
 0x21e   : > { %1442 = vst.msk [vmem:[#allocation3 + $0x838] sm:$0xff] %vm1156_vm2, %v1793_v16  ;;  %2209 = vst.msk [vmem:[#allocation3 + $0x7d8] sm:$0xff] %vm1156_vm2, %v1793_v16  ;;  %v1794_v50 = vpack.c.bf16 %v1378_v41, %v1377_v42  ;;  %v2367_v3 = vld [vmem:[#allocation3 + $0x4c8] sm:$0xff]  ;;  %v2300_v7 = vld [vmem:[#allocation3 + $0x2b0] sm:$0xff] }
 0x21f   : > { %1187 = vst.msk [vmem:[#allocation3 + $0x870] sm:$0xff] %vm1156_vm2, %v1154_v37  ;;  %1315 = vst.msk [vmem:[#allocation3 + $0x878] sm:$0xff] %vm1156_vm2, %v1283_v38  ;;  %v1252_v44 = vld [vmem:[#allocation2 + $0x430] sm:$0xff]  ;;  %v1122_v46 = vld [vmem:[#allocation2 + $0x427] sm:$0xff]  ;;  %3239 = vmatmul.mubr.bf16.gmra.mrb[64].mxu1 %v2358_v61 }
 0x220   : > { %1570 = vst.msk [vmem:[#allocation3 + $0x840] sm:$0xff] %vm1156_vm2, %v1154_v37  ;;  %1698 = vst.msk [vmem:[#allocation3 + $0x848] sm:$0xff] %vm1156_vm2, %v1283_v38  ;;  %v1123_v47 = vld [vmem:[#allocation2 + $0x42f] sm:$0xff]  ;;  %3246 = vmatprep.mubr.bf16.mxu1 %v2368_v62  ;;  %v2309_v13 = vld [vmem:[#allocation3 + $0x2f8] sm:$0xff] }
 0x221   : > { %1954 = vst.msk [vmem:[#allocation3 + $0x810] sm:$0xff] %vm1156_vm2, %v1154_v37  ;;  %2082 = vst.msk [vmem:[#allocation3 + $0x818] sm:$0xff] %vm1156_vm2, %v1283_v38  ;;  %v1251_v33 = vld [vmem:[#allocation2 + $0x428] sm:$0xff]  ;;  %v1155_v48 = vpack.c.bf16 %v1123_v47, %v1122_v46  ;;  %v1380_v55 = vld [vmem:[#allocation2 + $0x431] sm:$0xff]  ;;  %3745 = vmatmul.mubr.bf16.gmra.mrb[28].mxu0 %v2281_v63 }
 0x222   : > { %v1284_v49 = vpack.c.bf16 %v1252_v44, %v1251_v33  ;;  %1826 = vst.msk [vmem:[#allocation3 + $0x850] sm:$0xff] %vm1156_vm2, %v1794_v50  ;;  %1443 = vst.msk [vmem:[#allocation3 + $0x880] sm:$0xff] %vm1156_vm2, %v1794_v50  ;;  %v1379_v56 = vld [vmem:[#allocation2 + $0x429] sm:$0xff]  ;;  %3752 = vmatprep.mubr.bf16.mxu0 %v2291_v1  ;;  %v2385_v14 = vld [vmem:[#allocation3 + $0x558] sm:$0xff] }
 0x223   : > { %1188 = vst.msk [vmem:[#allocation3 + $0x8b8] sm:$0xff] %vm1156_vm2, %v1155_v48  ;;  %1571 = vst.msk [vmem:[#allocation3 + $0x888] sm:$0xff] %vm1156_vm2, %v1155_v48  ;;  %v1795_v60 = vpack.c.bf16 %v1380_v55, %v1379_v56  ;;  %v2299_v10 = vld [vmem:[#allocation3 + $0x2a8] sm:$0xff]  ;;  %v2308_v17 = vld [vmem:[#allocation3 + $0x2f0] sm:$0xff] }
 0x224   : > { %1316 = vst.msk [vmem:[#allocation3 + $0x8c0] sm:$0xff] %vm1156_vm2, %v1284_v49  ;;  %1699 = vst.msk [vmem:[#allocation3 + $0x890] sm:$0xff] %vm1156_vm2, %v1284_v49  ;;  %v2395_v12 = vld [vmem:[#allocation3 + $0x5a8] sm:$0xff]  ;;  %v2318_v20 = vld [vmem:[#allocation3 + $0x340] sm:$0xff] }
 0x225   : > { %1955 = vst.msk [vmem:[#allocation3 + $0x858] sm:$0xff] %vm1156_vm2, %v1155_v48  ;;  %2083 = vst.msk [vmem:[#allocation3 + $0x860] sm:$0xff] %vm1156_vm2, %v1284_v49  ;;  %v8123_v23 = vld [vmem:[%s12893_s1 + $0x1e8] sm:$0xff]   ;;  %v2394_v25 = vld [vmem:[#allocation3 + $0x5a0] sm:$0xff] }
 0x226   : > { %2210 = vst.msk [vmem:[#allocation3 + $0x820] sm:$0xff] %vm1156_vm2, %v1794_v50  ;;  %1827 = vst.msk [vmem:[#allocation3 + $0x898] sm:$0xff] %vm1156_vm2, %v1795_v60  ;;  %3972 = vmatpush1.bf16.msra.mxu0 %v8123_v23  ;;  %v2404_v26 = vld [vmem:[#allocation3 + $0x5f0] sm:$0xff]  ;;  %v2317_v15 = vld [vmem:[#allocation3 + $0x338] sm:$0xff] }
 0x227   : > { %1444 = vst.msk [vmem:[#allocation3 + $0x8c8] sm:$0xff] %vm1156_vm2, %v1795_v60  ;;  %2211 = vst.msk [vmem:[#allocation3 + $0x868] sm:$0xff] %vm1156_vm2, %v1795_v60  ;;  %3247 = vmatmul.mubr.bf16.gmra.mrb[68].mxu1 %v2367_v3  ;;  %3973 = vmatprep.subr.bf16.mxu0 %v8530_v6  ;;  %v2327_v27 = vld [vmem:[#allocation3 + $0x388] sm:$0xff]  ;;  %v2413_v19 = vld [vmem:[#allocation3 + $0x638] sm:$0xff] }
 0x228   : > { %2199 = vst.msk [vmem:[#allocation3 + $0x508] sm:$0xff] %vm1156_vm2, %v9884_v51  ;;  %3254 = vmatprep.mubr.bf16.mxu1 %v2377_v4  ;;  %2200 = vst.msk [vmem:[#allocation3 + $0x550] sm:$0xff] %vm1156_vm2, %v9902_v0  ;;  %v10118_v51 = vpop.f32.mrb[0].mxu1  ;;  %v2326_v16 = vld [vmem:[#allocation3 + $0x380] sm:$0xff]  ;;  %v2336_v29 = vld [vmem:[#allocation3 + $0x3d0] sm:$0xff] }
 0x229   : > { %3753 = vmatmul.mubr.bf16.gmra.mrb[32].mxu0 %v2290_v5  ;;  %v3114_v21 = vpop.f32.mrb[1].mxu1  ;;  %2201 = vst.msk [vmem:[#allocation3 + $0x598] sm:$0xff] %vm1156_vm2, %v9920_v18  ;;  %2202 = vst.msk [vmem:[#allocation3 + $0x5e0] sm:$0xff] %vm1156_vm2, %v9935_v24  ;;  %v2403_v18 = vld [vmem:[#allocation3 + $0x5e8] sm:$0xff]  ;;  %v8125_v30 = vld [vmem:[%s12893_s1 + $0x1f0] sm:$0xff]  }
 0x22a   : > { %3760 = vmatprep.mubr.bf16.mxu0 %v2300_v7  ;;  %v10125_v0 = vpop.f32.mrb[2].mxu1  ;;  %2203 = vst.msk [vmem:[#allocation3 + $0x628] sm:$0xff] %vm1156_vm2, %v9953_v45  ;;  %3974 = vmatpush1.bf16.msra.mxu0 %v8125_v30  ;;  %2196 = vst.msk [vmem:[#allocation3 + $0x430] sm:$0xff] %vm1156_vm2, %v9971_v58  ;;  %v2412_v24 = vld [vmem:[#allocation3 + $0x630] sm:$0xff]  ;;  %v2422_v32 = vld [vmem:[#allocation3 + $0x680] sm:$0xff] }
 0x22b   : > { %v3117_v22 = vpop.f32.mrb[3].mxu1  ;;  %3975 = vmatprep.subr.bf16.mxu0 %v8530_v6  ;;  %v2335_v45 = vld [vmem:[#allocation3 + $0x3c8] sm:$0xff]  ;;  %v2345_v34 = vld [vmem:[#allocation3 + $0x418] sm:$0xff]  ;;  %2204 = vst.msk [vmem:[#allocation3 + $0x670] sm:$0xff] %vm1156_vm2, %v9985_v11  ;;  %v2354_v58 = vld [vmem:[#allocation3 + $0x460] sm:$0xff] }
 0x22c   : > { %v2421_v6 = vld [vmem:[#allocation3 + $0x678] sm:$0xff]  ;;  %v2431_v37 = vld [vmem:[#allocation3 + $0x6c8] sm:$0xff]  ;;  %v2344_v38 = vld [vmem:[#allocation3 + $0x410] sm:$0xff]  ;;  %2205 = vst.msk [vmem:[#allocation3 + $0x6b8] sm:$0xff] %vm1156_vm2, %v10003_v28 }
 0x22d   : > { %v8127_v41 = vld [vmem:[%s12893_s1 + $0x1f8] sm:$0xff]   ;;  %v1349_v33 = vld [vmem:[#allocation2 + $0x249] sm:$0xff]  ;;  %v2430_v28 = vld [vmem:[#allocation3 + $0x6c0] sm:$0xff] }
 0x22e   : > { %3976 = vmatpush1.bf16.msra.mxu0 %v8127_v41  ;;  %v1350_v48 = vld [vmem:[#allocation2 + $0x251] sm:$0xff]  ;;  %v2363_v54 = vld [vmem:[#allocation3 + $0x4a8] sm:$0xff]  ;;  %v2362_v57 = vld [vmem:[#allocation3 + $0x4a0] sm:$0xff] }
 0x22f   : > { %3255 = vmatmul.mubr.bf16.gmra.mrb[72].mxu1 %v2376_v36  ;;  %v1397_v50 = vpack.c.bf16 %v1350_v48, %v1349_v33  ;;  %v2353_v52 = vld [vmem:[#allocation3 + $0x458] sm:$0xff]  ;;  %v2440_v53 = vld [vmem:[#allocation3 + $0x710] sm:$0xff]  ;;  %v2439_v55 = vld [vmem:[#allocation3 + $0x708] sm:$0xff] }
 0x230   : > { %3262 = vmatprep.mubr.bf16.mxu1 %v2386_v9  ;;  %v2449_v56 = vld [vmem:[#allocation3 + $0x758] sm:$0xff]  ;;  %v2372_v59 = vld [vmem:[#allocation3 + $0x4f0] sm:$0xff]  ;;  %v2458_v61 = vld [vmem:[#allocation3 + $0x7a0] sm:$0xff] }
 0x231   : > { %3761 = vmatmul.mubr.bf16.gmra.mrb[36].mxu0 %v2299_v10  ;;  %1429 = vst.msk [vmem:[#allocation3 + $0x490] sm:$0xff] %vm1156_vm2, %v1397_v50  ;;  %v2448_v60 = vld [vmem:[#allocation3 + $0x750] sm:$0xff]  ;;  %v2371_v62 = vld [vmem:[#allocation3 + $0x4e8] sm:$0xff]  ;;  %v2381_v63 = vld [vmem:[#allocation3 + $0x538] sm:$0xff] }
 0x232   : > { %3768 = vmatprep.mubr.bf16.mxu0 %v2309_v13  ;;  %v2457_v1 = vld [vmem:[#allocation3 + $0x798] sm:$0xff]  ;;  %v2467_v3 = vld [vmem:[#allocation3 + $0x7e8] sm:$0xff]  ;;  %v2380_v4 = vld [vmem:[#allocation3 + $0x530] sm:$0xff] }
 0x233   : > { %v2390_v5 = vld [vmem:[#allocation3 + $0x580] sm:$0xff]  ;;  %v2476_v13 = vld [vmem:[#allocation3 + $0x830] sm:$0xff]  ;;  %v2475_v23 = vld [vmem:[#allocation3 + $0x828] sm:$0xff] }
 0x234   : > { %v2466_v9 = vld [vmem:[#allocation3 + $0x7e0] sm:$0xff]  ;;  %v8126_v48 = vld [vmem:[%s12893_s1 + $0x210] sm:$0xff]  }
 0x235   : > { %v2494_v30 = vld [vmem:[#allocation3 + $0x8c0] sm:$0xff] }
 0x237   : > { %3263 = vmatmul.mubr.bf16.gmra.mrb[76].mxu1 %v2385_v14  ;;  %v2389_v14 = vld [vmem:[#allocation3 + $0x578] sm:$0xff] }
 0x238   : > { %3270 = vmatprep.mubr.bf16.mxu1 %v2395_v12  ;;  %v2399_v12 = vld [vmem:[#allocation3 + $0x5c8] sm:$0xff] }
 0x239   : > { %3769 = vmatmul.mubr.bf16.gmra.mrb[40].mxu0 %v2308_v17 }
 0x23a   : > { %3776 = vmatprep.mubr.bf16.mxu0 %v2318_v20 }
 0x23b   : > { %v929_v31 = vpop.permute.xlu1 %928 }
 0x23c   : > { %1059 = vst.msk [vmem:[#allocation2 + $0x450] sm:$0xff] %vm995_vm3, %v929_v31  ;;  %v2417_v31 = vld [vmem:[#allocation3 + $0x658] sm:$0xff] }
 0x23f   : > { %3271 = vmatmul.mubr.bf16.gmra.mrb[80].mxu1 %v2394_v25  ;;  %v2485_v25 = vld [vmem:[#allocation3 + $0x878] sm:$0xff] }
 0x240   : > { %3278 = vmatprep.mubr.bf16.mxu1 %v2404_v26  ;;  %v927_v35 = vpop.permute.xlu0 %926  ;;  %v2398_v26 = vld [vmem:[#allocation3 + $0x5c0] sm:$0xff] }
 0x241   : > { %3777 = vmatmul.mubr.bf16.gmra.mrb[44].mxu0 %v2317_v15  ;;  %1058 = vst.msk [vmem:[#allocation2 + $0x448] sm:$0xff] %vm995_vm3, %v927_v35  ;;  %v2408_v15 = vld [vmem:[#allocation3 + $0x610] sm:$0xff]  ;;  %v2493_v35 = vld [vmem:[#allocation3 + $0x8b8] sm:$0xff] }
 0x242   : > { %3784 = vmatprep.mubr.bf16.mxu0 %v2327_v27 }
 0x243   : > { %v1636_v39 = vld [vmem:[#allocation2 + $0x450] sm:$0xff] }
 0x244   : > { %v1764_v40 = vld [vmem:[#allocation2 + $0x451] sm:$0xff] }
 0x247   : > { %3279 = vmatmul.mubr.bf16.gmra.mrb[84].mxu1 %v2403_v18 }
 0x248   : > { %3286 = vmatprep.mubr.bf16.mxu1 %v2413_v19  ;;  %v1507_v11 = vld [vmem:[#allocation2 + $0x447] sm:$0xff]  ;;  %v1508_v42 = vld [vmem:[#allocation2 + $0x44f] sm:$0xff] }
 0x249   : > { %3785 = vmatmul.mubr.bf16.gmra.mrb[48].mxu0 %v2326_v16  ;;  %v1635_v43 = vld [vmem:[#allocation2 + $0x448] sm:$0xff]  ;;  %v1540_v44 = vpack.c.bf16 %v1508_v42, %v1507_v11  ;;  %v2484_v16 = vld [vmem:[#allocation3 + $0x870] sm:$0xff] }
 0x24a   : > { %3792 = vmatprep.mubr.bf16.mxu0 %v2336_v29  ;;  %v1668_v46 = vpack.c.bf16 %v1636_v39, %v1635_v43  ;;  %v1763_v47 = vld [vmem:[#allocation2 + $0x449] sm:$0xff]  ;;  %v2425_v43 = vld [vmem:[#allocation3 + $0x698] sm:$0xff] }
 0x24b   : > { %v1796_v49 = vpack.c.bf16 %v1764_v40, %v1763_v47  ;;  %1572 = vst.msk [vmem:[#allocation3 + $0x8d0] sm:$0xff] %vm1156_vm2, %v1540_v44  ;;  %1956 = vst.msk [vmem:[#allocation3 + $0x8a0] sm:$0xff] %vm1156_vm2, %v1540_v44  ;;  %v2288_v42 = vld [vmem:[#allocation3 + $0x250] sm:$0xff]  ;;  %v8124_v44 = vld [vmem:[%s12893_s1 + $0x208] sm:$0xff]  }
 0x24c   : > { %1700 = vst.msk [vmem:[#allocation3 + $0x8d8] sm:$0xff] %vm1156_vm2, %v1668_v46  ;;  %2084 = vst.msk [vmem:[#allocation3 + $0x8a8] sm:$0xff] %vm1156_vm2, %v1668_v46  ;;  %v2298_v46 = vld [vmem:[#allocation3 + $0x2a0] sm:$0xff]  ;;  %v2435_v47 = vld [vmem:[#allocation3 + $0x6e8] sm:$0xff] }
 0x24d   : > { %1828 = vst.msk [vmem:[#allocation3 + $0x8e0] sm:$0xff] %vm1156_vm2, %v1796_v49  ;;  %2212 = vst.msk [vmem:[#allocation3 + $0x8b0] sm:$0xff] %vm1156_vm2, %v1796_v49 }
 0x24f   : > { %3287 = vmatmul.mubr.bf16.gmra.mrb[88].mxu1 %v2412_v24  ;;  %v2407_v24 = vld [vmem:[#allocation3 + $0x608] sm:$0xff] }
 0x250   : > { %3294 = vmatprep.mubr.bf16.mxu1 %v2422_v32 }
 0x251   : > { %3793 = vmatmul.mubr.bf16.gmra.mrb[52].mxu0 %v2335_v45 }
 0x252   : > { %3800 = vmatprep.mubr.bf16.mxu0 %v2345_v34 }
 0x257   : > { %3295 = vmatmul.mubr.bf16.gmra.mrb[92].mxu1 %v2421_v6 }
 0x258   : > { %3302 = vmatprep.mubr.bf16.mxu1 %v2431_v37  ;;  %v2416_v37 = vld [vmem:[#allocation3 + $0x650] sm:$0xff] }
 0x259   : > { %3801 = vmatmul.mubr.bf16.gmra.mrb[56].mxu0 %v2344_v38  ;;  %v2426_v38 = vld [vmem:[#allocation3 + $0x6a0] sm:$0xff] }
 0x25a   : > { %3808 = vmatprep.mubr.bf16.mxu0 %v2354_v58  ;;  %v2289_v58 = vld [vmem:[#allocation3 + $0x258] sm:$0xff] }
 0x25f   : > { %3303 = vmatmul.mubr.bf16.gmra.mrb[96].mxu1 %v2430_v28 }
 0x260   : > { %3310 = vmatprep.mubr.bf16.mxu1 %v2440_v53  ;;  %v2434_v53 = vld [vmem:[#allocation3 + $0x6e0] sm:$0xff] }
 0x261   : > { %3809 = vmatmul.mubr.bf16.gmra.mrb[60].mxu0 %v2353_v52  ;;  %v2297_v52 = vld [vmem:[#allocation3 + $0x298] sm:$0xff] }
 0x262   : > { %3816 = vmatprep.mubr.bf16.mxu0 %v2363_v54  ;;  %v8128_v54 = vld [vmem:[%s12893_s1 + $0x218] sm:$0xff]  }
 0x267   : > { %3311 = vmatmul.mubr.bf16.gmra.mrb[100].mxu1 %v2439_v55  ;;  %v2444_v55 = vld [vmem:[#allocation3 + $0x730] sm:$0xff] }
 0x268   : > { %3318 = vmatprep.mubr.bf16.mxu1 %v2449_v56  ;;  %v10154_v7 = vpop.f32.mrb[4].mxu1 }
 0x269   : > { %3817 = vmatmul.mubr.bf16.gmra.mrb[64].mxu0 %v2362_v57  ;;  %v3122_v8 = vpop.f32.mrb[5].mxu1  ;;  %v8129_v57 = vld [vmem:[%s12893_s1 + $0x220] sm:$0xff]  }
 0x26a   : > { %3824 = vmatprep.mubr.bf16.mxu0 %v2372_v59  ;;  %v10156_v36 = vpop.f32.mrb[6].mxu1  ;;  %v2315_v8 = vld [vmem:[#allocation3 + $0x328] sm:$0xff] }
 0x26b   : > { %v3125_v10 = vpop.f32.mrb[7].mxu1 }
 0x26c   : > { %v2325_v10 = vld [vmem:[#allocation3 + $0x378] sm:$0xff] }
 0x26f   : > { %3319 = vmatmul.mubr.bf16.gmra.mrb[104].mxu1 %v2448_v60 }
 0x270   : > { %3326 = vmatprep.mubr.bf16.mxu1 %v2458_v61  ;;  %v10158_v17 = vpop.f32.mrb[8].mxu1 }
 0x271   : > { %3825 = vmatmul.mubr.bf16.gmra.mrb[68].mxu0 %v2371_v62  ;;  %v3130_v20 = vpop.f32.mrb[9].mxu1  ;;  %v2306_v62 = vld [vmem:[#allocation3 + $0x2e0] sm:$0xff] }
 0x272   : > { %3832 = vmatprep.mubr.bf16.mxu0 %v2381_v63  ;;  %v10160_v21 = vpop.f32.mrb[10].mxu1  ;;  %v2443_v63 = vld [vmem:[#allocation3 + $0x728] sm:$0xff]  ;;  %v2334_v20 = vld [vmem:[#allocation3 + $0x3c0] sm:$0xff] }
 0x273   : > { %v3133_v22 = vpop.f32.mrb[11].mxu1 }
 0x274   : > { %v2333_v22 = vld [vmem:[#allocation3 + $0x3b8] sm:$0xff] }
 0x277   : > { %3327 = vmatmul.mubr.bf16.gmra.mrb[108].mxu1 %v2457_v1  ;;  %v8130_v1 = vld [vmem:[%s12893_s1 + $0x228] sm:$0xff]  }
 0x278   : > { %3334 = vmatprep.mubr.bf16.mxu1 %v2467_v3  ;;  %v10162_v27 = vpop.f32.mrb[12].mxu1  ;;  %v2316_v3 = vld [vmem:[#allocation3 + $0x330] sm:$0xff] }
 0x279   : > { %3833 = vmatmul.mubr.bf16.gmra.mrb[72].mxu0 %v2380_v4  ;;  %v3138_v18 = vpop.f32.mrb[13].mxu1  ;;  %v2453_v4 = vld [vmem:[#allocation3 + $0x778] sm:$0xff] }
 0x27a   : > { %3840 = vmatprep.mubr.bf16.mxu0 %v2390_v5  ;;  %v10164_v19 = vpop.f32.mrb[14].mxu1  ;;  %v8131_v5 = vld [vmem:[%s12893_s1 + $0x230] sm:$0xff]   ;;  %v8132_v18 = vld [vmem:[%s12893_s1 + $0x238] sm:$0xff]  }
 0x27b   : > { %v3141_v29 = vpop.f32.mrb[15].mxu1 }
 0x27c   : > { %v2479_v29 = vld [vmem:[#allocation3 + $0x848] sm:$0xff] }
 0x27f   : > { %3335 = vmatmul.mubr.bf16.gmra.mrb[112].mxu1 %v2466_v9  ;;  %v2452_v9 = vld [vmem:[#allocation3 + $0x770] sm:$0xff] }
 0x280   : > { %3342 = vmatprep.mubr.bf16.mxu1 %v2476_v13  ;;  %v10166_v32 = vpop.f32.mrb[16].mxu1  ;;  %v2462_v13 = vld [vmem:[#allocation3 + $0x7c0] sm:$0xff] }
 0x281   : > { %3841 = vmatmul.mubr.bf16.gmra.mrb[76].mxu0 %v2389_v14  ;;  %v3146_v45 = vpop.f32.mrb[17].mxu1  ;;  %v2324_v14 = vld [vmem:[#allocation3 + $0x370] sm:$0xff] }
 0x282   : > { %3848 = vmatprep.mubr.bf16.mxu0 %v2399_v12  ;;  %v10168_v34 = vpop.f32.mrb[18].mxu1  ;;  %v2461_v12 = vld [vmem:[#allocation3 + $0x7b8] sm:$0xff]  ;;  %v2351_v45 = vld [vmem:[#allocation3 + $0x448] sm:$0xff] }
 0x283   : > { %v3149_v6 = vpop.f32.mrb[19].mxu1 }
 0x284   : > { %v2361_v6 = vld [vmem:[#allocation3 + $0x498] sm:$0xff] }
 0x287   : > { %3343 = vmatmul.mubr.bf16.gmra.mrb[116].mxu1 %v2475_v23  ;;  %v2471_v23 = vld [vmem:[#allocation3 + $0x808] sm:$0xff] }
 0x288   : > { %3350 = vmatprep.mubr.bf16.mxu1 %v2485_v25  ;;  %v10170_v39 = vpop.f32.mrb[20].mxu1  ;;  %v2470_v25 = vld [vmem:[#allocation3 + $0x800] sm:$0xff] }
 0x289   : > { %3849 = vmatmul.mubr.bf16.gmra.mrb[80].mxu0 %v2398_v26  ;;  %v3154_v40 = vpop.f32.mrb[21].mxu1  ;;  %v2343_v26 = vld [vmem:[#allocation3 + $0x408] sm:$0xff] }
 0x28a   : > { %3856 = vmatprep.mubr.bf16.mxu0 %v2408_v15  ;;  %v10172_v41 = vpop.f32.mrb[22].mxu1  ;;  %v2480_v15 = vld [vmem:[#allocation3 + $0x850] sm:$0xff] }
 0x28b   : > { %v3157_v11 = vpop.f32.mrb[23].mxu1 }
 0x28c   : > { %v1861_v11 = vld [vmem:[#allocation2 + $0x22f] sm:$0xff] }
 0x28f   : > { %3351 = vmatmul.mubr.bf16.gmra.mrb[120].mxu1 %v2484_v16  ;;  %v2342_v16 = vld [vmem:[#allocation3 + $0x400] sm:$0xff] }
 0x290   : > { %3358 = vmatprep.mubr.bf16.mxu1 %v2494_v30  ;;  %v10178_v33 = vpop.f32.mrb[24].mxu1  ;;  %v2352_v30 = vld [vmem:[#allocation3 + $0x450] sm:$0xff] }
 0x291   : > { %3857 = vmatmul.mubr.bf16.gmra.mrb[84].mxu0 %v2407_v24  ;;  %v3162_v49 = vpop.f32.mrb[25].mxu1  ;;  %v2489_v24 = vld [vmem:[#allocation3 + $0x898] sm:$0xff] }
 0x292   : > { %3864 = vmatprep.mubr.bf16.mxu0 %v2417_v31  ;;  %v10183_v50 = vpop.f32.mrb[26].mxu1  ;;  %v2498_v31 = vld [vmem:[#allocation3 + $0x8e0] sm:$0xff]  ;;  %v2220_v49 = vld [vmem:[#allocation3 + $0x30] sm:$0xff] }
 0x293   : > { %v3165_v28 = vpop.f32.mrb[27].mxu1 }
 0x294   : > { %v2379_v28 = vld [vmem:[#allocation3 + $0x528] sm:$0xff] }
 0x297   : > { %3359 = vmatmul.mubr.bf16.gmra.mrb[124].mxu1 %v2493_v35  ;;  %v2488_v35 = vld [vmem:[#allocation3 + $0x890] sm:$0xff] }
 0x298   : > { %3463 = vmatprep.mubr.bf16.mxu1 %v2289_v58  ;;  %v10188_v56 = vpop.f32.mrb[28].mxu1  ;;  %v1989_v58 = vld [vmem:[#allocation2 + $0x230] sm:$0xff] }
 0x299   : > { %3865 = vmatmul.mubr.bf16.gmra.mrb[88].mxu0 %v2416_v37  ;;  %v3170_v59 = vpop.f32.mrb[29].mxu1  ;;  %v1988_v37 = vld [vmem:[#allocation2 + $0x228] sm:$0xff] }
 0x29a   : > { %3872 = vmatprep.mubr.bf16.mxu0 %v2426_v38  ;;  %v10193_v60 = vpop.f32.mrb[30].mxu1  ;;  %v1860_v38 = vld [vmem:[#allocation2 + $0x227] sm:$0xff]  ;;  %v2037_v40 = vpack.c.bf16 %v1989_v58, %v1988_v37 }
 0x29b   : > { %v3173_v61 = vpop.f32.mrb[31].mxu1  ;;  %v2238_v59 = vld [vmem:[#allocation3 + $0xc0] sm:$0xff] }
 0x29c   : > { %2069 = vst.msk [vmem:[#allocation3 + $0x470] sm:$0xff] %vm1156_vm2, %v2037_v40  ;;  %v2397_v61 = vld [vmem:[#allocation3 + $0x5b8] sm:$0xff]  ;;  %v2302_v37 = vld [vmem:[#allocation3 + $0x2c0] sm:$0xff]  ;;  %v2460_v40 = vld [vmem:[#allocation3 + $0x7b0] sm:$0xff] }
 0x29d   : > { %v2450_v58 = vld [vmem:[#allocation3 + $0x760] sm:$0xff] }
 0x29f   : > { %3464 = vmatmul.mubr.bf16.vlgmr.msra.gmra.mrb[32].mxu1 %v2288_v42  ;;  %v1909_v42 = vpack.c.bf16 %v1861_v11, %v1860_v38  ;;  %v2301_v38 = vld [vmem:[#allocation3 + $0x2b8] sm:$0xff]  ;;  %v2311_v11 = vld [vmem:[#allocation3 + $0x308] sm:$0xff] }
 0x2a0   : > { %3471 = vmatprep.mubr.bf16.mxu1 %v2298_v46  ;;  %7616 = vmatpush3.bf16.msra.mxu1 %v10107_v2  ;;  %v2307_v2 = vld [vmem:[#allocation3 + $0x2e8] sm:$0xff]  ;;  %v2370_v46 = vld [vmem:[#allocation3 + $0x4e0] sm:$0xff] }
 0x2a1   : > { %3873 = vmatmul.mubr.bf16.gmra.mrb[92].mxu0 %v2425_v43  ;;  %7617 = vmatprep.subr.bf16.mxu1 %v8124_v44  ;;  %v2360_v43 = vld [vmem:[#allocation3 + $0x490] sm:$0xff]  ;;  %1941 = vst.msk [vmem:[#allocation3 + $0x468] sm:$0xff] %vm1156_vm2, %v1909_v42  ;;  %v2459_v42 = vld [vmem:[#allocation3 + $0x7a8] sm:$0xff] }
 0x2a2   : > { %3880 = vmatprep.mubr.bf16.mxu0 %v2435_v47  ;;  %v2221_v47 = vld [vmem:[#allocation3 + $0x38] sm:$0xff] }
 0x2a4   : > { %7618 = vmatpush3.bf16.msra.mxu1 %v8124_v44  ;;  %v2497_v44 = vld [vmem:[#allocation3 + $0x8d8] sm:$0xff] }
 0x2a5   : > { %7619 = vmatprep.subr.bf16.mxu1 %v8126_v48 }
 0x2a7   : > { %3472 = vmatmul.mubr.bf16.gmra.mrb[36].mxu1 %v2297_v52  ;;  %v2230_v52 = vld [vmem:[#allocation3 + $0x80] sm:$0xff] }
 0x2a8   : > { %3479 = vmatprep.mubr.bf16.mxu1 %v2307_v2  ;;  %7620 = vmatpush3.bf16.msra.mxu1 %v8126_v48  ;;  %v2369_v48 = vld [vmem:[#allocation3 + $0x4d8] sm:$0xff]  ;;  %v2388_v2 = vld [vmem:[#allocation3 + $0x570] sm:$0xff] }
 0x2a9   : > { %3881 = vmatmul.mubr.bf16.gmra.mrb[96].mxu0 %v2434_v53  ;;  %7621 = vmatprep.subr.bf16.mxu1 %v8128_v54  ;;  %v2378_v53 = vld [vmem:[#allocation3 + $0x520] sm:$0xff] }
 0x2aa   : > { %3888 = vmatprep.mubr.bf16.mxu0 %v2444_v55  ;;  %v2239_v55 = vld [vmem:[#allocation3 + $0xc8] sm:$0xff] }
 0x2ac   : > { %7622 = vmatpush3.bf16.msra.mxu1 %v8128_v54  ;;  %v2229_v54 = vld [vmem:[#allocation3 + $0x78] sm:$0xff] }
 0x2ad   : > { %7623 = vmatprep.subr.bf16.mxu1 %v8129_v57 }
 0x2af   : > { %3480 = vmatmul.mubr.bf16.gmra.mrb[40].mxu1 %v2306_v62  ;;  %v2248_v62 = vld [vmem:[#allocation3 + $0x110] sm:$0xff] }
 0x2b0   : > { %3487 = vmatprep.mubr.bf16.mxu1 %v2316_v3  ;;  %7624 = vmatpush3.bf16.msra.mxu1 %v8129_v57  ;;  %v2387_v57 = vld [vmem:[#allocation3 + $0x568] sm:$0xff]  ;;  %v2406_v3 = vld [vmem:[#allocation3 + $0x600] sm:$0xff] }
 0x2b1   : > { %3889 = vmatmul.mubr.bf16.gmra.mrb[100].mxu0 %v2443_v63  ;;  %7625 = vmatprep.subr.bf16.mxu1 %v8130_v1  ;;  %v2396_v63 = vld [vmem:[#allocation3 + $0x5b0] sm:$0xff] }
 0x2b2   : > { %3896 = vmatprep.mubr.bf16.mxu0 %v2453_v4  ;;  %v2257_v4 = vld [vmem:[#allocation3 + $0x158] sm:$0xff] }
 0x2b4   : > { %7626 = vmatpush3.bf16.msra.mxu1 %v8130_v1  ;;  %v2247_v1 = vld [vmem:[#allocation3 + $0x108] sm:$0xff] }
 0x2b5   : > { %7627 = vmatprep.subr.bf16.mxu1 %v8131_v5 }
 0x2b7   : > { %3488 = vmatmul.mubr.bf16.gmra.mrb[44].mxu1 %v2315_v8  ;;  %v2256_v8 = vld [vmem:[#allocation3 + $0x150] sm:$0xff] }
 0x2b8   : > { %3495 = vmatprep.mubr.bf16.mxu1 %v2325_v10  ;;  %7628 = vmatpush3.bf16.msra.mxu1 %v8131_v5  ;;  %v2405_v5 = vld [vmem:[#allocation3 + $0x5f8] sm:$0xff]  ;;  %v2266_v10 = vld [vmem:[#allocation3 + $0x1a0] sm:$0xff] }
 0x2b9   : > { %3897 = vmatmul.mubr.bf16.gmra.mrb[104].mxu0 %v2452_v9  ;;  %7629 = vmatprep.subr.bf16.mxu1 %v8132_v18  ;;  %v2415_v9 = vld [vmem:[#allocation3 + $0x648] sm:$0xff] }
 0x2ba   : > { %3904 = vmatprep.mubr.bf16.mxu0 %v2462_v13  ;;  %v2414_v13 = vld [vmem:[#allocation3 + $0x640] sm:$0xff] }
 0x2bc   : > { %7630 = vmatpush3.bf16.msra.mxu1 %v8132_v18  ;;  %v2117_v18 = vld [vmem:[#allocation2 + $0x231] sm:$0xff] }
 0x2bf   : > { %3496 = vmatmul.mubr.bf16.gmra.mrb[48].mxu1 %v2324_v14  ;;  %v2265_v14 = vld [vmem:[#allocation3 + $0x198] sm:$0xff] }
 0x2c0   : > { %3503 = vmatprep.mubr.bf16.mxu1 %v2334_v20  ;;  %v2275_v20 = vld [vmem:[#allocation3 + $0x1e8] sm:$0xff] }
 0x2c1   : > { %3905 = vmatmul.mubr.bf16.gmra.mrb[108].mxu0 %v2461_v12  ;;  %v2424_v12 = vld [vmem:[#allocation3 + $0x690] sm:$0xff] }
 0x2c2   : > { %3912 = vmatprep.mubr.bf16.mxu0 %v2471_v23  ;;  %v2423_v23 = vld [vmem:[#allocation3 + $0x688] sm:$0xff] }
 0x2c7   : > { %3504 = vmatmul.mubr.bf16.gmra.mrb[52].mxu1 %v2333_v22  ;;  %v2274_v22 = vld [vmem:[#allocation3 + $0x1e0] sm:$0xff] }
 0x2c8   : > { %3511 = vmatprep.mubr.bf16.mxu1 %v2343_v26  ;;  %v2433_v26 = vld [vmem:[#allocation3 + $0x6d8] sm:$0xff] }
 0x2c9   : > { %3913 = vmatmul.mubr.bf16.gmra.mrb[112].mxu0 %v2470_v25  ;;  %v2284_v25 = vld [vmem:[#allocation3 + $0x230] sm:$0xff] }
 0x2ca   : > { %3920 = vmatprep.mubr.bf16.mxu0 %v2480_v15  ;;  %v2116_v15 = vld [vmem:[#allocation2 + $0x229] sm:$0xff] }
 0x2cf   : > { %3512 = vmatmul.mubr.bf16.gmra.mrb[56].mxu1 %v2342_v16  ;;  %v2165_v16 = vpack.c.bf16 %v2117_v18, %v2116_v15  ;;  %v2364_v15 = vld [vmem:[#allocation3 + $0x4b0] sm:$0xff]  ;;  %v2249_v18 = vld [vmem:[#allocation3 + $0x118] sm:$0xff] }
 0x2d0   : > { %3519 = vmatprep.mubr.bf16.mxu1 %v2352_v30  ;;  %v2283_v30 = vld [vmem:[#allocation3 + $0x228] sm:$0xff] }
 0x2d1   : > { %3921 = vmatmul.mubr.bf16.gmra.mrb[116].mxu0 %v2479_v29  ;;  %2197 = vst.msk [vmem:[#allocation3 + $0x478] sm:$0xff] %vm1156_vm2, %v2165_v16  ;;  %v2432_v29 = vld [vmem:[#allocation3 + $0x6d0] sm:$0xff]  ;;  %v2374_v16 = vld [vmem:[#allocation3 + $0x500] sm:$0xff] }
 0x2d2   : > { %3928 = vmatprep.mubr.bf16.mxu0 %v2489_v24  ;;  %v2442_v24 = vld [vmem:[#allocation3 + $0x720] sm:$0xff] }
 0x2d7   : > { %3520 = vmatmul.mubr.bf16.gmra.mrb[60].mxu1 %v2351_v45  ;;  %v2441_v45 = vld [vmem:[#allocation3 + $0x718] sm:$0xff] }
 0x2d8   : > { %3527 = vmatprep.mubr.bf16.mxu1 %v2361_v6  ;;  %v2451_v6 = vld [vmem:[#allocation3 + $0x768] sm:$0xff] }
 0x2d9   : > { %3929 = vmatmul.mubr.bf16.gmra.mrb[120].mxu0 %v2488_v35  ;;  %v2292_v35 = vld [vmem:[#allocation3 + $0x270] sm:$0xff] }
 0x2da   : > { %3936 = vmatprep.mubr.bf16.mxu0 %v2498_v31  ;;  %v2293_v31 = vld [vmem:[#allocation3 + $0x278] sm:$0xff] }
 0x2df   : > { %3528 = vmatmul.mubr.bf16.gmra.mrb[64].mxu1 %v2360_v43  ;;  %v2310_v43 = vld [vmem:[#allocation3 + $0x300] sm:$0xff] }
 0x2e0   : > { %3535 = vmatprep.mubr.bf16.mxu1 %v2370_v46  ;;  %v2320_v46 = vld [vmem:[#allocation3 + $0x350] sm:$0xff] }
 0x2e1   : > { %3937 = vmatmul.mubr.bf16.gmra.mrb[124].mxu0 %v2497_v44  ;;  %v2469_v44 = vld [vmem:[#allocation3 + $0x7f8] sm:$0xff] }
 0x2e2   : > { %3977 = vmatprep.mubr.bf16.mxu0 %v2221_v47  ;;  %v2468_v47 = vld [vmem:[#allocation3 + $0x7f0] sm:$0xff] }
 0x2e7   : > { %3536 = vmatmul.mubr.bf16.gmra.mrb[68].mxu1 %v2369_v48  ;;  %v2319_v48 = vld [vmem:[#allocation3 + $0x348] sm:$0xff] }
 0x2e8   : > { %3543 = vmatprep.mubr.bf16.mxu1 %v2379_v28  ;;  %v2329_v28 = vld [vmem:[#allocation3 + $0x398] sm:$0xff] }
 0x2e9   : > { %3978 = vmatmul.mubr.bf16.vlgmr.msra.gmra.mrb[0].mxu0 %v2220_v49  ;;  %v2478_v49 = vld [vmem:[#allocation3 + $0x840] sm:$0xff] }
 0x2ea   : > { %3985 = vmatprep.mubr.bf16.mxu0 %v2230_v52  ;;  %v2477_v52 = vld [vmem:[#allocation3 + $0x838] sm:$0xff] }
 0x2ef   : > { %3544 = vmatmul.mubr.bf16.gmra.mrb[72].mxu1 %v2378_v53  ;;  %v2328_v53 = vld [vmem:[#allocation3 + $0x390] sm:$0xff] }
 0x2f0   : > { %3551 = vmatprep.mubr.bf16.mxu1 %v2388_v2  ;;  %v2338_v2 = vld [vmem:[#allocation3 + $0x3e0] sm:$0xff] }
 0x2f1   : > { %3986 = vmatmul.mubr.bf16.gmra.mrb[4].mxu0 %v2229_v54  ;;  %v2487_v54 = vld [vmem:[#allocation3 + $0x888] sm:$0xff] }
 0x2f2   : > { %3993 = vmatprep.mubr.bf16.mxu0 %v2239_v55  ;;  %v2486_v55 = vld [vmem:[#allocation3 + $0x880] sm:$0xff] }
 0x2f7   : > { %3552 = vmatmul.mubr.bf16.gmra.mrb[76].mxu1 %v2387_v57  ;;  %v2337_v57 = vld [vmem:[#allocation3 + $0x3d8] sm:$0xff] }
 0x2f8   : > { %3559 = vmatprep.mubr.bf16.mxu1 %v2397_v61  ;;  %v2347_v61 = vld [vmem:[#allocation3 + $0x428] sm:$0xff] }
 0x2f9   : > { %3994 = vmatmul.mubr.bf16.gmra.mrb[8].mxu0 %v2238_v59  ;;  %v2496_v59 = vld [vmem:[#allocation3 + $0x8d0] sm:$0xff] }
 0x2fa   : > { %4001 = vmatprep.mubr.bf16.mxu0 %v2248_v62  ;;  %v2356_v62 = vld [vmem:[#allocation3 + $0x470] sm:$0xff] }
 0x2ff   : > { %3560 = vmatmul.mubr.bf16.gmra.mrb[80].mxu1 %v2396_v63  ;;  %v2495_v63 = vld [vmem:[#allocation3 + $0x8c8] sm:$0xff] }
 0x300   : > { %3567 = vmatprep.mubr.bf16.mxu1 %v2406_v3  ;;  %v2222_v3 = vld [vmem:[#allocation3 + $0x40] sm:$0xff] }
 0x301   : > { %4002 = vmatmul.mubr.bf16.gmra.mrb[12].mxu0 %v2247_v1  ;;  %v2346_v1 = vld [vmem:[#allocation3 + $0x420] sm:$0xff] }
 0x302   : > { %4009 = vmatprep.mubr.bf16.mxu0 %v2257_v4  ;;  %v2148_v4 = vld [vmem:[#allocation2 + $0x469] sm:$0xff] }
 0x307   : > { %3568 = vmatmul.mubr.bf16.gmra.mrb[84].mxu1 %v2405_v5  ;;  %v2149_v5 = vld [vmem:[#allocation2 + $0x471] sm:$0xff] }
 0x308   : > { %3575 = vmatprep.mubr.bf16.mxu1 %v2415_v9  ;;  %v2355_v9 = vld [vmem:[#allocation3 + $0x468] sm:$0xff] }
 0x309   : > { %4010 = vmatmul.mubr.bf16.gmra.mrb[16].mxu0 %v2256_v8  ;;  %v2181_v8 = vpack.c.bf16 %v2149_v5, %v2148_v4  ;;  %v5258_v5 = vld [vmem:[#allocation4 + $0x8] sm:$0xff] }
 0x30a   : > { %4017 = vmatprep.mubr.bf16.mxu0 %v2266_v10  ;;  %v2020_v10 = vld [vmem:[#allocation2 + $0x468] sm:$0xff]  ;;  %5387 = vrot.lane.b32.xlu1 %v5258_v5, %s8529_s22 }
 0x30b   : > { %2213 = vst.msk [vmem:[#allocation3 + $0x8f8] sm:$0xff] %vm1156_vm2, %v2181_v8  ;;  %v5257_v8 = vld [vmem:[#allocation4] sm:$0xff]  ;;  %v5270_v5 = vld [vmem:[#allocation4 + $0x68] sm:$0xff] }
 0x30c   : > { %5385 = vrot.lane.b32.xlu0 %v5257_v8, %s8529_s22  ;;  %v5269_v8 = vld [vmem:[#allocation4 + $0x60] sm:$0xff] }
 0x30f   : > { %3576 = vmatmul.mubr.bf16.gmra.mrb[88].mxu1 %v2414_v13  ;;  %v2021_v13 = vld [vmem:[#allocation2 + $0x470] sm:$0xff] }
 0x310   : > { %3583 = vmatprep.mubr.bf16.mxu1 %v2424_v12  ;;  %v2231_v12 = vld [vmem:[#allocation3 + $0x88] sm:$0xff] }
 0x311   : > { %4018 = vmatmul.mubr.bf16.gmra.mrb[20].mxu0 %v2265_v14  ;;  %v1892_v14 = vld [vmem:[#allocation2 + $0x467] sm:$0xff] }
 0x312   : > { %4025 = vmatprep.mubr.bf16.mxu0 %v2275_v20  ;;  %v2053_v20 = vpack.c.bf16 %v2021_v13, %v2020_v10  ;;  %v2339_v10 = vld [vmem:[#allocation3 + $0x3e8] sm:$0xff] }
 0x313   : > { %v2419_v13 = vld [vmem:[#allocation3 + $0x668] sm:$0xff] }
 0x314   : > { %2085 = vst.msk [vmem:[#allocation3 + $0x8f0] sm:$0xff] %vm1156_vm2, %v2053_v20 }
 0x317   : > { %3584 = vmatmul.mubr.bf16.gmra.mrb[92].mxu1 %v2423_v23  ;;  %v1893_v23 = vld [vmem:[#allocation2 + $0x46f] sm:$0xff] }
 0x318   : > { %3591 = vmatprep.mubr.bf16.mxu1 %v2433_v26  ;;  %v1925_v26 = vpack.c.bf16 %v1893_v23, %v1892_v14  ;;  %v2348_v14 = vld [vmem:[#allocation3 + $0x430] sm:$0xff] }
 0x319   : > { %4026 = vmatmul.mubr.bf16.gmra.mrb[24].mxu0 %v2274_v22  ;;  %v2365_v22 = vld [vmem:[#allocation3 + $0x4b8] sm:$0xff] }
 0x31a   : > { %4033 = vmatprep.mubr.bf16.mxu0 %v2284_v25  ;;  %v2240_v25 = vld [vmem:[#allocation3 + $0xd0] sm:$0xff]  ;;  %1957 = vst.msk [vmem:[#allocation3 + $0x8e8] sm:$0xff] %vm1156_vm2, %v1925_v26  ;;  %v5260_v26 = vld [vmem:[#allocation4 + $0x18] sm:$0xff] }
 0x31b   : > { %5391 = vrot.lane.b32.xlu1 %v5260_v26, %s8529_s22  ;;  %v2411_v26 = vld [vmem:[#allocation3 + $0x628] sm:$0xff] }
 0x31f   : > { %3592 = vmatmul.mubr.bf16.gmra.mrb[96].mxu1 %v2432_v29  ;;  %v2258_v29 = vld [vmem:[#allocation3 + $0x160] sm:$0xff] }
 0x320   : > { %3599 = vmatprep.mubr.bf16.mxu1 %v2442_v24  ;;  %v2267_v24 = vld [vmem:[#allocation3 + $0x1a8] sm:$0xff] }
 0x321   : > { %4034 = vmatmul.mubr.bf16.gmra.mrb[28].mxu0 %v2283_v30  ;;  %v2373_v30 = vld [vmem:[#allocation3 + $0x4f8] sm:$0xff] }
 0x322   : > { %4041 = vmatprep.mubr.bf16.mxu0 %v2293_v31  ;;  %v2383_v31 = vld [vmem:[#allocation3 + $0x548] sm:$0xff] }
 0x327   : > { %3600 = vmatmul.mubr.bf16.gmra.mrb[100].mxu1 %v2441_v45  ;;  %v2276_v45 = vld [vmem:[#allocation3 + $0x1f0] sm:$0xff] }
 0x328   : > { %3607 = vmatprep.mubr.bf16.mxu1 %v2451_v6 }
 0x329   : > { %4042 = vmatmul.mubr.bf16.gmra.mrb[32].mxu0 %v2292_v35 }
 0x32a   : > { %4049 = vmatprep.mubr.bf16.mxu0 %v2302_v37 }
 0x32f   : > { %3608 = vmatmul.mubr.bf16.gmra.mrb[104].mxu1 %v2450_v58 }
 0x330   : > { %3615 = vmatprep.mubr.bf16.mxu1 %v2460_v40  ;;  %v2285_v40 = vld [vmem:[#allocation3 + $0x238] sm:$0xff] }
 0x331   : > { %4050 = vmatmul.mubr.bf16.gmra.mrb[36].mxu0 %v2301_v38  ;;  %v2382_v38 = vld [vmem:[#allocation3 + $0x540] sm:$0xff] }
 0x332   : > { %4057 = vmatprep.mubr.bf16.mxu0 %v2311_v11  ;;  %v2392_v11 = vld [vmem:[#allocation3 + $0x590] sm:$0xff] }
 0x337   : > { %3616 = vmatmul.mubr.bf16.gmra.mrb[108].mxu1 %v2459_v42  ;;  %v2294_v42 = vld [vmem:[#allocation3 + $0x280] sm:$0xff] }
 0x338   : > { %3623 = vmatprep.mubr.bf16.mxu1 %v2469_v44 }
 0x339   : > { %4058 = vmatmul.mubr.bf16.gmra.mrb[40].mxu0 %v2310_v43 }
 0x33a   : > { %4065 = vmatprep.mubr.bf16.mxu0 %v2320_v46 }
 0x33f   : > { %3624 = vmatmul.mubr.bf16.gmra.mrb[112].mxu1 %v2468_v47 }
 0x340   : > { %3631 = vmatprep.mubr.bf16.mxu1 %v2478_v49  ;;  %v2303_v49 = vld [vmem:[#allocation3 + $0x2c8] sm:$0xff] }
 0x341   : > { %4066 = vmatmul.mubr.bf16.gmra.mrb[44].mxu0 %v2319_v48  ;;  %v2391_v48 = vld [vmem:[#allocation3 + $0x588] sm:$0xff] }
 0x342   : > { %4073 = vmatprep.mubr.bf16.mxu0 %v2329_v28  ;;  %v2401_v28 = vld [vmem:[#allocation3 + $0x5d8] sm:$0xff] }
 0x347   : > { %3632 = vmatmul.mubr.bf16.gmra.mrb[116].mxu1 %v2477_v52  ;;  %v2312_v52 = vld [vmem:[#allocation3 + $0x310] sm:$0xff] }
 0x348   : > { %3639 = vmatprep.mubr.bf16.mxu1 %v2487_v54 }
 0x349   : > { %4074 = vmatmul.mubr.bf16.gmra.mrb[48].mxu0 %v2328_v53 }
 0x34a   : > { %4081 = vmatprep.mubr.bf16.mxu0 %v2338_v2 }
 0x34f   : > { %3640 = vmatmul.mubr.bf16.gmra.mrb[120].mxu1 %v2486_v55 }
 0x350   : > { %3647 = vmatprep.mubr.bf16.mxu1 %v2496_v59  ;;  %v2321_v59 = vld [vmem:[#allocation3 + $0x358] sm:$0xff] }
 0x351   : > { %4082 = vmatmul.mubr.bf16.gmra.mrb[52].mxu0 %v2337_v57  ;;  %v2400_v57 = vld [vmem:[#allocation3 + $0x5d0] sm:$0xff] }
 0x352   : > { %4089 = vmatprep.mubr.bf16.mxu0 %v2347_v61  ;;  %v2410_v61 = vld [vmem:[#allocation3 + $0x620] sm:$0xff] }
 0x357   : > { %3648 = vmatmul.mubr.bf16.gmra.mrb[124].mxu1 %v2495_v63 }
 0x358   : > { %7631 = vmatprep.mubr.bf16.mxu1 %v2222_v3 }
 0x359   : > { %4090 = vmatmul.mubr.bf16.gmra.mrb[56].mxu0 %v2346_v1 }
 0x35a   : > { %4097 = vmatprep.mubr.bf16.mxu0 %v2356_v62  ;;  %v2330_v62 = vld [vmem:[#allocation3 + $0x3a0] sm:$0xff] }
 0x35f   : > { %7632 = vmatmul.mubr.bf16.vlgmr.msra.gmra.mrb[128].mxu1 %v2231_v12 }
 0x360   : > { %7635 = vmatprep.mubr.bf16.mxu1 %v2240_v25 }
 0x361   : > { %4098 = vmatmul.mubr.bf16.gmra.mrb[60].mxu0 %v2355_v9  ;;  %v2409_v9 = vld [vmem:[#allocation3 + $0x618] sm:$0xff] }
 0x362   : > { %4105 = vmatprep.mubr.bf16.mxu0 %v2365_v22  ;;  %v2357_v22 = vld [vmem:[#allocation3 + $0x478] sm:$0xff] }
 0x367   : > { %7636 = vmatmul.mubr.bf16.gmra.mrb[132].mxu1 %v2249_v18  ;;  %v2418_v18 = vld [vmem:[#allocation3 + $0x660] sm:$0xff] }
 0x368   : > { %7639 = vmatprep.mubr.bf16.mxu1 %v2258_v29  ;;  %v2428_v29 = vld [vmem:[#allocation3 + $0x6b0] sm:$0xff] }
 0x369   : > { %4106 = vmatmul.mubr.bf16.gmra.mrb[64].mxu0 %v2364_v15  ;;  %v5259_v15 = vld [vmem:[#allocation4 + $0x10] sm:$0xff] }
 0x36a   : > { %4113 = vmatprep.mubr.bf16.mxu0 %v2374_v16  ;;  %v2366_v16 = vld [vmem:[#allocation3 + $0x4c0] sm:$0xff]  ;;  %5389 = vrot.lane.b32.xlu0 %v5259_v15, %s8529_s22  ;;  %v2420_v15 = vld [vmem:[#allocation3 + $0x670] sm:$0xff] }
 0x36f   : > { %7640 = vmatmul.mubr.bf16.gmra.mrb[136].mxu1 %v2267_v24  ;;  %v5261_v24 = vld [vmem:[#allocation4 + $0x20] sm:$0xff] }
 0x370   : > { %7643 = vmatprep.mubr.bf16.mxu1 %v2276_v45  ;;  %5393 = vrot.lane.b32.xlu0 %v5261_v24, %s8529_s22 }
 0x371   : > { %4114 = vmatmul.mubr.bf16.gmra.mrb[68].mxu0 %v2373_v30  ;;  %v5262_v30 = vld [vmem:[#allocation4 + $0x28] sm:$0xff] }
 0x372   : > { %4121 = vmatprep.mubr.bf16.mxu0 %v2383_v31  ;;  %v10210_v35 = vpop.f32.mrb[32].mxu1  ;;  %5395 = vrot.lane.b32.xlu1 %v5262_v30, %s8529_s22 }
 0x373   : > { %v3467_v6 = vpop.f32.mrb[33].mxu1 }
 0x374   : > { %v10212_v37 = vpop.f32.mrb[34].mxu1 }
 0x375   : > { %v3470_v58 = vpop.f32.mrb[35].mxu1 }
 0x377   : > { %7644 = vmatmul.mubr.bf16.gmra.mrb[140].mxu1 %v2285_v40  ;;  %v5263_v40 = vld [vmem:[#allocation4 + $0x30] sm:$0xff] }
 0x378   : > { %7647 = vmatprep.mubr.bf16.mxu1 %v2294_v42  ;;  %v2375_v42 = vld [vmem:[#allocation3 + $0x508] sm:$0xff]  ;;  %5397 = vrot.lane.b32.xlu0 %v5263_v40, %s8529_s22  ;;  %v2429_v40 = vld [vmem:[#allocation3 + $0x6b8] sm:$0xff] }
 0x379   : > { %4122 = vmatmul.mubr.bf16.gmra.mrb[72].mxu0 %v2382_v38  ;;  %v5264_v38 = vld [vmem:[#allocation4 + $0x38] sm:$0xff] }
 0x37a   : > { %4129 = vmatprep.mubr.bf16.mxu0 %v2392_v11  ;;  %v10214_v43 = vpop.f32.mrb[36].mxu1  ;;  %v2427_v11 = vld [vmem:[#allocation3 + $0x6a8] sm:$0xff]  ;;  %5399 = vrot.lane.b32.xlu1 %v5264_v38, %s8529_s22  ;;  %v2454_v38 = vld [vmem:[#allocation3 + $0x780] sm:$0xff] }
 0x37b   : > { %v3475_v44 = vpop.f32.mrb[37].mxu1 }
 0x37c   : > { %v10216_v46 = vpop.f32.mrb[38].mxu1  ;;  %v2384_v44 = vld [vmem:[#allocation3 + $0x550] sm:$0xff] }
 0x37d   : > { %v3478_v47 = vpop.f32.mrb[39].mxu1 }
 0x37e   : > { %v2437_v47 = vld [vmem:[#allocation3 + $0x6f8] sm:$0xff] }
 0x37f   : > { %7648 = vmatmul.mubr.bf16.gmra.mrb[144].mxu1 %v2303_v49  ;;  %v5265_v49 = vld [vmem:[#allocation4 + $0x40] sm:$0xff] }
 0x380   : > { %7651 = vmatprep.mubr.bf16.mxu1 %v2312_v52  ;;  %5401 = vrot.lane.b32.xlu0 %v5265_v49, %s8529_s22 }
 0x381   : > { %4130 = vmatmul.mubr.bf16.gmra.mrb[76].mxu0 %v2391_v48  ;;  %v5266_v48 = vld [vmem:[#allocation4 + $0x48] sm:$0xff] }
 0x382   : > { %4137 = vmatprep.mubr.bf16.mxu0 %v2401_v28  ;;  %v10218_v53 = vpop.f32.mrb[40].mxu1  ;;  %5403 = vrot.lane.b32.xlu1 %v5266_v48, %s8529_s22 }
 0x383   : > { %v3483_v54 = vpop.f32.mrb[41].mxu1 }
 0x384   : > { %v10220_v2 = vpop.f32.mrb[42].mxu1 }
 0x385   : > { %v3486_v55 = vpop.f32.mrb[43].mxu1 }
 0x387   : > { %7652 = vmatmul.mubr.bf16.gmra.mrb[148].mxu1 %v2321_v59  ;;  %v5267_v59 = vld [vmem:[#allocation4 + $0x50] sm:$0xff] }
 0x388   : > { %7655 = vmatprep.mubr.bf16.mxu1 %v2330_v62  ;;  %v2393_v62 = vld [vmem:[#allocation3 + $0x598] sm:$0xff]  ;;  %5405 = vrot.lane.b32.xlu0 %v5267_v59, %s8529_s22 }
 0x389   : > { %4138 = vmatmul.mubr.bf16.gmra.mrb[80].mxu0 %v2400_v57  ;;  %v5268_v57 = vld [vmem:[#allocation4 + $0x58] sm:$0xff] }
 0x38a   : > { %4145 = vmatprep.mubr.bf16.mxu0 %v2410_v61  ;;  %v10222_v63 = vpop.f32.mrb[44].mxu1  ;;  %v2436_v61 = vld [vmem:[#allocation3 + $0x6f0] sm:$0xff]  ;;  %5407 = vrot.lane.b32.xlu1 %v5268_v57, %s8529_s22 }
 0x38b   : > { %v3491_v1 = vpop.f32.mrb[45].mxu1 }
 0x38c   : > { %v10224_v3 = vpop.f32.mrb[46].mxu1  ;;  %v2402_v1 = vld [vmem:[#allocation3 + $0x5e0] sm:$0xff]  ;;  %5409 = vrot.lane.b32.xlu0 %v5269_v8, %s8529_s22 }
 0x38d   : > { %v3494_v4 = vpop.f32.mrb[47].mxu1 }
 0x38e   : > { %v2446_v4 = vld [vmem:[#allocation3 + $0x740] sm:$0xff]  ;;  %5411 = vrot.lane.b32.xlu1 %v5270_v5, %s8529_s22 }
 0x38f   : > { %7656 = vmatmul.mubr.bf16.gmra.mrb[152].mxu1 %v2339_v10 }
 0x390   : > { %7659 = vmatprep.mubr.bf16.mxu1 %v2348_v14 }
 0x391   : > { %4146 = vmatmul.mubr.bf16.gmra.mrb[84].mxu0 %v2409_v9 }
 0x392   : > { %4153 = vmatprep.mubr.bf16.mxu0 %v2419_v13  ;;  %v10228_v12 = vpop.f32.mrb[48].mxu1 }
 0x393   : > { %v3499_v20 = vpop.f32.mrb[49].mxu1 }
 0x394   : > { %v10230_v23 = vpop.f32.mrb[50].mxu1  ;;  %v5272_v20 = vld [vmem:[#allocation4 + $0x78] sm:$0xff] }
 0x395   : > { %v3502_v25 = vpop.f32.mrb[51].mxu1  ;;  %5415 = vrot.lane.b32.xlu1 %v5272_v20, %s8529_s22  ;;  %v2456_v20 = vld [vmem:[#allocation3 + $0x790] sm:$0xff] }
 0x396   : > { %v2445_v25 = vld [vmem:[#allocation3 + $0x738] sm:$0xff] }
 0x397   : > { %7660 = vmatmul.mubr.bf16.gmra.mrb[156].mxu1 %v2357_v22  ;;  %v5271_v22 = vld [vmem:[#allocation4 + $0x70] sm:$0xff] }
 0x398   : > { %7663 = vmatprep.mubr.bf16.mxu1 %v2366_v16  ;;  %5413 = vrot.lane.b32.xlu0 %v5271_v22, %s8529_s22  ;;  %v5274_v16 = vld [vmem:[#allocation4 + $0x88] sm:$0xff]  ;;  %v5280_v22 = vld [vmem:[#allocation4 + $0xb8] sm:$0xff] }
 0x399   : > { %4154 = vmatmul.mubr.bf16.gmra.mrb[88].mxu0 %v2418_v18  ;;  %v2455_v18 = vld [vmem:[#allocation3 + $0x788] sm:$0xff]  ;;  %5419 = vrot.lane.b32.xlu1 %v5274_v16, %s8529_s22 }
 0x39a   : > { %4161 = vmatprep.mubr.bf16.mxu0 %v2428_v29  ;;  %v10234_v31 = vpop.f32.mrb[52].mxu1  ;;  %v5273_v29 = vld [vmem:[#allocation4 + $0x80] sm:$0xff] }
 0x39b   : > { %v3507_v45 = vpop.f32.mrb[53].mxu1 }
 0x39c   : > { %v10238_v6 = vpop.f32.mrb[54].mxu1  ;;  %5417 = vrot.lane.b32.xlu0 %v5273_v29, %s8529_s22 }
 0x39d   : > { %v3510_v58 = vpop.f32.mrb[55].mxu1 }
 0x39f   : > { %7664 = vmatmul.mubr.bf16.gmra.mrb[160].mxu1 %v2375_v42  ;;  %v2464_v42 = vld [vmem:[#allocation3 + $0x7d0] sm:$0xff] }
 0x3a0   : > { %7667 = vmatprep.mubr.bf16.mxu1 %v2384_v44  ;;  %v5276_v44 = vld [vmem:[#allocation4 + $0x98] sm:$0xff] }
 0x3a1   : > { %4162 = vmatmul.mubr.bf16.gmra.mrb[92].mxu0 %v2427_v11  ;;  %v2438_v11 = vld [vmem:[#allocation3 + $0x700] sm:$0xff]  ;;  %5423 = vrot.lane.b32.xlu1 %v5276_v44, %s8529_s22  ;;  %v2472_v44 = vld [vmem:[#allocation3 + $0x810] sm:$0xff] }
 0x3a2   : > { %4169 = vmatprep.mubr.bf16.mxu0 %v2437_v47  ;;  %v10242_v28 = vpop.f32.mrb[56].mxu1  ;;  %v5275_v47 = vld [vmem:[#allocation4 + $0x90] sm:$0xff] }
 0x3a3   : > { %v3515_v52 = vpop.f32.mrb[57].mxu1  ;;  %5421 = vrot.lane.b32.xlu0 %v5275_v47, %s8529_s22  ;;  %v2465_v47 = vld [vmem:[#allocation3 + $0x7d8] sm:$0xff] }
 0x3a4   : > { %v10246_v54 = vpop.f32.mrb[58].mxu1 }
 0x3a5   : > { %v3518_v55 = vpop.f32.mrb[59].mxu1 }
 0x3a7   : > { %7668 = vmatmul.mubr.bf16.gmra.mrb[164].mxu1 %v2393_v62  ;;  %v5278_v62 = vld [vmem:[#allocation4 + $0xa8] sm:$0xff] }
 0x3a8   : > { %7671 = vmatprep.mubr.bf16.mxu1 %v2402_v1  ;;  %v5277_v1 = vld [vmem:[#allocation4 + $0xa0] sm:$0xff]  ;;  %5427 = vrot.lane.b32.xlu1 %v5278_v62, %s8529_s22 }
 0x3a9   : > { %4170 = vmatmul.mubr.bf16.gmra.mrb[96].mxu0 %v2436_v61  ;;  %5425 = vrot.lane.b32.xlu0 %v5277_v1, %s8529_s22 }
 0x3aa   : > { %4177 = vmatprep.mubr.bf16.mxu0 %v2446_v4  ;;  %v10250_v9 = vpop.f32.mrb[60].mxu1 }
 0x3ab   : > { %v3523_v10 = vpop.f32.mrb[61].mxu1 }
 0x3ac   : > { %v10254_v13 = vpop.f32.mrb[62].mxu1  ;;  %v2463_v10 = vld [vmem:[#allocation3 + $0x7c8] sm:$0xff]  ;;  %5431 = vrot.lane.b32.xlu1 %v5280_v22, %s8529_s22 }
 0x3ad   : > { %v3526_v14 = vpop.f32.mrb[63].mxu1 }
 0x3ae   : > { %v2447_v14 = vld [vmem:[#allocation3 + $0x748] sm:$0xff] }
 0x3af   : > { %7672 = vmatmul.mubr.bf16.gmra.mrb[168].mxu1 %v2411_v26 }
 0x3b0   : > { %7675 = vmatprep.mubr.bf16.mxu1 %v2420_v15 }
 0x3b1   : > { %4178 = vmatmul.mubr.bf16.gmra.mrb[100].mxu0 %v2445_v25  ;;  %v5279_v25 = vld [vmem:[#allocation4 + $0xb0] sm:$0xff] }
 0x3b2   : > { %4185 = vmatprep.mubr.bf16.mxu0 %v2455_v18  ;;  %v10258_v30 = vpop.f32.mrb[64].mxu1  ;;  %5429 = vrot.lane.b32.xlu0 %v5279_v25, %s8529_s22 }
 0x3b3   : > { %v3531_v24 = vpop.f32.mrb[65].mxu1 }
 0x3b4   : > { %v10262_v45 = vpop.f32.mrb[66].mxu1 }
 0x3b5   : > { %v3534_v58 = vpop.f32.mrb[67].mxu1 }
 0x3b6   : > { %v5282_v58 = vld [vmem:[#allocation4 + $0xc8] sm:$0xff] }
 0x3b7   : > { %7676 = vmatmul.mubr.bf16.gmra.mrb[172].mxu1 %v2429_v40  ;;  %5435 = vrot.lane.b32.xlu1 %v5282_v58, %s8529_s22  ;;  %v5287_v58 = vld [vmem:[#allocation4 + $0xf0] sm:$0xff] }
 0x3b8   : > { %7679 = vmatprep.mubr.bf16.mxu1 %v2438_v11 }
 0x3b9   : > { %4186 = vmatmul.mubr.bf16.gmra.mrb[104].mxu0 %v2454_v38  ;;  %v5281_v38 = vld [vmem:[#allocation4 + $0xc0] sm:$0xff] }
 0x3ba   : > { %4193 = vmatprep.mubr.bf16.mxu0 %v2464_v42  ;;  %v10266_v48 = vpop.f32.mrb[68].mxu1  ;;  %5433 = vrot.lane.b32.xlu0 %v5281_v38, %s8529_s22 }
 0x3bb   : > { %v3539_v55 = vpop.f32.mrb[69].mxu1 }
 0x3bc   : > { %v3979_v49 = vpop.f32.mrb[0].mxu0  ;;  %v10271_v59 = vpop.f32.mrb[70].mxu1  ;;  %v5284_v55 = vld [vmem:[#allocation4 + $0xd8] sm:$0xff] }
 0x3bd   : > { %v10269_v52 = vadd.f32 %v3979_v49, %v10118_v51  ;;  %v3981_v57 = vpop.f32.mrb[1].mxu0  ;;  %v3542_v5 = vpop.f32.mrb[71].mxu1  ;;  %v2473_v51 = vld [vmem:[#allocation3 + $0x818] sm:$0xff]  ;;  %v2474_v49 = vld [vmem:[#allocation3 + $0x820] sm:$0xff]  ;;  %5439 = vrot.lane.b32.xlu1 %v5284_v55, %s8529_s22  ;;  %v5290_v55 = vld [vmem:[#allocation4 + $0x108] sm:$0xff] }
 0x3be   : > { %v3982_v61 = vpop.f32.mrb[2].mxu0  ;;  %v5283_v57 = vld [vmem:[#allocation4 + $0xd0] sm:$0xff] }
 0x3bf   : > { %v10274_v4 = vadd.f32 %v3982_v61, %v10125_v0  ;;  %v3984_v8 = vpop.f32.mrb[3].mxu0  ;;  %7680 = vmatmul.mubr.bf16.gmra.mrb[176].mxu1 %v2447_v14  ;;  %5437 = vrot.lane.b32.xlu0 %v5283_v57, %s8529_s22  ;;  %v5286_v14 = vld [vmem:[#allocation4 + $0xe8] sm:$0xff]  ;;  %v5289_v57 = vld [vmem:[#allocation4 + $0x100] sm:$0xff] }
 0x3c0   : > { %7683 = vmatprep.mubr.bf16.mxu1 %v2456_v20 }
 0x3c1   : > { %4194 = vmatmul.mubr.bf16.gmra.mrb[108].mxu0 %v2463_v10  ;;  %5443 = vrot.lane.b32.xlu1 %v5286_v14, %s8529_s22  ;;  %v5292_v14 = vld [vmem:[#allocation4 + $0x118] sm:$0xff] }
 0x3c2   : > { %4201 = vmatprep.mubr.bf16.mxu0 %v2473_v51  ;;  %v10280_v0 = vpop.f32.mrb[72].mxu1  ;;  %v5285_v51 = vld [vmem:[#allocation4 + $0xe0] sm:$0xff] }
 0x3c3   : > { %v3547_v18 = vpop.f32.mrb[73].mxu1  ;;  %5441 = vrot.lane.b32.xlu0 %v5285_v51, %s8529_s22  ;;  %v5291_v51 = vld [vmem:[#allocation4 + $0x110] sm:$0xff] }
 0x3c4   : > { %v3987_v26 = vpop.f32.mrb[4].mxu0  ;;  %v10285_v29 = vpop.f32.mrb[74].mxu1  ;;  %v2483_v18 = vld [vmem:[#allocation3 + $0x868] sm:$0xff] }
 0x3c5   : > { %v10283_v15 = vadd.f32 %v3987_v26, %v10154_v7  ;;  %v3989_v16 = vpop.f32.mrb[5].mxu0  ;;  %v3550_v11 = vpop.f32.mrb[75].mxu1  ;;  %v2482_v7 = vld [vmem:[#allocation3 + $0x860] sm:$0xff]  ;;  %v2481_v26 = vld [vmem:[#allocation3 + $0x858] sm:$0xff] }
 0x3c6   : > { %v3990_v24 = vpop.f32.mrb[6].mxu0  ;;  %v2492_v16 = vld [vmem:[#allocation3 + $0x8b0] sm:$0xff] }
 0x3c7   : > { %v10288_v40 = vadd.f32 %v3990_v24, %v10156_v36  ;;  %v3992_v42 = vpop.f32.mrb[7].mxu0  ;;  %7684 = vmatmul.mubr.bf16.gmra.mrb[180].mxu1 %v2465_v47  ;;  %v5288_v24 = vld [vmem:[#allocation4 + $0xf8] sm:$0xff]  ;;  %5445 = vrot.lane.b32.xlu0 %v5287_v58, %s8529_s22  ;;  %v5294_v58 = vld [vmem:[#allocation4 + $0x128] sm:$0xff] }
 0x3c8   : > { %7687 = vmatprep.mubr.bf16.mxu1 %v2474_v49  ;;  %5447 = vrot.lane.b32.xlu1 %v5288_v24, %s8529_s22  ;;  %v2501_v49 = vld [vmem:[#allocation3 + $0x8f8] sm:$0xff]  ;;  %v2499_v24 = vld [vmem:[#allocation3 + $0x8e8] sm:$0xff] }
 0x3c9   : > { %4202 = vmatmul.mubr.bf16.gmra.mrb[112].mxu0 %v2472_v44 }
 0x3ca   : > { %4209 = vmatprep.mubr.bf16.mxu0 %v2482_v7  ;;  %v10294_v36 = vpop.f32.mrb[76].mxu1 }
 0x3cb   : > { %v3555_v1 = vpop.f32.mrb[77].mxu1  ;;  %5449 = vrot.lane.b32.xlu0 %v5289_v57, %s8529_s22 }
 0x3cc   : > { %v3995_v61 = vpop.f32.mrb[8].mxu0  ;;  %v10299_v8 = vpop.f32.mrb[78].mxu1  ;;  %5451 = vrot.lane.b32.xlu1 %v5290_v55, %s8529_s22 }
 0x3cd   : > { %v10297_v62 = vadd.f32 %v3995_v61, %v10158_v17  ;;  %v3997_v5 = vpop.f32.mrb[9].mxu0  ;;  %v3558_v22 = vpop.f32.mrb[79].mxu1  ;;  %v2491_v17 = vld [vmem:[#allocation3 + $0x8a8] sm:$0xff] }
 0x3ce   : > { %v3998_v10 = vpop.f32.mrb[10].mxu0 }
 0x3cf   : > { %v10302_v20 = vadd.f32 %v3998_v10, %v10160_v21  ;;  %v4000_v25 = vpop.f32.mrb[11].mxu0  ;;  %7688 = vmatmul.mubr.bf16.gmra.mrb[184].mxu1 %v2483_v18  ;;  %v2500_v10 = vld [vmem:[#allocation3 + $0x8f0] sm:$0xff]  ;;  %5453 = vrot.lane.b32.xlu0 %v5291_v51, %s8529_s22  ;;  %v5297_v51 = vld [vmem:[#allocation4 + $0x140] sm:$0xff] }
 0x3d0   : > { %7691 = vmatprep.mubr.bf16.mxu1 %v2492_v16  ;;  %5455 = vrot.lane.b32.xlu1 %v5292_v14, %s8529_s22  ;;  %v5298_v14 = vld [vmem:[#allocation4 + $0x148] sm:$0xff] }
 0x3d1   : > { %4210 = vmatmul.mubr.bf16.gmra.mrb[116].mxu0 %v2481_v26 }
 0x3d2   : > { %4217 = vmatprep.mubr.bf16.mxu0 %v2491_v17  ;;  %v10308_v21 = vpop.f32.mrb[80].mxu1 }
 0x3d3   : > { %v3563_v42 = vpop.f32.mrb[81].mxu1 }
 0x3d4   : > { %v4003_v38 = vpop.f32.mrb[12].mxu0  ;;  %v10313_v47 = vpop.f32.mrb[82].mxu1  ;;  %5459 = vrot.lane.b32.xlu1 %v5294_v58, %s8529_s22 }
 0x3d5   : > { %v10311_v11 = vadd.f32 %v4003_v38, %v10162_v27  ;;  %v4005_v44 = vpop.f32.mrb[13].mxu0  ;;  %v3566_v1 = vpop.f32.mrb[83].mxu1  ;;  %v2490_v27 = vld [vmem:[#allocation3 + $0x8a0] sm:$0xff] }
 0x3d6   : > { %v4006_v7 = vpop.f32.mrb[14].mxu0  ;;  %v5293_v38 = vld [vmem:[#allocation4 + $0x120] sm:$0xff] }
 0x3d7   : > { %v10316_v61 = vadd.f32 %v4006_v7, %v10164_v19  ;;  %v4008_v5 = vpop.f32.mrb[15].mxu0  ;;  %7692 = vmatmul.mubr.bf16.gmra.mrb[188].mxu1 %v2501_v49  ;;  %5457 = vrot.lane.b32.xlu0 %v5293_v38, %s8529_s22  ;;  %v5295_v49 = vld [vmem:[#allocation4 + $0x130] sm:$0xff] }
 0x3d9   : > { %4218 = vmatmul.mubr.bf16.gmra.mrb[120].mxu0 %v2490_v27 }
 0x3da   : > { %4225 = vmatprep.mubr.bf16.mxu0 %v2500_v10  ;;  %v10322_v22 = vpop.f32.mrb[84].mxu1 }
 0x3db   : > { %v3571_v26 = vpop.f32.mrb[85].mxu1  ;;  %5461 = vrot.lane.b32.xlu0 %v5295_v49, %s8529_s22  ;;  %v5302_v49 = vld [vmem:[#allocation4 + $0x168] sm:$0xff] }
 0x3dc   : > { %v4011_v19 = vpop.f32.mrb[16].mxu0  ;;  %v10327_v17 = vpop.f32.mrb[86].mxu1 }
 0x3dd   : > { %v10325_v25 = vadd.f32 %v4011_v19, %v10166_v32  ;;  %v4013_v18 = vpop.f32.mrb[17].mxu0  ;;  %v3574_v44 = vpop.f32.mrb[87].mxu1  ;;  %v5296_v32 = vld [vmem:[#allocation4 + $0x138] sm:$0xff] }
 0x3de   : > { %v4014_v16 = vpop.f32.mrb[18].mxu0  ;;  %5463 = vrot.lane.b32.xlu1 %v5296_v32, %s8529_s22 }
 0x3df   : > { %v10330_v42 = vadd.f32 %v4014_v16, %v10168_v34  ;;  %v4016_v7 = vpop.f32.mrb[19].mxu0  ;;  %5465 = vrot.lane.b32.xlu0 %v5297_v51, %s8529_s22  ;;  %v5300_v16 = vld [vmem:[#allocation4 + $0x158] sm:$0xff]  ;;  %v5303_v51 = vld [vmem:[#allocation4 + $0x170] sm:$0xff] }
 0x3e1   : > { %4226 = vmatmul.mubr.bf16.gmra.mrb[124].mxu0 %v2499_v24  ;;  %v5299_v24 = vld [vmem:[#allocation4 + $0x150] sm:$0xff] }
 0x3e2   : > { %v10336_v55 = vpop.f32.mrb[88].mxu1  ;;  %5467 = vrot.lane.b32.xlu1 %v5298_v14, %s8529_s22  ;;  %v5304_v14 = vld [vmem:[#allocation4 + $0x178] sm:$0xff] }
 0x3e3   : > { %v3579_v34 = vpop.f32.mrb[89].mxu1  ;;  %5469 = vrot.lane.b32.xlu0 %v5299_v24, %s8529_s22 }
 0x3e4   : > { %v4019_v57 = vpop.f32.mrb[20].mxu0  ;;  %v10341_v10 = vpop.f32.mrb[90].mxu1 }
 0x3e5   : > { %v10339_v1 = vadd.f32 %v4019_v57, %v10170_v39  ;;  %v4021_v5 = vpop.f32.mrb[21].mxu0  ;;  %v3582_v26 = vpop.f32.mrb[91].mxu1  ;;  %v5301_v57 = vld [vmem:[#allocation4 + $0x160] sm:$0xff] }
 0x3e6   : > { %v4022_v27 = vpop.f32.mrb[22].mxu0  ;;  %5471 = vrot.lane.b32.xlu1 %v5300_v16, %s8529_s22 }
 0x3e7   : > { %v10344_v19 = vadd.f32 %v4022_v27, %v10172_v41  ;;  %v4024_v18 = vpop.f32.mrb[23].mxu0  ;;  %5473 = vrot.lane.b32.xlu0 %v5301_v57, %s8529_s22 }
 0x3ea   : > { %v10350_v39 = vpop.f32.mrb[92].mxu1  ;;  %5475 = vrot.lane.b32.xlu1 %v5302_v49, %s8529_s22 }
 0x3eb   : > { %v3587_v41 = vpop.f32.mrb[93].mxu1  ;;  %5477 = vrot.lane.b32.xlu0 %v5303_v51, %s8529_s22 }
 0x3ec   : > { %v4027_v58 = vpop.f32.mrb[24].mxu0  ;;  %v10355_v7 = vpop.f32.mrb[94].mxu1  ;;  %v5306_v41 = vld [vmem:[#allocation4 + $0x188] sm:$0xff] }
 0x3ed   : > { %v10353_v38 = vadd.f32 %v4027_v58, %v10178_v33  ;;  %v4029_v44 = vpop.f32.mrb[25].mxu0  ;;  %v3590_v5 = vpop.f32.mrb[95].mxu1 }
 0x3ee   : > { %v4030_v32 = vpop.f32.mrb[26].mxu0  ;;  %5479 = vrot.lane.b32.xlu1 %v5304_v14, %s8529_s22  ;;  %v5305_v44 = vld [vmem:[#allocation4 + $0x180] sm:$0xff]  ;;  %v5308_v5 = vld [vmem:[#allocation4 + $0x198] sm:$0xff] }
 0x3ef   : > { %v10358_v34 = vadd.f32 %v4030_v32, %v10183_v50  ;;  %v4032_v27 = vpop.f32.mrb[27].mxu0  ;;  %5481 = vrot.lane.b32.xlu0 %v5305_v44, %s8529_s22 }
 0x3f0   : > { %v5307_v27 = vld [vmem:[#allocation4 + $0x190] sm:$0xff] }
 0x3f2   : > { %v10364_v33 = vpop.f32.mrb[96].mxu1  ;;  %5483 = vrot.lane.b32.xlu1 %v5306_v41, %s8529_s22  ;;  %v5309_v41 = vld [vmem:[#allocation4 + $0x1a0] sm:$0xff] }
 0x3f3   : > { %v3595_v50 = vpop.f32.mrb[97].mxu1  ;;  %5485 = vrot.lane.b32.xlu0 %v5307_v27, %s8529_s22  ;;  %v5311_v27 = vld [vmem:[#allocation4 + $0x1b0] sm:$0xff] }
 0x3f4   : > { %v4035_v26 = vpop.f32.mrb[28].mxu0  ;;  %v10369_v24 = vpop.f32.mrb[98].mxu1 }
 0x3f5   : > { %v10367_v18 = vadd.f32 %v4035_v26, %v10188_v56  ;;  %v4037_v16 = vpop.f32.mrb[29].mxu0  ;;  %v3598_v49 = vpop.f32.mrb[99].mxu1 }
 0x3f6   : > { %v4038_v58 = vpop.f32.mrb[30].mxu0  ;;  %5487 = vrot.lane.b32.xlu1 %v5308_v5, %s8529_s22  ;;  %v5312_v5 = vld [vmem:[#allocation4 + $0x1b8] sm:$0xff] }
 0x3f7   : > { %v10372_v32 = vadd.f32 %v4038_v58, %v10193_v60  ;;  %v4040_v57 = vpop.f32.mrb[31].mxu0  ;;  %v5310_v58 = vld [vmem:[#allocation4 + $0x1a8] sm:$0xff]  ;;  %5489 = vrot.lane.b32.xlu0 %v5309_v41, %s8529_s22 }
 0x3fa   : > { %v10378_v56 = vpop.f32.mrb[100].mxu1  ;;  %5491 = vrot.lane.b32.xlu1 %v5310_v58, %s8529_s22  ;;  %v5314_v58 = vld [vmem:[#allocation4 + $0x1c8] sm:$0xff] }
 0x3fb   : > { %13025 = vst [vmem:[#allocation5_spill] sm:$0xff] %v10378_v56  ;;  %v3603_v60 = vpop.f32.mrb[101].mxu1  ;;  %5493 = vrot.lane.b32.xlu0 %v5311_v27, %s8529_s22  ;;  %v5316_v27 = vld [vmem:[#allocation4 + $0x1d8] sm:$0xff] }
 0x3fc   : > { %v4043_v14 = vpop.f32.mrb[32].mxu0  ;;  %v10383_v50 = vpop.f32.mrb[102].mxu1 }
 0x3fd   : > { %v10381_v51 = vadd.f32 %v4043_v14, %v10210_v35  ;;  %v4045_v26 = vpop.f32.mrb[33].mxu0  ;;  %13026 = vst [vmem:[#allocation6_spill] sm:$0xff] %v10383_v50  ;;  %v3606_v49 = vpop.f32.mrb[103].mxu1 }
 0x3fe   : > { %v4046_v16 = vpop.f32.mrb[34].mxu0  ;;  %5495 = vrot.lane.b32.xlu1 %v5312_v5, %s8529_s22 }
 0x3ff   : > { %v10386_v44 = vadd.f32 %v4046_v16, %v10212_v37  ;;  %v4048_v57 = vpop.f32.mrb[35].mxu0 }
 0x400   : > { %v5313_v57 = vld [vmem:[#allocation4 + $0x1c0] sm:$0xff] }
 0x401   : > { %5497 = vrot.lane.b32.xlu0 %v5313_v57, %s8529_s22 }
 0x402   : > { %v10392_v35 = vpop.f32.mrb[104].mxu1  ;;  %5499 = vrot.lane.b32.xlu1 %v5314_v58, %s8529_s22  ;;  %v5318_v58 = vld [vmem:[#allocation4 + $0x1e8] sm:$0xff] }
 0x403   : > { %13027 = vst [vmem:[#allocation7_spill] sm:$0xff] %v10392_v35  ;;  %v3611_v37 = vpop.f32.mrb[105].mxu1  ;;  %v5315_v35 = vld [vmem:[#allocation4 + $0x1d0] sm:$0xff] }
 0x404   : > { %v4051_v14 = vpop.f32.mrb[36].mxu0  ;;  %v10397_v16 = vpop.f32.mrb[106].mxu1 }
 0x405   : > { %v10395_v60 = vadd.f32 %v4051_v14, %v10214_v43  ;;  %v4053_v26 = vpop.f32.mrb[37].mxu0  ;;  %13028 = vst [vmem:[#allocation8_spill] sm:$0xff] %v10397_v16  ;;  %v3614_v50 = vpop.f32.mrb[107].mxu1  ;;  %5501 = vrot.lane.b32.xlu0 %v5315_v35, %s8529_s22  ;;  %v5320_v35 = vld [vmem:[#allocation4 + $0x1f8] sm:$0xff] }
 0x406   : > { %v4054_v49 = vpop.f32.mrb[38].mxu0  ;;  %5503 = vrot.lane.b32.xlu1 %v5316_v27, %s8529_s22 }
 0x407   : > { %v10400_v41 = vadd.f32 %v4054_v49, %v10216_v46  ;;  %v4056_v5 = vpop.f32.mrb[39].mxu0 }
 0x408   : > { %v5317_v5 = vld [vmem:[#allocation4 + $0x1e0] sm:$0xff] }
 0x409   : > { %5505 = vrot.lane.b32.xlu0 %v5317_v5, %s8529_s22 }
 0x40a   : > { %v10406_v43 = vpop.f32.mrb[108].mxu1  ;;  %5507 = vrot.lane.b32.xlu1 %v5318_v58, %s8529_s22 }
 0x40b   : > { %13029 = vst [vmem:[#allocation9_spill] sm:$0xff] %v10406_v43  ;;  %v3619_v46 = vpop.f32.mrb[109].mxu1  ;;  %v5319_v43 = vld [vmem:[#allocation4 + $0x1f0] sm:$0xff] }
 0x40c   : > { %v4059_v14 = vpop.f32.mrb[40].mxu0  ;;  %v10411_v50 = vpop.f32.mrb[110].mxu1 }
 0x40d   : > { %v10409_v37 = vadd.f32 %v4059_v14, %v10218_v53  ;;  %v4061_v26 = vpop.f32.mrb[41].mxu0  ;;  %13030 = vst [vmem:[#allocation10_spill] sm:$0xff] %v10411_v50  ;;  %v3622_v16 = vpop.f32.mrb[111].mxu1  ;;  %5509 = vrot.lane.b32.xlu0 %v5319_v43, %s8529_s22 }
 0x40e   : > { %v4062_v49 = vpop.f32.mrb[42].mxu0  ;;  %5511 = vrot.lane.b32.xlu1 %v5320_v35, %s8529_s22 }
 0x40f   : > { %v10414_v57 = vadd.f32 %v4062_v49, %v10220_v2  ;;  %v4064_v27 = vpop.f32.mrb[43].mxu0 }
 0x412   : > { %v10420_v53 = vpop.f32.mrb[112].mxu1 }
 0x413   : > { %13031 = vst [vmem:[#allocation11_spill] sm:$0xff] %v10420_v53  ;;  %v3627_v2 = vpop.f32.mrb[113].mxu1 }
 0x414   : > { %v4067_v14 = vpop.f32.mrb[44].mxu0  ;;  %v10425_v16 = vpop.f32.mrb[114].mxu1 }
 0x415   : > { %v10423_v46 = vadd.f32 %v4067_v14, %v10222_v63  ;;  %v4069_v26 = vpop.f32.mrb[45].mxu0  ;;  %13032 = vst [vmem:[#allocation12_spill] sm:$0xff] %v10425_v16  ;;  %v3630_v5 = vpop.f32.mrb[115].mxu1 }
 0x416   : > { %v4070_v49 = vpop.f32.mrb[46].mxu0 }
 0x417   : > { %v10428_v58 = vadd.f32 %v4070_v49, %v10224_v3  ;;  %v4072_v27 = vpop.f32.mrb[47].mxu0 }
 0x41a   : > { %v10430_v50 = vpop.f32.mrb[116].mxu1 }
 0x41b   : > { %13033 = vst [vmem:[#allocation13_spill] sm:$0xff] %v10430_v50  ;;  %v3635_v53 = vpop.f32.mrb[117].mxu1 }
 0x41c   : > { %v4075_v35 = vpop.f32.mrb[48].mxu0  ;;  %v10435_v63 = vpop.f32.mrb[118].mxu1 }
 0x41d   : > { %v10433_v43 = vadd.f32 %v4075_v35, %v10228_v12  ;;  %v4077_v56 = vpop.f32.mrb[49].mxu0  ;;  %13034 = vst [vmem:[#allocation14_spill] sm:$0xff] %v10435_v63  ;;  %v3638_v26 = vpop.f32.mrb[119].mxu1 }
 0x41e   : > { %v4078_v14 = vpop.f32.mrb[50].mxu0 }
 0x41f   : > { %v10438_v2 = vadd.f32 %v4078_v14, %v10230_v23  ;;  %v4080_v16 = vpop.f32.mrb[51].mxu0 }
 0x422   : > { %v10440_v3 = vpop.f32.mrb[120].mxu1 }
 0x423   : > { %13035 = vst [vmem:[#allocation15_spill] sm:$0xff] %v10440_v3  ;;  %v3643_v27 = vpop.f32.mrb[121].mxu1 }
 0x424   : > { %v4083_v49 = vpop.f32.mrb[52].mxu0  ;;  %v10445_v12 = vpop.f32.mrb[122].mxu1 }
 0x425   : > { %v10443_v5 = vadd.f32 %v4083_v49, %v10234_v31  ;;  %v4085_v50 = vpop.f32.mrb[53].mxu0  ;;  %13036 = vst [vmem:[#allocation16_spill] sm:$0xff] %v10445_v12  ;;  %v3646_v35 = vpop.f32.mrb[123].mxu1 }
 0x426   : > { %v4086_v53 = vpop.f32.mrb[54].mxu0 }
 0x427   : > { %v10448_v56 = vadd.f32 %v4086_v53, %v10238_v6  ;;  %v4088_v63 = vpop.f32.mrb[55].mxu0 }
 0x42a   : > { %v10450_v23 = vpop.f32.mrb[124].mxu1 }
 0x42b   : > { %v3651_v26 = vpop.f32.mrb[125].mxu1 }
 0x42c   : > { %v4091_v14 = vpop.f32.mrb[56].mxu0  ;;  %v10455_v31 = vpop.f32.mrb[126].mxu1 }
 0x42d   : > { %v10453_v16 = vadd.f32 %v4091_v14, %v10242_v28  ;;  %v4093_v3 = vpop.f32.mrb[57].mxu0  ;;  %13037 = vst [vmem:[#allocation17_spill] sm:$0xff] %v10455_v31  ;;  %v3654_v27 = vpop.f32.mrb[127].mxu1 }
 0x42e   : > { %v4094_v49 = vpop.f32.mrb[58].mxu0 }
 0x42f   : > { %v10458_v50 = vadd.f32 %v4094_v49, %v10246_v54  ;;  %v4096_v12 = vpop.f32.mrb[59].mxu0 }
 0x432   : > { %v7633_v53 = vpop.f32.mrb[128].mxu1 }
 0x433   : > { %v10464_v35 = vadd.f32 %v10283_v15, %v7633_v53  ;;  %v4268_v14 = vpop.f32.mrb[129].mxu1 }
 0x434   : > { %v4099_v6 = vpop.f32.mrb[60].mxu0  ;;  %v10467_v3 = vadd.f32 %v10269_v52, %v4268_v14  ;;  %v7634_v31 = vpop.f32.mrb[130].mxu1 }
 0x435   : > { %v10461_v63 = vadd.f32 %v4099_v6, %v10250_v9  ;;  %13038 = vst [vmem:[#allocation18_spill] sm:$0xff] %v10464_v35  ;;  %v4101_v28 = vpop.f32.mrb[61].mxu0  ;;  %v10473_v12 = vadd.f32 %v10288_v40, %v7634_v31  ;;  %v4271_v27 = vpop.f32.mrb[131].mxu1 }
 0x436   : > { %13039 = vst [vmem:[#allocation19_spill] sm:$0xff] %v10467_v3  ;;  %v4102_v26 = vpop.f32.mrb[62].mxu0  ;;  %v10476_v9 = vadd.f32 %v10274_v4, %v4271_v27  ;;  %v4593_v15 = vmul.f32 %v10467_v3, %v10467_v3 }
 0x437   : > { %v10470_v54 = vadd.f32 %v4102_v26, %v10254_v13  ;;  %v4104_v49 = vpop.f32.mrb[63].mxu0  ;;  %v4595_v13 = vmul.f32 %v10464_v35, %v10464_v35  ;;  %v4596_v27 = vmul.f32 %v10473_v12, %v10473_v12 }
 0x438   : > { %13040 = vst [vmem:[#allocation20_spill] sm:$0xff] %v10476_v9  ;;  %v4523_v52 = vadd.f32 %v10476_v9, %v10467_v3  ;;  %v4594_v6 = vmul.f32 %v10476_v9, %v10476_v9 }
 0x43a   : > { %v4524_v40 = vadd.f32 %v4523_v52, %v10464_v35  ;;  %v4657_v31 = vadd.f32 %v4594_v6, %v4593_v15  ;;  %v7637_v28 = vpop.f32.mrb[132].mxu1 }
 0x43b   : > { %v10491_v14 = vadd.f32 %v10311_v11, %v7637_v28  ;;  %v4284_v49 = vpop.f32.mrb[133].mxu1 }
 0x43c   : > { %v4107_v53 = vpop.f32.mrb[64].mxu0  ;;  %v4658_v9 = vadd.f32 %v4657_v31, %v4595_v13  ;;  %v10496_v3 = vadd.f32 %v10297_v62, %v4284_v49  ;;  %v4525_v52 = vadd.f32 %v4524_v40, %v10473_v12  ;;  %v7638_v6 = vpop.f32.mrb[134].mxu1 }
 0x43d   : > { %v10488_v4 = vadd.f32 %v4107_v53, %v10258_v30  ;;  %v4109_v26 = vpop.f32.mrb[65].mxu0  ;;  %v10503_v30 = vadd.f32 %v10316_v61, %v7638_v6  ;;  %v4287_v53 = vpop.f32.mrb[135].mxu1  ;;  %v4599_v61 = vmul.f32 %v10491_v14, %v10491_v14 }
 0x43e   : > { %v4110_v15 = vpop.f32.mrb[66].mxu0  ;;  %v4526_v28 = vadd.f32 %v4525_v52, %v10496_v3  ;;  %v4597_v13 = vmul.f32 %v10496_v3, %v10496_v3  ;;  %v4659_v31 = vadd.f32 %v4658_v9, %v4596_v27  ;;  %v10509_v62 = vadd.f32 %v10302_v20, %v4287_v53 }
 0x43f   : > { %v10500_v35 = vadd.f32 %v4110_v15, %v10262_v45  ;;  %v4112_v11 = vpop.f32.mrb[67].mxu0  ;;  %v4600_v53 = vmul.f32 %v10503_v30, %v10503_v30 }
 0x440   : > { %v4660_v40 = vadd.f32 %v4659_v31, %v4597_v13  ;;  %v4527_v26 = vadd.f32 %v4526_v28, %v10509_v62  ;;  %v4598_v45 = vmul.f32 %v10509_v62, %v10509_v62 }
 0x442   : > { %v4528_v49 = vadd.f32 %v4527_v26, %v10491_v14  ;;  %v4661_v15 = vadd.f32 %v4660_v40, %v4598_v45  ;;  %v7641_v6 = vpop.f32.mrb[136].mxu1 }
 0x443   : > { %v10521_v20 = vadd.f32 %v10339_v1, %v7641_v6  ;;  %v4300_v27 = vpop.f32.mrb[137].mxu1 }
 0x444   : > { %v4115_v52 = vpop.f32.mrb[68].mxu0  ;;  %v4662_v28 = vadd.f32 %v4661_v15, %v4599_v61  ;;  %v10526_v13 = vadd.f32 %v10325_v25, %v4300_v27  ;;  %v4529_v31 = vadd.f32 %v4528_v49, %v10503_v30  ;;  %v7642_v26 = vpop.f32.mrb[138].mxu1 }
 0x445   : > { %v10518_v11 = vadd.f32 %v4115_v52, %v10266_v48  ;;  %v4117_v9 = vpop.f32.mrb[69].mxu0  ;;  %v10533_v48 = vadd.f32 %v10344_v19, %v7642_v26  ;;  %v4303_v52 = vpop.f32.mrb[139].mxu1  ;;  %v4603_v19 = vmul.f32 %v10521_v20, %v10521_v20 }
 0x446   : > { %v4118_v40 = vpop.f32.mrb[70].mxu0  ;;  %v4530_v6 = vadd.f32 %v4529_v31, %v10526_v13  ;;  %v4601_v61 = vmul.f32 %v10526_v13, %v10526_v13  ;;  %v4663_v15 = vadd.f32 %v4662_v28, %v4600_v53  ;;  %v10539_v25 = vadd.f32 %v10330_v42, %v4303_v52 }
 0x447   : > { %v10530_v45 = vadd.f32 %v4118_v40, %v10271_v59  ;;  %v4120_v1 = vpop.f32.mrb[71].mxu0  ;;  %v4604_v52 = vmul.f32 %v10533_v48, %v10533_v48 }
 0x448   : > { %v4664_v49 = vadd.f32 %v4663_v15, %v4601_v61  ;;  %v4531_v9 = vadd.f32 %v4530_v6, %v10539_v25  ;;  %v4602_v59 = vmul.f32 %v10539_v25, %v10539_v25 }
 0x44a   : > { %v4532_v27 = vadd.f32 %v4531_v9, %v10521_v20  ;;  %v4665_v40 = vadd.f32 %v4664_v49, %v4602_v59  ;;  %v7645_v26 = vpop.f32.mrb[140].mxu1 }
 0x44b   : > { %v10551_v42 = vadd.f32 %v10367_v18, %v7645_v26  ;;  %v4316_v28 = vpop.f32.mrb[141].mxu1 }
 0x44c   : > { %v4123_v31 = vpop.f32.mrb[72].mxu0  ;;  %v4666_v6 = vadd.f32 %v4665_v40, %v4603_v19  ;;  %v10556_v61 = vadd.f32 %v10353_v38, %v4316_v28  ;;  %v4533_v15 = vadd.f32 %v4532_v27, %v10533_v48  ;;  %v7646_v9 = vpop.f32.mrb[142].mxu1 }
 0x44d   : > { %v10548_v1 = vadd.f32 %v4123_v31, %v10280_v0  ;;  %v4125_v53 = vpop.f32.mrb[73].mxu0  ;;  %v10563_v0 = vadd.f32 %v10372_v32, %v7646_v9  ;;  %v4319_v31 = vpop.f32.mrb[143].mxu1  ;;  %v4607_v32 = vmul.f32 %v10551_v42, %v10551_v42 }
 0x44e   : > { %v4126_v49 = vpop.f32.mrb[74].mxu0  ;;  %v4534_v26 = vadd.f32 %v4533_v15, %v10556_v61  ;;  %v4605_v19 = vmul.f32 %v10556_v61, %v10556_v61  ;;  %v4667_v40 = vadd.f32 %v4666_v6, %v4604_v52  ;;  %v10569_v38 = vadd.f32 %v10358_v34, %v4319_v31 }
 0x44f   : > { %v10560_v59 = vadd.f32 %v4126_v49, %v10285_v29  ;;  %v4128_v18 = vpop.f32.mrb[75].mxu0  ;;  %v4608_v31 = vmul.f32 %v10563_v0, %v10563_v0 }
 0x450   : > { %v4668_v27 = vadd.f32 %v4667_v40, %v4605_v19  ;;  %v4535_v53 = vadd.f32 %v4534_v26, %v10569_v38  ;;  %v4606_v29 = vmul.f32 %v10569_v38, %v10569_v38 }
 0x452   : > { %v4536_v28 = vadd.f32 %v4535_v53, %v10551_v42  ;;  %v4669_v49 = vadd.f32 %v4668_v27, %v4606_v29  ;;  %v7649_v9 = vpop.f32.mrb[144].mxu1 }
 0x453   : > { %v10581_v34 = vadd.f32 %v10395_v60, %v7649_v9  ;;  %v4332_v6 = vpop.f32.mrb[145].mxu1 }
 0x454   : > { %v4131_v15 = vpop.f32.mrb[76].mxu0  ;;  %v4670_v26 = vadd.f32 %v4669_v49, %v4607_v32  ;;  %v10586_v19 = vadd.f32 %v10381_v51, %v4332_v6  ;;  %v4537_v40 = vadd.f32 %v4536_v28, %v10563_v0  ;;  %v7650_v53 = vpop.f32.mrb[146].mxu1 }
 0x455   : > { %v10578_v18 = vadd.f32 %v4131_v15, %v10294_v36  ;;  %v4133_v52 = vpop.f32.mrb[77].mxu0  ;;  %v10593_v36 = vadd.f32 %v10400_v41, %v7650_v53  ;;  %v4335_v15 = vpop.f32.mrb[147].mxu1  ;;  %v4611_v41 = vmul.f32 %v10581_v34, %v10581_v34 }
 0x456   : > { %v4134_v27 = vpop.f32.mrb[78].mxu0  ;;  %v4538_v9 = vadd.f32 %v4537_v40, %v10586_v19  ;;  %v4609_v32 = vmul.f32 %v10586_v19, %v10586_v19  ;;  %v4671_v49 = vadd.f32 %v4670_v26, %v4608_v31  ;;  %v10599_v51 = vadd.f32 %v10386_v44, %v4335_v15 }
 0x457   : > { %v10590_v29 = vadd.f32 %v4134_v27, %v10299_v8  ;;  %v4136_v60 = vpop.f32.mrb[79].mxu0  ;;  %v4612_v15 = vmul.f32 %v10593_v36, %v10593_v36 }
 0x458   : > { %v4672_v28 = vadd.f32 %v4671_v49, %v4609_v32  ;;  %v4539_v52 = vadd.f32 %v4538_v9, %v10599_v51  ;;  %v4610_v8 = vmul.f32 %v10599_v51, %v10599_v51 }
 0x45a   : > { %v4540_v6 = vadd.f32 %v4539_v52, %v10581_v34  ;;  %v4673_v27 = vadd.f32 %v4672_v28, %v4610_v8  ;;  %v7653_v53 = vpop.f32.mrb[148].mxu1 }
 0x45b   : > { %v10611_v44 = vadd.f32 %v10423_v46, %v7653_v53  ;;  %v4348_v26 = vpop.f32.mrb[149].mxu1 }
 0x45c   : > { %v4139_v40 = vpop.f32.mrb[80].mxu0  ;;  %v4674_v9 = vadd.f32 %v4673_v27, %v4611_v41  ;;  %v10616_v32 = vadd.f32 %v10409_v37, %v4348_v26  ;;  %v4541_v49 = vadd.f32 %v4540_v6, %v10593_v36  ;;  %v7654_v52 = vpop.f32.mrb[150].mxu1 }
 0x45d   : > { %v10608_v60 = vadd.f32 %v4139_v40, %v10308_v21  ;;  %v4141_v31 = vpop.f32.mrb[81].mxu0  ;;  %v10623_v21 = vadd.f32 %v10428_v58, %v7654_v52  ;;  %v4351_v40 = vpop.f32.mrb[151].mxu1  ;;  %v4615_v58 = vmul.f32 %v10611_v44, %v10611_v44 }
 0x45e   : > { %v4142_v28 = vpop.f32.mrb[82].mxu0  ;;  %v4542_v53 = vadd.f32 %v4541_v49, %v10616_v32  ;;  %v4613_v41 = vmul.f32 %v10616_v32, %v10616_v32  ;;  %v4675_v27 = vadd.f32 %v4674_v9, %v4612_v15  ;;  %v10629_v37 = vadd.f32 %v10414_v57, %v4351_v40 }
 0x45f   : > { %v10620_v8 = vadd.f32 %v4142_v28, %v10313_v47  ;;  %v4144_v46 = vpop.f32.mrb[83].mxu0  ;;  %v4616_v40 = vmul.f32 %v10623_v21, %v10623_v21 }
 0x460   : > { %v4676_v6 = vadd.f32 %v4675_v27, %v4613_v41  ;;  %v4543_v31 = vadd.f32 %v4542_v53, %v10629_v37  ;;  %v4614_v47 = vmul.f32 %v10629_v37, %v10629_v37 }
 0x462   : > { %v4544_v26 = vadd.f32 %v4543_v31, %v10611_v44  ;;  %v4677_v28 = vadd.f32 %v4676_v6, %v4614_v47  ;;  %v7657_v52 = vpop.f32.mrb[152].mxu1 }
 0x463   : > { %v10641_v57 = vadd.f32 %v10443_v5, %v7657_v52  ;;  %v4364_v9 = vpop.f32.mrb[153].mxu1 }
 0x464   : > { %v4147_v49 = vpop.f32.mrb[84].mxu0  ;;  %v4678_v53 = vadd.f32 %v4677_v28, %v4615_v58  ;;  %v10646_v41 = vadd.f32 %v10433_v43, %v4364_v9  ;;  %v4545_v27 = vadd.f32 %v4544_v26, %v10623_v21  ;;  %v7658_v31 = vpop.f32.mrb[154].mxu1 }
 0x465   : > { %v10638_v46 = vadd.f32 %v4147_v49, %v10322_v22  ;;  %v4149_v15 = vpop.f32.mrb[85].mxu0  ;;  %v10653_v22 = vadd.f32 %v10448_v56, %v7658_v31  ;;  %v4367_v49 = vpop.f32.mrb[155].mxu1  ;;  %v4619_v56 = vmul.f32 %v10641_v57, %v10641_v57 }
 0x466   : > { %v4150_v6 = vpop.f32.mrb[86].mxu0  ;;  %v4546_v52 = vadd.f32 %v4545_v27, %v10646_v41  ;;  %v4617_v58 = vmul.f32 %v10646_v41, %v10646_v41  ;;  %v4679_v28 = vadd.f32 %v4678_v53, %v4616_v40  ;;  %v10659_v43 = vadd.f32 %v10438_v2, %v4367_v49 }
 0x467   : > { %v10650_v47 = vadd.f32 %v4150_v6, %v10327_v17  ;;  %v4152_v5 = vpop.f32.mrb[87].mxu0  ;;  %v4620_v49 = vmul.f32 %v10653_v22, %v10653_v22 }
 0x468   : > { %v4680_v26 = vadd.f32 %v4679_v28, %v4617_v58  ;;  %v4547_v15 = vadd.f32 %v4546_v52, %v10659_v43  ;;  %v4618_v17 = vmul.f32 %v10659_v43, %v10659_v43 }
 0x46a   : > { %v4548_v9 = vadd.f32 %v4547_v15, %v10641_v57  ;;  %v4681_v6 = vadd.f32 %v4680_v26, %v4618_v17  ;;  %v7661_v31 = vpop.f32.mrb[156].mxu1 }
 0x46b   : > { %v10671_v2 = vadd.f32 %v10461_v63, %v7661_v31  ;;  %v4380_v53 = vpop.f32.mrb[157].mxu1 }
 0x46c   : > { %v4155_v27 = vpop.f32.mrb[88].mxu0  ;;  %v4682_v52 = vadd.f32 %v4681_v6, %v4619_v56  ;;  %v10676_v58 = vadd.f32 %v10453_v16, %v4380_v53  ;;  %v4549_v28 = vadd.f32 %v4548_v9, %v10653_v22  ;;  %v7662_v15 = vpop.f32.mrb[158].mxu1 }
 0x46d   : > { %v10668_v5 = vadd.f32 %v4155_v27, %v10336_v55  ;;  %v4157_v40 = vpop.f32.mrb[89].mxu0  ;;  %v10683_v55 = vadd.f32 %v10470_v54, %v7662_v15  ;;  %v4383_v27 = vpop.f32.mrb[159].mxu1  ;;  %v4623_v54 = vmul.f32 %v10671_v2, %v10671_v2 }
 0x46e   : > { %v4158_v26 = vpop.f32.mrb[90].mxu0  ;;  %v4550_v31 = vadd.f32 %v4549_v28, %v10676_v58  ;;  %v4621_v56 = vmul.f32 %v10676_v58, %v10676_v58  ;;  %v4683_v6 = vadd.f32 %v4682_v52, %v4620_v49  ;;  %v10689_v16 = vadd.f32 %v10458_v50, %v4383_v27 }
 0x46f   : > { %v10680_v17 = vadd.f32 %v4158_v26, %v10341_v10  ;;  %v4160_v63 = vpop.f32.mrb[91].mxu0  ;;  %v4624_v27 = vmul.f32 %v10683_v55, %v10683_v55 }
 0x470   : > { %v4684_v9 = vadd.f32 %v4683_v6, %v4621_v56  ;;  %v4551_v40 = vadd.f32 %v4550_v31, %v10689_v16  ;;  %v4622_v10 = vmul.f32 %v10689_v16, %v10689_v16 }
 0x472   : > { %v4552_v53 = vadd.f32 %v4551_v40, %v10671_v2  ;;  %v4685_v26 = vadd.f32 %v4684_v9, %v4622_v10  ;;  %v7665_v15 = vpop.f32.mrb[160].mxu1 }
 0x473   : > { %v10701_v50 = vadd.f32 %v10518_v11, %v7665_v15  ;;  %v4396_v52 = vpop.f32.mrb[161].mxu1 }
 0x474   : > { %v4163_v28 = vpop.f32.mrb[92].mxu0  ;;  %v4686_v31 = vadd.f32 %v4685_v26, %v4623_v54  ;;  %v10706_v56 = vadd.f32 %v10488_v4, %v4396_v52  ;;  %v4553_v6 = vadd.f32 %v4552_v53, %v10683_v55  ;;  %v7666_v40 = vpop.f32.mrb[162].mxu1 }
 0x475   : > { %v10698_v63 = vadd.f32 %v4163_v28, %v10350_v39  ;;  %v4165_v49 = vpop.f32.mrb[93].mxu0  ;;  %v10713_v39 = vadd.f32 %v10530_v45, %v7666_v40  ;;  %v4399_v28 = vpop.f32.mrb[163].mxu1  ;;  %v4627_v45 = vmul.f32 %v10701_v50, %v10701_v50 }
 0x476   : > { %v4166_v9 = vpop.f32.mrb[94].mxu0  ;;  %v4554_v15 = vadd.f32 %v4553_v6, %v10706_v56  ;;  %v4625_v54 = vmul.f32 %v10706_v56, %v10706_v56  ;;  %v4687_v26 = vadd.f32 %v4686_v31, %v4624_v27  ;;  %v10719_v4 = vadd.f32 %v10500_v35, %v4399_v28 }
 0x477   : > { %v10710_v10 = vadd.f32 %v4166_v9, %v10355_v7  ;;  %v4168_v11 = vpop.f32.mrb[95].mxu0  ;;  %v4628_v28 = vmul.f32 %v10713_v39, %v10713_v39 }
 0x478   : > { %v4688_v53 = vadd.f32 %v4687_v26, %v4625_v54  ;;  %v4555_v49 = vadd.f32 %v4554_v15, %v10719_v4  ;;  %v4626_v7 = vmul.f32 %v10719_v4, %v10719_v4 }
 0x47a   : > { %v4556_v52 = vadd.f32 %v4555_v49, %v10701_v50  ;;  %v4689_v9 = vadd.f32 %v4688_v53, %v4626_v7  ;;  %v7669_v40 = vpop.f32.mrb[164].mxu1 }
 0x47b   : > { %v10731_v35 = vadd.f32 %v10578_v18, %v7669_v40  ;;  %v4412_v31 = vpop.f32.mrb[165].mxu1 }
 0x47c   : > { %v4171_v6 = vpop.f32.mrb[96].mxu0  ;;  %v4690_v15 = vadd.f32 %v4689_v9, %v4627_v45  ;;  %v10736_v54 = vadd.f32 %v10548_v1, %v4412_v31  ;;  %v4557_v26 = vadd.f32 %v4556_v52, %v10713_v39  ;;  %v7670_v49 = vpop.f32.mrb[166].mxu1 }
 0x47d   : > { %v10728_v11 = vadd.f32 %v4171_v6, %v10364_v33  ;;  %13041 = vst [vmem:[#allocation21_spill] sm:$0xff] %v10731_v35  ;;  %v4173_v27 = vpop.f32.mrb[97].mxu0  ;;  %v10743_v33 = vadd.f32 %v10590_v29, %v7670_v49  ;;  %v4415_v6 = vpop.f32.mrb[167].mxu1  ;;  %v4631_v29 = vmul.f32 %v10731_v35, %v10731_v35 }
 0x47e   : > { %13042 = vst [vmem:[#allocation22_spill] sm:$0xff] %v10736_v54  ;;  %v4174_v53 = vpop.f32.mrb[98].mxu0  ;;  %v4558_v40 = vadd.f32 %v4557_v26, %v10736_v54  ;;  %v4629_v45 = vmul.f32 %v10736_v54, %v10736_v54  ;;  %v4691_v9 = vadd.f32 %v4690_v15, %v4628_v28  ;;  %v10749_v1 = vadd.f32 %v10560_v59, %v4415_v6 }
 0x47f   : > { %v10740_v7 = vadd.f32 %v4174_v53, %v10369_v24  ;;  %v4176_v18 = vpop.f32.mrb[99].mxu0  ;;  %v4632_v6 = vmul.f32 %v10743_v33, %v10743_v33 }
 0x480   : > { %v4692_v52 = vadd.f32 %v4691_v9, %v4629_v45  ;;  %v4559_v27 = vadd.f32 %v4558_v40, %v10749_v1  ;;  %v4630_v24 = vmul.f32 %v10749_v1, %v10749_v1  ;;  %v13043_v18 = vld [vmem:[#allocation5_spill] sm:$0xff] }
 0x482   : > { %v4560_v31 = vadd.f32 %v4559_v27, %v10731_v35  ;;  %v4693_v53 = vadd.f32 %v4692_v52, %v4630_v24  ;;  %v7673_v49 = vpop.f32.mrb[168].mxu1  ;;  %v13046_v24 = vld [vmem:[#allocation6_spill] sm:$0xff] }
 0x483   : > { %v10759_v28 = vadd.f32 %v10638_v46, %v7673_v49  ;;  %v4428_v15 = vpop.f32.mrb[169].mxu1 }
 0x484   : > { %v4179_v26 = vpop.f32.mrb[100].mxu0  ;;  %v4694_v40 = vadd.f32 %v4693_v53, %v4631_v29  ;;  %v10764_v45 = vadd.f32 %v10608_v60, %v4428_v15  ;;  %v4561_v9 = vadd.f32 %v4560_v31, %v10743_v33  ;;  %v7674_v52 = vpop.f32.mrb[170].mxu1 }
 0x485   : > { %v7777_v54 = vadd.f32 %v4179_v26, %v13043_v18  ;;  %13044 = vst [vmem:[#allocation5_spill] sm:$0xff] %v10759_v28  ;;  %v4181_v59 = vpop.f32.mrb[101].mxu0  ;;  %v10769_v26 = vadd.f32 %v10650_v47, %v7674_v52  ;;  %v4431_v49 = vpop.f32.mrb[171].mxu1  ;;  %v4635_v47 = vmul.f32 %v10759_v28, %v10759_v28 }
 0x486   : > { %13045 = vst [vmem:[#allocation23_spill] sm:$0xff] %v10764_v45  ;;  %v4182_v27 = vpop.f32.mrb[102].mxu0  ;;  %v4562_v18 = vadd.f32 %v4561_v9, %v10764_v45  ;;  %v4633_v59 = vmul.f32 %v10764_v45, %v10764_v45  ;;  %v4695_v29 = vadd.f32 %v4694_v40, %v4632_v6  ;;  %v10775_v60 = vadd.f32 %v10620_v8, %v4431_v49 }
 0x487   : > { %v7778_v35 = vadd.f32 %v4182_v27, %v13046_v24  ;;  %v4184_v46 = vpop.f32.mrb[103].mxu0  ;;  %v4636_v49 = vmul.f32 %v10769_v26, %v10769_v26 }
 0x488   : > { %v4696_v53 = vadd.f32 %v4695_v29, %v4633_v59  ;;  %v4563_v31 = vadd.f32 %v4562_v18, %v10775_v60  ;;  %v4634_v15 = vmul.f32 %v10775_v60, %v10775_v60  ;;  %v13047_v46 = vld [vmem:[#allocation7_spill] sm:$0xff] }
 0x48a   : > { %v4564_v27 = vadd.f32 %v4563_v31, %v10759_v28  ;;  %v4697_v52 = vadd.f32 %v4696_v53, %v4634_v15  ;;  %v7677_v24 = vpop.f32.mrb[172].mxu1  ;;  %v13050_v15 = vld [vmem:[#allocation8_spill] sm:$0xff] }
 0x48b   : > { %v10785_v6 = vadd.f32 %v10698_v63, %v7677_v24  ;;  %v4444_v40 = vpop.f32.mrb[173].mxu1 }
 0x48c   : > { %v4187_v9 = vpop.f32.mrb[104].mxu0  ;;  %v4698_v18 = vadd.f32 %v4697_v52, %v4635_v47  ;;  %v10790_v59 = vadd.f32 %v10668_v5, %v4444_v40  ;;  %v4565_v29 = vadd.f32 %v4564_v27, %v10769_v26  ;;  %v7678_v53 = vpop.f32.mrb[174].mxu1 }
 0x48d   : > { %v7779_v45 = vadd.f32 %v4187_v9, %v13047_v46  ;;  %13048 = vst [vmem:[#allocation6_spill] sm:$0xff] %v10785_v6  ;;  %v4189_v8 = vpop.f32.mrb[105].mxu0  ;;  %v10795_v9 = vadd.f32 %v10710_v10, %v7678_v53  ;;  %v4447_v24 = vpop.f32.mrb[175].mxu1  ;;  %v4639_v10 = vmul.f32 %v10785_v6, %v10785_v6 }
 0x48e   : > { %13049 = vst [vmem:[#allocation7_spill] sm:$0xff] %v10790_v59  ;;  %v4190_v31 = vpop.f32.mrb[106].mxu0  ;;  %v4566_v46 = vadd.f32 %v4565_v29, %v10790_v59  ;;  %v4637_v8 = vmul.f32 %v10790_v59, %v10790_v59  ;;  %v4699_v47 = vadd.f32 %v4698_v18, %v4636_v49  ;;  %v10801_v5 = vadd.f32 %v10680_v17, %v4447_v24 }
 0x48f   : > { %v7780_v28 = vadd.f32 %v4190_v31, %v13050_v15  ;;  %v4192_v63 = vpop.f32.mrb[107].mxu0  ;;  %v4640_v24 = vmul.f32 %v10795_v9, %v10795_v9 }
 0x490   : > { %13051 = vst [vmem:[#allocation8_spill] sm:$0xff] %v10801_v5  ;;  %v4700_v52 = vadd.f32 %v4699_v47, %v4637_v8  ;;  %v4567_v27 = vadd.f32 %v4566_v46, %v10801_v5  ;;  %v4638_v40 = vmul.f32 %v10801_v5, %v10801_v5  ;;  %v13052_v63 = vld [vmem:[#allocation9_spill] sm:$0xff] }
 0x492   : > { %v4568_v31 = vadd.f32 %v4567_v27, %v10785_v6  ;;  %v4701_v53 = vadd.f32 %v4700_v52, %v4638_v40  ;;  %v7681_v15 = vpop.f32.mrb[176].mxu1  ;;  %v13055_v52 = vld [vmem:[#allocation10_spill] sm:$0xff] }
 0x493   : > { %v10810_v49 = vadd.f32 %v7777_v54, %v7681_v15  ;;  %v4460_v18 = vpop.f32.mrb[177].mxu1 }
 0x494   : > { %v4195_v29 = vpop.f32.mrb[108].mxu0  ;;  %v4702_v46 = vadd.f32 %v4701_v53, %v4639_v10  ;;  %v10815_v8 = vadd.f32 %v10728_v11, %v4460_v18  ;;  %v4569_v47 = vadd.f32 %v4568_v31, %v10795_v9  ;;  %v7682_v27 = vpop.f32.mrb[178].mxu1 }
 0x495   : > { %v7781_v59 = vadd.f32 %v4195_v29, %v13052_v63  ;;  %13053 = vst [vmem:[#allocation9_spill] sm:$0xff] %v10810_v49  ;;  %v4197_v17 = vpop.f32.mrb[109].mxu0  ;;  %v10819_v6 = vadd.f32 %v7778_v35, %v7682_v27  ;;  %v4463_v54 = vpop.f32.mrb[179].mxu1  ;;  %v4643_v35 = vmul.f32 %v10810_v49, %v10810_v49 }
 0x496   : > { %13054 = vst [vmem:[#allocation24_spill] sm:$0xff] %v10815_v8  ;;  %v4198_v5 = vpop.f32.mrb[110].mxu0  ;;  %v4570_v15 = vadd.f32 %v4569_v47, %v10815_v8  ;;  %v4641_v63 = vmul.f32 %v10815_v8, %v10815_v8  ;;  %v4703_v17 = vadd.f32 %v4702_v46, %v4640_v24  ;;  %v10825_v10 = vadd.f32 %v10740_v7, %v4463_v54 }
 0x497   : > { %v7782_v40 = vadd.f32 %v4198_v5, %v13055_v52  ;;  %v4200_v29 = vpop.f32.mrb[111].mxu0  ;;  %v13057_v52 = vld [vmem:[#allocation11_spill] sm:$0xff]  ;;  %v4644_v54 = vmul.f32 %v10819_v6, %v10819_v6 }
 0x498   : > { %13056 = vst [vmem:[#allocation10_spill] sm:$0xff] %v10825_v10  ;;  %v4704_v11 = vadd.f32 %v4703_v17, %v4641_v63  ;;  %v4571_v31 = vadd.f32 %v4570_v15, %v10825_v10  ;;  %v4642_v53 = vmul.f32 %v10825_v10, %v10825_v10 }
 0x49a   : > { %v4572_v5 = vadd.f32 %v4571_v31, %v10810_v49  ;;  %v4705_v18 = vadd.f32 %v4704_v11, %v4642_v53  ;;  %v7685_v27 = vpop.f32.mrb[180].mxu1  ;;  %v13060_v31 = vld [vmem:[#allocation12_spill] sm:$0xff] }
 0x49b   : > { %v10834_v24 = vadd.f32 %v7781_v59, %v7685_v27  ;;  %v4476_v46 = vpop.f32.mrb[181].mxu1 }
 0x49c   : > { %v4203_v47 = vpop.f32.mrb[112].mxu0  ;;  %v4706_v15 = vadd.f32 %v4705_v18, %v4643_v35  ;;  %v10838_v63 = vadd.f32 %v7779_v45, %v4476_v46  ;;  %v4573_v17 = vadd.f32 %v4572_v5, %v10819_v6  ;;  %v7686_v8 = vpop.f32.mrb[182].mxu1 }
 0x49d   : > { %v7783_v29 = vadd.f32 %v4203_v47, %v13057_v52  ;;  %13058 = vst [vmem:[#allocation11_spill] sm:$0xff] %v10834_v24  ;;  %v4205_v7 = vpop.f32.mrb[113].mxu0  ;;  %v10842_v53 = vadd.f32 %v7782_v40, %v7686_v8  ;;  %v4479_v47 = vpop.f32.mrb[183].mxu1 }
 0x49e   : > { %13059 = vst [vmem:[#allocation25_spill] sm:$0xff] %v10838_v63  ;;  %v4206_v10 = vpop.f32.mrb[114].mxu0  ;;  %v4574_v59 = vadd.f32 %v4573_v17, %v10838_v63  ;;  %v4645_v27 = vmul.f32 %v10838_v63, %v10838_v63  ;;  %v4707_v52 = vadd.f32 %v4706_v15, %v4644_v54  ;;  %v10847_v7 = vadd.f32 %v7780_v28, %v4479_v47  ;;  %v10852_v18 = vpop.permute.xlu1 %5387  ;;  %v13064_v28 = vld [vmem:[#allocation13_spill] sm:$0xff] }
 0x49f   : > { %v7784_v11 = vadd.f32 %v4206_v10, %v13060_v31  ;;  %v4208_v49 = vpop.f32.mrb[115].mxu0  ;;  %13062 = vst [vmem:[#allocation26_spill] sm:$0xff] %v10852_v18  ;;  %v10854_v8 = vpop.permute.xlu0 %5385  ;;  %v4648_v47 = vmul.f32 %v10842_v53, %v10842_v53 }
 0x4a0   : > { %13061 = vst [vmem:[#allocation12_spill] sm:$0xff] %v10847_v7  ;;  %v4708_v45 = vadd.f32 %v4707_v52, %v4645_v27  ;;  %v4575_v35 = vadd.f32 %v4574_v59, %v10847_v7  ;;  %v4646_v5 = vmul.f32 %v10847_v7, %v10847_v7  ;;  %13063 = vst [vmem:[#allocation27_spill] sm:$0xff] %v10854_v8 }
 0x4a1   : > { %v4647_v49 = vmul.f32 %v10834_v24, %v10834_v24 }
 0x4a2   : > { %v4576_v40 = vadd.f32 %v4575_v35, %v10834_v24  ;;  %v4709_v10 = vadd.f32 %v4708_v45, %v4646_v5  ;;  %v7689_v54 = vpop.f32.mrb[184].mxu1  ;;  %v13066_v35 = vld [vmem:[#allocation14_spill] sm:$0xff] }
 0x4a3   : > { %v4492_v31 = vpop.f32.mrb[185].mxu1 }
 0x4a4   : > { %v4211_v46 = vpop.f32.mrb[116].mxu0  ;;  %v4710_v59 = vadd.f32 %v4709_v10, %v4647_v49  ;;  %v10862_v27 = vadd.f32 %v7783_v29, %v4492_v31  ;;  %v4577_v52 = vadd.f32 %v4576_v40, %v10842_v53  ;;  %v7690_v18 = vpop.f32.mrb[186].mxu1 }
 0x4a5   : > { %v7785_v15 = vadd.f32 %v4211_v46, %v13064_v28  ;;  %v4213_v17 = vpop.f32.mrb[117].mxu0  ;;  %v4495_v24 = vpop.f32.mrb[187].mxu1 }
 0x4a6   : > { %v4214_v8 = vpop.f32.mrb[118].mxu0  ;;  %v4578_v46 = vadd.f32 %v4577_v52, %v10862_v27  ;;  %v4649_v28 = vmul.f32 %v10862_v27, %v10862_v27  ;;  %v4711_v17 = vadd.f32 %v4710_v59, %v4648_v47  ;;  %v10871_v63 = vadd.f32 %v7784_v11, %v4495_v24 }
 0x4a7   : > { %v10865_v7 = vadd.f32 %v7785_v15, %v7689_v54  ;;  %v7786_v45 = vadd.f32 %v4214_v8, %v13066_v35  ;;  %v4216_v5 = vpop.f32.mrb[119].mxu0  ;;  %v10878_v54 = vpop.permute.xlu1 %5391 }
 0x4a8   : > { %13067 = vst [vmem:[#allocation14_spill] sm:$0xff] %v10871_v63  ;;  %v4712_v49 = vadd.f32 %v4711_v17, %v4649_v28  ;;  %v4579_v40 = vadd.f32 %v4578_v46, %v10871_v63  ;;  %v4650_v10 = vmul.f32 %v10871_v63, %v10871_v63  ;;  %13068 = vst [vmem:[#allocation28_spill] sm:$0xff] %v10878_v54  ;;  %v10880_v8 = vpop.permute.xlu0 %5389  ;;  %v13071_v17 = vld [vmem:[#allocation16_spill] sm:$0xff] }
 0x4a9   : > { %13065 = vst [vmem:[#allocation13_spill] sm:$0xff] %v10865_v7  ;;  %v10873_v29 = vadd.f32 %v7786_v45, %v7690_v18  ;;  %13069 = vst [vmem:[#allocation29_spill] sm:$0xff] %v10880_v8  ;;  %v4651_v15 = vmul.f32 %v10865_v7, %v10865_v7  ;;  %v13070_v18 = vld [vmem:[#allocation15_spill] sm:$0xff] }
 0x4aa   : > { %v4580_v31 = vadd.f32 %v4579_v40, %v10865_v7  ;;  %v4713_v47 = vadd.f32 %v4712_v49, %v4650_v10  ;;  %v7693_v11 = vpop.f32.mrb[188].mxu1 }
 0x4ab   : > { %v4508_v35 = vpop.f32.mrb[189].mxu1  ;;  %v4652_v28 = vmul.f32 %v10873_v29, %v10873_v29 }
 0x4ac   : > { %v4219_v24 = vpop.f32.mrb[120].mxu0  ;;  %v4714_v45 = vadd.f32 %v4713_v47, %v4651_v15  ;;  %v7694_v46 = vpop.f32.mrb[190].mxu1  ;;  %v4581_v63 = vadd.f32 %v4580_v31, %v10873_v29 }
 0x4ad   : > { %v7787_v59 = vadd.f32 %v4219_v24, %v13070_v18  ;;  %v4221_v52 = vpop.f32.mrb[121].mxu0  ;;  %v4511_v49 = vpop.f32.mrb[191].mxu1 }
 0x4ae   : > { %v4222_v5 = vpop.f32.mrb[122].mxu0  ;;  %v4715_v24 = vadd.f32 %v4714_v45, %v4652_v28  ;;  %v10897_v47 = vpop.permute.xlu1 %5395 }
 0x4af   : > { %v7788_v8 = vadd.f32 %v4222_v5, %v13071_v17  ;;  %v10889_v54 = vadd.f32 %v7787_v59, %v4508_v35  ;;  %v4224_v40 = vpop.f32.mrb[123].mxu0  ;;  %13074 = vst [vmem:[#allocation30_spill] sm:$0xff] %v10897_v47  ;;  %v10899_v7 = vpop.permute.xlu0 %5393 }
 0x4b0   : > { %13075 = vst [vmem:[#allocation31_spill] sm:$0xff] %v10899_v7 }
 0x4b1   : > { %13072 = vst [vmem:[#allocation15_spill] sm:$0xff] %v10889_v54  ;;  %v4653_v10 = vmul.f32 %v10889_v54, %v10889_v54  ;;  %v10894_v18 = vadd.f32 %v7788_v8, %v4511_v49  ;;  %v4582_v15 = vadd.f32 %v4581_v63, %v10889_v54  ;;  %v13076_v8 = vld [vmem:[#allocation17_spill] sm:$0xff] }
 0x4b2   : > { %v10911_v7 = vpop.permute.xlu1 %5399 }
 0x4b3   : > { %13073 = vst [vmem:[#allocation16_spill] sm:$0xff] %v10894_v18  ;;  %v4716_v5 = vadd.f32 %v4715_v24, %v4653_v10  ;;  %v4654_v59 = vmul.f32 %v10894_v18, %v10894_v18  ;;  %v4583_v40 = vadd.f32 %v4582_v15, %v10894_v18  ;;  %13077 = vst [vmem:[#allocation17_spill] sm:$0xff] %v10911_v7  ;;  %v10913_v54 = vpop.permute.xlu0 %5397 }
 0x4b4   : > { %v4227_v52 = vpop.f32.mrb[124].mxu0  ;;  %13078 = vst [vmem:[#allocation32_spill] sm:$0xff] %v10913_v54 }
 0x4b5   : > { %v7789_v31 = vadd.f32 %v4227_v52, %v10450_v23  ;;  %v4229_v35 = vpop.f32.mrb[125].mxu0  ;;  %v4717_v49 = vadd.f32 %v4716_v5, %v4654_v59 }
 0x4b6   : > { %v4230_v17 = vpop.f32.mrb[126].mxu0 }
 0x4b7   : > { %v10905_v45 = vadd.f32 %v7789_v31, %v7693_v11  ;;  %v7790_v28 = vadd.f32 %v4230_v17, %v13076_v8  ;;  %v4232_v63 = vpop.f32.mrb[127].mxu0  ;;  %v10915_v17 = vpop.permute.xlu1 %5403 }
 0x4b8   : > { %13079 = vst [vmem:[#allocation33_spill] sm:$0xff] %v10915_v17  ;;  %v10917_v5 = vpop.permute.xlu0 %5401 }
 0x4b9   : > { %v4584_v47 = vadd.f32 %v4583_v40, %v10905_v45  ;;  %v4655_v10 = vmul.f32 %v10905_v45, %v10905_v45  ;;  %v4520_v24 = vadd.f32 %v7790_v28, %v7694_v46  ;;  %13080 = vst [vmem:[#allocation34_spill] sm:$0xff] %v10917_v5 }
 0x4bb   : > { %v4718_v23 = vadd.f32 %v4717_v49, %v4655_v10  ;;  %v4585_v52 = vadd.f32 %v4584_v47, %v4520_v24  ;;  %v4656_v35 = vmul.f32 %v4520_v24, %v4520_v24  ;;  %v10919_v7 = vpop.permute.xlu1 %5407 }
 0x4bc   : > { %13081 = vst [vmem:[#allocation35_spill] sm:$0xff] %v10919_v7  ;;  %v10921_v54 = vpop.permute.xlu0 %5405  ;;  %v13111_v7 = vld [vmem:[#allocation9_spill] sm:$0xff] }
 0x4bd   : > { %v4586_v15 = vrot.slane %v4585_v52, 4  ;;  %v4719_v11 = vadd.f32 %v4718_v23, %v4656_v35  ;;  %13082 = vst [vmem:[#allocation36_spill] sm:$0xff] %v10921_v54  ;;  %v13109_v54 = vld [vmem:[#allocation10_spill] sm:$0xff] }
 0x4bf   : > { %v4587_v31 = vadd.f32 %v4586_v15, %v4585_v52  ;;  %v4720_v18 = vrot.slane %v4719_v11, 4  ;;  %v10923_v15 = vpop.permute.xlu1 %5411 }
 0x4c0   : > { %13083 = vst [vmem:[#allocation37_spill] sm:$0xff] %v10923_v15  ;;  %v10925_v17 = vpop.permute.xlu0 %5409  ;;  %v13107_v15 = vld [vmem:[#allocation24_spill] sm:$0xff] }
 0x4c1   : > { %v4588_v59 = vrot.slane %v4587_v31, 2  ;;  %v4721_v40 = vadd.f32 %v4720_v18, %v4719_v11  ;;  %13084 = vst [vmem:[#allocation38_spill] sm:$0xff] %v10925_v17  ;;  %v13105_v17 = vld [vmem:[#allocation6_spill] sm:$0xff] }
 0x4c3   : > { %v4589_v8 = vadd.f32 %v4588_v59, %v4587_v31  ;;  %v4722_v63 = vrot.slane %v4721_v40, 2  ;;  %v10927_v31 = vpop.permute.xlu1 %5415 }
 0x4c4   : > { %13085 = vst [vmem:[#allocation39_spill] sm:$0xff] %v10927_v31  ;;  %v10929_v59 = vpop.permute.xlu0 %5413  ;;  %v13104_v31 = vld [vmem:[#allocation8_spill] sm:$0xff] }
 0x4c5   : > { %v4590_v46 = vrot.slane %v4589_v8, 1  ;;  %v4723_v28 = vadd.f32 %v4722_v63, %v4721_v40  ;;  %13086 = vst [vmem:[#allocation40_spill] sm:$0xff] %v10929_v59  ;;  %v4737_v40 = vlaneseq }
 0x4c7   : > { %v4591_v47 = vadd.f32 %v4590_v46, %v4589_v8  ;;  %v4724_v49 = vrot.slane %v4723_v28, 1  ;;  %v4738_v63 = vshrl.u32 %v4737_v40, 7  ;;  %v10931_v8 = vpop.permute.xlu1 %5419 }
 0x4c8   : > { %13087 = vst [vmem:[#allocation41_spill] sm:$0xff] %v10931_v8  ;;  %v10933_v46 = vpop.permute.xlu0 %5417  ;;  %v13091_v8 = vld [vmem:[#allocation19_spill] sm:$0xff] }
 0x4c9   : > { %v4592_v10 = vmul.f32 0.001953125, %v4591_v47  ;;  %v4725_v23 = vadd.f32 %v4724_v49, %v4723_v28  ;;  %13088 = vst [vmem:[#allocation42_spill] sm:$0xff] %v10933_v46  ;;  %v4730_v28 = vld [vmem:[%s12894_s2] sm:$0x1]  ;;  %v4739_v47 = vsub.s32 0, %v4738_v63  ;;  %v13092_v63 = vld [vmem:[#allocation20_spill] sm:$0xff] }
 0x4cb   : > { %v4726_v52 = vmul.f32 0.001953125, %v4725_v23  ;;  %v4727_v35 = vmul.f32 %v4592_v10, %v4592_v10 }
 0x4cd   : > { %v4728_v5 = vsub.f32 %v4726_v52, %v4727_v35  ;;  %v10940_v52 = vpop.permute.xlu0 %5421  ;;  %v4734_v35 = vld [vmem:[%s12894_s2 + $0x1] sm:$0x1] }
 0x4ce   : > { %13090 = vst [vmem:[#allocation44_spill] sm:$0xff] %v10940_v52 }
 0x4cf   : > { %v4729_v18 = vmax.f32 %v4728_v5, 0.0  ;;  %v10938_v5 = vpop.permute.xlu1 %5423 }
 0x4d0   : > { %13089 = vst [vmem:[#allocation43_spill] sm:$0xff] %v10938_v5 }
 0x4d1   : > { %v4731_v11 = vadd.f32 1e-05, %v4729_v18 }
 0x4d3   : > { %8133 = vrsqrt.f32 %v4731_v11 }
 0x4dd   : > { %v8134_v49 = vpop.eup %8133 }
 0x4de   : > { %v4733_v23 = vmul.f32 %v8134_v49, %v4730_v28  ;;  %v13093_v49 = vld [vmem:[#allocation18_spill] sm:$0xff] }
 0x4e0   : > { %v4735_v18 = vmul.f32 %v4733_v23, %v4592_v10  ;;  %v10945_v11 = vrot.slane %v4733_v23, %v4739_v47  ;;  %v10974_v23 = vpop.permute.xlu1 %5427 }
 0x4e1   : > { %13094 = vst [vmem:[#allocation19_spill] sm:$0xff] %v10974_v23  ;;  %v13103_v23 = vld [vmem:[#allocation7_spill] sm:$0xff] }
 0x4e2   : > { %v4736_v40 = vsub.f32 %v4734_v35, %v4735_v18  ;;  %v4804_v46 = vmul.f32 %v10945_v11, %v4520_v24  ;;  %v10950_v59 = vmul.f32 %v10945_v11, %v13091_v8  ;;  %v10954_v28 = vmul.f32 %v10945_v11, %v13092_v63  ;;  %v10976_v35 = vpop.permute.xlu0 %5425 }
 0x4e3   : > { %v10958_v52 = vmul.f32 %v10945_v11, %v13093_v49  ;;  %v10964_v10 = vmul.f32 %v10945_v11, %v10473_v12  ;;  %v10968_v24 = vmul.f32 %v10945_v11, %v10496_v3  ;;  %v10972_v8 = vmul.f32 %v10945_v11, %v10509_v62  ;;  %13095 = vst [vmem:[#allocation20_spill] sm:$0xff] %v10976_v35  ;;  %v13099_v49 = vld [vmem:[#allocation22_spill] sm:$0xff]  ;;  %v13102_v35 = vld [vmem:[#allocation5_spill] sm:$0xff] }
 0x4e4   : > { %v10960_v5 = vrot.slane %v4736_v40, %v4739_v47  ;;  %v10980_v47 = vmul.f32 %v10945_v11, %v10491_v14  ;;  %v10984_v12 = vmul.f32 %v10945_v11, %v10503_v30  ;;  %v10988_v3 = vmul.f32 %v10945_v11, %v10526_v13 }
 0x4e5   : > { %v10992_v62 = vmul.f32 %v10945_v11, %v10539_v25  ;;  %v10999_v40 = vmul.f32 %v10945_v11, %v10521_v20  ;;  %v11003_v14 = vmul.f32 %v10945_v11, %v10533_v48  ;;  %v11007_v30 = vmul.f32 %v10945_v11, %v10556_v61 }
 0x4e6   : > { %v10995_v18 = vadd.f32 %v10960_v5, %v4804_v46  ;;  %v11011_v13 = vmul.f32 %v10945_v11, %v10569_v38  ;;  %v11015_v25 = vmul.f32 %v10945_v11, %v10551_v42  ;;  %v11019_v20 = vmul.f32 %v10945_v11, %v10563_v0  ;;  %v11073_v46 = vpop.permute.xlu1 %5431 }
 0x4e7   : > { %v11023_v48 = vmul.f32 %v10945_v11, %v10586_v19  ;;  %v11027_v61 = vmul.f32 %v10945_v11, %v10599_v51  ;;  %v11031_v38 = vmul.f32 %v10945_v11, %v10581_v34  ;;  %v11035_v42 = vmul.f32 %v10945_v11, %v10593_v36  ;;  %13097 = vst [vmem:[#allocation45_spill] sm:$0xff] %v11073_v46  ;;  %v13101_v46 = vld [vmem:[#allocation23_spill] sm:$0xff] }
 0x4e8   : > { %13096 = vst [vmem:[#allocation18_spill] sm:$0xff] %v10995_v18  ;;  %v11039_v0 = vmul.f32 %v10945_v11, %v10616_v32  ;;  %v11043_v19 = vmul.f32 %v10945_v11, %v10629_v37  ;;  %v11047_v51 = vmul.f32 %v10945_v11, %v10611_v44  ;;  %v11051_v34 = vmul.f32 %v10945_v11, %v10623_v21  ;;  %v13112_v18 = vld [vmem:[#allocation25_spill] sm:$0xff] }
 0x4e9   : > { %v11055_v36 = vmul.f32 %v10945_v11, %v10646_v41  ;;  %v11059_v32 = vmul.f32 %v10945_v11, %v10659_v43  ;;  %v11063_v37 = vmul.f32 %v10945_v11, %v10641_v57  ;;  %v11067_v44 = vmul.f32 %v10945_v11, %v10653_v22  ;;  %v11075_v41 = vpop.permute.xlu0 %5429 }
 0x4ea   : > { %v11071_v21 = vmul.f32 %v10945_v11, %v10676_v58  ;;  %13098 = vst [vmem:[#allocation46_spill] sm:$0xff] %v11075_v41  ;;  %v11079_v43 = vmul.f32 %v10945_v11, %v10689_v16  ;;  %v11083_v57 = vmul.f32 %v10945_v11, %v10671_v2  ;;  %v11087_v22 = vmul.f32 %v10945_v11, %v10683_v55  ;;  %v13100_v41 = vld [vmem:[#allocation21_spill] sm:$0xff] }
 0x4eb   : > { %v11091_v58 = vmul.f32 %v10945_v11, %v10706_v56  ;;  %v11095_v63 = vmul.f32 %v10945_v11, %v10719_v4  ;;  %v11099_v16 = vmul.f32 %v10945_v11, %v10701_v50  ;;  %v11103_v2 = vmul.f32 %v10945_v11, %v10713_v39 }
 0x4ec   : > { %v11107_v55 = vmul.f32 %v10945_v11, %v13099_v49  ;;  %v11111_v56 = vmul.f32 %v10945_v11, %v10749_v1  ;;  %v11115_v4 = vmul.f32 %v10945_v11, %v13100_v41  ;;  %v11119_v50 = vmul.f32 %v10945_v11, %v10743_v33 }
 0x4ed   : > { %v11123_v39 = vmul.f32 %v10945_v11, %v13101_v46  ;;  %v11127_v49 = vmul.f32 %v10945_v11, %v10775_v60  ;;  %v11131_v1 = vmul.f32 %v10945_v11, %v13102_v35  ;;  %v11135_v41 = vmul.f32 %v10945_v11, %v10769_v26 }
 0x4ee   : > { %v11139_v33 = vmul.f32 %v10945_v11, %v13103_v23  ;;  %v11143_v46 = vmul.f32 %v10945_v11, %v13104_v31  ;;  %v11147_v60 = vmul.f32 %v10945_v11, %v13105_v17  ;;  %v11151_v35 = vmul.f32 %v10945_v11, %v10795_v9 }
 0x4ef   : > { %v11155_v26 = vmul.f32 %v10945_v11, %v13107_v15  ;;  %v11159_v23 = vmul.f32 %v10945_v11, %v13109_v54  ;;  %v11163_v31 = vmul.f32 %v10945_v11, %v13111_v7  ;;  %v11167_v17 = vmul.f32 %v10945_v11, %v10819_v6  ;;  %v11175_v15 = vpop.permute.xlu0 %5433 }
 0x4f0   : > { %13106 = vst [vmem:[#allocation22_spill] sm:$0xff] %v11151_v35  ;;  %v11171_v9 = vmul.f32 %v10945_v11, %v13112_v18  ;;  %v11173_v35 = vpop.permute.xlu1 %5435  ;;  %13115 = vst [vmem:[#allocation8_spill] sm:$0xff] %v11175_v15  ;;  %v11187_v6 = vmul.f32 %v10945_v11, %v10842_v53  ;;  %v11191_v18 = vmul.f32 %v10945_v11, %v10862_v27  ;;  %v13120_v15 = vld [vmem:[#allocation13_spill] sm:$0xff] }
 0x4f1   : > { %13108 = vst [vmem:[#allocation21_spill] sm:$0xff] %v11155_v26  ;;  %13110 = vst [vmem:[#allocation23_spill] sm:$0xff] %v11159_v23  ;;  %v13116_v26 = vld [vmem:[#allocation12_spill] sm:$0xff]  ;;  %v13117_v23 = vld [vmem:[#allocation11_spill] sm:$0xff]  ;;  %v11211_v27 = vmul.f32 %v10945_v11, %v10905_v45  ;;  %v11231_v45 = vadd.f32 %v10960_v5, %v10968_v24  ;;  %v11251_v24 = vadd.f32 %v10960_v5, %v10992_v62 }
 0x4f2   : > { %13113 = vst [vmem:[#allocation5_spill] sm:$0xff] %v11171_v9  ;;  %13114 = vst [vmem:[#allocation7_spill] sm:$0xff] %v11173_v35  ;;  %v11179_v54 = vmul.f32 %v10945_v11, %v13116_v26  ;;  %v11183_v7 = vmul.f32 %v10945_v11, %v13117_v23  ;;  %v13119_v9 = vld [vmem:[#allocation14_spill] sm:$0xff]  ;;  %v11199_v26 = vmul.f32 %v10945_v11, %v13120_v15  ;;  %v13127_v62 = vld [vmem:[#allocation15_spill] sm:$0xff] }
 0x4f3   : > { %v11195_v35 = vmul.f32 %v10945_v11, %v13119_v9  ;;  %v11203_v23 = vmul.f32 %v10945_v11, %v10873_v29  ;;  %v11215_v9 = vadd.f32 %v10960_v5, %v10950_v59  ;;  %v11219_v15 = vadd.f32 %v10960_v5, %v10954_v28  ;;  %13124 = vst [vmem:[#allocation9_spill] sm:$0xff] %v11231_v45 }
 0x4f4   : > { %13118 = vst [vmem:[#allocation6_spill] sm:$0xff] %v11183_v7  ;;  %v13121_v7 = vld [vmem:[#allocation16_spill] sm:$0xff]  ;;  %v11223_v29 = vadd.f32 %v10960_v5, %v10958_v52  ;;  %v11235_v59 = vadd.f32 %v10960_v5, %v10972_v8  ;;  %v11239_v28 = vadd.f32 %v10960_v5, %v10980_v47  ;;  %v11243_v52 = vadd.f32 %v10960_v5, %v10984_v12 }
 0x4f5   : > { %v11207_v53 = vmul.f32 %v10945_v11, %v13121_v7  ;;  %13122 = vst [vmem:[#allocation24_spill] sm:$0xff] %v11215_v9  ;;  %13123 = vst [vmem:[#allocation10_spill] sm:$0xff] %v11219_v15  ;;  %v11227_v7 = vadd.f32 %v10960_v5, %v10964_v10  ;;  %v11247_v10 = vadd.f32 %v10960_v5, %v10988_v3  ;;  %5707 = vrot.lane.b32.xlu1 %v11219_v15, %s8531_s30 }
 0x4f6   : > { %13125 = vst [vmem:[#allocation25_spill] sm:$0xff] %v11235_v59  ;;  %5705 = vrot.lane.b32.xlu0 %v11215_v9, %s8531_s30  ;;  %v11259_v8 = vadd.f32 %v10960_v5, %v10999_v40  ;;  %v11263_v47 = vadd.f32 %v10960_v5, %v11003_v14  ;;  %v11267_v12 = vadd.f32 %v10960_v5, %v11007_v30  ;;  %v11287_v30 = vpop.permute.xlu1 %5439 }
 0x4f7   : > { %v11271_v3 = vadd.f32 %v10960_v5, %v11011_v13  ;;  %v4801_v15 = vmul.f32 %v10945_v11, %v13127_v62  ;;  %v11277_v9 = vadd.f32 %v10960_v5, %v11015_v25  ;;  %v11281_v40 = vadd.f32 %v10960_v5, %v11019_v20  ;;  %13128 = vst [vmem:[#allocation11_spill] sm:$0xff] %v11287_v30 }
 0x4f8   : > { %13126 = vst [vmem:[#allocation12_spill] sm:$0xff] %v11267_v12  ;;  %v11285_v14 = vadd.f32 %v10960_v5, %v11023_v48  ;;  %v11289_v12 = vpop.permute.xlu0 %5437  ;;  %v11293_v13 = vadd.f32 %v10960_v5, %v11027_v61  ;;  %v11297_v11 = vadd.f32 %v10960_v5, %v11031_v38  ;;  %v11301_v25 = vadd.f32 %v10960_v5, %v11035_v42 }
 0x4f9   : > { %13129 = vst [vmem:[#allocation14_spill] sm:$0xff] %v11289_v12  ;;  %v11305_v20 = vadd.f32 %v10960_v5, %v11039_v0  ;;  %v11309_v48 = vadd.f32 %v10960_v5, %v11043_v19  ;;  %v11313_v61 = vadd.f32 %v10960_v5, %v11047_v51  ;;  %v11317_v38 = vadd.f32 %v10960_v5, %v11051_v34 }
 0x4fa   : > { %v11321_v42 = vadd.f32 %v10960_v5, %v11055_v36  ;;  %5711 = vrot.lane.b32.xlu1 %v11227_v7, %s8531_s30  ;;  %v11327_v0 = vadd.f32 %v10960_v5, %v11059_v32  ;;  %v11331_v19 = vadd.f32 %v10960_v5, %v11063_v37  ;;  %v11335_v51 = vadd.f32 %v10960_v5, %v11067_v44  ;;  %v11391_v62 = vpop.permute.xlu1 %5443 }
 0x4fb   : > { %v11339_v34 = vadd.f32 %v10960_v5, %v11071_v21  ;;  %5709 = vrot.lane.b32.xlu0 %v11223_v29, %s8531_s30  ;;  %v11345_v36 = vadd.f32 %v10960_v5, %v11079_v43  ;;  %v11349_v32 = vadd.f32 %v10960_v5, %v11083_v57  ;;  %v11353_v37 = vadd.f32 %v10960_v5, %v11087_v22 }
 0x4fc   : > { %v11357_v44 = vadd.f32 %v10960_v5, %v11091_v58  ;;  %v11361_v21 = vadd.f32 %v10960_v5, %v11095_v63  ;;  %v11365_v43 = vadd.f32 %v10960_v5, %v11099_v16  ;;  %v11369_v57 = vadd.f32 %v10960_v5, %v11103_v2  ;;  %13130 = vst [vmem:[#allocation13_spill] sm:$0xff] %v11391_v62 }
 0x4fd   : > { %v11373_v22 = vadd.f32 %v10960_v5, %v11107_v55  ;;  %v11377_v58 = vadd.f32 %v10960_v5, %v11111_v56  ;;  %v11381_v63 = vadd.f32 %v10960_v5, %v11115_v4  ;;  %v11385_v16 = vadd.f32 %v10960_v5, %v11119_v50  ;;  %v11393_v55 = vpop.permute.xlu0 %5441 }
 0x4fe   : > { %v11389_v2 = vadd.f32 %v10960_v5, %v11123_v39  ;;  %13131 = vst [vmem:[#allocation16_spill] sm:$0xff] %v11393_v55  ;;  %5715 = vrot.lane.b32.xlu1 %v11235_v59, %s8531_s30  ;;  %v11399_v56 = vadd.f32 %v10960_v5, %v11127_v49  ;;  %v11403_v4 = vadd.f32 %v10960_v5, %v11131_v1  ;;  %v13133_v1 = vld [vmem:[#allocation22_spill] sm:$0xff] }
 0x4ff   : > { %v11407_v50 = vadd.f32 %v10960_v5, %v11135_v41  ;;  %v11411_v39 = vadd.f32 %v10960_v5, %v11139_v33  ;;  %5713 = vrot.lane.b32.xlu0 %v11231_v45, %s8531_s30  ;;  %v11417_v55 = vadd.f32 %v10960_v5, %v11143_v46  ;;  %v11421_v49 = vadd.f32 %v10960_v5, %v11147_v60  ;;  %v13135_v41 = vld [vmem:[#allocation21_spill] sm:$0xff]  ;;  %v13137_v33 = vld [vmem:[#allocation23_spill] sm:$0xff]  ;;  %v13140_v59 = vld [vmem:[#allocation6_spill] sm:$0xff] }
 0x500   : > { %v11425_v62 = vadd.f32 %v10960_v5, %v13133_v1  ;;  %v11429_v12 = vadd.f32 %v10960_v5, %v13135_v41  ;;  %v11433_v30 = vadd.f32 %v10960_v5, %v13137_v33  ;;  %v11437_v46 = vadd.f32 %v10960_v5, %v11163_v31  ;;  %v13139_v45 = vld [vmem:[#allocation5_spill] sm:$0xff] }
 0x501   : > { %13132 = vst [vmem:[#allocation15_spill] sm:$0xff] %v11417_v55  ;;  %v11441_v60 = vadd.f32 %v10960_v5, %v11167_v17  ;;  %v11445_v1 = vadd.f32 %v10960_v5, %v13139_v45  ;;  %v11449_v41 = vadd.f32 %v10960_v5, %v11179_v54  ;;  %v11453_v33 = vadd.f32 %v10960_v5, %v13140_v59 }
 0x502   : > { %13134 = vst [vmem:[#allocation22_spill] sm:$0xff] %v11425_v62  ;;  %13136 = vst [vmem:[#allocation21_spill] sm:$0xff] %v11429_v12  ;;  %v11457_v31 = vadd.f32 %v10960_v5, %v11187_v6  ;;  %v11461_v17 = vadd.f32 %v10960_v5, %v11191_v18  ;;  %5719 = vrot.lane.b32.xlu1 %v11243_v52, %s8531_s30  ;;  %v11467_v45 = vadd.f32 %v10960_v5, %v11195_v35 }
 0x503   : > { %13138 = vst [vmem:[#allocation23_spill] sm:$0xff] %v11433_v30  ;;  %v11471_v54 = vadd.f32 %v10960_v5, %v11199_v26  ;;  %v11475_v59 = vadd.f32 %v10960_v5, %v11203_v23  ;;  %v11478_v6 = vadd.f32 %v10960_v5, %v4801_v15  ;;  %5717 = vrot.lane.b32.xlu0 %v11239_v28, %s8531_s30  ;;  %v11490_v26 = vpop.permute.xlu1 %5447 }
 0x504   : > { %v11484_v18 = vadd.f32 %v10960_v5, %v11207_v53  ;;  %v11488_v35 = vadd.f32 %v10960_v5, %v11211_v27  ;;  %13145 = vst [vmem:[#allocation49_spill] sm:$0xff] %v11490_v26  ;;  %v13149_v5 = vld [vmem:[#allocation12_spill] sm:$0xff] }
 0x505   : > { %13141 = vst [vmem:[#allocation5_spill] sm:$0xff] %v11471_v54  ;;  %13142 = vst [vmem:[#allocation6_spill] sm:$0xff] %v11478_v6  ;;  %v11492_v54 = vpop.permute.xlu0 %5445  ;;  %v13175_v26 = vld [vmem:[#allocation24_spill] sm:$0xff] }
 0x506   : > { %13143 = vst [vmem:[#allocation47_spill] sm:$0xff] %v11484_v18  ;;  %13144 = vst [vmem:[#allocation48_spill] sm:$0xff] %v11488_v35  ;;  %5723 = vrot.lane.b32.xlu1 %v11251_v24, %s8531_s30 }
 0x507   : > { %13146 = vst [vmem:[#allocation50_spill] sm:$0xff] %v11492_v54  ;;  %5721 = vrot.lane.b32.xlu0 %v11247_v10, %s8531_s30  ;;  %v11498_v23 = vpop.permute.xlu1 %5451  ;;  %v13174_v54 = vld [vmem:[#allocation10_spill] sm:$0xff] }
 0x508   : > { %13147 = vst [vmem:[#allocation51_spill] sm:$0xff] %v11498_v23 }
 0x509   : > { %v11500_v15 = vpop.permute.xlu0 %5449 }
 0x50a   : > { %13148 = vst [vmem:[#allocation52_spill] sm:$0xff] %v11500_v15  ;;  %5727 = vrot.lane.b32.xlu1 %v11263_v47, %s8531_s30 }
 0x50b   : > { %5725 = vrot.lane.b32.xlu0 %v11259_v8, %s8531_s30  ;;  %v11510_v53 = vpop.permute.xlu1 %5455 }
 0x50c   : > { %13150 = vst [vmem:[#allocation12_spill] sm:$0xff] %v11510_v53 }
 0x50d   : > { %v11512_v27 = vpop.permute.xlu0 %5453 }
 0x50e   : > { %5731 = vrot.lane.b32.xlu1 %v11271_v3, %s8531_s30  ;;  %13151 = vst [vmem:[#allocation53_spill] sm:$0xff] %v11512_v27 }
 0x50f   : > { %5729 = vrot.lane.b32.xlu0 %v13149_v5, %s8531_s30  ;;  %v11518_v15 = vpop.permute.xlu1 %5459 }
 0x510   : > { %13152 = vst [vmem:[#allocation54_spill] sm:$0xff] %v11518_v15 }
 0x511   : > { %v11520_v23 = vpop.permute.xlu0 %5457 }
 0x512   : > { %5735 = vrot.lane.b32.xlu1 %v11281_v40, %s8531_s30  ;;  %13153 = vst [vmem:[#allocation55_spill] sm:$0xff] %v11520_v23 }
 0x513   : > { %5733 = vrot.lane.b32.xlu0 %v11277_v9, %s8531_s30  ;;  %v11530_v27 = vpop.permute.xlu1 %5463 }
 0x514   : > { %13154 = vst [vmem:[#allocation56_spill] sm:$0xff] %v11530_v27 }
 0x515   : > { %v11532_v53 = vpop.permute.xlu0 %5461 }
 0x516   : > { %5739 = vrot.lane.b32.xlu1 %v11293_v13, %s8531_s30  ;;  %13155 = vst [vmem:[#allocation57_spill] sm:$0xff] %v11532_v53 }
 0x517   : > { %5737 = vrot.lane.b32.xlu0 %v11285_v14, %s8531_s30  ;;  %v11538_v23 = vpop.permute.xlu1 %5467 }
 0x518   : > { %13156 = vst [vmem:[#allocation58_spill] sm:$0xff] %v11538_v23 }
 0x519   : > { %v11540_v15 = vpop.permute.xlu0 %5465 }
 0x51a   : > { %5743 = vrot.lane.b32.xlu1 %v11301_v25, %s8531_s30  ;;  %13157 = vst [vmem:[#allocation59_spill] sm:$0xff] %v11540_v15 }
 0x51b   : > { %5741 = vrot.lane.b32.xlu0 %v11297_v11, %s8531_s30  ;;  %v11550_v53 = vpop.permute.xlu1 %5471 }
 0x51c   : > { %13158 = vst [vmem:[#allocation60_spill] sm:$0xff] %v11550_v53 }
 0x51d   : > { %v11552_v27 = vpop.permute.xlu0 %5469 }
 0x51e   : > { %5747 = vrot.lane.b32.xlu1 %v11309_v48, %s8531_s30  ;;  %13159 = vst [vmem:[#allocation61_spill] sm:$0xff] %v11552_v27 }
 0x51f   : > { %5745 = vrot.lane.b32.xlu0 %v11305_v20, %s8531_s30  ;;  %v11558_v15 = vpop.permute.xlu1 %5475 }
 0x520   : > { %13160 = vst [vmem:[#allocation62_spill] sm:$0xff] %v11558_v15 }
 0x521   : > { %v11560_v23 = vpop.permute.xlu0 %5473 }
 0x522   : > { %5751 = vrot.lane.b32.xlu1 %v11317_v38, %s8531_s30  ;;  %13161 = vst [vmem:[#allocation63_spill] sm:$0xff] %v11560_v23 }
 0x523   : > { %5749 = vrot.lane.b32.xlu0 %v11313_v61, %s8531_s30  ;;  %v11570_v27 = vpop.permute.xlu1 %5479 }
 0x524   : > { %13162 = vst [vmem:[#allocation64_spill] sm:$0xff] %v11570_v27 }
 0x525   : > { %v11572_v53 = vpop.permute.xlu0 %5477 }
 0x526   : > { %5755 = vrot.lane.b32.xlu1 %v11327_v0, %s8531_s30  ;;  %13163 = vst [vmem:[#allocation65_spill] sm:$0xff] %v11572_v53 }
 0x527   : > { %5753 = vrot.lane.b32.xlu0 %v11321_v42, %s8531_s30  ;;  %v11578_v23 = vpop.permute.xlu1 %5483 }
 0x528   : > { %13164 = vst [vmem:[#allocation66_spill] sm:$0xff] %v11578_v23 }
 0x529   : > { %v11580_v15 = vpop.permute.xlu0 %5481 }
 0x52a   : > { %5759 = vrot.lane.b32.xlu1 %v11335_v51, %s8531_s30  ;;  %13165 = vst [vmem:[#allocation67_spill] sm:$0xff] %v11580_v15 }
 0x52b   : > { %5757 = vrot.lane.b32.xlu0 %v11331_v19, %s8531_s30  ;;  %v11590_v53 = vpop.permute.xlu1 %5487 }
 0x52c   : > { %13166 = vst [vmem:[#allocation68_spill] sm:$0xff] %v11590_v53 }
 0x52d   : > { %v11592_v27 = vpop.permute.xlu0 %5485 }
 0x52e   : > { %5763 = vrot.lane.b32.xlu1 %v11345_v36, %s8531_s30  ;;  %13167 = vst [vmem:[#allocation69_spill] sm:$0xff] %v11592_v27 }
 0x52f   : > { %5761 = vrot.lane.b32.xlu0 %v11339_v34, %s8531_s30  ;;  %v11598_v15 = vpop.permute.xlu1 %5491 }
 0x530   : > { %13168 = vst [vmem:[#allocation70_spill] sm:$0xff] %v11598_v15 }
 0x531   : > { %v11600_v23 = vpop.permute.xlu0 %5489 }
 0x532   : > { %5767 = vrot.lane.b32.xlu1 %v11353_v37, %s8531_s30  ;;  %13169 = vst [vmem:[#allocation71_spill] sm:$0xff] %v11600_v23 }
 0x533   : > { %5765 = vrot.lane.b32.xlu0 %v11349_v32, %s8531_s30  ;;  %v11610_v27 = vpop.permute.xlu1 %5495 }
 0x534   : > { %13170 = vst [vmem:[#allocation72_spill] sm:$0xff] %v11610_v27  ;;  %v7508_v27 = vmul.f32 -1.442695, %v13174_v54  ;;  %v13178_v54 = vld [vmem:[#allocation25_spill] sm:$0xff] }
 0x535   : > { %v11612_v53 = vpop.permute.xlu0 %5493 }
 0x536   : > { %5771 = vrot.lane.b32.xlu1 %v11361_v21, %s8531_s30  ;;  %13171 = vst [vmem:[#allocation73_spill] sm:$0xff] %v11612_v53  ;;  %v7507_v53 = vmul.f32 -1.442695, %v13175_v26  ;;  %8135 = vpow2.f32 %v7508_v27  ;;  %v7512_v26 = vmul.f32 -1.442695, %v13178_v54 }
 0x537   : > { %5769 = vrot.lane.b32.xlu0 %v11357_v44, %s8531_s30  ;;  %v11618_v23 = vpop.permute.xlu1 %5499  ;;  %v7515_v54 = vmul.f32 -1.442695, %v11247_v10  ;;  %v7517_v10 = vmul.f32 -1.442695, %v11259_v8  ;;  %v7519_v8 = vmul.f32 -1.442695, %v13149_v5 }
 0x538   : > { %13172 = vst [vmem:[#allocation74_spill] sm:$0xff] %v11618_v23  ;;  %v7510_v23 = vmul.f32 -1.442695, %v11227_v7  ;;  %8137 = vpow2.f32 %v7507_v53  ;;  %v7513_v53 = vmul.f32 -1.442695, %v11239_v28 }
 0x539   : > { %v11620_v15 = vpop.permute.xlu0 %5497  ;;  %v7521_v5 = vmul.f32 -1.442695, %v11277_v9 }
 0x53a   : > { %5775 = vrot.lane.b32.xlu1 %v11369_v57, %s8531_s30  ;;  %13173 = vst [vmem:[#allocation75_spill] sm:$0xff] %v11620_v15  ;;  %8139 = vpow2.f32 %v7510_v23 }
 0x53b   : > { %5773 = vrot.lane.b32.xlu0 %v11365_v43, %s8531_s30  ;;  %v11633_v15 = vpop.permute.xlu1 %5503 }
 0x53c   : > { %13176 = vst [vmem:[#allocation10_spill] sm:$0xff] %v11633_v15  ;;  %v13185_v15 = vld [vmem:[#allocation18_spill] sm:$0xff] }
 0x53e   : > { %5779 = vrot.lane.b32.xlu1 %v11377_v58, %s8531_s30 }
 0x53f   : > { %5777 = vrot.lane.b32.xlu0 %v11373_v22, %s8531_s30  ;;  %v11644_v7 = vpop.permute.xlu1 %5507 }
 0x540   : > { %13180 = vst [vmem:[#allocation25_spill] sm:$0xff] %v11644_v7  ;;  %v8136_v23 = vpop.eup %8135 }
 0x541   : > { %v5066_v28 = vadd.f32 1.0, %v8136_v23 }
 0x542   : > { %5783 = vrot.lane.b32.xlu1 %v11385_v16, %s8531_s30 }
 0x543   : > { %5781 = vrot.lane.b32.xlu0 %v11381_v63, %s8531_s30 }
 0x546   : > { %5787 = vrot.lane.b32.xlu1 %v11399_v56, %s8531_s30 }
 0x547   : > { %5785 = vrot.lane.b32.xlu0 %v11389_v2, %s8531_s30 }
 0x54a   : > { %5791 = vrot.lane.b32.xlu1 %v11407_v50, %s8531_s30 }
 0x54b   : > { %5789 = vrot.lane.b32.xlu0 %v11403_v4, %s8531_s30 }
 0x54e   : > { %5795 = vrot.lane.b32.xlu1 %v11417_v55, %s8531_s30  ;;  %v11635_v55 = vpop.permute.xlu0 %5501 }
 0x54f   : > { %5793 = vrot.lane.b32.xlu0 %v11411_v39, %s8531_s30  ;;  %13177 = vst [vmem:[#allocation24_spill] sm:$0xff] %v11635_v55 }
 0x552   : > { %5799 = vrot.lane.b32.xlu1 %v11425_v62, %s8531_s30  ;;  %v7509_v62 = vmul.f32 -1.442695, %v11223_v29  ;;  %v11646_v27 = vpop.permute.xlu0 %5505  ;;  %v7514_v29 = vmul.f32 -1.442695, %v11243_v52  ;;  %v11661_v52 = vpop.permute.xlu1 %5511 }
 0x553   : > { %5797 = vrot.lane.b32.xlu0 %v11421_v49, %s8531_s30  ;;  %13182 = vst [vmem:[#allocation76_spill] sm:$0xff] %v11661_v52 }
 0x554   : > { %8141 = vpow2.f32 %v7509_v62  ;;  %v8138_v62 = vpop.eup %8137 }
 0x555   : > { %8143 = vpow2.f32 %v7512_v26 }
 0x556   : > { %5803 = vrot.lane.b32.xlu1 %v11433_v30, %s8531_s30  ;;  %v13179_v30 = vld [vmem:[#allocation9_spill] sm:$0xff]  ;;  %v11663_v26 = vpop.permute.xlu0 %5509 }
 0x557   : > { %5801 = vrot.lane.b32.xlu0 %v11429_v12, %s8531_s30  ;;  %v7511_v12 = vmul.f32 -1.442695, %v13179_v30  ;;  %13181 = vst [vmem:[#allocation9_spill] sm:$0xff] %v11646_v27  ;;  %v7534_v30 = vmul.f32 -1.442695, %v11335_v51  ;;  %13183 = vst [vmem:[#allocation77_spill] sm:$0xff] %v11663_v26 }
 0x558   : > { %v7516_v27 = vmul.f32 -1.442695, %v11251_v24  ;;  %v5065_v51 = vadd.f32 1.0, %v8138_v62  ;;  %v7518_v24 = vmul.f32 -1.442695, %v11263_v47 }
 0x559   : > { %8145 = vpow2.f32 %v7511_v12  ;;  %v8140_v12 = vpop.eup %8139  ;;  %v7520_v47 = vmul.f32 -1.442695, %v11271_v3  ;;  %v7522_v3 = vmul.f32 -1.442695, %v11281_v40 }
 0x55a   : > { %5807 = vrot.lane.b32.xlu1 %v11441_v60, %s8531_s30  ;;  %8147 = vpow2.f32 %v7514_v29 }
 0x55b   : > { %5805 = vrot.lane.b32.xlu0 %v11437_v46, %s8531_s30  ;;  %8149 = vpow2.f32 %v7513_v53  ;;  %v5068_v53 = vadd.f32 1.0, %v8140_v12 }
 0x55c   : > { %8151 = vpow2.f32 %v7534_v30 }
 0x55d   : > { %8153 = vpow2.f32 %v7515_v54  ;;  %v13184_v54 = vld [vmem:[#allocation5_spill] sm:$0xff] }
 0x55e   : > { %5811 = vrot.lane.b32.xlu1 %v11449_v41, %s8531_s30  ;;  %v8142_v7 = vpop.eup %8141  ;;  %8155 = vpow2.f32 %v7516_v27 }
 0x55f   : > { %5809 = vrot.lane.b32.xlu0 %v11445_v1, %s8531_s30  ;;  %8157 = vrcp.f32 %v5066_v28  ;;  %v8144_v23 = vpop.eup %8143  ;;  %v5067_v30 = vadd.f32 1.0, %v8142_v7 }
 0x560   : > { %8159 = vrcp.f32 %v5065_v51  ;;  %v5070_v52 = vadd.f32 1.0, %v8144_v23 }
 0x561   : > { %8161 = vpow2.f32 %v7517_v10 }
 0x562   : > { %5815 = vrot.lane.b32.xlu1 %v11457_v31, %s8531_s30  ;;  %8163 = vpow2.f32 %v7518_v24 }
 0x563   : > { %5813 = vrot.lane.b32.xlu0 %v11453_v33, %s8531_s30  ;;  %v8146_v62 = vpop.eup %8145  ;;  %8165 = vrcp.f32 %v5068_v53 }
 0x564   : > { %v8148_v12 = vpop.eup %8147  ;;  %v5069_v7 = vadd.f32 1.0, %v8146_v62  ;;  %8167 = vrcp.f32 %v5067_v30 }
 0x565   : > { %v8150_v51 = vpop.eup %8149  ;;  %8169 = vpow2.f32 %v7519_v8  ;;  %v5072_v23 = vadd.f32 1.0, %v8148_v12  ;;  %v7523_v8 = vmul.f32 -1.442695, %v11285_v14 }
 0x566   : > { %5819 = vrot.lane.b32.xlu1 %v11467_v45, %s8531_s30  ;;  %v11682_v10 = vpop.eup %8151  ;;  %8171 = vpow2.f32 %v7520_v47  ;;  %v5071_v55 = vadd.f32 1.0, %v8150_v51  ;;  %v7524_v47 = vmul.f32 -1.442695, %v11293_v13 }
 0x567   : > { %5817 = vrot.lane.b32.xlu0 %v11461_v17, %s8531_s30  ;;  %v5708_v29 = vpop.permute.xlu1 %5707  ;;  %v8154_v53 = vpop.eup %8153  ;;  %8173 = vrcp.f32 %v5070_v52 }
 0x568   : > { %v5706_v26 = vpop.permute.xlu0 %5705  ;;  %v8156_v62 = vpop.eup %8155  ;;  %8175 = vrcp.f32 %v5069_v7  ;;  %v5073_v14 = vadd.f32 1.0, %v8154_v53 }
 0x569   : > { %v11687_v9 = vpop.eup %8157  ;;  %8177 = vpow2.f32 %v7521_v5  ;;  %v5074_v51 = vadd.f32 1.0, %v8156_v62 }
 0x56a   : > { %5823 = vrot.lane.b32.xlu1 %v11475_v59, %s8531_s30  ;;  %13186 = vst [vmem:[#allocation5_spill] sm:$0xff] %v11687_v9  ;;  %v11692_v40 = vpop.eup %8159  ;;  %8179 = vpow2.f32 %v7522_v3  ;;  %v5898_v52 = vmul.f32 %v11687_v9, %v5708_v29  ;;  %v7526_v29 = vmul.f32 -1.442695, %v11301_v25 }
 0x56b   : > { %5821 = vrot.lane.b32.xlu0 %v13184_v54, %s8531_s30  ;;  %13187 = vst [vmem:[#allocation78_spill] sm:$0xff] %v11692_v40  ;;  %v8162_v7 = vpop.eup %8161  ;;  %8181 = vrcp.f32 %v5072_v23 }
 0x56c   : > { %v5712_v27 = vpop.permute.xlu1 %5711  ;;  %8183 = vrcp.f32 %v5071_v55 }
 0x56d   : > { %v5710_v28 = vpop.permute.xlu0 %5709  ;;  %8185 = vpow2.f32 %v7523_v8 }
 0x56e   : > { %5827 = vrot.lane.b32.xlu1 %v11484_v18, %s8531_s30  ;;  %8187 = vpow2.f32 %v7524_v47 }
 0x56f   : > { %5825 = vrot.lane.b32.xlu0 %v11478_v6, %s8531_s30  ;;  %v8164_v6 = vpop.eup %8163  ;;  %8189 = vrcp.f32 %v5074_v51 }
 0x570   : > { %v5716_v24 = vpop.permute.xlu1 %5715  ;;  %v11698_v5 = vpop.eup %8165  ;;  %v5076_v53 = vadd.f32 1.0, %v8164_v6  ;;  %8191 = vrcp.f32 %v5073_v14  ;;  %v7528_v6 = vmul.f32 -1.442695, %v11309_v48 }
 0x571   : > { %v5714_v30 = vpop.permute.xlu0 %5713  ;;  %13188 = vst [vmem:[#allocation79_spill] sm:$0xff] %v11698_v5  ;;  %v11702_v13 = vpop.eup %8167 }
 0x572   : > { %5831 = vrot.lane.b32.xlu1 %v13185_v15, %s8531_s30  ;;  %v5897_v15 = vmul.f32 %v11692_v40, %v5706_v26  ;;  %13189 = vst [vmem:[#allocation80_spill] sm:$0xff] %v11702_v13  ;;  %v5900_v26 = vmul.f32 %v11698_v5, %v5712_v27  ;;  %v8170_v23 = vpop.eup %8169  ;;  %v5899_v55 = vmul.f32 %v11702_v13, %v5710_v28  ;;  %v5075_v40 = vadd.f32 1.0, %v8162_v7 }
 0x573   : > { %5829 = vrot.lane.b32.xlu0 %v11488_v35, %s8531_s30  ;;  %v7525_v35 = vmul.f32 -1.442695, %v11297_v11 }
 0x574   : > { %v5720_v12 = vpop.permute.xlu1 %5719 }
 0x575   : > { %v5718_v18 = vpop.permute.xlu0 %5717  ;;  %8193 = vpow2.f32 %v7525_v35  ;;  %v7529_v35 = vmul.f32 -1.442695, %v11313_v61 }
 0x576   : > { %6027 = vrot.lane.b32.xlu1 %v5898_v52, %s8529_s22  ;;  %v8172_v52 = vpop.eup %8171  ;;  %8195 = vpow2.f32 %v7526_v29 }
 0x577   : > { %6025 = vrot.lane.b32.xlu0 %v5897_v15, %s8529_s22  ;;  %v11708_v11 = vpop.eup %8173  ;;  %v7527_v15 = vmul.f32 -1.442695, %v11305_v20  ;;  %v5078_v47 = vadd.f32 1.0, %v8172_v52  ;;  %8197 = vrcp.f32 %v5076_v53 }
 0x578   : > { %v5724_v3 = vpop.permute.xlu1 %5723  ;;  %13190 = vst [vmem:[#allocation81_spill] sm:$0xff] %v11708_v11  ;;  %v11712_v25 = vpop.eup %8175  ;;  %v5902_v27 = vmul.f32 %v11708_v11, %v5716_v24  ;;  %8199 = vrcp.f32 %v5075_v40  ;;  %v7530_v24 = vmul.f32 -1.442695, %v11317_v38 }
 0x579   : > { %v5722_v62 = vpop.permute.xlu0 %5721  ;;  %13191 = vst [vmem:[#allocation82_spill] sm:$0xff] %v11712_v25  ;;  %v8178_v8 = vpop.eup %8177  ;;  %v5901_v7 = vmul.f32 %v11712_v25, %v5714_v30  ;;  %8201 = vpow2.f32 %v7527_v15  ;;  %v7531_v15 = vmul.f32 -1.442695, %v11321_v42 }
 0x57a   : > { %6031 = vrot.lane.b32.xlu1 %v5900_v26, %s8529_s22  ;;  %v8180_v14 = vpop.eup %8179  ;;  %v5077_v26 = vadd.f32 1.0, %v8170_v23  ;;  %8203 = vpow2.f32 %v7528_v6 }
 0x57b   : > { %6029 = vrot.lane.b32.xlu0 %v5899_v55, %s8529_s22  ;;  %v11718_v20 = vpop.eup %8181  ;;  %v5080_v23 = vadd.f32 1.0, %v8180_v14  ;;  %8205 = vrcp.f32 %v5078_v47 }
 0x57c   : > { %v5728_v28 = vpop.permute.xlu1 %5727  ;;  %13192 = vst [vmem:[#allocation83_spill] sm:$0xff] %v11718_v20  ;;  %v11722_v48 = vpop.eup %8183  ;;  %v5904_v30 = vmul.f32 %v11718_v20, %v5720_v12  ;;  %8207 = vrcp.f32 %v5077_v26  ;;  %v7532_v12 = vmul.f32 -1.442695, %v11327_v0 }
 0x57d   : > { %v5726_v51 = vpop.permute.xlu0 %5725  ;;  %13193 = vst [vmem:[#allocation84_spill] sm:$0xff] %v11722_v48  ;;  %v8186_v53 = vpop.eup %8185  ;;  %v5903_v40 = vmul.f32 %v11722_v48, %v5718_v18  ;;  %8209 = vpow2.f32 %v7529_v35 }
 0x57e   : > { %6035 = vrot.lane.b32.xlu1 %v5902_v27, %s8529_s22  ;;  %v8188_v52 = vpop.eup %8187  ;;  %v5079_v27 = vadd.f32 1.0, %v8178_v8  ;;  %8211 = vpow2.f32 %v7530_v24 }
 0x57f   : > { %6033 = vrot.lane.b32.xlu0 %v5901_v7, %s8529_s22  ;;  %v11728_v61 = vpop.eup %8189  ;;  %v5082_v8 = vadd.f32 1.0, %v8188_v52  ;;  %8213 = vrcp.f32 %v5080_v23 }
 0x580   : > { %v5732_v29 = vpop.permute.xlu1 %5731  ;;  %13194 = vst [vmem:[#allocation85_spill] sm:$0xff] %v11728_v61  ;;  %v11732_v38 = vpop.eup %8191  ;;  %v5906_v18 = vmul.f32 %v11728_v61, %v5724_v3  ;;  %8215 = vrcp.f32 %v5079_v27  ;;  %v7533_v3 = vmul.f32 -1.442695, %v11331_v19 }
 0x581   : > { %v5730_v55 = vpop.permute.xlu0 %5729  ;;  %13195 = vst [vmem:[#allocation86_spill] sm:$0xff] %v11732_v38  ;;  %v8194_v47 = vpop.eup %8193  ;;  %v5905_v7 = vmul.f32 %v11732_v38, %v5722_v62  ;;  %8217 = vpow2.f32 %v7531_v15 }
 0x582   : > { %6039 = vrot.lane.b32.xlu1 %v5904_v30, %s8529_s22  ;;  %v8196_v26 = vpop.eup %8195  ;;  %v5081_v30 = vadd.f32 1.0, %v8186_v53  ;;  %8219 = vpow2.f32 %v7532_v12  ;;  %v5083_v27 = vadd.f32 1.0, %v8194_v47 }
 0x583   : > { %6037 = vrot.lane.b32.xlu0 %v5903_v40, %s8529_s22  ;;  %v11738_v42 = vpop.eup %8197  ;;  %v5084_v23 = vadd.f32 1.0, %v8196_v26  ;;  %8221 = vrcp.f32 %v5082_v8 }
 0x584   : > { %v5736_v6 = vpop.permute.xlu1 %5735  ;;  %13196 = vst [vmem:[#allocation87_spill] sm:$0xff] %v11738_v42  ;;  %v11741_v0 = vpop.eup %8199  ;;  %v5908_v35 = vmul.f32 %v11738_v42, %v5728_v28  ;;  %8223 = vrcp.f32 %v5081_v30  ;;  %v7536_v28 = vmul.f32 -1.442695, %v11345_v36 }
 0x585   : > { %v5734_v14 = vpop.permute.xlu0 %5733  ;;  %13197 = vst [vmem:[#allocation88_spill] sm:$0xff] %v11741_v0  ;;  %v8202_v62 = vpop.eup %8201  ;;  %v5907_v53 = vmul.f32 %v11741_v0, %v5726_v51  ;;  %8225 = vpow2.f32 %v7533_v3 }
 0x586   : > { %6043 = vrot.lane.b32.xlu1 %v5906_v18, %s8529_s22  ;;  %v8204_v52 = vpop.eup %8203  ;;  %v7535_v18 = vmul.f32 -1.442695, %v11339_v34  ;;  %8227 = vrcp.f32 %v5084_v23 }
 0x587   : > { %6041 = vrot.lane.b32.xlu0 %v5905_v7, %s8529_s22  ;;  %v11747_v15 = vpop.eup %8205  ;;  %v5086_v7 = vadd.f32 1.0, %v8204_v52  ;;  %8229 = vrcp.f32 %v5083_v27 }
 0x588   : > { %v5740_v24 = vpop.permute.xlu1 %5739  ;;  %13198 = vst [vmem:[#allocation89_spill] sm:$0xff] %v11747_v15  ;;  %v11751_v19 = vpop.eup %8207  ;;  %v5910_v12 = vmul.f32 %v11747_v15, %v5732_v29  ;;  %8231 = vpow2.f32 %v7535_v18  ;;  %v7538_v29 = vmul.f32 -1.442695, %v11353_v37  ;;  %v7539_v18 = vmul.f32 -1.442695, %v11357_v44 }
 0x589   : > { %v5738_v40 = vpop.permute.xlu0 %5737  ;;  %13199 = vst [vmem:[#allocation90_spill] sm:$0xff] %v11751_v19  ;;  %v8210_v8 = vpop.eup %8209  ;;  %v5909_v47 = vmul.f32 %v11751_v19, %v5730_v55  ;;  %8233 = vpow2.f32 %v7536_v28 }
 0x58a   : > { %6047 = vrot.lane.b32.xlu1 %v5908_v35, %s8529_s22  ;;  %v8212_v30 = vpop.eup %8211  ;;  %v5085_v35 = vadd.f32 1.0, %v8202_v62  ;;  %8235 = vrcp.f32 %v5086_v7  ;;  %v5087_v19 = vadd.f32 1.0, %v8210_v8 }
 0x58b   : > { %6045 = vrot.lane.b32.xlu0 %v5907_v53, %s8529_s22  ;;  %v11757_v34 = vpop.eup %8213  ;;  %v7537_v53 = vmul.f32 -1.442695, %v11349_v32  ;;  %v5088_v62 = vadd.f32 1.0, %v8212_v30 }
 0x58c   : > { %v5744_v51 = vpop.permute.xlu1 %5743  ;;  %13200 = vst [vmem:[#allocation91_spill] sm:$0xff] %v11757_v34  ;;  %v11761_v36 = vpop.eup %8215  ;;  %v5912_v55 = vmul.f32 %v11757_v34, %v5736_v6  ;;  %8237 = vrcp.f32 %v5085_v35  ;;  %v7540_v6 = vmul.f32 -1.442695, %v11361_v21 }
 0x58d   : > { %v5742_v26 = vpop.permute.xlu0 %5741  ;;  %13201 = vst [vmem:[#allocation92_spill] sm:$0xff] %v11761_v36  ;;  %v8218_v23 = vpop.eup %8217  ;;  %v5911_v52 = vmul.f32 %v11761_v36, %v5734_v14  ;;  %8239 = vpow2.f32 %v7537_v53  ;;  %v5092_v53 = vadd.f32 1.0, %v11682_v10 }
 0x58e   : > { %6051 = vrot.lane.b32.xlu1 %v5910_v12, %s8529_s22  ;;  %v8220_v12 = vpop.eup %8219  ;;  %8241 = vpow2.f32 %v7538_v29  ;;  %v5089_v35 = vadd.f32 1.0, %v8218_v23 }
 0x58f   : > { %6049 = vrot.lane.b32.xlu0 %v5909_v47, %s8529_s22  ;;  %v11767_v32 = vpop.eup %8221  ;;  %v5090_v7 = vadd.f32 1.0, %v8220_v12  ;;  %8243 = vrcp.f32 %v5088_v62 }
 0x590   : > { %v5748_v3 = vpop.permute.xlu1 %5747  ;;  %13202 = vst [vmem:[#allocation93_spill] sm:$0xff] %v11767_v32  ;;  %v11771_v37 = vpop.eup %8223  ;;  %v5914_v14 = vmul.f32 %v11767_v32, %v5740_v24  ;;  %8245 = vrcp.f32 %v5087_v19  ;;  %v7542_v24 = vmul.f32 -1.442695, %v11369_v57  ;;  %v7541_v19 = vmul.f32 -1.442695, %v11365_v43 }
 0x591   : > { %v5746_v27 = vpop.permute.xlu0 %5745  ;;  %13203 = vst [vmem:[#allocation94_spill] sm:$0xff] %v11771_v37  ;;  %v5913_v8 = vmul.f32 %v11771_v37, %v5738_v40  ;;  %v8226_v30 = vpop.eup %8225  ;;  %8247 = vpow2.f32 %v7539_v18  ;;  %v7543_v57 = vmul.f32 -1.442695, %v11373_v22  ;;  %v7544_v43 = vmul.f32 -1.442695, %v11377_v58 }
 0x592   : > { %6055 = vrot.lane.b32.xlu1 %v5912_v55, %s8529_s22  ;;  %v11777_v44 = vpop.eup %8227  ;;  %8249 = vpow2.f32 %v7540_v6  ;;  %v5091_v10 = vadd.f32 1.0, %v8226_v30 }
 0x593   : > { %6053 = vrot.lane.b32.xlu0 %v5911_v52, %s8529_s22  ;;  %13204 = vst [vmem:[#allocation95_spill] sm:$0xff] %v11777_v44  ;;  %v11781_v21 = vpop.eup %8229  ;;  %v5916_v40 = vmul.f32 %v11777_v44, %v5744_v51  ;;  %8251 = vrcp.f32 %v5090_v7 }
 0x594   : > { %v5752_v28 = vpop.permute.xlu1 %5751  ;;  %13205 = vst [vmem:[#allocation96_spill] sm:$0xff] %v11781_v21  ;;  %v8232_v55 = vpop.eup %8231  ;;  %v5915_v23 = vmul.f32 %v11781_v21, %v5742_v26  ;;  %8253 = vrcp.f32 %v5089_v35 }
 0x595   : > { %v5750_v47 = vpop.permute.xlu0 %5749  ;;  %v8234_v52 = vpop.eup %8233  ;;  %8255 = vrcp.f32 %v5092_v53  ;;  %v5093_v35 = vadd.f32 1.0, %v8232_v55  ;;  %v7545_v53 = vmul.f32 -1.442695, %v11381_v63 }
 0x596   : > { %6059 = vrot.lane.b32.xlu1 %v5914_v14, %s8529_s22  ;;  %v11788_v12 = vpop.eup %8235  ;;  %8257 = vpow2.f32 %v7542_v24  ;;  %v5094_v14 = vadd.f32 1.0, %v8234_v52 }
 0x597   : > { %6057 = vrot.lane.b32.xlu0 %v5913_v8, %s8529_s22  ;;  %13206 = vst [vmem:[#allocation97_spill] sm:$0xff] %v11788_v12  ;;  %v11792_v51 = vpop.eup %8237  ;;  %v5918_v26 = vmul.f32 %v11788_v12, %v5748_v3  ;;  %8259 = vpow2.f32 %v7541_v19  ;;  %v7546_v3 = vmul.f32 -1.442695, %v11385_v16 }
 0x598   : > { %v5756_v29 = vpop.permute.xlu1 %5755  ;;  %13207 = vst [vmem:[#allocation98_spill] sm:$0xff] %v11792_v51  ;;  %v8240_v6 = vpop.eup %8239  ;;  %v5917_v7 = vmul.f32 %v11792_v51, %v5746_v27  ;;  %8261 = vrcp.f32 %v5091_v10 }
 0x599   : > { %v5754_v62 = vpop.permute.xlu0 %5753  ;;  %v8242_v30 = vpop.eup %8241  ;;  %8263 = vpow2.f32 %v7543_v57  ;;  %v5095_v10 = vadd.f32 1.0, %v8240_v6  ;;  %v7547_v57 = vmul.f32 -1.442695, %v11389_v2 }
 0x59a   : > { %6063 = vrot.lane.b32.xlu1 %v5916_v40, %s8529_s22  ;;  %v11798_v22 = vpop.eup %8243  ;;  %8265 = vpow2.f32 %v7544_v43  ;;  %v5096_v55 = vadd.f32 1.0, %v8242_v30 }
 0x59b   : > { %6061 = vrot.lane.b32.xlu0 %v5915_v23, %s8529_s22  ;;  %13208 = vst [vmem:[#allocation99_spill] sm:$0xff] %v11798_v22  ;;  %v11802_v58 = vpop.eup %8245  ;;  %v5920_v27 = vmul.f32 %v11798_v22, %v5752_v28  ;;  %8267 = vrcp.f32 %v5094_v14  ;;  %v7548_v28 = vmul.f32 -1.442695, %v11399_v56 }
 0x59c   : > { %v5760_v18 = vpop.permute.xlu1 %5759  ;;  %13209 = vst [vmem:[#allocation100_spill] sm:$0xff] %v11802_v58  ;;  %v8248_v40 = vpop.eup %8247  ;;  %v5919_v19 = vmul.f32 %v11802_v58, %v5750_v47  ;;  %8269 = vrcp.f32 %v5093_v35 }
 0x59d   : > { %v5758_v8 = vpop.permute.xlu0 %5757  ;;  %v8250_v52 = vpop.eup %8249  ;;  %8271 = vpow2.f32 %v7545_v53  ;;  %v5097_v2 = vadd.f32 1.0, %v8248_v40  ;;  %v7549_v53 = vmul.f32 -1.442695, %v11403_v4 }
 0x59e   : > { %6067 = vrot.lane.b32.xlu1 %v5918_v26, %s8529_s22  ;;  %v11808_v63 = vpop.eup %8251  ;;  %8273 = vpow2.f32 %v7546_v3  ;;  %v5098_v6 = vadd.f32 1.0, %v8250_v52 }
 0x59f   : > { %6065 = vrot.lane.b32.xlu0 %v5917_v7, %s8529_s22  ;;  %13210 = vst [vmem:[#allocation101_spill] sm:$0xff] %v11808_v63  ;;  %v11812_v16 = vpop.eup %8253  ;;  %v5922_v47 = vmul.f32 %v11808_v63, %v5756_v29  ;;  %8275 = vrcp.f32 %v5096_v55  ;;  %v7550_v29 = vmul.f32 -1.442695, %v11407_v50 }
 0x5a0   : > { %v5764_v24 = vpop.permute.xlu1 %5763  ;;  %13211 = vst [vmem:[#allocation102_spill] sm:$0xff] %v11812_v16  ;;  %v11816_v26 = vpop.eup %8255  ;;  %v5921_v14 = vmul.f32 %v11812_v16, %v5754_v62  ;;  %8277 = vrcp.f32 %v5095_v10 }
 0x5a1   : > { %v5762_v23 = vpop.permute.xlu0 %5761  ;;  %13212 = vst [vmem:[#allocation103_spill] sm:$0xff] %v11816_v26  ;;  %v8258_v30 = vpop.eup %8257  ;;  %8279 = vpow2.f32 %v7547_v57  ;;  %v5924_v3 = vmul.f32 %v11816_v26, %v5760_v18  ;;  %v7551_v57 = vmul.f32 -1.442695, %v11411_v39  ;;  %v13216_v18 = vld [vmem:[#allocation15_spill] sm:$0xff] }
 0x5a2   : > { %6071 = vrot.lane.b32.xlu1 %v5920_v27, %s8529_s22  ;;  %v8260_v35 = vpop.eup %8259  ;;  %8281 = vpow2.f32 %v7548_v28  ;;  %v5100_v55 = vadd.f32 1.0, %v8258_v30  ;;  %v7552_v28 = vmul.f32 -1.442695, %v13216_v18 }
 0x5a3   : > { %6069 = vrot.lane.b32.xlu0 %v5919_v19, %s8529_s22  ;;  %v11822_v56 = vpop.eup %8261  ;;  %8283 = vrcp.f32 %v5098_v6  ;;  %v5099_v10 = vadd.f32 1.0, %v8260_v35 }
 0x5a4   : > { %v5768_v43 = vpop.permute.xlu1 %5767  ;;  %13213 = vst [vmem:[#allocation104_spill] sm:$0xff] %v11822_v56  ;;  %v8264_v27 = vpop.eup %8263  ;;  %v5923_v40 = vmul.f32 %v11822_v56, %v5758_v8  ;;  %8285 = vrcp.f32 %v5097_v2 }
 0x5a5   : > { %v5766_v7 = vpop.permute.xlu0 %5765  ;;  %v8266_v52 = vpop.eup %8265  ;;  %8287 = vpow2.f32 %v7549_v53  ;;  %v7553_v53 = vmul.f32 -1.442695, %v11421_v49 }
 0x5a6   : > { %6075 = vrot.lane.b32.xlu1 %v5922_v47, %s8529_s22  ;;  %v11828_v4 = vpop.eup %8267  ;;  %8289 = vpow2.f32 %v7550_v29  ;;  %v13219_v29 = vld [vmem:[#allocation22_spill] sm:$0xff] }
 0x5a7   : > { %6073 = vrot.lane.b32.xlu0 %v5921_v14, %s8529_s22  ;;  %13214 = vst [vmem:[#allocation105_spill] sm:$0xff] %v11828_v4  ;;  %v11832_v50 = vpop.eup %8269  ;;  %v5926_v8 = vmul.f32 %v11828_v4, %v5764_v24  ;;  %v5102_v14 = vadd.f32 1.0, %v8266_v52  ;;  %8291 = vrcp.f32 %v5100_v55 }
 0x5a8   : > { %v5772_v62 = vpop.permute.xlu1 %5771  ;;  %13215 = vst [vmem:[#allocation106_spill] sm:$0xff] %v11832_v50  ;;  %v8272_v6 = vpop.eup %8271  ;;  %v5925_v30 = vmul.f32 %v11832_v50, %v5762_v23  ;;  %8293 = vrcp.f32 %v5099_v10 }
 0x5a9   : > { %v5770_v19 = vpop.permute.xlu0 %5769  ;;  %v8274_v35 = vpop.eup %8273  ;;  %8295 = vpow2.f32 %v7551_v57  ;;  %v5103_v50 = vadd.f32 1.0, %v8272_v6  ;;  %v13221_v57 = vld [vmem:[#allocation21_spill] sm:$0xff] }
 0x5aa   : > { %6079 = vrot.lane.b32.xlu1 %v5924_v3, %s8529_s22  ;;  %v5101_v3 = vadd.f32 1.0, %v8264_v27  ;;  %v11838_v39 = vpop.eup %8275  ;;  %8297 = vpow2.f32 %v7552_v28  ;;  %v5104_v27 = vadd.f32 1.0, %v8274_v35  ;;  %v13223_v28 = vld [vmem:[#allocation23_spill] sm:$0xff] }
 0x5ab   : > { %6077 = vrot.lane.b32.xlu0 %v5923_v40, %s8529_s22  ;;  %13217 = vst [vmem:[#allocation15_spill] sm:$0xff] %v11838_v39  ;;  %v11842_v24 = vpop.eup %8277  ;;  %v7554_v40 = vmul.f32 -1.442695, %v13219_v29  ;;  %v5928_v23 = vmul.f32 %v11838_v39, %v5768_v43  ;;  %8299 = vrcp.f32 %v5102_v14  ;;  %v7556_v35 = vmul.f32 -1.442695, %v13223_v28 }
 0x5ac   : > { %v5776_v47 = vpop.permute.xlu1 %5775  ;;  %13218 = vst [vmem:[#allocation107_spill] sm:$0xff] %v11842_v24  ;;  %v8280_v52 = vpop.eup %8279  ;;  %v5927_v10 = vmul.f32 %v11842_v24, %v5766_v7  ;;  %8301 = vrcp.f32 %v5101_v3 }
 0x5ad   : > { %v5774_v2 = vpop.permute.xlu0 %5773  ;;  %8303 = vpow2.f32 %v7553_v53  ;;  %v5105_v39 = vadd.f32 1.0, %v8280_v52 }
 0x5ae   : > { %6083 = vrot.lane.b32.xlu1 %v5926_v8, %s8529_s22  ;;  %v8282_v8 = vpop.eup %8281  ;;  %8305 = vpow2.f32 %v7554_v40  ;;  %v7558_v40 = vmul.f32 -1.442695, %v11441_v60 }
 0x5af   : > { %6081 = vrot.lane.b32.xlu0 %v5925_v30, %s8529_s22  ;;  %v11848_v49 = vpop.eup %8283  ;;  %v7555_v30 = vmul.f32 -1.442695, %v13221_v57  ;;  %v5106_v6 = vadd.f32 1.0, %v8282_v8  ;;  %8307 = vrcp.f32 %v5104_v27 }
 0x5b0   : > { %v5780_v55 = vpop.permute.xlu1 %5779  ;;  %13220 = vst [vmem:[#allocation22_spill] sm:$0xff] %v11848_v49  ;;  %v11852_v43 = vpop.eup %8285  ;;  %v5930_v7 = vmul.f32 %v11848_v49, %v5772_v62  ;;  %8309 = vrcp.f32 %v5103_v50 }
 0x5b1   : > { %v5778_v18 = vpop.permute.xlu0 %5777  ;;  %13222 = vst [vmem:[#allocation21_spill] sm:$0xff] %v11852_v43  ;;  %v8288_v29 = vpop.eup %8287  ;;  %v5929_v3 = vmul.f32 %v11852_v43, %v5770_v19  ;;  %8311 = vpow2.f32 %v7555_v30  ;;  %v7559_v30 = vmul.f32 -1.442695, %v11445_v1 }
 0x5b2   : > { %6087 = vrot.lane.b32.xlu1 %v5928_v23, %s8529_s22  ;;  %v8290_v24 = vpop.eup %8289  ;;  %8313 = vpow2.f32 %v7556_v35 }
 0x5b3   : > { %6085 = vrot.lane.b32.xlu0 %v5927_v10, %s8529_s22  ;;  %v11858_v53 = vpop.eup %8291  ;;  %v7557_v10 = vmul.f32 -1.442695, %v11437_v46  ;;  %v5108_v52 = vadd.f32 1.0, %v8290_v24  ;;  %8315 = vrcp.f32 %v5106_v6 }
 0x5b4   : > { %v5784_v14 = vpop.permute.xlu1 %5783  ;;  %13224 = vst [vmem:[#allocation23_spill] sm:$0xff] %v11858_v53  ;;  %v11862_v62 = vpop.eup %8293  ;;  %v5932_v19 = vmul.f32 %v11858_v53, %v5776_v47  ;;  %8317 = vrcp.f32 %v5105_v39  ;;  %v7560_v47 = vmul.f32 -1.442695, %v11449_v41 }
 0x5b5   : > { %v5782_v23 = vpop.permute.xlu0 %5781  ;;  %13225 = vst [vmem:[#allocation108_spill] sm:$0xff] %v11862_v62  ;;  %v8296_v8 = vpop.eup %8295  ;;  %v5931_v50 = vmul.f32 %v11862_v62, %v5774_v2  ;;  %8319 = vpow2.f32 %v7557_v10  ;;  %v7561_v10 = vmul.f32 -1.442695, %v11453_v33 }
 0x5b6   : > { %6091 = vrot.lane.b32.xlu1 %v5930_v7, %s8529_s22  ;;  %v8298_v28 = vpop.eup %8297  ;;  %v5107_v7 = vadd.f32 1.0, %v8288_v29  ;;  %8321 = vpow2.f32 %v7558_v40 }
 0x5b7   : > { %6089 = vrot.lane.b32.xlu0 %v5929_v3, %s8529_s22  ;;  %v11868_v46 = vpop.eup %8299  ;;  %v5110_v29 = vadd.f32 1.0, %v8298_v28  ;;  %8323 = vrcp.f32 %v5108_v52 }
 0x5b8   : > { %v5788_v27 = vpop.permute.xlu1 %5787  ;;  %13226 = vst [vmem:[#allocation109_spill] sm:$0xff] %v11868_v46  ;;  %v11872_v60 = vpop.eup %8301  ;;  %v5934_v2 = vmul.f32 %v11868_v46, %v5780_v55  ;;  %8325 = vrcp.f32 %v5107_v7  ;;  %v7562_v55 = vmul.f32 -1.442695, %v11457_v31 }
 0x5b9   : > { %v5786_v57 = vpop.permute.xlu0 %5785  ;;  %13227 = vst [vmem:[#allocation110_spill] sm:$0xff] %v11872_v60  ;;  %v8304_v35 = vpop.eup %8303  ;;  %v5933_v39 = vmul.f32 %v11872_v60, %v5778_v18  ;;  %8327 = vpow2.f32 %v7559_v30  ;;  %v7563_v30 = vmul.f32 -1.442695, %v11461_v17 }
 0x5ba   : > { %6095 = vrot.lane.b32.xlu1 %v5932_v19, %s8529_s22  ;;  %v8306_v3 = vpop.eup %8305  ;;  %v5109_v19 = vadd.f32 1.0, %v8296_v8  ;;  %8329 = vpow2.f32 %v7560_v47 }
 0x5bb   : > { %6093 = vrot.lane.b32.xlu0 %v5931_v50, %s8529_s22  ;;  %v11878_v1 = vpop.eup %8307  ;;  %v5112_v8 = vadd.f32 1.0, %v8306_v3  ;;  %8331 = vrcp.f32 %v5110_v29 }
 0x5bc   : > { %v5792_v24 = vpop.permute.xlu1 %5791  ;;  %13228 = vst [vmem:[#allocation111_spill] sm:$0xff] %v11878_v1  ;;  %v11882_v41 = vpop.eup %8309  ;;  %v5936_v18 = vmul.f32 %v11878_v1, %v5784_v14  ;;  %8333 = vrcp.f32 %v5109_v19  ;;  %v7564_v14 = vmul.f32 -1.442695, %v11467_v45 }
 0x5bd   : > { %v5790_v6 = vpop.permute.xlu0 %5789  ;;  %13229 = vst [vmem:[#allocation112_spill] sm:$0xff] %v11882_v41  ;;  %v8312_v52 = vpop.eup %8311  ;;  %v5935_v50 = vmul.f32 %v11882_v41, %v5782_v23  ;;  %8335 = vpow2.f32 %v7561_v10  ;;  %v7565_v10 = vmul.f32 -1.442695, %v13184_v54 }
 0x5be   : > { %6099 = vrot.lane.b32.xlu1 %v5934_v2, %s8529_s22  ;;  %v8314_v7 = vpop.eup %8313  ;;  %v5111_v2 = vadd.f32 1.0, %v8304_v35  ;;  %8337 = vpow2.f32 %v7562_v55 }
 0x5bf   : > { %6097 = vrot.lane.b32.xlu0 %v5933_v39, %s8529_s22  ;;  %v11888_v33 = vpop.eup %8315  ;;  %v5114_v35 = vadd.f32 1.0, %v8314_v7  ;;  %8339 = vrcp.f32 %v5112_v8 }
 0x5c0   : > { %v5796_v40 = vpop.permute.xlu1 %5795  ;;  %13230 = vst [vmem:[#allocation113_spill] sm:$0xff] %v11888_v33  ;;  %v11892_v31 = vpop.eup %8317  ;;  %v5938_v23 = vmul.f32 %v11888_v33, %v5788_v27  ;;  %8341 = vrcp.f32 %v5111_v2  ;;  %v7566_v27 = vmul.f32 -1.442695, %v11475_v59 }
 0x5c1   : > { %v5794_v28 = vpop.permute.xlu0 %5793  ;;  %13231 = vst [vmem:[#allocation114_spill] sm:$0xff] %v11892_v31  ;;  %v8320_v29 = vpop.eup %8319  ;;  %v5937_v39 = vmul.f32 %v11892_v31, %v5786_v57  ;;  %8343 = vpow2.f32 %v7563_v30  ;;  %v13235_v30 = vld [vmem:[#allocation6_spill] sm:$0xff] }
 0x5c2   : > { %6103 = vrot.lane.b32.xlu1 %v5936_v18, %s8529_s22  ;;  %v8322_v19 = vpop.eup %8321  ;;  %v5113_v18 = vadd.f32 1.0, %v8312_v52  ;;  %8345 = vpow2.f32 %v7564_v14 }
 0x5c3   : > { %6101 = vrot.lane.b32.xlu0 %v5935_v50, %s8529_s22  ;;  %v11898_v17 = vpop.eup %8323  ;;  %v5116_v52 = vadd.f32 1.0, %v8322_v19  ;;  %8347 = vrcp.f32 %v5114_v35 }
 0x5c4   : > { %v5800_v47 = vpop.permute.xlu1 %5799  ;;  %13232 = vst [vmem:[#allocation115_spill] sm:$0xff] %v11898_v17  ;;  %v11902_v45 = vpop.eup %8325  ;;  %v5940_v57 = vmul.f32 %v11898_v17, %v5792_v24  ;;  %8349 = vrcp.f32 %v5113_v18  ;;  %v13237_v24 = vld [vmem:[#allocation47_spill] sm:$0xff] }
 0x5c5   : > { %v5798_v3 = vpop.permute.xlu0 %5797  ;;  %13233 = vst [vmem:[#allocation116_spill] sm:$0xff] %v11902_v45  ;;  %v8328_v8 = vpop.eup %8327  ;;  %v5939_v50 = vmul.f32 %v11902_v45, %v5790_v6  ;;  %8351 = vpow2.f32 %v7565_v10  ;;  %v7568_v14 = vmul.f32 -1.442695, %v13237_v24 }
 0x5c6   : > { %6107 = vrot.lane.b32.xlu1 %v5938_v23, %s8529_s22  ;;  %v8330_v2 = vpop.eup %8329  ;;  %v5115_v23 = vadd.f32 1.0, %v8320_v29  ;;  %8353 = vpow2.f32 %v7566_v27  ;;  %v5117_v17 = vadd.f32 1.0, %v8328_v8  ;;  %v13241_v27 = vld [vmem:[#allocation48_spill] sm:$0xff] }
 0x5c7   : > { %6105 = vrot.lane.b32.xlu0 %v5937_v39, %s8529_s22  ;;  %v11908_v54 = vpop.eup %8331  ;;  %v7567_v39 = vmul.f32 -1.442695, %v13235_v30  ;;  %v5118_v29 = vadd.f32 1.0, %v8330_v2  ;;  %8355 = vrcp.f32 %v5116_v52  ;;  %v7569_v2 = vmul.f32 -1.442695, %v13241_v27 }
 0x5c8   : > { %v5804_v55 = vpop.permute.xlu1 %5803  ;;  %13234 = vst [vmem:[#allocation117_spill] sm:$0xff] %v11908_v54  ;;  %v11912_v59 = vpop.eup %8333  ;;  %v5942_v6 = vmul.f32 %v11908_v54, %v5796_v40  ;;  %8357 = vrcp.f32 %v5115_v23 }
 0x5c9   : > { %v5802_v7 = vpop.permute.xlu0 %5801  ;;  %13236 = vst [vmem:[#allocation6_spill] sm:$0xff] %v11912_v59  ;;  %v8336_v19 = vpop.eup %8335  ;;  %v5941_v18 = vmul.f32 %v11912_v59, %v5794_v28  ;;  %8359 = vpow2.f32 %v7567_v39 }
 0x5ca   : > { %6111 = vrot.lane.b32.xlu1 %v5940_v57, %s8529_s22  ;;  %v8338_v45 = vpop.eup %8337  ;;  %8361 = vpow2.f32 %v7568_v14  ;;  %v5119_v54 = vadd.f32 1.0, %v8336_v19 }
 0x5cb   : > { %6109 = vrot.lane.b32.xlu0 %v5939_v50, %s8529_s22  ;;  %v11918_v10 = vpop.eup %8339  ;;  %v13239_v50 = vld [vmem:[#allocation18_spill] sm:$0xff]  ;;  %v5120_v8 = vadd.f32 1.0, %v8338_v45  ;;  %8363 = vrcp.f32 %v5118_v29 }
 0x5cc   : > { %v5808_v35 = vpop.permute.xlu1 %5807  ;;  %13238 = vst [vmem:[#allocation47_spill] sm:$0xff] %v11918_v10  ;;  %v7570_v30 = vmul.f32 -1.442695, %v13239_v50  ;;  %v11922_v40 = vpop.eup %8341  ;;  %v5944_v28 = vmul.f32 %v11918_v10, %v5800_v47  ;;  %8365 = vrcp.f32 %v5117_v17 }
 0x5cd   : > { %v5806_v57 = vpop.permute.xlu0 %5805  ;;  %13240 = vst [vmem:[#allocation18_spill] sm:$0xff] %v11922_v40  ;;  %v8344_v24 = vpop.eup %8343  ;;  %v5943_v23 = vmul.f32 %v11922_v40, %v5798_v3 }
 0x5ce   : > { %6115 = vrot.lane.b32.xlu1 %v5942_v6, %s8529_s22  ;;  %v8346_v59 = vpop.eup %8345  ;;  %8367 = vpow2.f32 %v7570_v30  ;;  %v5121_v50 = vadd.f32 1.0, %v8344_v24 }
 0x5cf   : > { %6113 = vrot.lane.b32.xlu0 %v5941_v18, %s8529_s22  ;;  %v11928_v39 = vpop.eup %8347  ;;  %8369 = vpow2.f32 %v7569_v2  ;;  %v5122_v18 = vadd.f32 1.0, %v8346_v59 }
 0x5d0   : > { %v5812_v52 = vpop.permute.xlu1 %5811  ;;  %13242 = vst [vmem:[#allocation48_spill] sm:$0xff] %v11928_v39  ;;  %v11931_v14 = vpop.eup %8349  ;;  %v5946_v47 = vmul.f32 %v11928_v39, %v5804_v55  ;;  %8371 = vrcp.f32 %v5120_v8 }
 0x5d1   : > { %v5810_v6 = vpop.permute.xlu0 %5809  ;;  %13243 = vst [vmem:[#allocation118_spill] sm:$0xff] %v11931_v14  ;;  %v8352_v29 = vpop.eup %8351  ;;  %v5945_v3 = vmul.f32 %v11931_v14, %v5802_v7  ;;  %8373 = vrcp.f32 %v5119_v54 }
 0x5d2   : > { %6119 = vrot.lane.b32.xlu1 %v5944_v28, %s8529_s22  ;;  %v8354_v17 = vpop.eup %8353  ;;  %8375 = vrcp.f32 %v5122_v18  ;;  %v5123_v24 = vadd.f32 1.0, %v8352_v29 }
 0x5d3   : > { %6117 = vrot.lane.b32.xlu0 %v5943_v23, %s8529_s22  ;;  %v11936_v30 = vpop.eup %8355  ;;  %v5124_v59 = vadd.f32 1.0, %v8354_v17  ;;  %8377 = vrcp.f32 %v5121_v50 }
 0x5d4   : > { %v5816_v45 = vpop.permute.xlu1 %5815  ;;  %13244 = vst [vmem:[#allocation119_spill] sm:$0xff] %v11936_v30  ;;  %v11939_v27 = vpop.eup %8357  ;;  %v5948_v55 = vmul.f32 %v11936_v30, %v5808_v35 }
 0x5d5   : > { %v5814_v19 = vpop.permute.xlu0 %5813  ;;  %13245 = vst [vmem:[#allocation120_spill] sm:$0xff] %v11939_v27  ;;  %v8360_v28 = vpop.eup %8359  ;;  %v5947_v7 = vmul.f32 %v11939_v27, %v5806_v57  ;;  %8379 = vrcp.f32 %v5124_v59 }
 0x5d6   : > { %6123 = vrot.lane.b32.xlu1 %v5946_v47, %s8529_s22  ;;  %v8362_v23 = vpop.eup %8361  ;;  %v5125_v29 = vadd.f32 1.0, %v8360_v28  ;;  %8381 = vrcp.f32 %v5123_v24 }
 0x5d7   : > { %6121 = vrot.lane.b32.xlu0 %v5945_v3, %s8529_s22  ;;  %v11944_v54 = vpop.eup %8363  ;;  %v5126_v17 = vadd.f32 1.0, %v8362_v23 }
 0x5d8   : > { %v5820_v2 = vpop.permute.xlu1 %5819  ;;  %13246 = vst [vmem:[#allocation121_spill] sm:$0xff] %v11944_v54  ;;  %v11947_v47 = vpop.eup %8365  ;;  %v5950_v35 = vmul.f32 %v11944_v54, %v5812_v52 }
 0x5d9   : > { %v5818_v8 = vpop.permute.xlu0 %5817  ;;  %13247 = vst [vmem:[#allocation122_spill] sm:$0xff] %v11947_v47  ;;  %v8368_v30 = vpop.eup %8367  ;;  %v5949_v57 = vmul.f32 %v11947_v47, %v5810_v6  ;;  %8383 = vrcp.f32 %v5126_v17 }
 0x5da   : > { %6127 = vrot.lane.b32.xlu1 %v5948_v55, %s8529_s22  ;;  %v8370_v27 = vpop.eup %8369  ;;  %v5128_v54 = vadd.f32 1.0, %v8368_v30  ;;  %8385 = vrcp.f32 %v5125_v29 }
 0x5db   : > { %6125 = vrot.lane.b32.xlu0 %v5947_v7, %s8529_s22  ;;  %v11952_v50 = vpop.eup %8371  ;;  %v5127_v23 = vadd.f32 1.0, %v8370_v27 }
 0x5dc   : > { %v5824_v3 = vpop.permute.xlu1 %5823  ;;  %13248 = vst [vmem:[#allocation123_spill] sm:$0xff] %v11952_v50  ;;  %v11955_v55 = vpop.eup %8373  ;;  %v5952_v52 = vmul.f32 %v11952_v50, %v5816_v45  ;;  %8387 = vrcp.f32 %v5128_v54 }
 0x5dd   : > { %v5822_v18 = vpop.permute.xlu0 %5821  ;;  %13249 = vst [vmem:[#allocation124_spill] sm:$0xff] %v11955_v55  ;;  %v5951_v59 = vmul.f32 %v11955_v55, %v5814_v19  ;;  %v11960_v28 = vpop.eup %8375  ;;  %8389 = vrcp.f32 %v5127_v23 }
 0x5de   : > { %6131 = vrot.lane.b32.xlu1 %v5950_v35, %s8529_s22  ;;  %13250 = vst [vmem:[#allocation125_spill] sm:$0xff] %v11960_v28  ;;  %v11963_v24 = vpop.eup %8377  ;;  %v5954_v35 = vmul.f32 %v11960_v28, %v5820_v2 }
 0x5df   : > { %6129 = vrot.lane.b32.xlu0 %v5949_v57, %s8529_s22  ;;  %13251 = vst [vmem:[#allocation126_spill] sm:$0xff] %v11963_v24  ;;  %v5953_v45 = vmul.f32 %v11963_v24, %v5818_v8  ;;  %v11968_v19 = vpop.eup %8379  ;;  %v13257_v24 = vld [vmem:[#allocation26_spill] sm:$0xff] }
 0x5e0   : > { %v5828_v7 = vpop.permute.xlu1 %5827  ;;  %13252 = vst [vmem:[#allocation127_spill] sm:$0xff] %v11968_v19  ;;  %v11971_v27 = vpop.eup %8381  ;;  %v5956_v17 = vmul.f32 %v11968_v19, %v5824_v3 }
 0x5e1   : > { %v5826_v6 = vpop.permute.xlu0 %5825  ;;  %13253 = vst [vmem:[#allocation128_spill] sm:$0xff] %v11971_v27 }
 0x5e2   : > { %6135 = vrot.lane.b32.xlu1 %v5952_v52, %s8529_s22  ;;  %v5955_v52 = vmul.f32 %v11971_v27, %v5822_v18 }
 0x5e3   : > { %6133 = vrot.lane.b32.xlu0 %v5951_v59, %s8529_s22  ;;  %v11976_v54 = vpop.eup %8383 }
 0x5e4   : > { %v5832_v57 = vpop.permute.xlu1 %5831  ;;  %13254 = vst [vmem:[#allocation129_spill] sm:$0xff] %v11976_v54  ;;  %v11979_v8 = vpop.eup %8385  ;;  %v5958_v59 = vmul.f32 %v11976_v54, %v5828_v7  ;;  %v5578_v7 = vmul.f32 %v11687_v9, %v13257_v24  ;;  %v13261_v24 = vld [vmem:[#allocation29_spill] sm:$0xff] }
 0x5e5   : > { %v5830_v30 = vpop.permute.xlu0 %5829  ;;  %13255 = vst [vmem:[#allocation130_spill] sm:$0xff] %v11979_v8 }
 0x5e6   : > { %6139 = vrot.lane.b32.xlu1 %v5954_v35, %s8529_s22  ;;  %v5957_v35 = vmul.f32 %v11979_v8, %v5826_v6  ;;  %v11984_v3 = vpop.eup %8387  ;;  %v13258_v6 = vld [vmem:[#allocation27_spill] sm:$0xff]  ;;  %v13259_v8 = vld [vmem:[#allocation78_spill] sm:$0xff] }
 0x5e7   : > { %6137 = vrot.lane.b32.xlu0 %v5953_v45, %s8529_s22  ;;  %13256 = vst [vmem:[#allocation131_spill] sm:$0xff] %v11984_v3  ;;  %v11987_v18 = vpop.eup %8389 }
 0x5e8   : > { %v6028_v29 = vpop.permute.xlu1 %6027 }
 0x5e9   : > { %v6026_v2 = vpop.permute.xlu0 %6025  ;;  %v11997_v54 = vadd.f32 %v6028_v29, %v5578_v7 }
 0x5ea   : > { %6143 = vrot.lane.b32.xlu1 %v5956_v17, %s8529_s22  ;;  %v5960_v17 = vmul.f32 %v11984_v3, %v5832_v57  ;;  %v13260_v3 = vld [vmem:[#allocation28_spill] sm:$0xff] }
 0x5eb   : > { %6141 = vrot.lane.b32.xlu0 %v5955_v52, %s8529_s22  ;;  %v5959_v52 = vmul.f32 %v11987_v18, %v5830_v30  ;;  %v5580_v30 = vmul.f32 %v11698_v5, %v13260_v3  ;;  %v13263_v3 = vld [vmem:[#allocation31_spill] sm:$0xff]  ;;  %8391 = vtanh.f32 %v11997_v54 }
 0x5ec   : > { %v6032_v23 = vpop.permute.xlu1 %6031  ;;  %v5581_v5 = vmul.f32 %v11712_v25, %v13263_v3 }
 0x5ed   : > { %v6030_v45 = vpop.permute.xlu0 %6029 }
 0x5ee   : > { %6147 = vrot.lane.b32.xlu1 %v5958_v59, %s8529_s22  ;;  %v5577_v59 = vmul.f32 %v13259_v8, %v13258_v6  ;;  %v13262_v6 = vld [vmem:[#allocation30_spill] sm:$0xff] }
 0x5ef   : > { %6145 = vrot.lane.b32.xlu0 %v5957_v35, %s8529_s22 }
 0x5f0   : > { %v6036_v27 = vpop.permute.xlu1 %6035  ;;  %v11999_v28 = vadd.f32 %v6026_v2, %v5577_v59  ;;  %v5582_v59 = vmul.f32 %v11708_v11, %v13262_v6  ;;  %v13265_v6 = vld [vmem:[#allocation32_spill] sm:$0xff] }
 0x5f1   : > { %v6034_v19 = vpop.permute.xlu0 %6033  ;;  %v5583_v11 = vmul.f32 %v11722_v48, %v13265_v6 }
 0x5f2   : > { %6151 = vrot.lane.b32.xlu1 %v5960_v17, %s8529_s22  ;;  %v5579_v17 = vmul.f32 %v11702_v13, %v13261_v24  ;;  %v12021_v24 = vadd.f32 %v6036_v27, %v5582_v59  ;;  %8393 = vtanh.f32 %v11999_v28 }
 0x5f3   : > { %6149 = vrot.lane.b32.xlu0 %v5959_v52, %s8529_s22  ;;  %v12009_v52 = vadd.f32 %v6032_v23, %v5580_v30  ;;  %v12023_v30 = vadd.f32 %v6034_v19, %v5581_v5  ;;  %v13266_v19 = vld [vmem:[#allocation33_spill] sm:$0xff] }
 0x5f4   : > { %v6040_v35 = vpop.permute.xlu1 %6039  ;;  %v12011_v7 = vadd.f32 %v6030_v45, %v5579_v17  ;;  %v13264_v17 = vld [vmem:[#allocation17_spill] sm:$0xff]  ;;  %v5586_v25 = vmul.f32 %v11728_v61, %v13266_v19  ;;  %v13269_v19 = vld [vmem:[#allocation36_spill] sm:$0xff] }
 0x5f5   : > { %v6038_v57 = vpop.permute.xlu0 %6037  ;;  %v5584_v13 = vmul.f32 %v11718_v20, %v13264_v17  ;;  %v13267_v17 = vld [vmem:[#allocation34_spill] sm:$0xff]  ;;  %v5587_v61 = vmul.f32 %v11741_v0, %v13269_v19  ;;  %8395 = vtanh.f32 %v12009_v52 }
 0x5f6   : > { %6731 = vrot.lane.b32.xlu1 %v11997_v54, %s8532_s4  ;;  %v12035_v59 = vadd.f32 %v6038_v57, %v5583_v11  ;;  %v5585_v20 = vmul.f32 %v11732_v38, %v13267_v17  ;;  %v13268_v57 = vld [vmem:[#allocation35_spill] sm:$0xff]  ;;  %v13352_v54 = vld [vmem:[#allocation77_spill] sm:$0xff]  ;;  %8397 = vtanh.f32 %v12011_v7 }
 0x5f7   : > { %6729 = vrot.lane.b32.xlu0 %v11999_v28, %s8532_s4  ;;  %v12033_v3 = vadd.f32 %v6040_v35, %v5584_v13  ;;  %v5588_v48 = vmul.f32 %v11738_v42, %v13268_v57  ;;  %v13271_v57 = vld [vmem:[#allocation38_spill] sm:$0xff]  ;;  %8399 = vtanh.f32 %v12021_v24 }
 0x5f8   : > { %v6044_v29 = vpop.permute.xlu1 %6043  ;;  %v13272_v42 = vld [vmem:[#allocation90_spill] sm:$0xff]  ;;  %8401 = vtanh.f32 %v12023_v30 }
 0x5f9   : > { %v6042_v2 = vpop.permute.xlu0 %6041  ;;  %v12045_v6 = vadd.f32 %v6044_v29, %v5586_v25  ;;  %v5589_v8 = vmul.f32 %v13272_v42, %v13271_v57  ;;  %8403 = vtanh.f32 %v12033_v3 }
 0x5fa   : > { %6735 = vrot.lane.b32.xlu1 %v12009_v52, %s8532_s4  ;;  %v12047_v35 = vadd.f32 %v6042_v2, %v5585_v20  ;;  %v13270_v2 = vld [vmem:[#allocation37_spill] sm:$0xff]  ;;  %8405 = vtanh.f32 %v12035_v59 }
 0x5fb   : > { %6733 = vrot.lane.b32.xlu0 %v12011_v7, %s8532_s4  ;;  %v5590_v38 = vmul.f32 %v11747_v15, %v13270_v2  ;;  %v13274_v2 = vld [vmem:[#allocation40_spill] sm:$0xff]  ;;  %v8392_v7 = vpop.eup %8391  ;;  %8407 = vtanh.f32 %v12045_v6 }
 0x5fc   : > { %v6048_v23 = vpop.permute.xlu1 %6047  ;;  %v5591_v15 = vmul.f32 %v11761_v36, %v13274_v2  ;;  %8409 = vtanh.f32 %v12047_v35 }
 0x5fd   : > { %v6046_v45 = vpop.permute.xlu0 %6045  ;;  %v12057_v17 = vadd.f32 %v6048_v23, %v5588_v48 }
 0x5fe   : > { %6739 = vrot.lane.b32.xlu1 %v12021_v24, %s8532_s4  ;;  %v12059_v29 = vadd.f32 %v6046_v45, %v5587_v61  ;;  %v13273_v45 = vld [vmem:[#allocation39_spill] sm:$0xff] }
 0x5ff   : > { %6737 = vrot.lane.b32.xlu0 %v12023_v30, %s8532_s4  ;;  %v5592_v0 = vmul.f32 %v11757_v34, %v13273_v45  ;;  %v13276_v45 = vld [vmem:[#allocation42_spill] sm:$0xff]  ;;  %8411 = vtanh.f32 %v12057_v17 }
 0x600   : > { %v6052_v27 = vpop.permute.xlu1 %6051  ;;  %v5593_v34 = vmul.f32 %v11771_v37, %v13276_v45  ;;  %8413 = vtanh.f32 %v12059_v29 }
 0x601   : > { %v6050_v5 = vpop.permute.xlu0 %6049  ;;  %v12069_v19 = vadd.f32 %v6052_v27, %v5590_v38 }
 0x602   : > { %6743 = vrot.lane.b32.xlu1 %v12033_v3, %s8532_s4  ;;  %v12071_v23 = vadd.f32 %v6050_v5, %v5589_v8  ;;  %v13275_v5 = vld [vmem:[#allocation41_spill] sm:$0xff] }
 0x603   : > { %6741 = vrot.lane.b32.xlu0 %v12035_v59, %s8532_s4  ;;  %v5594_v42 = vmul.f32 %v11767_v32, %v13275_v5  ;;  %v13278_v5 = vld [vmem:[#allocation44_spill] sm:$0xff]  ;;  %8415 = vtanh.f32 %v12069_v19 }
 0x604   : > { %v6056_v13 = vpop.permute.xlu1 %6055  ;;  %v5595_v32 = vmul.f32 %v11781_v21, %v13278_v5  ;;  %8417 = vtanh.f32 %v12071_v23 }
 0x605   : > { %v6054_v11 = vpop.permute.xlu0 %6053  ;;  %v12081_v57 = vadd.f32 %v6056_v13, %v5592_v0 }
 0x606   : > { %6747 = vrot.lane.b32.xlu1 %v12045_v6, %s8532_s4  ;;  %v12083_v27 = vadd.f32 %v6054_v11, %v5591_v15  ;;  %v13277_v11 = vld [vmem:[#allocation43_spill] sm:$0xff] }
 0x607   : > { %6745 = vrot.lane.b32.xlu0 %v12047_v35, %s8532_s4  ;;  %v5596_v36 = vmul.f32 %v11777_v44, %v13277_v11  ;;  %v13280_v11 = vld [vmem:[#allocation20_spill] sm:$0xff]  ;;  %8419 = vtanh.f32 %v12081_v57 }
 0x608   : > { %v6060_v25 = vpop.permute.xlu1 %6059  ;;  %v5597_v44 = vmul.f32 %v11792_v51, %v13280_v11  ;;  %8421 = vtanh.f32 %v12083_v27 }
 0x609   : > { %v6058_v20 = vpop.permute.xlu0 %6057  ;;  %v12093_v2 = vadd.f32 %v6060_v25, %v5594_v42 }
 0x60a   : > { %6751 = vrot.lane.b32.xlu1 %v12057_v17, %s8532_s4  ;;  %v12095_v13 = vadd.f32 %v6058_v20, %v5593_v34  ;;  %v13279_v20 = vld [vmem:[#allocation19_spill] sm:$0xff] }
 0x60b   : > { %6749 = vrot.lane.b32.xlu0 %v12059_v29, %s8532_s4  ;;  %v5598_v37 = vmul.f32 %v11788_v12, %v13279_v20  ;;  %v13282_v20 = vld [vmem:[#allocation46_spill] sm:$0xff]  ;;  %8423 = vtanh.f32 %v12093_v2 }
 0x60c   : > { %v6064_v48 = vpop.permute.xlu1 %6063  ;;  %v5599_v12 = vmul.f32 %v11802_v58, %v13282_v20 }
 0x60d   : > { %v6062_v61 = vpop.permute.xlu0 %6061  ;;  %v12105_v45 = vadd.f32 %v6064_v48, %v5596_v36 }
 0x60e   : > { %6755 = vrot.lane.b32.xlu1 %v12069_v19, %s8532_s4  ;;  %v12107_v25 = vadd.f32 %v6062_v61, %v5595_v32  ;;  %v13281_v61 = vld [vmem:[#allocation45_spill] sm:$0xff] }
 0x60f   : > { %6753 = vrot.lane.b32.xlu0 %v12071_v23, %s8532_s4  ;;  %v5600_v21 = vmul.f32 %v11798_v22, %v13281_v61  ;;  %v13284_v61 = vld [vmem:[#allocation8_spill] sm:$0xff] }
 0x610   : > { %v6068_v38 = vpop.permute.xlu1 %6067  ;;  %v5601_v22 = vmul.f32 %v11812_v16, %v13284_v61 }
 0x611   : > { %v6066_v8 = vpop.permute.xlu0 %6065  ;;  %v12117_v5 = vadd.f32 %v6068_v38, %v5598_v37 }
 0x612   : > { %6759 = vrot.lane.b32.xlu1 %v12081_v57, %s8532_s4  ;;  %v12119_v48 = vadd.f32 %v6066_v8, %v5597_v44  ;;  %v13283_v8 = vld [vmem:[#allocation7_spill] sm:$0xff] }
 0x613   : > { %6757 = vrot.lane.b32.xlu0 %v12083_v27, %s8532_s4  ;;  %v5602_v51 = vmul.f32 %v11808_v63, %v13283_v8  ;;  %v13287_v8 = vld [vmem:[#allocation14_spill] sm:$0xff] }
 0x614   : > { %v6072_v0 = vpop.permute.xlu1 %6071  ;;  %v5603_v63 = vmul.f32 %v11822_v56, %v13287_v8  ;;  %v13293_v56 = vld [vmem:[#allocation15_spill] sm:$0xff] }
 0x615   : > { %v6070_v15 = vpop.permute.xlu0 %6069  ;;  %v12129_v11 = vadd.f32 %v6072_v0, %v5600_v21 }
 0x616   : > { %6763 = vrot.lane.b32.xlu1 %v12093_v2, %s8532_s4  ;;  %v12131_v38 = vadd.f32 %v6070_v15, %v5599_v12  ;;  %v13286_v15 = vld [vmem:[#allocation11_spill] sm:$0xff] }
 0x617   : > { %6761 = vrot.lane.b32.xlu0 %v12095_v13, %s8532_s4  ;;  %v5604_v58 = vmul.f32 %v11816_v26, %v13286_v15  ;;  %v13290_v15 = vld [vmem:[#allocation16_spill] sm:$0xff]  ;;  %v13291_v26 = vld [vmem:[#allocation106_spill] sm:$0xff] }
 0x618   : > { %v6076_v42 = vpop.permute.xlu1 %6075  ;;  %v5605_v9 = vmul.f32 %v13291_v26, %v13290_v15 }
 0x619   : > { %v6074_v34 = vpop.permute.xlu0 %6073  ;;  %v12141_v20 = vadd.f32 %v6076_v42, %v5602_v51 }
 0x61a   : > { %6767 = vrot.lane.b32.xlu1 %v12105_v45, %s8532_s4  ;;  %v12143_v0 = vadd.f32 %v6074_v34, %v5601_v22  ;;  %v13289_v34 = vld [vmem:[#allocation13_spill] sm:$0xff] }
 0x61b   : > { %6765 = vrot.lane.b32.xlu0 %v12107_v25, %s8532_s4  ;;  %v5606_v16 = vmul.f32 %v11828_v4, %v13289_v34  ;;  %v13294_v34 = vld [vmem:[#allocation50_spill] sm:$0xff]  ;;  %v13295_v4 = vld [vmem:[#allocation107_spill] sm:$0xff] }
 0x61c   : > { %v6080_v36 = vpop.permute.xlu1 %6079  ;;  %13285 = vst [vmem:[#allocation26_spill] sm:$0xff] %v12143_v0 }
 0x61d   : > { %v6078_v32 = vpop.permute.xlu0 %6077  ;;  %v12153_v61 = vadd.f32 %v6080_v36, %v5604_v58 }
 0x61e   : > { %6771 = vrot.lane.b32.xlu1 %v12117_v5, %s8532_s4  ;;  %v12155_v42 = vadd.f32 %v6078_v32, %v5603_v63  ;;  %v13292_v32 = vld [vmem:[#allocation49_spill] sm:$0xff] }
 0x61f   : > { %6769 = vrot.lane.b32.xlu0 %v12119_v48, %s8532_s4  ;;  %13288 = vst [vmem:[#allocation27_spill] sm:$0xff] %v12153_v61 }
 0x620   : > { %v6084_v37 = vpop.permute.xlu1 %6083 }
 0x621   : > { %v6082_v44 = vpop.permute.xlu0 %6081  ;;  %v12165_v8 = vadd.f32 %v6084_v37, %v5606_v16 }
 0x622   : > { %6775 = vrot.lane.b32.xlu1 %v12129_v11, %s8532_s4  ;;  %v12167_v36 = vadd.f32 %v6082_v44, %v5605_v9  ;;  %v13296_v44 = vld [vmem:[#allocation51_spill] sm:$0xff] }
 0x623   : > { %6773 = vrot.lane.b32.xlu0 %v12131_v38, %s8532_s4  ;;  %v5610_v26 = vmul.f32 %v11848_v49, %v13296_v44  ;;  %v13299_v44 = vld [vmem:[#allocation53_spill] sm:$0xff] }
 0x624   : > { %v6088_v21 = vpop.permute.xlu1 %6087  ;;  %v5611_v49 = vmul.f32 %v11862_v62, %v13299_v44 }
 0x625   : > { %v6086_v12 = vpop.permute.xlu0 %6085 }
 0x626   : > { %6779 = vrot.lane.b32.xlu1 %v12141_v20, %s8532_s4 }
 0x627   : > { %6777 = vrot.lane.b32.xlu0 %v12143_v0, %s8532_s4  ;;  %v5608_v0 = vmul.f32 %v13293_v56, %v13292_v32  ;;  %v13297_v32 = vld [vmem:[#allocation52_spill] sm:$0xff] }
 0x628   : > { %v6092_v51 = vpop.permute.xlu1 %6091  ;;  %v5609_v56 = vmul.f32 %v11852_v43, %v13297_v32 }
 0x629   : > { %v6090_v22 = vpop.permute.xlu0 %6089  ;;  %v12177_v15 = vadd.f32 %v6088_v21, %v5608_v0 }
 0x62a   : > { %6783 = vrot.lane.b32.xlu1 %v12153_v61, %s8532_s4  ;;  %v5607_v61 = vmul.f32 %v13295_v4, %v13294_v34  ;;  %v12189_v34 = vadd.f32 %v6092_v51, %v5610_v26  ;;  %v12191_v0 = vadd.f32 %v6090_v22, %v5609_v56  ;;  %v13300_v22 = vld [vmem:[#allocation54_spill] sm:$0xff] }
 0x62b   : > { %6781 = vrot.lane.b32.xlu0 %v12155_v42, %s8532_s4  ;;  %v5614_v43 = vmul.f32 %v11868_v46, %v13300_v22  ;;  %v13304_v22 = vld [vmem:[#allocation57_spill] sm:$0xff] }
 0x62c   : > { %v6096_v58 = vpop.permute.xlu1 %6095  ;;  %v12179_v37 = vadd.f32 %v6086_v12, %v5607_v61  ;;  %v13298_v61 = vld [vmem:[#allocation12_spill] sm:$0xff]  ;;  %v5615_v46 = vmul.f32 %v11882_v41, %v13304_v22  ;;  %v13311_v41 = vld [vmem:[#allocation115_spill] sm:$0xff] }
 0x62d   : > { %v6094_v63 = vpop.permute.xlu0 %6093  ;;  %v5612_v4 = vmul.f32 %v11858_v53, %v13298_v61  ;;  %v13301_v61 = vld [vmem:[#allocation55_spill] sm:$0xff] }
 0x62e   : > { %6787 = vrot.lane.b32.xlu1 %v12165_v8, %s8532_s4  ;;  %v12203_v51 = vadd.f32 %v6094_v63, %v5611_v49  ;;  %v5613_v53 = vmul.f32 %v11872_v60, %v13301_v61  ;;  %v13303_v63 = vld [vmem:[#allocation56_spill] sm:$0xff] }
 0x62f   : > { %6785 = vrot.lane.b32.xlu0 %v12167_v36, %s8532_s4  ;;  %v12201_v32 = vadd.f32 %v6096_v58, %v5612_v4  ;;  %v5616_v62 = vmul.f32 %v11878_v1, %v13303_v63  ;;  %v13308_v63 = vld [vmem:[#allocation59_spill] sm:$0xff] }
 0x630   : > { %v6100_v16 = vpop.permute.xlu1 %6099  ;;  %v5617_v1 = vmul.f32 %v11892_v31, %v13308_v63  ;;  %v13315_v31 = vld [vmem:[#allocation117_spill] sm:$0xff] }
 0x631   : > { %v6098_v9 = vpop.permute.xlu0 %6097  ;;  %v12213_v44 = vadd.f32 %v6100_v16, %v5614_v43 }
 0x632   : > { %6791 = vrot.lane.b32.xlu1 %v12177_v15, %s8532_s4  ;;  %v12215_v58 = vadd.f32 %v6098_v9, %v5613_v53  ;;  %v13307_v9 = vld [vmem:[#allocation58_spill] sm:$0xff] }
 0x633   : > { %6789 = vrot.lane.b32.xlu0 %v12179_v37, %s8532_s4  ;;  %v5618_v60 = vmul.f32 %v11888_v33, %v13307_v9  ;;  %v13312_v9 = vld [vmem:[#allocation61_spill] sm:$0xff]  ;;  %v13313_v33 = vld [vmem:[#allocation116_spill] sm:$0xff] }
 0x634   : > { %v6104_v21 = vpop.permute.xlu1 %6103  ;;  %13302 = vst [vmem:[#allocation28_spill] sm:$0xff] %v12215_v58 }
 0x635   : > { %v6102_v12 = vpop.permute.xlu0 %6101  ;;  %v12225_v61 = vadd.f32 %v6104_v21, %v5616_v62 }
 0x636   : > { %6795 = vrot.lane.b32.xlu1 %v12189_v34, %s8532_s4  ;;  %v12227_v16 = vadd.f32 %v6102_v12, %v5615_v46  ;;  %v13310_v12 = vld [vmem:[#allocation60_spill] sm:$0xff] }
 0x637   : > { %6793 = vrot.lane.b32.xlu0 %v12191_v0, %s8532_s4  ;;  %13305 = vst [vmem:[#allocation29_spill] sm:$0xff] %v12225_v61 }
 0x638   : > { %v6108_v26 = vpop.permute.xlu1 %6107  ;;  %13306 = vst [vmem:[#allocation30_spill] sm:$0xff] %v12227_v16 }
 0x639   : > { %v6106_v56 = vpop.permute.xlu0 %6105  ;;  %v12237_v22 = vadd.f32 %v6108_v26, %v5618_v60 }
 0x63a   : > { %6799 = vrot.lane.b32.xlu1 %v12201_v32, %s8532_s4  ;;  %v12239_v21 = vadd.f32 %v6106_v56, %v5617_v1  ;;  %v13314_v56 = vld [vmem:[#allocation62_spill] sm:$0xff] }
 0x63b   : > { %6797 = vrot.lane.b32.xlu0 %v12203_v51, %s8532_s4  ;;  %13309 = vst [vmem:[#allocation31_spill] sm:$0xff] %v12237_v22 }
 0x63c   : > { %v6112_v4 = vpop.permute.xlu1 %6111 }
 0x63d   : > { %v6110_v49 = vpop.permute.xlu0 %6109 }
 0x63e   : > { %6803 = vrot.lane.b32.xlu1 %v12213_v44, %s8532_s4 }
 0x63f   : > { %6801 = vrot.lane.b32.xlu0 %v12215_v58, %s8532_s4  ;;  %v5620_v58 = vmul.f32 %v13311_v41, %v13310_v12  ;;  %v13316_v12 = vld [vmem:[#allocation63_spill] sm:$0xff]  ;;  %v13317_v41 = vld [vmem:[#allocation6_spill] sm:$0xff] }
 0x640   : > { %v6116_v43 = vpop.permute.xlu1 %6115 }
 0x641   : > { %v6114_v53 = vpop.permute.xlu0 %6113  ;;  %v12249_v63 = vadd.f32 %v6112_v4, %v5620_v58 }
 0x642   : > { %6807 = vrot.lane.b32.xlu1 %v12225_v61, %s8532_s4  ;;  %v5619_v61 = vmul.f32 %v13313_v33, %v13312_v9 }
 0x643   : > { %6805 = vrot.lane.b32.xlu0 %v12227_v16, %s8532_s4  ;;  %v5622_v16 = vmul.f32 %v13315_v31, %v13314_v56  ;;  %v13320_v56 = vld [vmem:[#allocation65_spill] sm:$0xff] }
 0x644   : > { %v6120_v62 = vpop.permute.xlu1 %6119  ;;  %v12251_v26 = vadd.f32 %v6110_v49, %v5619_v61  ;;  %v13319_v61 = vld [vmem:[#allocation64_spill] sm:$0xff]  ;;  %v5623_v31 = vmul.f32 %v11922_v40, %v13320_v56  ;;  %v13326_v40 = vld [vmem:[#allocation119_spill] sm:$0xff] }
 0x645   : > { %v6118_v46 = vpop.permute.xlu0 %6117  ;;  %v12261_v9 = vadd.f32 %v6116_v43, %v5622_v16  ;;  %v5624_v33 = vmul.f32 %v11918_v10, %v13319_v61  ;;  %v13324_v61 = vld [vmem:[#allocation67_spill] sm:$0xff] }
 0x646   : > { %6811 = vrot.lane.b32.xlu1 %v12237_v22, %s8532_s4  ;;  %v5621_v22 = vmul.f32 %v13317_v41, %v13316_v12  ;;  %v12275_v16 = vadd.f32 %v6118_v46, %v5623_v31  ;;  %v5625_v10 = vmul.f32 %v11931_v14, %v13324_v61  ;;  %v13325_v46 = vld [vmem:[#allocation68_spill] sm:$0xff]  ;;  %v13331_v14 = vld [vmem:[#allocation121_spill] sm:$0xff] }
 0x647   : > { %6809 = vrot.lane.b32.xlu0 %v12239_v21, %s8532_s4  ;;  %v12273_v12 = vadd.f32 %v6120_v62, %v5624_v33 }
 0x648   : > { %v6124_v60 = vpop.permute.xlu1 %6123  ;;  %v12263_v58 = vadd.f32 %v6114_v53, %v5621_v22  ;;  %13322 = vst [vmem:[#allocation33_spill] sm:$0xff] %v12275_v16  ;;  %v13323_v22 = vld [vmem:[#allocation66_spill] sm:$0xff] }
 0x649   : > { %v6122_v1 = vpop.permute.xlu0 %6121  ;;  %13321 = vst [vmem:[#allocation32_spill] sm:$0xff] %v12273_v12  ;;  %v5626_v41 = vmul.f32 %v11928_v39, %v13323_v22  ;;  %v13327_v22 = vld [vmem:[#allocation69_spill] sm:$0xff]  ;;  %v13328_v39 = vld [vmem:[#allocation120_spill] sm:$0xff] }
 0x64a   : > { %6815 = vrot.lane.b32.xlu1 %v12249_v63, %s8532_s4  ;;  %13318 = vst [vmem:[#allocation17_spill] sm:$0xff] %v12263_v58  ;;  %v12287_v62 = vadd.f32 %v6122_v1, %v5625_v10  ;;  %v13330_v1 = vld [vmem:[#allocation70_spill] sm:$0xff] }
 0x64b   : > { %6813 = vrot.lane.b32.xlu0 %v12251_v26, %s8532_s4  ;;  %v12285_v56 = vadd.f32 %v6124_v60, %v5626_v41 }
 0x64c   : > { %v6128_v4 = vpop.permute.xlu1 %6127 }
 0x64d   : > { %v6126_v49 = vpop.permute.xlu0 %6125 }
 0x64e   : > { %6819 = vrot.lane.b32.xlu1 %v12261_v9, %s8532_s4 }
 0x64f   : > { %6817 = vrot.lane.b32.xlu0 %v12263_v58, %s8532_s4  ;;  %v5628_v58 = vmul.f32 %v13326_v40, %v13325_v46  ;;  %v13332_v46 = vld [vmem:[#allocation71_spill] sm:$0xff] }
 0x650   : > { %v6132_v43 = vpop.permute.xlu1 %6131  ;;  %v5629_v40 = vmul.f32 %v11947_v47, %v13332_v46  ;;  %v13339_v47 = vld [vmem:[#allocation125_spill] sm:$0xff] }
 0x651   : > { %v6130_v53 = vpop.permute.xlu0 %6129  ;;  %v12297_v61 = vadd.f32 %v6128_v4, %v5628_v58 }
 0x652   : > { %6823 = vrot.lane.b32.xlu1 %v12273_v12, %s8532_s4  ;;  %v5627_v12 = vmul.f32 %v13328_v39, %v13327_v22  ;;  %v12311_v58 = vadd.f32 %v6130_v53, %v5629_v40  ;;  %v13338_v53 = vld [vmem:[#allocation74_spill] sm:$0xff] }
 0x653   : > { %6821 = vrot.lane.b32.xlu0 %v12275_v16, %s8532_s4  ;;  %v5630_v16 = vmul.f32 %v13331_v14, %v13330_v1  ;;  %v13336_v1 = vld [vmem:[#allocation73_spill] sm:$0xff] }
 0x654   : > { %v6136_v33 = vpop.permute.xlu1 %6135  ;;  %v12299_v60 = vadd.f32 %v6126_v49, %v5627_v12  ;;  %13334 = vst [vmem:[#allocation36_spill] sm:$0xff] %v12311_v58  ;;  %v13335_v12 = vld [vmem:[#allocation72_spill] sm:$0xff]  ;;  %v5631_v14 = vmul.f32 %v11955_v55, %v13336_v1  ;;  %v13343_v55 = vld [vmem:[#allocation127_spill] sm:$0xff] }
 0x655   : > { %v6134_v31 = vpop.permute.xlu0 %6133  ;;  %v12309_v22 = vadd.f32 %v6132_v43, %v5630_v16  ;;  %v5632_v39 = vmul.f32 %v11952_v50, %v13335_v12  ;;  %v13340_v12 = vld [vmem:[#allocation75_spill] sm:$0xff]  ;;  %v13341_v50 = vld [vmem:[#allocation126_spill] sm:$0xff] }
 0x656   : > { %6827 = vrot.lane.b32.xlu1 %v12285_v56, %s8532_s4  ;;  %13329 = vst [vmem:[#allocation34_spill] sm:$0xff] %v12299_v60  ;;  %v12323_v16 = vadd.f32 %v6134_v31, %v5631_v14  ;;  %v13342_v31 = vld [vmem:[#allocation10_spill] sm:$0xff] }
 0x657   : > { %6825 = vrot.lane.b32.xlu0 %v12287_v62, %s8532_s4  ;;  %13333 = vst [vmem:[#allocation35_spill] sm:$0xff] %v12309_v22  ;;  %v12321_v46 = vadd.f32 %v6136_v33, %v5632_v39 }
 0x658   : > { %v6140_v41 = vpop.permute.xlu1 %6139 }
 0x659   : > { %v6138_v10 = vpop.permute.xlu0 %6137  ;;  %13337 = vst [vmem:[#allocation37_spill] sm:$0xff] %v12321_v46 }
 0x65a   : > { %6831 = vrot.lane.b32.xlu1 %v12297_v61, %s8532_s4 }
 0x65b   : > { %6829 = vrot.lane.b32.xlu0 %v12299_v60, %s8532_s4  ;;  %v5634_v60 = vmul.f32 %v13339_v47, %v13338_v53  ;;  %v13344_v53 = vld [vmem:[#allocation24_spill] sm:$0xff] }
 0x65c   : > { %v6144_v4 = vpop.permute.xlu1 %6143  ;;  %v13345_v47 = vld [vmem:[#allocation128_spill] sm:$0xff] }
 0x65d   : > { %v6142_v49 = vpop.permute.xlu0 %6141  ;;  %v12333_v1 = vadd.f32 %v6140_v41, %v5634_v60 }
 0x65e   : > { %6835 = vrot.lane.b32.xlu1 %v12309_v22, %s8532_s4  ;;  %v5633_v22 = vmul.f32 %v13341_v50, %v13340_v12 }
 0x65f   : > { %6833 = vrot.lane.b32.xlu0 %v12311_v58, %s8532_s4  ;;  %v5636_v58 = vmul.f32 %v13343_v55, %v13342_v31  ;;  %v13347_v31 = vld [vmem:[#allocation129_spill] sm:$0xff] }
 0x660   : > { %v6148_v43 = vpop.permute.xlu1 %6147  ;;  %v12335_v33 = vadd.f32 %v6138_v10, %v5633_v22  ;;  %v13346_v22 = vld [vmem:[#allocation25_spill] sm:$0xff] }
 0x661   : > { %v6146_v40 = vpop.permute.xlu0 %6145  ;;  %v12345_v12 = vadd.f32 %v6144_v4, %v5636_v58  ;;  %v5638_v55 = vmul.f32 %v13347_v31, %v13346_v22 }
 0x662   : > { %6839 = vrot.lane.b32.xlu1 %v12321_v46, %s8532_s4  ;;  %v5635_v46 = vmul.f32 %v13345_v47, %v13344_v53  ;;  %v13348_v53 = vld [vmem:[#allocation9_spill] sm:$0xff]  ;;  %v13349_v47 = vld [vmem:[#allocation130_spill] sm:$0xff] }
 0x663   : > { %6837 = vrot.lane.b32.xlu0 %v12323_v16, %s8532_s4  ;;  %v5637_v50 = vmul.f32 %v13349_v47, %v13348_v53  ;;  %v12361_v4 = vadd.f32 %v6148_v43, %v5638_v55  ;;  %v5639_v53 = vmul.f32 %v11987_v18, %v13352_v54 }
 0x664   : > { %v6152_v39 = vpop.permute.xlu1 %6151  ;;  %v12347_v60 = vadd.f32 %v6142_v49, %v5635_v46 }
 0x665   : > { %v6150_v14 = vpop.permute.xlu0 %6149  ;;  %v12363_v49 = vadd.f32 %v6146_v40, %v5637_v50 }
 0x666   : > { %6843 = vrot.lane.b32.xlu1 %v12333_v1, %s8532_s4  ;;  %v12379_v28 = vadd.f32 %v6150_v14, %v5639_v53 }
 0x667   : > { %6841 = vrot.lane.b32.xlu0 %v12335_v33, %s8532_s4 }
 0x668   : > { %v6732_v41 = vpop.permute.xlu1 %6731 }
 0x669   : > { %6923 = vst.msk [vmem:[#allocation4 + $0x8] sm:$0xff] %vm6921_vm4, %v6732_v41  ;;  %v6730_v10 = vpop.permute.xlu0 %6729  ;;  %v13350_v41 = vld [vmem:[#allocation76_spill] sm:$0xff] }
 0x66a   : > { %6922 = vst.msk [vmem:[#allocation4] sm:$0xff] %vm6921_vm4, %v6730_v10  ;;  %6847 = vrot.lane.b32.xlu1 %v12345_v12, %s8532_s4  ;;  %v13351_v10 = vld [vmem:[#allocation131_spill] sm:$0xff] }
 0x66b   : > { %6845 = vrot.lane.b32.xlu0 %v12347_v60, %s8532_s4  ;;  %v5640_v22 = vmul.f32 %v13351_v10, %v13350_v41 }
 0x66c   : > { %v6736_v58 = vpop.permute.xlu1 %6735 }
 0x66d   : > { %6925 = vst.msk [vmem:[#allocation4 + $0x18] sm:$0xff] %vm6921_vm4, %v6736_v58  ;;  %v6734_v46 = vpop.permute.xlu0 %6733  ;;  %v12377_v50 = vadd.f32 %v6152_v39, %v5640_v22  ;;  %v8394_v39 = vpop.eup %8393  ;;  %8425 = vtanh.f32 %v12095_v13 }
 0x66e   : > { %6924 = vst.msk [vmem:[#allocation4 + $0x10] sm:$0xff] %vm6921_vm4, %v6734_v46  ;;  %6851 = vrot.lane.b32.xlu1 %v12361_v4, %s8532_s4  ;;  %v8396_v14 = vpop.eup %8395  ;;  %8427 = vtanh.f32 %v12105_v45 }
 0x66f   : > { %6849 = vrot.lane.b32.xlu0 %v12363_v49, %s8532_s4  ;;  %v8398_v58 = vpop.eup %8397  ;;  %8429 = vtanh.f32 %v12107_v25 }
 0x670   : > { %v6740_v55 = vpop.permute.xlu1 %6739  ;;  %v8400_v46 = vpop.eup %8399  ;;  %8431 = vtanh.f32 %v12117_v5 }
 0x671   : > { %6927 = vst.msk [vmem:[#allocation4 + $0x28] sm:$0xff] %vm6921_vm4, %v6740_v55  ;;  %v6738_v43 = vpop.permute.xlu0 %6737  ;;  %v8402_v41 = vpop.eup %8401  ;;  %8433 = vtanh.f32 %v12119_v48 }
 0x672   : > { %6926 = vst.msk [vmem:[#allocation4 + $0x20] sm:$0xff] %vm6921_vm4, %v6738_v43  ;;  %6855 = vrot.lane.b32.xlu1 %v12377_v50, %s8532_s4  ;;  %v8404_v22 = vpop.eup %8403  ;;  %8435 = vtanh.f32 %v12129_v11 }
 0x673   : > { %6853 = vrot.lane.b32.xlu0 %v12379_v28, %s8532_s4  ;;  %v8406_v54 = vpop.eup %8405  ;;  %8437 = vtanh.f32 %v12131_v38 }
 0x674   : > { %v6744_v52 = vpop.permute.xlu1 %6743  ;;  %v8408_v53 = vpop.eup %8407  ;;  %8439 = vtanh.f32 %v12141_v20 }
 0x675   : > { %6929 = vst.msk [vmem:[#allocation4 + $0x38] sm:$0xff] %vm6921_vm4, %v6744_v52  ;;  %v6742_v40 = vpop.permute.xlu0 %6741  ;;  %v8410_v55 = vpop.eup %8409 }
 0x676   : > { %6928 = vst.msk [vmem:[#allocation4 + $0x30] sm:$0xff] %vm6921_vm4, %v6742_v40  ;;  %6411 = vrot.lane.b32.xlu1 %v8392_v7, %s8531_s30  ;;  %v8412_v43 = vpop.eup %8411 }
 0x677   : > { %6409 = vrot.lane.b32.xlu0 %v8394_v39, %s8531_s30  ;;  %v8414_v52 = vpop.eup %8413 }
 0x678   : > { %v6748_v24 = vpop.permute.xlu1 %6747  ;;  %v8416_v7 = vpop.eup %8415 }
 0x679   : > { %6931 = vst.msk [vmem:[#allocation4 + $0x48] sm:$0xff] %vm6921_vm4, %v6748_v24  ;;  %v6746_v30 = vpop.permute.xlu0 %6745  ;;  %v8418_v40 = vpop.eup %8417 }
 0x67a   : > { %6930 = vst.msk [vmem:[#allocation4 + $0x40] sm:$0xff] %vm6921_vm4, %v6746_v30  ;;  %6415 = vrot.lane.b32.xlu1 %v8396_v14, %s8531_s30  ;;  %v8420_v39 = vpop.eup %8419 }
 0x67b   : > { %6413 = vrot.lane.b32.xlu0 %v8398_v58, %s8531_s30  ;;  %v8422_v24 = vpop.eup %8421 }
 0x67c   : > { %v6752_v3 = vpop.permute.xlu1 %6751  ;;  %v8424_v14 = vpop.eup %8423 }
 0x67d   : > { %6933 = vst.msk [vmem:[#allocation4 + $0x58] sm:$0xff] %vm6921_vm4, %v6752_v3  ;;  %v6750_v59 = vpop.permute.xlu0 %6749  ;;  %v8426_v30 = vpop.eup %8425 }
 0x67e   : > { %6932 = vst.msk [vmem:[#allocation4 + $0x50] sm:$0xff] %vm6921_vm4, %v6750_v59  ;;  %6419 = vrot.lane.b32.xlu1 %v8400_v46, %s8531_s30  ;;  %v8428_v58 = vpop.eup %8427  ;;  %v13353_v46 = vld [vmem:[#allocation26_spill] sm:$0xff] }
 0x67f   : > { %6417 = vrot.lane.b32.xlu0 %v8402_v41, %s8531_s30  ;;  %v8430_v3 = vpop.eup %8429  ;;  %8441 = vtanh.f32 %v13353_v46 }
 0x680   : > { %v6756_v6 = vpop.permute.xlu1 %6755  ;;  %v8432_v59 = vpop.eup %8431 }
 0x681   : > { %6935 = vst.msk [vmem:[#allocation4 + $0x68] sm:$0xff] %vm6921_vm4, %v6756_v6  ;;  %v6754_v35 = vpop.permute.xlu0 %6753  ;;  %v8434_v41 = vpop.eup %8433  ;;  %v13354_v6 = vld [vmem:[#allocation27_spill] sm:$0xff] }
 0x682   : > { %6934 = vst.msk [vmem:[#allocation4 + $0x60] sm:$0xff] %vm6921_vm4, %v6754_v35  ;;  %6423 = vrot.lane.b32.xlu1 %v8404_v22, %s8531_s30  ;;  %8443 = vtanh.f32 %v13354_v6  ;;  %v8436_v22 = vpop.eup %8435  ;;  %v13361_v6 = vld [vmem:[#allocation33_spill] sm:$0xff] }
 0x683   : > { %6421 = vrot.lane.b32.xlu0 %v8406_v54, %s8531_s30  ;;  %8445 = vtanh.f32 %v12155_v42  ;;  %v8438_v54 = vpop.eup %8437 }
 0x684   : > { %v6760_v17 = vpop.permute.xlu1 %6759  ;;  %8447 = vtanh.f32 %v12165_v8 }
 0x685   : > { %6937 = vst.msk [vmem:[#allocation4 + $0x78] sm:$0xff] %vm6921_vm4, %v6760_v17  ;;  %v6758_v29 = vpop.permute.xlu0 %6757  ;;  %8449 = vtanh.f32 %v12167_v36 }
 0x686   : > { %6936 = vst.msk [vmem:[#allocation4 + $0x70] sm:$0xff] %vm6921_vm4, %v6758_v29  ;;  %6427 = vrot.lane.b32.xlu1 %v8408_v53, %s8531_s30  ;;  %v8440_v53 = vpop.eup %8439  ;;  %8451 = vtanh.f32 %v12177_v15 }
 0x687   : > { %6425 = vrot.lane.b32.xlu0 %v8410_v55, %s8531_s30  ;;  %8453 = vtanh.f32 %v12179_v37 }
 0x688   : > { %v6764_v19 = vpop.permute.xlu1 %6763  ;;  %8455 = vtanh.f32 %v12189_v34 }
 0x689   : > { %6939 = vst.msk [vmem:[#allocation4 + $0x88] sm:$0xff] %vm6921_vm4, %v6764_v19  ;;  %v6762_v23 = vpop.permute.xlu0 %6761  ;;  %v8442_v29 = vpop.eup %8441  ;;  %8457 = vtanh.f32 %v12191_v0 }
 0x68a   : > { %6938 = vst.msk [vmem:[#allocation4 + $0x80] sm:$0xff] %vm6921_vm4, %v6762_v23  ;;  %6431 = vrot.lane.b32.xlu1 %v8412_v43, %s8531_s30  ;;  %8459 = vtanh.f32 %v12201_v32 }
 0x68b   : > { %6429 = vrot.lane.b32.xlu0 %v8414_v52, %s8531_s30  ;;  %8461 = vtanh.f32 %v12203_v51 }
 0x68c   : > { %v6768_v57 = vpop.permute.xlu1 %6767  ;;  %v8444_v55 = vpop.eup %8443  ;;  %8463 = vtanh.f32 %v12213_v44 }
 0x68d   : > { %6941 = vst.msk [vmem:[#allocation4 + $0x98] sm:$0xff] %vm6921_vm4, %v6768_v57  ;;  %v6766_v27 = vpop.permute.xlu0 %6765  ;;  %v8446_v19 = vpop.eup %8445 }
 0x68e   : > { %6940 = vst.msk [vmem:[#allocation4 + $0x90] sm:$0xff] %vm6921_vm4, %v6766_v27  ;;  %6435 = vrot.lane.b32.xlu1 %v8416_v7, %s8531_s30  ;;  %v8448_v43 = vpop.eup %8447  ;;  %v13355_v7 = vld [vmem:[#allocation28_spill] sm:$0xff] }
 0x68f   : > { %6433 = vrot.lane.b32.xlu0 %v8418_v40, %s8531_s30  ;;  %v8450_v23 = vpop.eup %8449  ;;  %8465 = vtanh.f32 %v13355_v7 }
 0x690   : > { %v6772_v2 = vpop.permute.xlu1 %6771  ;;  %v8452_v52 = vpop.eup %8451 }
 0x691   : > { %6943 = vst.msk [vmem:[#allocation4 + $0xa8] sm:$0xff] %vm6921_vm4, %v6772_v2  ;;  %v6770_v13 = vpop.permute.xlu0 %6769  ;;  %v8454_v57 = vpop.eup %8453  ;;  %v13356_v2 = vld [vmem:[#allocation29_spill] sm:$0xff] }
 0x692   : > { %6942 = vst.msk [vmem:[#allocation4 + $0xa0] sm:$0xff] %vm6921_vm4, %v6770_v13  ;;  %6439 = vrot.lane.b32.xlu1 %v8420_v39, %s8531_s30  ;;  %v8456_v27 = vpop.eup %8455  ;;  %8467 = vtanh.f32 %v13356_v2  ;;  %v13357_v39 = vld [vmem:[#allocation30_spill] sm:$0xff] }
 0x693   : > { %6437 = vrot.lane.b32.xlu0 %v8422_v24, %s8531_s30  ;;  %v8458_v40 = vpop.eup %8457  ;;  %8469 = vtanh.f32 %v13357_v39 }
 0x694   : > { %v6776_v45 = vpop.permute.xlu1 %6775  ;;  %v8460_v13 = vpop.eup %8459 }
 0x695   : > { %6945 = vst.msk [vmem:[#allocation4 + $0xb8] sm:$0xff] %vm6921_vm4, %v6776_v45  ;;  %v6774_v25 = vpop.permute.xlu0 %6773  ;;  %v8462_v45 = vpop.eup %8461 }
 0x696   : > { %6944 = vst.msk [vmem:[#allocation4 + $0xb0] sm:$0xff] %vm6921_vm4, %v6774_v25  ;;  %6443 = vrot.lane.b32.xlu1 %v8424_v14, %s8531_s30  ;;  %v13358_v14 = vld [vmem:[#allocation31_spill] sm:$0xff] }
 0x697   : > { %6441 = vrot.lane.b32.xlu0 %v8426_v30, %s8531_s30  ;;  %8471 = vtanh.f32 %v13358_v14  ;;  %v8464_v30 = vpop.eup %8463 }
 0x698   : > { %v6780_v5 = vpop.permute.xlu1 %6779  ;;  %8473 = vtanh.f32 %v12239_v21 }
 0x699   : > { %6947 = vst.msk [vmem:[#allocation4 + $0xc8] sm:$0xff] %vm6921_vm4, %v6780_v5  ;;  %v6778_v48 = vpop.permute.xlu0 %6777  ;;  %8475 = vtanh.f32 %v12249_v63 }
 0x69a   : > { %6946 = vst.msk [vmem:[#allocation4 + $0xc0] sm:$0xff] %vm6921_vm4, %v6778_v48  ;;  %6447 = vrot.lane.b32.xlu1 %v8428_v58, %s8531_s30  ;;  %v8466_v58 = vpop.eup %8465  ;;  %8477 = vtanh.f32 %v12251_v26 }
 0x69b   : > { %6445 = vrot.lane.b32.xlu0 %v8430_v3, %s8531_s30  ;;  %8479 = vtanh.f32 %v12261_v9 }
 0x69c   : > { %v6784_v11 = vpop.permute.xlu1 %6783  ;;  %v8468_v3 = vpop.eup %8467 }
 0x69d   : > { %6949 = vst.msk [vmem:[#allocation4 + $0xd8] sm:$0xff] %vm6921_vm4, %v6784_v11  ;;  %v6782_v38 = vpop.permute.xlu0 %6781  ;;  %v8470_v46 = vpop.eup %8469  ;;  %v13359_v11 = vld [vmem:[#allocation17_spill] sm:$0xff] }
 0x69e   : > { %6948 = vst.msk [vmem:[#allocation4 + $0xd0] sm:$0xff] %vm6921_vm4, %v6782_v38  ;;  %6451 = vrot.lane.b32.xlu1 %v8432_v59, %s8531_s30  ;;  %8481 = vtanh.f32 %v13359_v11 }
 0x69f   : > { %6449 = vrot.lane.b32.xlu0 %v8434_v41, %s8531_s30  ;;  %v13360_v41 = vld [vmem:[#allocation32_spill] sm:$0xff] }
 0x6a0   : > { %v6788_v20 = vpop.permute.xlu1 %6787  ;;  %8483 = vtanh.f32 %v13360_v41 }
 0x6a1   : > { %6951 = vst.msk [vmem:[#allocation4 + $0xe8] sm:$0xff] %vm6921_vm4, %v6788_v20  ;;  %v6786_v35 = vpop.permute.xlu0 %6785  ;;  %v8472_v59 = vpop.eup %8471  ;;  %8485 = vtanh.f32 %v13361_v6 }
 0x6a2   : > { %6950 = vst.msk [vmem:[#allocation4 + $0xe0] sm:$0xff] %vm6921_vm4, %v6786_v35  ;;  %6455 = vrot.lane.b32.xlu1 %v8436_v22, %s8531_s30  ;;  %v8474_v38 = vpop.eup %8473  ;;  %8487 = vtanh.f32 %v12285_v56 }
 0x6a3   : > { %6453 = vrot.lane.b32.xlu0 %v8438_v54, %s8531_s30  ;;  %v8476_v20 = vpop.eup %8475  ;;  %8489 = vtanh.f32 %v12287_v62 }
 0x6a4   : > { %v6792_v17 = vpop.permute.xlu1 %6791  ;;  %v8478_v35 = vpop.eup %8477  ;;  %8491 = vtanh.f32 %v12297_v61 }
 0x6a5   : > { %6953 = vst.msk [vmem:[#allocation4 + $0xf8] sm:$0xff] %vm6921_vm4, %v6792_v17  ;;  %v6790_v42 = vpop.permute.xlu0 %6789  ;;  %v8480_v17 = vpop.eup %8479 }
 0x6a6   : > { %6952 = vst.msk [vmem:[#allocation4 + $0xf0] sm:$0xff] %vm6921_vm4, %v6790_v42  ;;  %6459 = vrot.lane.b32.xlu1 %v8440_v53, %s8531_s30 }
 0x6a7   : > { %6457 = vrot.lane.b32.xlu0 %v8442_v29, %s8531_s30  ;;  %v13362_v29 = vld [vmem:[#allocation34_spill] sm:$0xff] }
 0x6a8   : > { %v6796_v8 = vpop.permute.xlu1 %6795  ;;  %v8482_v42 = vpop.eup %8481  ;;  %8493 = vtanh.f32 %v13362_v29 }
 0x6a9   : > { %6955 = vst.msk [vmem:[#allocation4 + $0x108] sm:$0xff] %vm6921_vm4, %v6796_v8  ;;  %v6794_v36 = vpop.permute.xlu0 %6793 }
 0x6aa   : > { %6954 = vst.msk [vmem:[#allocation4 + $0x100] sm:$0xff] %vm6921_vm4, %v6794_v36  ;;  %6463 = vrot.lane.b32.xlu1 %v8444_v55, %s8531_s30  ;;  %v8484_v8 = vpop.eup %8483  ;;  %v13363_v36 = vld [vmem:[#allocation35_spill] sm:$0xff] }
 0x6ab   : > { %6461 = vrot.lane.b32.xlu0 %v8446_v19, %s8531_s30  ;;  %v8486_v55 = vpop.eup %8485  ;;  %8495 = vtanh.f32 %v13363_v36  ;;  %v13364_v19 = vld [vmem:[#allocation36_spill] sm:$0xff] }
 0x6ac   : > { %v6800_v15 = vpop.permute.xlu1 %6799  ;;  %8497 = vtanh.f32 %v13364_v19 }
 0x6ad   : > { %6957 = vst.msk [vmem:[#allocation4 + $0x118] sm:$0xff] %vm6921_vm4, %v6800_v15  ;;  %v6798_v37 = vpop.permute.xlu0 %6797  ;;  %v8488_v15 = vpop.eup %8487 }
 0x6ae   : > { %6956 = vst.msk [vmem:[#allocation4 + $0x110] sm:$0xff] %vm6921_vm4, %v6798_v37  ;;  %6467 = vrot.lane.b32.xlu1 %v8448_v43, %s8531_s30  ;;  %v8490_v37 = vpop.eup %8489 }
 0x6af   : > { %6465 = vrot.lane.b32.xlu0 %v8450_v23, %s8531_s30  ;;  %v13365_v23 = vld [vmem:[#allocation37_spill] sm:$0xff] }
 0x6b0   : > { %v6804_v34 = vpop.permute.xlu1 %6803  ;;  %8499 = vtanh.f32 %v13365_v23 }
 0x6b1   : > { %6959 = vst.msk [vmem:[#allocation4 + $0x128] sm:$0xff] %vm6921_vm4, %v6804_v34  ;;  %v6802_v0 = vpop.permute.xlu0 %6801  ;;  %8501 = vtanh.f32 %v12323_v16 }
 0x6b2   : > { %6958 = vst.msk [vmem:[#allocation4 + $0x120] sm:$0xff] %vm6921_vm4, %v6802_v0  ;;  %6471 = vrot.lane.b32.xlu1 %v8452_v52, %s8531_s30  ;;  %v8492_v52 = vpop.eup %8491  ;;  %8503 = vtanh.f32 %v12333_v1 }
 0x6b3   : > { %6469 = vrot.lane.b32.xlu0 %v8454_v57, %s8531_s30  ;;  %v8494_v57 = vpop.eup %8493  ;;  %8505 = vtanh.f32 %v12335_v33 }
 0x6b4   : > { %v6808_v32 = vpop.permute.xlu1 %6807  ;;  %8507 = vtanh.f32 %v12345_v12 }
 0x6b5   : > { %6961 = vst.msk [vmem:[#allocation4 + $0x138] sm:$0xff] %vm6921_vm4, %v6808_v32  ;;  %v6806_v51 = vpop.permute.xlu0 %6805  ;;  %v8496_v32 = vpop.eup %8495  ;;  %8509 = vtanh.f32 %v12347_v60 }
 0x6b6   : > { %6960 = vst.msk [vmem:[#allocation4 + $0x130] sm:$0xff] %vm6921_vm4, %v6806_v51  ;;  %6475 = vrot.lane.b32.xlu1 %v8456_v27, %s8531_s30  ;;  %v8498_v27 = vpop.eup %8497  ;;  %8511 = vtanh.f32 %v12361_v4 }
 0x6b7   : > { %6473 = vrot.lane.b32.xlu0 %v8458_v40, %s8531_s30  ;;  %8513 = vtanh.f32 %v12363_v49 }
 0x6b8   : > { %v6812_v44 = vpop.permute.xlu1 %6811  ;;  %8515 = vtanh.f32 %v12377_v50 }
 0x6b9   : > { %6963 = vst.msk [vmem:[#allocation4 + $0x148] sm:$0xff] %vm6921_vm4, %v6812_v44  ;;  %v6810_v24 = vpop.permute.xlu0 %6809  ;;  %8517 = vtanh.f32 %v12379_v28 }
 0x6ba   : > { %6962 = vst.msk [vmem:[#allocation4 + $0x140] sm:$0xff] %vm6921_vm4, %v6810_v24  ;;  %6479 = vrot.lane.b32.xlu1 %v8460_v13, %s8531_s30  ;;  %v8500_v51 = vpop.eup %8499 }
 0x6bb   : > { %6477 = vrot.lane.b32.xlu0 %v8462_v45, %s8531_s30  ;;  %v8502_v40 = vpop.eup %8501 }
 0x6bc   : > { %v6816_v25 = vpop.permute.xlu1 %6815  ;;  %v8504_v2 = vpop.eup %8503 }
 0x6bd   : > { %6965 = vst.msk [vmem:[#allocation4 + $0x158] sm:$0xff] %vm6921_vm4, %v6816_v25  ;;  %v6814_v5 = vpop.permute.xlu0 %6813  ;;  %v8506_v39 = vpop.eup %8505 }
 0x6be   : > { %6964 = vst.msk [vmem:[#allocation4 + $0x150] sm:$0xff] %vm6921_vm4, %v6814_v5  ;;  %6483 = vrot.lane.b32.xlu1 %v8464_v30, %s8531_s30  ;;  %v8508_v44 = vpop.eup %8507 }
 0x6bf   : > { %6481 = vrot.lane.b32.xlu0 %v8466_v58, %s8531_s30  ;;  %v8510_v49 = vpop.eup %8509  ;;  %v13366_v58 = vld [vmem:[#allocation5_spill] sm:$0xff] }
 0x6c0   : > { %v6820_v48 = vpop.permute.xlu1 %6819  ;;  %v8512_v45 = vpop.eup %8511 }
 0x6c1   : > { %6967 = vst.msk [vmem:[#allocation4 + $0x168] sm:$0xff] %vm6921_vm4, %v6820_v48  ;;  %v6818_v21 = vpop.permute.xlu0 %6817  ;;  %v8514_v25 = vpop.eup %8513 }
 0x6c2   : > { %6966 = vst.msk [vmem:[#allocation4 + $0x160] sm:$0xff] %vm6921_vm4, %v6818_v21  ;;  %6487 = vrot.lane.b32.xlu1 %v8468_v3, %s8531_s30  ;;  %v8516_v30 = vpop.eup %8515  ;;  %v13367_v21 = vld [vmem:[#allocation78_spill] sm:$0xff] }
 0x6c3   : > { %6485 = vrot.lane.b32.xlu0 %v8470_v46, %s8531_s30  ;;  %v8518_v28 = vpop.eup %8517 }
 0x6c4   : > { %v6824_v63 = vpop.permute.xlu1 %6823 }
 0x6c5   : > { %6969 = vst.msk [vmem:[#allocation4 + $0x178] sm:$0xff] %vm6921_vm4, %v6824_v63  ;;  %v6822_v26 = vpop.permute.xlu0 %6821  ;;  %v13368_v63 = vld [vmem:[#allocation79_spill] sm:$0xff] }
 0x6c6   : > { %6968 = vst.msk [vmem:[#allocation4 + $0x170] sm:$0xff] %vm6921_vm4, %v6822_v26  ;;  %6491 = vrot.lane.b32.xlu1 %v8472_v59, %s8531_s30 }
 0x6c7   : > { %6489 = vrot.lane.b32.xlu0 %v8474_v38, %s8531_s30  ;;  %v13369_v38 = vld [vmem:[#allocation80_spill] sm:$0xff] }
 0x6c8   : > { %v6828_v9 = vpop.permute.xlu1 %6827 }
 0x6c9   : > { %6971 = vst.msk [vmem:[#allocation4 + $0x188] sm:$0xff] %vm6921_vm4, %v6828_v9  ;;  %v6826_v22 = vpop.permute.xlu0 %6825  ;;  %v13370_v9 = vld [vmem:[#allocation81_spill] sm:$0xff] }
 0x6ca   : > { %6970 = vst.msk [vmem:[#allocation4 + $0x180] sm:$0xff] %vm6921_vm4, %v6826_v22  ;;  %6495 = vrot.lane.b32.xlu1 %v8476_v20, %s8531_s30 }
 0x6cb   : > { %6493 = vrot.lane.b32.xlu0 %v8478_v35, %s8531_s30  ;;  %v13371_v35 = vld [vmem:[#allocation82_spill] sm:$0xff] }
 0x6cc   : > { %v6832_v54 = vpop.permute.xlu1 %6831 }
 0x6cd   : > { %6973 = vst.msk [vmem:[#allocation4 + $0x198] sm:$0xff] %vm6921_vm4, %v6832_v54  ;;  %v6830_v53 = vpop.permute.xlu0 %6829 }
 0x6ce   : > { %6972 = vst.msk [vmem:[#allocation4 + $0x190] sm:$0xff] %vm6921_vm4, %v6830_v53  ;;  %6499 = vrot.lane.b32.xlu1 %v8480_v17, %s8531_s30  ;;  %v13372_v53 = vld [vmem:[#allocation83_spill] sm:$0xff] }
 0x6cf   : > { %6497 = vrot.lane.b32.xlu0 %v8482_v42, %s8531_s30 }
 0x6d0   : > { %v6836_v56 = vpop.permute.xlu1 %6835 }
 0x6d1   : > { %6975 = vst.msk [vmem:[#allocation4 + $0x1a8] sm:$0xff] %vm6921_vm4, %v6836_v56  ;;  %v6834_v62 = vpop.permute.xlu0 %6833  ;;  %v13373_v56 = vld [vmem:[#allocation84_spill] sm:$0xff] }
 0x6d2   : > { %6974 = vst.msk [vmem:[#allocation4 + $0x1a0] sm:$0xff] %vm6921_vm4, %v6834_v62  ;;  %6503 = vrot.lane.b32.xlu1 %v8484_v8, %s8531_s30 }
 0x6d3   : > { %6501 = vrot.lane.b32.xlu0 %v8486_v55, %s8531_s30  ;;  %v13374_v55 = vld [vmem:[#allocation85_spill] sm:$0xff] }
 0x6d4   : > { %v6840_v61 = vpop.permute.xlu1 %6839 }
 0x6d5   : > { %6977 = vst.msk [vmem:[#allocation4 + $0x1b8] sm:$0xff] %vm6921_vm4, %v6840_v61  ;;  %v6838_v43 = vpop.permute.xlu0 %6837  ;;  %v13375_v61 = vld [vmem:[#allocation86_spill] sm:$0xff] }
 0x6d6   : > { %6976 = vst.msk [vmem:[#allocation4 + $0x1b0] sm:$0xff] %vm6921_vm4, %v6838_v43  ;;  %6507 = vrot.lane.b32.xlu1 %v8488_v15, %s8531_s30 }
 0x6d7   : > { %6505 = vrot.lane.b32.xlu0 %v8490_v37, %s8531_s30  ;;  %v13376_v37 = vld [vmem:[#allocation87_spill] sm:$0xff] }
 0x6d8   : > { %v6844_v34 = vpop.permute.xlu1 %6843 }
 0x6d9   : > { %6979 = vst.msk [vmem:[#allocation4 + $0x1c8] sm:$0xff] %vm6921_vm4, %v6844_v34  ;;  %v6842_v0 = vpop.permute.xlu0 %6841 }
 0x6da   : > { %6978 = vst.msk [vmem:[#allocation4 + $0x1c0] sm:$0xff] %vm6921_vm4, %v6842_v0  ;;  %6511 = vrot.lane.b32.xlu1 %v8492_v52, %s8531_s30  ;;  %v13377_v52 = vld [vmem:[#allocation88_spill] sm:$0xff] }
 0x6db   : > { %6509 = vrot.lane.b32.xlu0 %v8494_v57, %s8531_s30 }
 0x6dc   : > { %v6848_v7 = vpop.permute.xlu1 %6847 }
 0x6dd   : > { %6981 = vst.msk [vmem:[#allocation4 + $0x1d8] sm:$0xff] %vm6921_vm4, %v6848_v7  ;;  %v6846_v16 = vpop.permute.xlu0 %6845  ;;  %v13378_v7 = vld [vmem:[#allocation89_spill] sm:$0xff] }
 0x6de   : > { %6980 = vst.msk [vmem:[#allocation4 + $0x1d0] sm:$0xff] %vm6921_vm4, %v6846_v16  ;;  %6515 = vrot.lane.b32.xlu1 %v8496_v32, %s8531_s30 }
 0x6df   : > { %6513 = vrot.lane.b32.xlu0 %v8498_v27, %s8531_s30  ;;  %v13379_v27 = vld [vmem:[#allocation90_spill] sm:$0xff] }
 0x6e0   : > { %v6852_v1 = vpop.permute.xlu1 %6851 }
 0x6e1   : > { %6983 = vst.msk [vmem:[#allocation4 + $0x1e8] sm:$0xff] %vm6921_vm4, %v6852_v1  ;;  %v6850_v33 = vpop.permute.xlu0 %6849 }
 0x6e2   : > { %6982 = vst.msk [vmem:[#allocation4 + $0x1e0] sm:$0xff] %vm6921_vm4, %v6850_v33  ;;  %6519 = vrot.lane.b32.xlu1 %v8500_v51, %s8531_s30  ;;  %v13380_v33 = vld [vmem:[#allocation91_spill] sm:$0xff] }
 0x6e3   : > { %6517 = vrot.lane.b32.xlu0 %v8502_v40, %s8531_s30 }
 0x6e4   : > { %v6856_v12 = vpop.permute.xlu1 %6855 }
 0x6e5   : > { %6985 = vst.msk [vmem:[#allocation4 + $0x1f8] sm:$0xff] %vm6921_vm4, %v6856_v12  ;;  %v6854_v60 = vpop.permute.xlu0 %6853 }
 0x6e6   : > { %6984 = vst.msk [vmem:[#allocation4 + $0x1f0] sm:$0xff] %vm6921_vm4, %v6854_v60  ;;  %6523 = vrot.lane.b32.xlu1 %v8504_v2, %s8531_s30  ;;  %v13381_v2 = vld [vmem:[#allocation92_spill] sm:$0xff] }
 0x6e7   : > { %6521 = vrot.lane.b32.xlu0 %v8506_v39, %s8531_s30 }
 0x6e8   : > { %v6412_v4 = vpop.permute.xlu1 %6411 }
 0x6e9   : > { %v6410_v13 = vpop.permute.xlu0 %6409  ;;  %v6602_v48 = vmul.f32 %v13366_v58, %v6412_v4  ;;  %v13382_v4 = vld [vmem:[#allocation93_spill] sm:$0xff] }
 0x6ea   : > { %6527 = vrot.lane.b32.xlu1 %v8508_v44, %s8531_s30  ;;  %v6601_v46 = vmul.f32 %v13367_v21, %v6410_v13  ;;  %v13386_v58 = vld [vmem:[#allocation97_spill] sm:$0xff]  ;;  %v13387_v21 = vld [vmem:[#allocation98_spill] sm:$0xff] }
 0x6eb   : > { %6525 = vrot.lane.b32.xlu0 %v8510_v49, %s8531_s30  ;;  %v13383_v49 = vld [vmem:[#allocation94_spill] sm:$0xff] }
 0x6ec   : > { %v6416_v24 = vpop.permute.xlu1 %6415 }
 0x6ed   : > { %v6414_v14 = vpop.permute.xlu0 %6413  ;;  %v6604_v59 = vmul.f32 %v13368_v63, %v6416_v24  ;;  %v13388_v63 = vld [vmem:[#allocation99_spill] sm:$0xff] }
 0x6ee   : > { %6531 = vrot.lane.b32.xlu1 %v8512_v45, %s8531_s30  ;;  %v6603_v41 = vmul.f32 %v13369_v38, %v6414_v14  ;;  %v13384_v14 = vld [vmem:[#allocation95_spill] sm:$0xff]  ;;  %v13389_v38 = vld [vmem:[#allocation100_spill] sm:$0xff] }
 0x6ef   : > { %6529 = vrot.lane.b32.xlu0 %v8514_v25, %s8531_s30 }
 0x6f0   : > { %v6420_v50 = vpop.permute.xlu1 %6419 }
 0x6f1   : > { %v6418_v5 = vpop.permute.xlu0 %6417  ;;  %v6606_v20 = vmul.f32 %v13370_v9, %v6420_v50  ;;  %v13390_v9 = vld [vmem:[#allocation101_spill] sm:$0xff] }
 0x6f2   : > { %6535 = vrot.lane.b32.xlu1 %v8516_v30, %s8531_s30  ;;  %v6605_v54 = vmul.f32 %v13371_v35, %v6418_v5  ;;  %v13385_v30 = vld [vmem:[#allocation96_spill] sm:$0xff]  ;;  %v13391_v35 = vld [vmem:[#allocation102_spill] sm:$0xff] }
 0x6f3   : > { %6533 = vrot.lane.b32.xlu0 %v8518_v28, %s8531_s30 }
 0x6f4   : > { %v6424_v3 = vpop.permute.xlu1 %6423 }
 0x6f5   : > { %v6422_v11 = vpop.permute.xlu0 %6421  ;;  %v6608_v42 = vmul.f32 %v13372_v53, %v6424_v3  ;;  %v13392_v53 = vld [vmem:[#allocation103_spill] sm:$0xff] }
 0x6f6   : > { %7052 = vrot.lane.b32.xlu1 %v6602_v48, %s8529_s22  ;;  %v6607_v8 = vmul.f32 %v13373_v56, %v6422_v11  ;;  %v13393_v56 = vld [vmem:[#allocation104_spill] sm:$0xff] }
 0x6f7   : > { %7050 = vrot.lane.b32.xlu0 %v6601_v46, %s8529_s22 }
 0x6f8   : > { %v6428_v26 = vpop.permute.xlu1 %6427 }
 0x6f9   : > { %v6426_v6 = vpop.permute.xlu0 %6425  ;;  %v6610_v36 = vmul.f32 %v13374_v55, %v6428_v26  ;;  %v13394_v55 = vld [vmem:[#allocation105_spill] sm:$0xff] }
 0x6fa   : > { %7056 = vrot.lane.b32.xlu1 %v6604_v59, %s8529_s22  ;;  %v6609_v15 = vmul.f32 %v13375_v61, %v6426_v6  ;;  %v13395_v61 = vld [vmem:[#allocation106_spill] sm:$0xff] }
 0x6fb   : > { %7054 = vrot.lane.b32.xlu0 %v6603_v41, %s8529_s22 }
 0x6fc   : > { %v6432_v22 = vpop.permute.xlu1 %6431 }
 0x6fd   : > { %v6430_v17 = vpop.permute.xlu0 %6429  ;;  %v6612_v23 = vmul.f32 %v13376_v37, %v6432_v22  ;;  %v13396_v37 = vld [vmem:[#allocation15_spill] sm:$0xff] }
 0x6fe   : > { %7060 = vrot.lane.b32.xlu1 %v6606_v20, %s8529_s22  ;;  %v6611_v0 = vmul.f32 %v13377_v52, %v6430_v17  ;;  %v13397_v52 = vld [vmem:[#allocation107_spill] sm:$0xff] }
 0x6ff   : > { %7058 = vrot.lane.b32.xlu0 %v6605_v54, %s8529_s22 }
 0x700   : > { %v6436_v29 = vpop.permute.xlu1 %6435 }
 0x701   : > { %v6434_v62 = vpop.permute.xlu0 %6433  ;;  %v6614_v32 = vmul.f32 %v13378_v7, %v6436_v29  ;;  %v13398_v7 = vld [vmem:[#allocation22_spill] sm:$0xff] }
 0x702   : > { %7064 = vrot.lane.b32.xlu1 %v6608_v42, %s8529_s22  ;;  %v6613_v1 = vmul.f32 %v13379_v27, %v6434_v62  ;;  %v13399_v27 = vld [vmem:[#allocation21_spill] sm:$0xff] }
 0x703   : > { %7062 = vrot.lane.b32.xlu0 %v6607_v8, %s8529_s22 }
 0x704   : > { %v6440_v19 = vpop.permute.xlu1 %6439 }
 0x705   : > { %v6438_v43 = vpop.permute.xlu0 %6437  ;;  %v6616_v40 = vmul.f32 %v13380_v33, %v6440_v19  ;;  %v13400_v33 = vld [vmem:[#allocation23_spill] sm:$0xff] }
 0x706   : > { %7068 = vrot.lane.b32.xlu1 %v6610_v36, %s8529_s22  ;;  %v6615_v60 = vmul.f32 %v13381_v2, %v6438_v43  ;;  %v13401_v2 = vld [vmem:[#allocation108_spill] sm:$0xff] }
 0x707   : > { %7066 = vrot.lane.b32.xlu0 %v6609_v15, %s8529_s22 }
 0x708   : > { %v6444_v34 = vpop.permute.xlu1 %6443 }
 0x709   : > { %v6442_v57 = vpop.permute.xlu0 %6441  ;;  %v6618_v44 = vmul.f32 %v13382_v4, %v6444_v34  ;;  %v13402_v4 = vld [vmem:[#allocation109_spill] sm:$0xff] }
 0x70a   : > { %7072 = vrot.lane.b32.xlu1 %v6612_v23, %s8529_s22  ;;  %v6617_v24 = vmul.f32 %v13383_v49, %v6442_v57  ;;  %v13403_v49 = vld [vmem:[#allocation110_spill] sm:$0xff] }
 0x70b   : > { %7070 = vrot.lane.b32.xlu0 %v6611_v0, %s8529_s22 }
 0x70c   : > { %v6448_v16 = vpop.permute.xlu1 %6447 }
 0x70d   : > { %v6446_v51 = vpop.permute.xlu0 %6445  ;;  %v6620_v25 = vmul.f32 %v13384_v14, %v6448_v16  ;;  %v13404_v14 = vld [vmem:[#allocation111_spill] sm:$0xff] }
 0x70e   : > { %7076 = vrot.lane.b32.xlu1 %v6614_v32, %s8529_s22  ;;  %v6619_v5 = vmul.f32 %v13385_v30, %v6446_v51  ;;  %v13405_v30 = vld [vmem:[#allocation112_spill] sm:$0xff] }
 0x70f   : > { %7074 = vrot.lane.b32.xlu0 %v6613_v1, %s8529_s22 }
 0x710   : > { %v6452_v12 = vpop.permute.xlu1 %6451 }
 0x711   : > { %v6450_v39 = vpop.permute.xlu0 %6449  ;;  %v6622_v48 = vmul.f32 %v13386_v58, %v6452_v12  ;;  %v13406_v58 = vld [vmem:[#allocation113_spill] sm:$0xff] }
 0x712   : > { %7080 = vrot.lane.b32.xlu1 %v6616_v40, %s8529_s22  ;;  %v6621_v46 = vmul.f32 %v13387_v21, %v6450_v39  ;;  %v13407_v21 = vld [vmem:[#allocation114_spill] sm:$0xff] }
 0x713   : > { %7078 = vrot.lane.b32.xlu0 %v6615_v60, %s8529_s22 }
 0x714   : > { %v6456_v13 = vpop.permute.xlu1 %6455 }
 0x715   : > { %v6454_v45 = vpop.permute.xlu0 %6453  ;;  %v6624_v59 = vmul.f32 %v13388_v63, %v6456_v13  ;;  %v13408_v63 = vld [vmem:[#allocation115_spill] sm:$0xff] }
 0x716   : > { %7084 = vrot.lane.b32.xlu1 %v6618_v44, %s8529_s22  ;;  %v6623_v41 = vmul.f32 %v13389_v38, %v6454_v45  ;;  %v13409_v38 = vld [vmem:[#allocation116_spill] sm:$0xff] }
 0x717   : > { %7082 = vrot.lane.b32.xlu0 %v6617_v24, %s8529_s22 }
 0x718   : > { %v6460_v50 = vpop.permute.xlu1 %6459 }
 0x719   : > { %v6458_v28 = vpop.permute.xlu0 %6457  ;;  %v6626_v20 = vmul.f32 %v13390_v9, %v6460_v50  ;;  %v13410_v9 = vld [vmem:[#allocation117_spill] sm:$0xff] }
 0x71a   : > { %7088 = vrot.lane.b32.xlu1 %v6620_v25, %s8529_s22  ;;  %v6625_v54 = vmul.f32 %v13391_v35, %v6458_v28  ;;  %v13411_v35 = vld [vmem:[#allocation6_spill] sm:$0xff] }
 0x71b   : > { %7086 = vrot.lane.b32.xlu0 %v6619_v5, %s8529_s22 }
 0x71c   : > { %v6464_v3 = vpop.permute.xlu1 %6463 }
 0x71d   : > { %v6462_v11 = vpop.permute.xlu0 %6461  ;;  %v6628_v42 = vmul.f32 %v13392_v53, %v6464_v3  ;;  %v13412_v53 = vld [vmem:[#allocation47_spill] sm:$0xff] }
 0x71e   : > { %7092 = vrot.lane.b32.xlu1 %v6622_v48, %s8529_s22  ;;  %v6627_v8 = vmul.f32 %v13393_v56, %v6462_v11  ;;  %v13413_v56 = vld [vmem:[#allocation18_spill] sm:$0xff] }
 0x71f   : > { %7090 = vrot.lane.b32.xlu0 %v6621_v46, %s8529_s22 }
 0x720   : > { %v6468_v26 = vpop.permute.xlu1 %6467 }
 0x721   : > { %v6466_v6 = vpop.permute.xlu0 %6465  ;;  %v6630_v36 = vmul.f32 %v13394_v55, %v6468_v26  ;;  %v13414_v55 = vld [vmem:[#allocation48_spill] sm:$0xff] }
 0x722   : > { %7096 = vrot.lane.b32.xlu1 %v6624_v59, %s8529_s22  ;;  %v6629_v15 = vmul.f32 %v13395_v61, %v6466_v6  ;;  %v13415_v61 = vld [vmem:[#allocation118_spill] sm:$0xff] }
 0x723   : > { %7094 = vrot.lane.b32.xlu0 %v6623_v41, %s8529_s22 }
 0x724   : > { %v6472_v22 = vpop.permute.xlu1 %6471 }
 0x725   : > { %v6470_v17 = vpop.permute.xlu0 %6469  ;;  %v6632_v23 = vmul.f32 %v13396_v37, %v6472_v22  ;;  %v13416_v37 = vld [vmem:[#allocation119_spill] sm:$0xff] }
 0x726   : > { %7100 = vrot.lane.b32.xlu1 %v6626_v20, %s8529_s22  ;;  %v6631_v0 = vmul.f32 %v13397_v52, %v6470_v17  ;;  %v13417_v52 = vld [vmem:[#allocation120_spill] sm:$0xff] }
 0x727   : > { %7098 = vrot.lane.b32.xlu0 %v6625_v54, %s8529_s22 }
 0x728   : > { %v6476_v29 = vpop.permute.xlu1 %6475 }
 0x729   : > { %v6474_v62 = vpop.permute.xlu0 %6473  ;;  %v6634_v32 = vmul.f32 %v13398_v7, %v6476_v29  ;;  %v13418_v7 = vld [vmem:[#allocation121_spill] sm:$0xff] }
 0x72a   : > { %7104 = vrot.lane.b32.xlu1 %v6628_v42, %s8529_s22  ;;  %v6633_v1 = vmul.f32 %v13399_v27, %v6474_v62  ;;  %v13419_v27 = vld [vmem:[#allocation122_spill] sm:$0xff] }
 0x72b   : > { %7102 = vrot.lane.b32.xlu0 %v6627_v8, %s8529_s22 }
 0x72c   : > { %v6480_v19 = vpop.permute.xlu1 %6479 }
 0x72d   : > { %v6478_v43 = vpop.permute.xlu0 %6477  ;;  %v6636_v40 = vmul.f32 %v13400_v33, %v6480_v19  ;;  %v13420_v33 = vld [vmem:[#allocation123_spill] sm:$0xff] }
 0x72e   : > { %7108 = vrot.lane.b32.xlu1 %v6630_v36, %s8529_s22  ;;  %v6635_v60 = vmul.f32 %v13401_v2, %v6478_v43  ;;  %v13421_v2 = vld [vmem:[#allocation124_spill] sm:$0xff] }
 0x72f   : > { %7106 = vrot.lane.b32.xlu0 %v6629_v15, %s8529_s22 }
 0x730   : > { %v6484_v34 = vpop.permute.xlu1 %6483 }
 0x731   : > { %v6482_v57 = vpop.permute.xlu0 %6481  ;;  %v6638_v44 = vmul.f32 %v13402_v4, %v6484_v34  ;;  %v13422_v4 = vld [vmem:[#allocation125_spill] sm:$0xff] }
 0x732   : > { %7112 = vrot.lane.b32.xlu1 %v6632_v23, %s8529_s22  ;;  %v6637_v24 = vmul.f32 %v13403_v49, %v6482_v57  ;;  %v13423_v49 = vld [vmem:[#allocation126_spill] sm:$0xff] }
 0x733   : > { %7110 = vrot.lane.b32.xlu0 %v6631_v0, %s8529_s22 }
 0x734   : > { %v6488_v16 = vpop.permute.xlu1 %6487 }
 0x735   : > { %v6486_v51 = vpop.permute.xlu0 %6485  ;;  %v6640_v25 = vmul.f32 %v13404_v14, %v6488_v16  ;;  %v13424_v14 = vld [vmem:[#allocation127_spill] sm:$0xff] }
 0x736   : > { %7116 = vrot.lane.b32.xlu1 %v6634_v32, %s8529_s22  ;;  %v6639_v5 = vmul.f32 %v13405_v30, %v6486_v51  ;;  %v13425_v30 = vld [vmem:[#allocation128_spill] sm:$0xff] }
 0x737   : > { %7114 = vrot.lane.b32.xlu0 %v6633_v1, %s8529_s22 }
 0x738   : > { %v6492_v12 = vpop.permute.xlu1 %6491 }
 0x739   : > { %v6490_v39 = vpop.permute.xlu0 %6489  ;;  %v6642_v48 = vmul.f32 %v13406_v58, %v6492_v12 }
 0x73a   : > { %7120 = vrot.lane.b32.xlu1 %v6636_v40, %s8529_s22  ;;  %v6641_v46 = vmul.f32 %v13407_v21, %v6490_v39 }
 0x73b   : > { %7118 = vrot.lane.b32.xlu0 %v6635_v60, %s8529_s22 }
 0x73c   : > { %v6496_v13 = vpop.permute.xlu1 %6495 }
 0x73d   : > { %v6494_v45 = vpop.permute.xlu0 %6493  ;;  %v6644_v59 = vmul.f32 %v13408_v63, %v6496_v13 }
 0x73e   : > { %7124 = vrot.lane.b32.xlu1 %v6638_v44, %s8529_s22  ;;  %v6643_v41 = vmul.f32 %v13409_v38, %v6494_v45 }
 0x73f   : > { %7122 = vrot.lane.b32.xlu0 %v6637_v24, %s8529_s22 }
 0x740   : > { %v6500_v50 = vpop.permute.xlu1 %6499 }
 0x741   : > { %v6498_v28 = vpop.permute.xlu0 %6497  ;;  %v6646_v20 = vmul.f32 %v13410_v9, %v6500_v50 }
 0x742   : > { %7128 = vrot.lane.b32.xlu1 %v6640_v25, %s8529_s22  ;;  %v6645_v54 = vmul.f32 %v13411_v35, %v6498_v28 }
 0x743   : > { %7126 = vrot.lane.b32.xlu0 %v6639_v5, %s8529_s22 }
 0x744   : > { %v6504_v3 = vpop.permute.xlu1 %6503 }
 0x745   : > { %v6502_v11 = vpop.permute.xlu0 %6501  ;;  %v6648_v42 = vmul.f32 %v13412_v53, %v6504_v3 }
 0x746   : > { %7132 = vrot.lane.b32.xlu1 %v6642_v48, %s8529_s22  ;;  %v6647_v8 = vmul.f32 %v13413_v56, %v6502_v11 }
 0x747   : > { %7130 = vrot.lane.b32.xlu0 %v6641_v46, %s8529_s22 }
 0x748   : > { %v6508_v26 = vpop.permute.xlu1 %6507 }
 0x749   : > { %v6506_v6 = vpop.permute.xlu0 %6505  ;;  %v6650_v36 = vmul.f32 %v13414_v55, %v6508_v26 }
 0x74a   : > { %7136 = vrot.lane.b32.xlu1 %v6644_v59, %s8529_s22  ;;  %v6649_v15 = vmul.f32 %v13415_v61, %v6506_v6 }
 0x74b   : > { %7134 = vrot.lane.b32.xlu0 %v6643_v41, %s8529_s22 }
 0x74c   : > { %v6512_v22 = vpop.permute.xlu1 %6511 }
 0x74d   : > { %v6510_v17 = vpop.permute.xlu0 %6509  ;;  %v6652_v23 = vmul.f32 %v13416_v37, %v6512_v22 }
 0x74e   : > { %7140 = vrot.lane.b32.xlu1 %v6646_v20, %s8529_s22  ;;  %v6651_v0 = vmul.f32 %v13417_v52, %v6510_v17 }
 0x74f   : > { %7138 = vrot.lane.b32.xlu0 %v6645_v54, %s8529_s22 }
 0x750   : > { %v6516_v29 = vpop.permute.xlu1 %6515 }
 0x751   : > { %v6514_v62 = vpop.permute.xlu0 %6513  ;;  %v6654_v32 = vmul.f32 %v13418_v7, %v6516_v29 }
 0x752   : > { %7144 = vrot.lane.b32.xlu1 %v6648_v42, %s8529_s22  ;;  %v6653_v1 = vmul.f32 %v13419_v27, %v6514_v62 }
 0x753   : > { %7142 = vrot.lane.b32.xlu0 %v6647_v8, %s8529_s22 }
 0x754   : > { %v6520_v19 = vpop.permute.xlu1 %6519 }
 0x755   : > { %v6518_v43 = vpop.permute.xlu0 %6517  ;;  %v6656_v40 = vmul.f32 %v13420_v33, %v6520_v19 }
 0x756   : > { %7148 = vrot.lane.b32.xlu1 %v6650_v36, %s8529_s22  ;;  %v6655_v60 = vmul.f32 %v13421_v2, %v6518_v43 }
 0x757   : > { %7146 = vrot.lane.b32.xlu0 %v6649_v15, %s8529_s22 }
 0x758   : > { %v6524_v34 = vpop.permute.xlu1 %6523 }
 0x759   : > { %v6522_v57 = vpop.permute.xlu0 %6521  ;;  %v6658_v44 = vmul.f32 %v13422_v4, %v6524_v34 }
 0x75a   : > { %7152 = vrot.lane.b32.xlu1 %v6652_v23, %s8529_s22  ;;  %v6657_v24 = vmul.f32 %v13423_v49, %v6522_v57 }
 0x75b   : > { %7150 = vrot.lane.b32.xlu0 %v6651_v0, %s8529_s22 }
 0x75c   : > { %v6528_v16 = vpop.permute.xlu1 %6527 }
 0x75d   : > { %v6526_v51 = vpop.permute.xlu0 %6525  ;;  %v6660_v25 = vmul.f32 %v13424_v14, %v6528_v16 }
 0x75e   : > { %7156 = vrot.lane.b32.xlu1 %v6654_v32, %s8529_s22  ;;  %v6659_v5 = vmul.f32 %v13425_v30, %v6526_v51 }
 0x75f   : > { %7154 = vrot.lane.b32.xlu0 %v6653_v1, %s8529_s22 }
 0x760   : > { %v6532_v12 = vpop.permute.xlu1 %6531 }
 0x761   : > { %v6530_v39 = vpop.permute.xlu0 %6529  ;;  %v6662_v58 = vmul.f32 %v13347_v31, %v6532_v12 }
 0x762   : > { %7160 = vrot.lane.b32.xlu1 %v6656_v40, %s8529_s22  ;;  %v6661_v3 = vmul.f32 %v13349_v47, %v6530_v39 }
 0x763   : > { %7158 = vrot.lane.b32.xlu0 %v6655_v60, %s8529_s22 }
 0x764   : > { %v6536_v13 = vpop.permute.xlu1 %6535 }
 0x765   : > { %v6534_v45 = vpop.permute.xlu0 %6533  ;;  %v6664_v31 = vmul.f32 %v13351_v10, %v6536_v13 }
 0x766   : > { %7164 = vrot.lane.b32.xlu1 %v6658_v44, %s8529_s22  ;;  %v6663_v47 = vmul.f32 %v11987_v18, %v6534_v45 }
 0x767   : > { %7162 = vrot.lane.b32.xlu0 %v6657_v24, %s8529_s22 }
 0x768   : > { %v7053_v50 = vpop.permute.xlu1 %7052 }
 0x769   : > { %7243 = vst.msk [vmem:[#allocation2 + $0x30] sm:$0xff] %vm6921_vm4, %v7053_v50  ;;  %7307 = vst.msk [vmem:[%s8569_s21 + $0x8] sm:$0xff] %vm6921_vm4, %v7053_v50  ;;  %v7051_v28 = vpop.permute.xlu0 %7050 }
 0x76a   : > { %7242 = vst.msk [vmem:[#allocation2 + $0x28] sm:$0xff] %vm6921_vm4, %v7051_v28  ;;  %7306 = vst.msk [vmem:[%s8569_s21] sm:$0xff] %vm6921_vm4, %v7051_v28  ;;  %7168 = vrot.lane.b32.xlu1 %v6660_v25, %s8529_s22 }
 0x76b   : > { %7166 = vrot.lane.b32.xlu0 %v6659_v5, %s8529_s22 }
 0x76c   : > { %v7057_v48 = vpop.permute.xlu1 %7056 }
 0x76d   : > { %7245 = vst.msk [vmem:[#allocation2 + $0x50] sm:$0xff] %vm6921_vm4, %v7057_v48  ;;  %7309 = vst.msk [vmem:[%s8569_s21 + $0x18] sm:$0xff] %vm6921_vm4, %v7057_v48  ;;  %v7055_v21 = vpop.permute.xlu0 %7054 }
 0x76e   : > { %7244 = vst.msk [vmem:[#allocation2 + $0x48] sm:$0xff] %vm6921_vm4, %v7055_v21  ;;  %7308 = vst.msk [vmem:[%s8569_s21 + $0x10] sm:$0xff] %vm6921_vm4, %v7055_v21  ;;  %7172 = vrot.lane.b32.xlu1 %v6662_v58, %s8529_s22 }
 0x76f   : > { %7170 = vrot.lane.b32.xlu0 %v6661_v3, %s8529_s22 }
 0x770   : > { %v7061_v46 = vpop.permute.xlu1 %7060 }
 0x771   : > { %7247 = vst.msk [vmem:[#allocation2 + $0x70] sm:$0xff] %vm6921_vm4, %v7061_v46  ;;  %7311 = vst.msk [vmem:[%s8569_s21 + $0x28] sm:$0xff] %vm6921_vm4, %v7061_v46  ;;  %v7059_v11 = vpop.permute.xlu0 %7058 }
 0x772   : > { %7246 = vst.msk [vmem:[#allocation2 + $0x68] sm:$0xff] %vm6921_vm4, %v7059_v11  ;;  %7310 = vst.msk [vmem:[%s8569_s21 + $0x20] sm:$0xff] %vm6921_vm4, %v7059_v11  ;;  %7176 = vrot.lane.b32.xlu1 %v6664_v31, %s8529_s22 }
 0x773   : > { %7174 = vrot.lane.b32.xlu0 %v6663_v47, %s8529_s22 }
 0x774   : > { %v7065_v10 = vpop.permute.xlu1 %7064 }
 0x775   : > { %7249 = vst.msk [vmem:[#allocation2 + $0x90] sm:$0xff] %vm6921_vm4, %v7065_v10  ;;  %7313 = vst.msk [vmem:[%s8569_s21 + $0x38] sm:$0xff] %vm6921_vm4, %v7065_v10  ;;  %v7063_v18 = vpop.permute.xlu0 %7062 }
 0x776   : > { %7248 = vst.msk [vmem:[#allocation2 + $0x88] sm:$0xff] %vm6921_vm4, %v7063_v18  ;;  %7312 = vst.msk [vmem:[%s8569_s21 + $0x30] sm:$0xff] %vm6921_vm4, %v7063_v18 }
 0x778   : > { %v7069_v63 = vpop.permute.xlu1 %7068 }
 0x779   : > { %7251 = vst.msk [vmem:[#allocation2 + $0xb0] sm:$0xff] %vm6921_vm4, %v7069_v63  ;;  %7315 = vst.msk [vmem:[%s8569_s21 + $0x48] sm:$0xff] %vm6921_vm4, %v7069_v63  ;;  %v7067_v59 = vpop.permute.xlu0 %7066 }
 0x77a   : > { %7250 = vst.msk [vmem:[#allocation2 + $0xa8] sm:$0xff] %vm6921_vm4, %v7067_v59  ;;  %7314 = vst.msk [vmem:[%s8569_s21 + $0x40] sm:$0xff] %vm6921_vm4, %v7067_v59 }
 0x77c   : > { %v7073_v26 = vpop.permute.xlu1 %7072 }
 0x77d   : > { %7253 = vst.msk [vmem:[#allocation2 + $0xd0] sm:$0xff] %vm6921_vm4, %v7073_v26  ;;  %7317 = vst.msk [vmem:[%s8569_s21 + $0x58] sm:$0xff] %vm6921_vm4, %v7073_v26  ;;  %v7071_v38 = vpop.permute.xlu0 %7070 }
 0x77e   : > { %7252 = vst.msk [vmem:[#allocation2 + $0xc8] sm:$0xff] %vm6921_vm4, %v7071_v38  ;;  %7316 = vst.msk [vmem:[%s8569_s21 + $0x50] sm:$0xff] %vm6921_vm4, %v7071_v38 }
 0x780   : > { %v7077_v41 = vpop.permute.xlu1 %7076 }
 0x781   : > { %7255 = vst.msk [vmem:[#allocation2 + $0xf0] sm:$0xff] %vm6921_vm4, %v7077_v41  ;;  %7319 = vst.msk [vmem:[%s8569_s21 + $0x68] sm:$0xff] %vm6921_vm4, %v7077_v41  ;;  %v7075_v6 = vpop.permute.xlu0 %7074 }
 0x782   : > { %7254 = vst.msk [vmem:[#allocation2 + $0xe8] sm:$0xff] %vm6921_vm4, %v7075_v6  ;;  %7318 = vst.msk [vmem:[%s8569_s21 + $0x60] sm:$0xff] %vm6921_vm4, %v7075_v6 }
 0x784   : > { %v7081_v9 = vpop.permute.xlu1 %7080 }
 0x785   : > { %7257 = vst.msk [vmem:[#allocation2 + $0x110] sm:$0xff] %vm6921_vm4, %v7081_v9  ;;  %7321 = vst.msk [vmem:[%s8569_s21 + $0x78] sm:$0xff] %vm6921_vm4, %v7081_v9  ;;  %v7079_v20 = vpop.permute.xlu0 %7078 }
 0x786   : > { %7256 = vst.msk [vmem:[#allocation2 + $0x108] sm:$0xff] %vm6921_vm4, %v7079_v20  ;;  %7320 = vst.msk [vmem:[%s8569_s21 + $0x70] sm:$0xff] %vm6921_vm4, %v7079_v20 }
 0x788   : > { %v7085_v22 = vpop.permute.xlu1 %7084 }
 0x789   : > { %7259 = vst.msk [vmem:[#allocation2 + $0x130] sm:$0xff] %vm6921_vm4, %v7085_v22  ;;  %7323 = vst.msk [vmem:[%s8569_s21 + $0x88] sm:$0xff] %vm6921_vm4, %v7085_v22  ;;  %v7083_v35 = vpop.permute.xlu0 %7082 }
 0x78a   : > { %7258 = vst.msk [vmem:[#allocation2 + $0x128] sm:$0xff] %vm6921_vm4, %v7083_v35  ;;  %7322 = vst.msk [vmem:[%s8569_s21 + $0x80] sm:$0xff] %vm6921_vm4, %v7083_v35 }
 0x78c   : > { %v7089_v54 = vpop.permute.xlu1 %7088 }
 0x78d   : > { %7261 = vst.msk [vmem:[#allocation2 + $0x150] sm:$0xff] %vm6921_vm4, %v7089_v54  ;;  %7325 = vst.msk [vmem:[%s8569_s21 + $0x98] sm:$0xff] %vm6921_vm4, %v7089_v54  ;;  %v7087_v17 = vpop.permute.xlu0 %7086 }
 0x78e   : > { %7260 = vst.msk [vmem:[#allocation2 + $0x148] sm:$0xff] %vm6921_vm4, %v7087_v17  ;;  %7324 = vst.msk [vmem:[%s8569_s21 + $0x90] sm:$0xff] %vm6921_vm4, %v7087_v17 }
 0x790   : > { %v7093_v53 = vpop.permute.xlu1 %7092 }
 0x791   : > { %7263 = vst.msk [vmem:[#allocation2 + $0x170] sm:$0xff] %vm6921_vm4, %v7093_v53  ;;  %7327 = vst.msk [vmem:[%s8569_s21 + $0xa8] sm:$0xff] %vm6921_vm4, %v7093_v53  ;;  %v7091_v42 = vpop.permute.xlu0 %7090 }
 0x792   : > { %7262 = vst.msk [vmem:[#allocation2 + $0x168] sm:$0xff] %vm6921_vm4, %v7091_v42  ;;  %7326 = vst.msk [vmem:[%s8569_s21 + $0xa0] sm:$0xff] %vm6921_vm4, %v7091_v42 }
 0x794   : > { %v7097_v29 = vpop.permute.xlu1 %7096 }
 0x795   : > { %7265 = vst.msk [vmem:[#allocation2 + $0x190] sm:$0xff] %vm6921_vm4, %v7097_v29  ;;  %7329 = vst.msk [vmem:[%s8569_s21 + $0xb8] sm:$0xff] %vm6921_vm4, %v7097_v29  ;;  %v7095_v56 = vpop.permute.xlu0 %7094 }
 0x796   : > { %7264 = vst.msk [vmem:[#allocation2 + $0x188] sm:$0xff] %vm6921_vm4, %v7095_v56  ;;  %7328 = vst.msk [vmem:[%s8569_s21 + $0xb0] sm:$0xff] %vm6921_vm4, %v7095_v56 }
 0x798   : > { %v7101_v8 = vpop.permute.xlu1 %7100 }
 0x799   : > { %7267 = vst.msk [vmem:[#allocation2 + $0x1b0] sm:$0xff] %vm6921_vm4, %v7101_v8  ;;  %7331 = vst.msk [vmem:[%s8569_s21 + $0xc8] sm:$0xff] %vm6921_vm4, %v7101_v8  ;;  %v7099_v62 = vpop.permute.xlu0 %7098 }
 0x79a   : > { %7266 = vst.msk [vmem:[#allocation2 + $0x1a8] sm:$0xff] %vm6921_vm4, %v7099_v62  ;;  %7330 = vst.msk [vmem:[%s8569_s21 + $0xc0] sm:$0xff] %vm6921_vm4, %v7099_v62 }
 0x79c   : > { %v7105_v55 = vpop.permute.xlu1 %7104 }
 0x79d   : > { %7269 = vst.msk [vmem:[#allocation2 + $0x1d0] sm:$0xff] %vm6921_vm4, %v7105_v55  ;;  %7333 = vst.msk [vmem:[%s8569_s21 + $0xd8] sm:$0xff] %vm6921_vm4, %v7105_v55  ;;  %v7103_v36 = vpop.permute.xlu0 %7102 }
 0x79e   : > { %7268 = vst.msk [vmem:[#allocation2 + $0x1c8] sm:$0xff] %vm6921_vm4, %v7103_v36  ;;  %7332 = vst.msk [vmem:[%s8569_s21 + $0xd0] sm:$0xff] %vm6921_vm4, %v7103_v36 }
 0x7a0   : > { %v7109_v19 = vpop.permute.xlu1 %7108 }
 0x7a1   : > { %7271 = vst.msk [vmem:[#allocation2 + $0x1f0] sm:$0xff] %vm6921_vm4, %v7109_v19  ;;  %7335 = vst.msk [vmem:[%s8569_s21 + $0xe8] sm:$0xff] %vm6921_vm4, %v7109_v19  ;;  %v7107_v61 = vpop.permute.xlu0 %7106 }
 0x7a2   : > { %7270 = vst.msk [vmem:[#allocation2 + $0x1e8] sm:$0xff] %vm6921_vm4, %v7107_v61  ;;  %7334 = vst.msk [vmem:[%s8569_s21 + $0xe0] sm:$0xff] %vm6921_vm4, %v7107_v61 }
 0x7a4   : > { %v7113_v15 = vpop.permute.xlu1 %7112 }
 0x7a5   : > { %7273 = vst.msk [vmem:[#allocation2 + $0x210] sm:$0xff] %vm6921_vm4, %v7113_v15  ;;  %7337 = vst.msk [vmem:[%s8569_s21 + $0xf8] sm:$0xff] %vm6921_vm4, %v7113_v15  ;;  %v7111_v43 = vpop.permute.xlu0 %7110 }
 0x7a6   : > { %7272 = vst.msk [vmem:[#allocation2 + $0x208] sm:$0xff] %vm6921_vm4, %v7111_v43  ;;  %7336 = vst.msk [vmem:[%s8569_s21 + $0xf0] sm:$0xff] %vm6921_vm4, %v7111_v43 }
 0x7a8   : > { %v7117_v37 = vpop.permute.xlu1 %7116 }
 0x7a9   : > { %7275 = vst.msk [vmem:[#allocation2 + $0x270] sm:$0xff] %vm6921_vm4, %v7117_v37  ;;  %7339 = vst.msk [vmem:[%s8569_s21 + $0x108] sm:$0xff] %vm6921_vm4, %v7117_v37  ;;  %v7115_v23 = vpop.permute.xlu0 %7114 }
 0x7aa   : > { %7274 = vst.msk [vmem:[#allocation2 + $0x268] sm:$0xff] %vm6921_vm4, %v7115_v23  ;;  %7338 = vst.msk [vmem:[%s8569_s21 + $0x100] sm:$0xff] %vm6921_vm4, %v7115_v23 }
 0x7ac   : > { %v7121_v34 = vpop.permute.xlu1 %7120 }
 0x7ad   : > { %7277 = vst.msk [vmem:[#allocation2 + $0x290] sm:$0xff] %vm6921_vm4, %v7121_v34  ;;  %7341 = vst.msk [vmem:[%s8569_s21 + $0x118] sm:$0xff] %vm6921_vm4, %v7121_v34  ;;  %v7119_v52 = vpop.permute.xlu0 %7118 }
 0x7ae   : > { %7276 = vst.msk [vmem:[#allocation2 + $0x288] sm:$0xff] %vm6921_vm4, %v7119_v52  ;;  %7340 = vst.msk [vmem:[%s8569_s21 + $0x110] sm:$0xff] %vm6921_vm4, %v7119_v52 }
 0x7b0   : > { %v7125_v0 = vpop.permute.xlu1 %7124 }
 0x7b1   : > { %7279 = vst.msk [vmem:[#allocation2 + $0x2b0] sm:$0xff] %vm6921_vm4, %v7125_v0  ;;  %7343 = vst.msk [vmem:[%s8569_s21 + $0x128] sm:$0xff] %vm6921_vm4, %v7125_v0  ;;  %v7123_v57 = vpop.permute.xlu0 %7122 }
 0x7b2   : > { %7278 = vst.msk [vmem:[#allocation2 + $0x2a8] sm:$0xff] %vm6921_vm4, %v7123_v57  ;;  %7342 = vst.msk [vmem:[%s8569_s21 + $0x120] sm:$0xff] %vm6921_vm4, %v7123_v57 }
 0x7b4   : > { %v7129_v7 = vpop.permute.xlu1 %7128 }
 0x7b5   : > { %7281 = vst.msk [vmem:[#allocation2 + $0x2d0] sm:$0xff] %vm6921_vm4, %v7129_v7  ;;  %7345 = vst.msk [vmem:[%s8569_s21 + $0x138] sm:$0xff] %vm6921_vm4, %v7129_v7  ;;  %v7127_v32 = vpop.permute.xlu0 %7126 }
 0x7b6   : > { %7280 = vst.msk [vmem:[#allocation2 + $0x2c8] sm:$0xff] %vm6921_vm4, %v7127_v32  ;;  %7344 = vst.msk [vmem:[%s8569_s21 + $0x130] sm:$0xff] %vm6921_vm4, %v7127_v32 }
 0x7b8   : > { %v7133_v16 = vpop.permute.xlu1 %7132 }
 0x7b9   : > { %7283 = vst.msk [vmem:[#allocation2 + $0x2f0] sm:$0xff] %vm6921_vm4, %v7133_v16  ;;  %7347 = vst.msk [vmem:[%s8569_s21 + $0x148] sm:$0xff] %vm6921_vm4, %v7133_v16  ;;  %v7131_v27 = vpop.permute.xlu0 %7130 }
 0x7ba   : > { %7282 = vst.msk [vmem:[#allocation2 + $0x2e8] sm:$0xff] %vm6921_vm4, %v7131_v27  ;;  %7346 = vst.msk [vmem:[%s8569_s21 + $0x140] sm:$0xff] %vm6921_vm4, %v7131_v27 }
 0x7bc   : > { %v7137_v1 = vpop.permute.xlu1 %7136 }
 0x7bd   : > { %7285 = vst.msk [vmem:[#allocation2 + $0x310] sm:$0xff] %vm6921_vm4, %v7137_v1  ;;  %7349 = vst.msk [vmem:[%s8569_s21 + $0x158] sm:$0xff] %vm6921_vm4, %v7137_v1  ;;  %v7135_v51 = vpop.permute.xlu0 %7134 }
 0x7be   : > { %7284 = vst.msk [vmem:[#allocation2 + $0x308] sm:$0xff] %vm6921_vm4, %v7135_v51  ;;  %7348 = vst.msk [vmem:[%s8569_s21 + $0x150] sm:$0xff] %vm6921_vm4, %v7135_v51 }
 0x7c0   : > { %v7141_v33 = vpop.permute.xlu1 %7140 }
 0x7c1   : > { %7287 = vst.msk [vmem:[#allocation2 + $0x330] sm:$0xff] %vm6921_vm4, %v7141_v33  ;;  %7351 = vst.msk [vmem:[%s8569_s21 + $0x168] sm:$0xff] %vm6921_vm4, %v7141_v33  ;;  %v7139_v40 = vpop.permute.xlu0 %7138 }
 0x7c2   : > { %7286 = vst.msk [vmem:[#allocation2 + $0x328] sm:$0xff] %vm6921_vm4, %v7139_v40  ;;  %7350 = vst.msk [vmem:[%s8569_s21 + $0x160] sm:$0xff] %vm6921_vm4, %v7139_v40 }
 0x7c4   : > { %v7145_v12 = vpop.permute.xlu1 %7144 }
 0x7c5   : > { %7289 = vst.msk [vmem:[#allocation2 + $0x350] sm:$0xff] %vm6921_vm4, %v7145_v12  ;;  %7353 = vst.msk [vmem:[%s8569_s21 + $0x178] sm:$0xff] %vm6921_vm4, %v7145_v12  ;;  %v7143_v2 = vpop.permute.xlu0 %7142 }
 0x7c6   : > { %7288 = vst.msk [vmem:[#allocation2 + $0x348] sm:$0xff] %vm6921_vm4, %v7143_v2  ;;  %7352 = vst.msk [vmem:[%s8569_s21 + $0x170] sm:$0xff] %vm6921_vm4, %v7143_v2 }
 0x7c8   : > { %v7149_v60 = vpop.permute.xlu1 %7148 }
 0x7c9   : > { %7291 = vst.msk [vmem:[#allocation2 + $0x370] sm:$0xff] %vm6921_vm4, %v7149_v60  ;;  %7355 = vst.msk [vmem:[%s8569_s21 + $0x188] sm:$0xff] %vm6921_vm4, %v7149_v60  ;;  %v7147_v39 = vpop.permute.xlu0 %7146 }
 0x7ca   : > { %7290 = vst.msk [vmem:[#allocation2 + $0x368] sm:$0xff] %vm6921_vm4, %v7147_v39  ;;  %7354 = vst.msk [vmem:[%s8569_s21 + $0x180] sm:$0xff] %vm6921_vm4, %v7147_v39 }
 0x7cc   : > { %v7153_v4 = vpop.permute.xlu1 %7152 }
 0x7cd   : > { %7293 = vst.msk [vmem:[#allocation2 + $0x390] sm:$0xff] %vm6921_vm4, %v7153_v4  ;;  %7357 = vst.msk [vmem:[%s8569_s21 + $0x198] sm:$0xff] %vm6921_vm4, %v7153_v4  ;;  %v7151_v44 = vpop.permute.xlu0 %7150 }
 0x7ce   : > { %7292 = vst.msk [vmem:[#allocation2 + $0x388] sm:$0xff] %vm6921_vm4, %v7151_v44  ;;  %7356 = vst.msk [vmem:[%s8569_s21 + $0x190] sm:$0xff] %vm6921_vm4, %v7151_v44 }
 0x7d0   : > { %v7157_v13 = vpop.permute.xlu1 %7156 }
 0x7d1   : > { %7295 = vst.msk [vmem:[#allocation2 + $0x3b0] sm:$0xff] %vm6921_vm4, %v7157_v13  ;;  %7359 = vst.msk [vmem:[%s8569_s21 + $0x1a8] sm:$0xff] %vm6921_vm4, %v7157_v13  ;;  %v7155_v49 = vpop.permute.xlu0 %7154 }
 0x7d2   : > { %7294 = vst.msk [vmem:[#allocation2 + $0x3a8] sm:$0xff] %vm6921_vm4, %v7155_v49  ;;  %7358 = vst.msk [vmem:[%s8569_s21 + $0x1a0] sm:$0xff] %vm6921_vm4, %v7155_v49 }
 0x7d4   : > { %v7161_v24 = vpop.permute.xlu1 %7160 }
 0x7d5   : > { %7297 = vst.msk [vmem:[#allocation2 + $0x3d0] sm:$0xff] %vm6921_vm4, %v7161_v24  ;;  %7361 = vst.msk [vmem:[%s8569_s21 + $0x1b8] sm:$0xff] %vm6921_vm4, %v7161_v24  ;;  %v7159_v45 = vpop.permute.xlu0 %7158 }
 0x7d6   : > { %7296 = vst.msk [vmem:[#allocation2 + $0x3c8] sm:$0xff] %vm6921_vm4, %v7159_v45  ;;  %7360 = vst.msk [vmem:[%s8569_s21 + $0x1b0] sm:$0xff] %vm6921_vm4, %v7159_v45 }
 0x7d8   : > { %v7165_v14 = vpop.permute.xlu1 %7164 }
 0x7d9   : > { %7299 = vst.msk [vmem:[#allocation2 + $0x3f0] sm:$0xff] %vm6921_vm4, %v7165_v14  ;;  %7363 = vst.msk [vmem:[%s8569_s21 + $0x1c8] sm:$0xff] %vm6921_vm4, %v7165_v14  ;;  %v7163_v25 = vpop.permute.xlu0 %7162 }
 0x7da   : > { %7298 = vst.msk [vmem:[#allocation2 + $0x3e8] sm:$0xff] %vm6921_vm4, %v7163_v25  ;;  %7362 = vst.msk [vmem:[%s8569_s21 + $0x1c0] sm:$0xff] %vm6921_vm4, %v7163_v25 }
 0x7dc   : > { %v7169_v50 = vpop.permute.xlu1 %7168 }
 0x7dd   : > { %7301 = vst.msk [vmem:[#allocation2 + $0x410] sm:$0xff] %vm6921_vm4, %v7169_v50  ;;  %7365 = vst.msk [vmem:[%s8569_s21 + $0x1d8] sm:$0xff] %vm6921_vm4, %v7169_v50  ;;  %v7167_v30 = vpop.permute.xlu0 %7166 }
 0x7de   : > { %7300 = vst.msk [vmem:[#allocation2 + $0x408] sm:$0xff] %vm6921_vm4, %v7167_v30  ;;  %7364 = vst.msk [vmem:[%s8569_s21 + $0x1d0] sm:$0xff] %vm6921_vm4, %v7167_v30 }
 0x7e0   : > { %v7173_v5 = vpop.permute.xlu1 %7172 }
 0x7e1   : > { %7303 = vst.msk [vmem:[#allocation2 + $0x430] sm:$0xff] %vm6921_vm4, %v7173_v5  ;;  %7367 = vst.msk [vmem:[%s8569_s21 + $0x1e8] sm:$0xff] %vm6921_vm4, %v7173_v5  ;;  %v7171_v28 = vpop.permute.xlu0 %7170 }
 0x7e2   : > { %7302 = vst.msk [vmem:[#allocation2 + $0x428] sm:$0xff] %vm6921_vm4, %v7171_v28  ;;  %7366 = vst.msk [vmem:[%s8569_s21 + $0x1e0] sm:$0xff] %vm6921_vm4, %v7171_v28 }
 0x7e4   : > { %v7177_v58 = vpop.permute.xlu1 %7176 }
 0x7e5   : > { %7305 = vst.msk [vmem:[#allocation2 + $0x450] sm:$0xff] %vm6921_vm4, %v7177_v58  ;;  %7369 = vst.msk [vmem:[%s8569_s21 + $0x1f8] sm:$0xff] %vm6921_vm4, %v7177_v58  ;;  %v7175_v48 = vpop.permute.xlu0 %7174 }
 0x7e6   : > { %7304 = vst.msk [vmem:[#allocation2 + $0x448] sm:$0xff] %vm6921_vm4, %v7175_v48  ;;  %7368 = vst.msk [vmem:[%s8569_s21 + $0x1f0] sm:$0xff] %vm6921_vm4, %v7175_v48 }
 0x7e7 PF: > { %s13_s12 = sadd.s32 1, %s8525_s12  }
 0x7e8   : > { %p10_p5 = scmp.ge.s32.totalorder %s13_s12, 10  }
 0x7ea   :  { %12 = sbr.rel (!%p10_p5) target bundleno = 1 (0x1), region = 68 }

</bundles_post_ra>
